<compile_context>
chip_gen: v7x
topology: tpu7x:2x2x1
jax: 0.10.0
libtpu: 0.0.40
codegen_flags: <defaults>
</compile_context>

<pallas_src>
import functools

import jax
import jax.numpy as jnp
from jax.experimental import pallas as pl
from jax.experimental.pallas import tpu as pltpu

EPS = 1e-5
LANE = 128
MIB = 1024 * 1024


def _round_up(x, m):
    return (x + m - 1) // m * m


def _device_vmem_bytes():
    try:
        return int(pltpu.get_tpu_info().vmem_capacity_bytes)
    except Exception:
        return 64 * MIB  # conservative fallback (v7x per-core VMEM)


def _conv_step_bytes(th, w, cpi, cpo, in_bytes, out_bytes):
    """Approximate VMEM bytes live per grid step of the conv stage."""
    wp = _round_up(w + 2, 8)
    bufs = 2 * (th * w * cpi * in_bytes          # main input block (double buf)
                + 2 * w * cpi * in_bytes          # two 1-row halo blocks
                + th * w * cpo * out_bytes        # conv output block
                + 8 * cpo * 4)                    # stats block
    wgts = 2 * (3 * 3 * cpi * cpo * 2 + 2 * cpi * 4)   # weights + scale/shift
    scratch = ((th + 3) * wp * cpi * 2            # zero-bordered work tile
               + (th + 2) * wp * 3 * cpi * 2      # staged dx-expanded LHS
               + th * wp * cpo * 4)               # f32 accumulator
    return bufs + wgts + scratch


def _epi_step_bytes(th, w, cp, in_bytes, out_bytes):
    return 2 * th * w * cp * (in_bytes + out_bytes) + 2 * 2 * cp * 4


def _pick_tile_h(h, n, step_bytes_fn, budget):
    """Largest multiple-of-8 divisor of H whose per-step footprint fits budget.

    Keeps >= 2 grid tiles when batch == 1 so both v7x TensorCores get work.
    """
    assert h % 8 == 0, "spatial height must be a multiple of 8"
    best = 8
    for th in range(8, h + 1, 8):
        if h % th:
            continue
        if n == 1 and th == h and h > 8:
            continue
        if step_bytes_fn(th) <= budget:
            best = th
    return best


def _vmem_limit(step_bytes, capacity):
    # Never request the full physical VMEM (leave headroom for Mosaic internal
    # scratch / semaphores); generous multiple of the computed footprint.
    cap = capacity * 3 // 4
    return int(min(cap, max(32 * MIB, 2 * step_bytes)))


# ---------------------------------------------------------------------------
# conv3x3 (+ optional fused input BN/ReLU) + per-tile BN partial statistics
# ---------------------------------------------------------------------------
def _conv_stats_kernel(x_cur_ref, x_top_ref, x_bot_ref, w_ref, scale_ref,
                       shift_ref, y_ref, stats_ref, xw_ref, lhs_ref, acc_ref, *,
                       apply_input_act, th, width, wp, h_tiles):
    # x_cur_ref : (1, TH, W, CPi)     input rows of this tile
    # x_top_ref : (1, 1,  W, CPi)     row above (index clamped at border)
    # x_bot_ref : (1, 1,  W, CPi)     row below (index clamped at border)
    # w_ref     : (3, 3*CPi, CPo)     weights, (dy, (dx, ci), co), bf16
    # scale/shift: (1, CPi)           per-channel affine fused on the INPUT
    # y_ref     : (1, TH, W, CPo)     raw conv output (pre-BN), bf16
    # stats_ref : (1, 1, 8, CPo)      row0 = sum, row1 = sum of squares (f32)
    # xw_ref    : (TH+3, wp, CPi)     zero-bordered work tile, wp = ceil8(W+2)
    # lhs_ref   : ((TH+2)*wp, 3*CPi)  staged dx-expanded LHS
    # acc_ref   : (TH*wp, CPo)        f32 accumulator (junk wide cols dropped)
    h = pl.program_id(1)
    cpi = x_cur_ref.shape[-1]
    cpo = y_ref.shape[-1]
    m = th * wp                 # wide output rows (cols >= width are dropped)
    mt = (th + 2) * wp          # staged-LHS rows

    def _act(v_f32):
        if apply_input_act:     # previous stage's BN+ReLU, fused (f32 math)
            v_f32 = jnp.maximum(v_f32 * scale_ref[...] + shift_ref[...], 0.0)
        return v_f32

    # Only the 1-wide left/right zero-padding columns (0 and width+1) must be
    # zeroed.  Interior + halo rows are fully overwritten below; any remaining
    # stale scratch (row th+2, columns >= width+2) only reaches output
    # positions dropped by the [:, :width] slice, so it never contaminates the
    # kept outputs or the BN statistics.  (documented invariant)
    zcol = jnp.zeros((th + 3, 1, cpi), xw_ref.dtype)
    xw_ref[:, 0:1, :] = zcol
    xw_ref[:, width + 1:width + 2, :] = zcol

    cur = _act(x_cur_ref[...].reshape(th, width, cpi).astype(jnp.float32))
    xw_ref[1:th + 1, 1:width + 1, :] = cur.astype(xw_ref.dtype)

    top = _act(x_top_ref[...].reshape(1, width, cpi).astype(jnp.float32))
    top = top * (h > 0).astype(jnp.float32)            # zero pad at image top
    xw_ref[0:1, 1:width + 1, :] = top.astype(xw_ref.dtype)

    bot = _act(x_bot_ref[...].reshape(1, width, cpi).astype(jnp.float32))
    bot = bot * (h < h_tiles - 1).astype(jnp.float32)  # zero pad at image bottom
    xw_ref[th + 1:th + 2, 1:width + 1, :] = bot.astype(xw_ref.dtype)

    # Stage the dx-expanded LHS once (flat-shift trick): row i of lhs_ref holds
    # [x_flat[i], x_flat[i+1], x_flat[i+2]].  wp is a multiple of 8, so the
    # flatten below is a zero-cost view (no (8,128) relayout).
    xf = xw_ref[...].reshape((th + 3) * wp, cpi)
    lhs_ref[:, 0 * cpi:1 * cpi] = xf[0:mt]
    lhs_ref[:, 1 * cpi:2 * cpi] = xf[1:mt + 1]
    lhs_ref[:, 2 * cpi:3 * cpi] = xf[2:mt + 2]

    # 3x3 conv as 3 MXU matmuls with K = 3*CPi; each LHS is a contiguous,
    # sublane-aligned row slice of the staged buffer (dy*wp is a multiple of 8).
    for dy in range(3):
        contrib = jnp.dot(lhs_ref[dy * wp:dy * wp + m, :], w_ref[dy],
                          preferred_element_type=jnp.float32)
        if dy == 0:
            acc_ref[...] = contrib
        else:
            acc_ref[...] += contrib

    # Valid region (drop junk wide columns); write tile + BN partial stats.
    yv = acc_ref[...].reshape(th, wp, cpo)[:, :width, :]
    y_ref[...] = yv.reshape(1, th, width, cpo).astype(y_ref.dtype)

    yv2 = yv.reshape(th * width, cpo)
    s = jnp.sum(yv2, axis=0, keepdims=True)              # (1, CPo)
    ss = jnp.sum(yv2 * yv2, axis=0, keepdims=True)       # (1, CPo)
    # TODO(synk): sum / sum-of-squares partials cancel when |mean| >> std; a
    # centered (Welford-style) combine would be more robust for general inputs.
    stats_ref[...] = jnp.concatenate(
        [s, ss, jnp.zeros((6, cpo), jnp.float32)], axis=0).reshape(1, 1, 8, cpo)


def _conv_stage(x, w, scale, shift, *, apply_input_act, compute_dtype,
                out_dtype, vmem_capacity):
    n, hh, ww, cpi = x.shape
    cpo = w.shape[-1]
    in_bytes = jnp.dtype(x.dtype).itemsize
    out_bytes = jnp.dtype(out_dtype).itemsize

    step_bytes_fn = lambda th: _conv_step_bytes(th, ww, cpi, cpo, in_bytes, out_bytes)
    tile_h = _pick_tile_h(hh, n, step_bytes_fn, budget=vmem_capacity // 2)
    hb = hh // tile_h
    wp = _round_up(ww + 2, 8)

    kernel = functools.partial(_conv_stats_kernel,
                               apply_input_act=apply_input_act,
                               th=tile_h, width=ww, wp=wp, h_tiles=hb)

    y, stats = pl.pallas_call(
        kernel,
        out_shape=(jax.ShapeDtypeStruct((n, hh, ww, cpo), out_dtype),
                   jax.ShapeDtypeStruct((n, hb, 8, cpo), jnp.float32)),
        grid_spec=pltpu.PrefetchScalarGridSpec(
            num_scalar_prefetch=0,
            grid=(n, hb),
            in_specs=[
                pl.BlockSpec((1, tile_h, ww, cpi), lambda i, j: (i, j, 0, 0)),
                pl.BlockSpec((1, 1, ww, cpi),
                             lambda i, j: (i, jnp.maximum(j * tile_h - 1, 0), 0, 0)),
                pl.BlockSpec((1, 1, ww, cpi),
                             lambda i, j: (i, jnp.minimum((j + 1) * tile_h, hh - 1), 0, 0)),
                # Grid-invariant operands (no re-DMA).  Single-buffering them
                # (pipeline_mode=pl.Buffered(1)) would save VMEM at large C on
                # v7x; left default-buffered here for portability.
                pl.BlockSpec((3, 3 * cpi, cpo), lambda i, j: (0, 0, 0)),
                pl.BlockSpec((1, cpi), lambda i, j: (0, 0)),
                pl.BlockSpec((1, cpi), lambda i, j: (0, 0)),
            ],
            out_specs=[
                pl.BlockSpec((1, tile_h, ww, cpo), lambda i, j: (i, j, 0, 0)),
                pl.BlockSpec((1, 1, 8, cpo), lambda i, j: (i, j, 0, 0)),
            ],
            scratch_shapes=[
                pltpu.VMEM((tile_h + 3, wp, cpi), compute_dtype),
                pltpu.VMEM(((tile_h + 2) * wp, 3 * cpi), compute_dtype),
                pltpu.VMEM((tile_h * wp, cpo), jnp.float32),
            ],
        ),
        compiler_params=pltpu.CompilerParams(
            dimension_semantics=("parallel", "parallel"),
            vmem_limit_bytes=_vmem_limit(step_bytes_fn(tile_h), vmem_capacity),
        ),
    )(x, x, x, w, scale, shift)
    return y, stats


# ---------------------------------------------------------------------------
# final BN + ReLU epilogue (elementwise, large lane-dense blocks)
# ---------------------------------------------------------------------------
def _bn_relu_kernel(y_ref, scale_ref, shift_ref, o_ref):
    y = y_ref[...].astype(jnp.float32)
    o_ref[...] = jnp.maximum(y * scale_ref[...] + shift_ref[...], 0.0).astype(o_ref.dtype)


def _bn_relu_stage(y, scale, shift, *, out_dtype, vmem_capacity):
    n, hh, ww, cp = y.shape
    in_bytes = jnp.dtype(y.dtype).itemsize
    out_bytes = jnp.dtype(out_dtype).itemsize
    step_bytes_fn = lambda th: _epi_step_bytes(th, ww, cp, in_bytes, out_bytes)
    tile_h = _pick_tile_h(hh, n, step_bytes_fn, budget=vmem_capacity // 2)
    hb = hh // tile_h
    return pl.pallas_call(
        _bn_relu_kernel,
        out_shape=jax.ShapeDtypeStruct((n, hh, ww, cp), out_dtype),
        grid_spec=pltpu.PrefetchScalarGridSpec(
            num_scalar_prefetch=0,
            grid=(n, hb),
            in_specs=[
                pl.BlockSpec((1, tile_h, ww, cp), lambda i, j: (i, j, 0, 0)),
                pl.BlockSpec((1, cp), lambda i, j: (0, 0)),
                pl.BlockSpec((1, cp), lambda i, j: (0, 0)),
            ],
            out_specs=pl.BlockSpec((1, tile_h, ww, cp), lambda i, j: (i, j, 0, 0)),
        ),
        compiler_params=pltpu.CompilerParams(
            dimension_semantics=("parallel", "parallel"),
            vmem_limit_bytes=_vmem_limit(step_bytes_fn(tile_h), vmem_capacity),
        ),
    )(y, scale, shift)


# ---------------------------------------------------------------------------
# host-side glue (tiny per-channel math + parameter packing)
# ---------------------------------------------------------------------------
def _bn_scale_shift(stats, count, gamma, beta):
    s = jnp.sum(stats, axis=(0, 1))                 # (8, C)
    total, total_sq = s[0:1], s[1:2]                # (1, C)
    mean = total / count
    var = jnp.maximum(total_sq / count - mean * mean, 0.0)   # biased (training) var
    inv = jax.lax.rsqrt(var + EPS)
    scale = gamma * inv
    shift = beta - mean * scale
    return scale, shift


def _prep_weight(w_hwio, cpi, cpo, dtype):
    kh, kw, ci, co = w_hwio.shape
    w = jnp.pad(w_hwio, ((0, 0), (0, 0), (0, cpi - ci), (0, cpo - co)))
    # (dy, dx, ci, co) -> (dy, dx*ci, co): matches the in-kernel dx staging order
    return w.reshape(kh, kw * cpi, cpo).astype(dtype)


def _pad_channel_vec(v, cp):
    return jnp.pad(v, (0, cp - v.shape[0])).reshape(1, cp).astype(jnp.float32)


def double_conv(x_nchw, params, *, compute_dtype=jnp.bfloat16):
    n, cin, hh, ww = x_nchw.shape
    cout = params["w1"].shape[-1]
    cpi = _round_up(cin, LANE)
    cpo = _round_up(cout, LANE)
    vmem_capacity = _device_vmem_bytes()

    # NCHW -> NHWC; single wrapper-side pad (channels up to lane width).
    x = jnp.transpose(x_nchw, (0, 2, 3, 1))
    x = jnp.pad(x, ((0, 0), (0, 0), (0, 0), (0, cpi - cin)))

    w1 = _prep_weight(params["w1"], cpi, cpo, compute_dtype)
    w2 = _prep_weight(params["w2"], cpo, cpo, compute_dtype)
    g1 = _pad_channel_vec(params["g1"], cpo)
    b1 = _pad_channel_vec(params["b1"], cpo)
    g2 = _pad_channel_vec(params["g2"], cpo)
    b2 = _pad_channel_vec(params["b2"], cpo)

    count = float(n * hh * ww)
    ident_scale = jnp.ones((1, cpi), jnp.float32)
    ident_shift = jnp.zeros((1, cpi), jnp.float32)

    # stage 1: conv1 + per-tile BN1 partial stats; raw pre-BN output kept (bf16,
    # stats come from the f32 accumulator so they are unaffected by the cast).
    y1, st1 = _conv_stage(x, w1, ident_scale, ident_shift,
                          apply_input_act=False, compute_dtype=compute_dtype,
                          out_dtype=jnp.bfloat16, vmem_capacity=vmem_capacity)
    scale1, shift1 = _bn_scale_shift(st1, count, g1, b1)

    # stage 2: BN1+ReLU fused into conv2's input prologue, + BN2 partial stats.
    y2, st2 = _conv_stage(y1, w2, scale1, shift1,
                          apply_input_act=True, compute_dtype=compute_dtype,
                          out_dtype=jnp.bfloat16, vmem_capacity=vmem_capacity)
    scale2, shift2 = _bn_scale_shift(st2, count, g2, b2)

    # BN2 + ReLU epilogue: final output stays f32 (module semantics), so no
    # input/output aliasing (dtype differs from the bf16 intermediate).
    out = _bn_relu_stage(y2, scale2, shift2, out_dtype=jnp.float32,
                         vmem_capacity=vmem_capacity)
    return jnp.transpose(out[..., :cout], (0, 3, 1, 2))


def double_conv_ref(x_nchw, params):
    """Pure-JAX f32 reference (training-mode BatchNorm)."""
    x = jnp.transpose(x_nchw, (0, 2, 3, 1))

    def stage(x, w, g, b):
        y = jax.lax.conv_general_dilated(
            x, w, window_strides=(1, 1), padding="SAME",
            dimension_numbers=("NHWC", "HWIO", "NHWC"))
        mean = jnp.mean(y, axis=(0, 1, 2), keepdims=True)
        var = jnp.mean((y - mean) ** 2, axis=(0, 1, 2), keepdims=True)
        y = (y - mean) * jax.lax.rsqrt(var + EPS) * g + b
        return jnp.maximum(y, 0.0)

    y = stage(x, params["w1"], params["g1"], params["b1"])
    y = stage(y, params["w2"], params["g2"], params["b2"])
    return jnp.transpose(y, (0, 3, 1, 2))


if __name__ == "__main__":
    N, Cin, Cout, H, W = 2, 4, 8, 16, 16

    key = jax.random.PRNGKey(0)
    k1, k2, k3, k4, k5, k6, kx = jax.random.split(key, 7)
    params = {
        "w1": 0.1 * jax.random.normal(k1, (3, 3, Cin, Cout), jnp.float32),
        "g1": 1.0 + 0.1 * jax.random.normal(k2, (Cout,), jnp.float32),
        "b1": 0.1 * jax.random.normal(k3, (Cout,), jnp.float32),
        "w2": 0.1 * jax.random.normal(k4, (3, 3, Cout, Cout), jnp.float32),
        "g2": 1.0 + 0.1 * jax.random.normal(k5, (Cout,), jnp.float32),
        "b2": 0.1 * jax.random.normal(k6, (Cout,), jnp.float32),
    }
    x = jax.random.normal(kx, (N, Cin, H, W), jnp.float32)   # NCHW like PyTorch

    out = jax.block_until_ready(jax.jit(double_conv)(x, params))
    ref = jax.block_until_ready(double_conv_ref(x, params))

    assert out.shape == (N, Cout, H, W)
    # bf16 MXU operands + bf16 inter-stage activations with f32 accumulation /
    # f32 BN stats vs. an f32 reference; typical error ~1e-3..1e-2.
    assert jnp.allclose(out, ref, atol=5e-2, rtol=5e-2), \
        float(jnp.max(jnp.abs(out - ref)))
    print("KERNEL_OK")
</pallas_src>

<mosaic_0001>
module attributes {stable_mosaic.version = 11 : i64} {
  func.func @_conv_stats_kernel(%arg0: i32, %arg1: i32, %arg2: memref<1x16x16x128xf32, #tpu.memory_space<vmem>>, %arg3: memref<1x1x16x128xf32, #tpu.memory_space<vmem>>, %arg4: memref<1x1x16x128xf32, #tpu.memory_space<vmem>>, %arg5: memref<3x384x128xbf16, #tpu.memory_space<vmem>>, %arg6: memref<1x128xf32, #tpu.memory_space<vmem>>, %arg7: memref<1x128xf32, #tpu.memory_space<vmem>>, %arg8: memref<1x16x16x128xbf16, #tpu.memory_space<vmem>>, %arg9: memref<1x1x8x128xf32, #tpu.memory_space<vmem>>, %arg10: memref<19x24x128xbf16, #tpu.memory_space<vmem>>, %arg11: memref<432x384xbf16, #tpu.memory_space<vmem>>, %arg12: memref<384x128xf32, #tpu.memory_space<vmem>>) attributes {dimension_semantics = [#tpu.dimension_semantics<parallel>, #tpu.dimension_semantics<parallel>], iteration_bounds = array<i64: 2, 1>, scalar_prefetch = 0 : i64, scratch_operands = 3 : i64, tpu.core_type = #tpu.core_type<tc>, window_params = [{transform_indices = @transform_0, window_bounds = array<i64: 1, 16, 16, 128>}, {transform_indices = @transform_1, window_bounds = array<i64: 1, 1, 16, 128>}, {transform_indices = @transform_2, window_bounds = array<i64: 1, 1, 16, 128>}, {pipeline_mode = #tpu.pipeline_mode<synchronous>, transform_indices = @transform_3, window_bounds = array<i64: 3, 384, 128>}, {pipeline_mode = #tpu.pipeline_mode<synchronous>, transform_indices = @transform_4, window_bounds = array<i64: 1, 128>}, {pipeline_mode = #tpu.pipeline_mode<synchronous>, transform_indices = @transform_5, window_bounds = array<i64: 1, 128>}, {transform_indices = @transform_6, window_bounds = array<i64: 1, 16, 16, 128>}, {transform_indices = @transform_7, window_bounds = array<i64: 1, 1, 8, 128>}]} {
    %cst = arith.constant 0.000000e+00 : bf16
    %0 = vector.broadcast %cst : bf16 to vector<19x1x128xbf16>
    %c0 = arith.constant 0 : index
    %c0_0 = arith.constant 0 : index
    %c0_1 = arith.constant 0 : index
    %1 = vector.load %arg10[%c0, %c0_0, %c0_1] : memref<19x24x128xbf16, #tpu.memory_space<vmem>>, vector<19x1x128xbf16>
    tpu.vector_store %arg10[%c0, %c0_0, %c0_1], %0 {strides = array<i32>} : memref<19x24x128xbf16, #tpu.memory_space<vmem>>, vector<19x1x128xbf16>,
    %c0_2 = arith.constant 0 : index
    %c17 = arith.constant 17 : index
    %c0_3 = arith.constant 0 : index
    %2 = vector.load %arg10[%c0_2, %c17, %c0_3] : memref<19x24x128xbf16, #tpu.memory_space<vmem>>, vector<19x1x128xbf16>
    tpu.vector_store %arg10[%c0_2, %c17, %c0_3], %0 {strides = array<i32>} : memref<19x24x128xbf16, #tpu.memory_space<vmem>>, vector<19x1x128xbf16>,
    %c0_4 = arith.constant 0 : index
    %c0_5 = arith.constant 0 : index
    %c0_6 = arith.constant 0 : index
    %c0_7 = arith.constant 0 : index
    %3 = vector.load %arg2[%c0_4, %c0_5, %c0_6, %c0_7] : memref<1x16x16x128xf32, #tpu.memory_space<vmem>>, vector<1x16x16x128xf32>
    %4 = vector.shape_cast %3 : vector<1x16x16x128xf32> to vector<16x16x128xf32>
    %5 = arith.truncf %4 : vector<16x16x128xf32> to vector<16x16x128xbf16>
    %c1 = arith.constant 1 : index
    %c1_8 = arith.constant 1 : index
    %c0_9 = arith.constant 0 : index
    %6 = vector.load %arg10[%c1, %c1_8, %c0_9] : memref<19x24x128xbf16, #tpu.memory_space<vmem>>, vector<16x16x128xbf16>
    tpu.vector_store %arg10[%c1, %c1_8, %c0_9], %5 {strides = array<i32>} : memref<19x24x128xbf16, #tpu.memory_space<vmem>>, vector<16x16x128xbf16>,
    %c0_10 = arith.constant 0 : index
    %c0_11 = arith.constant 0 : index
    %c0_12 = arith.constant 0 : index
    %c0_13 = arith.constant 0 : index
    %7 = vector.load %arg3[%c0_10, %c0_11, %c0_12, %c0_13] : memref<1x1x16x128xf32, #tpu.memory_space<vmem>>, vector<1x1x16x128xf32>
    %8 = vector.shape_cast %7 : vector<1x1x16x128xf32> to vector<1x16x128xf32>
    %c0_i32 = arith.constant 0 : i32
    %9 = arith.cmpi sgt, %arg1, %c0_i32 : i32
    %10 = arith.extui %9 : i1 to i32
    %11 = arith.sitofp %10 : i32 to f32
    %12 = vector.broadcast %11 : f32 to vector<1x16x128xf32>
    %13 = arith.mulf %8, %12 : vector<1x16x128xf32>
    %14 = arith.truncf %13 : vector<1x16x128xf32> to vector<1x16x128xbf16>
    %c0_14 = arith.constant 0 : index
    %c1_15 = arith.constant 1 : index
    %c0_16 = arith.constant 0 : index
    %15 = vector.load %arg10[%c0_14, %c1_15, %c0_16] : memref<19x24x128xbf16, #tpu.memory_space<vmem>>, vector<1x16x128xbf16>
    tpu.vector_store %arg10[%c0_14, %c1_15, %c0_16], %14 {strides = array<i32>} : memref<19x24x128xbf16, #tpu.memory_space<vmem>>, vector<1x16x128xbf16>,
    %c0_17 = arith.constant 0 : index
    %c0_18 = arith.constant 0 : index
    %c0_19 = arith.constant 0 : index
    %c0_20 = arith.constant 0 : index
    %16 = vector.load %arg4[%c0_17, %c0_18, %c0_19, %c0_20] : memref<1x1x16x128xf32, #tpu.memory_space<vmem>>, vector<1x1x16x128xf32>
    %17 = vector.shape_cast %16 : vector<1x1x16x128xf32> to vector<1x16x128xf32>
    %c0_i32_21 = arith.constant 0 : i32
    %18 = arith.cmpi slt, %arg1, %c0_i32_21 : i32
    %19 = arith.extui %18 : i1 to i32
    %20 = arith.sitofp %19 : i32 to f32
    %21 = vector.broadcast %20 : f32 to vector<1x16x128xf32>
    %22 = arith.mulf %17, %21 : vector<1x16x128xf32>
    %23 = arith.truncf %22 : vector<1x16x128xf32> to vector<1x16x128xbf16>
    %c17_22 = arith.constant 17 : index
    %c1_23 = arith.constant 1 : index
    %c0_24 = arith.constant 0 : index
    %24 = vector.load %arg10[%c17_22, %c1_23, %c0_24] : memref<19x24x128xbf16, #tpu.memory_space<vmem>>, vector<1x16x128xbf16>
    tpu.vector_store %arg10[%c17_22, %c1_23, %c0_24], %23 {strides = array<i32>} : memref<19x24x128xbf16, #tpu.memory_space<vmem>>, vector<1x16x128xbf16>,
    %c0_25 = arith.constant 0 : index
    %c0_26 = arith.constant 0 : index
    %c0_27 = arith.constant 0 : index
    %25 = vector.load %arg10[%c0_25, %c0_26, %c0_27] : memref<19x24x128xbf16, #tpu.memory_space<vmem>>, vector<19x24x128xbf16>
    %26 = vector.shape_cast %25 : vector<19x24x128xbf16> to vector<456x128xbf16>
    %27 = vector.extract_strided_slice %26 {offsets = [0, 0], sizes = [432, 128], strides = [1, 1]} : vector<456x128xbf16> to vector<432x128xbf16>
    %c0_28 = arith.constant 0 : index
    %c0_29 = arith.constant 0 : index
    %28 = vector.load %arg11[%c0_28, %c0_29] : memref<432x384xbf16, #tpu.memory_space<vmem>>, vector<432x128xbf16>
    tpu.vector_store %arg11[%c0_28, %c0_29], %27 {strides = array<i32>} : memref<432x384xbf16, #tpu.memory_space<vmem>>, vector<432x128xbf16>,
    %29 = vector.extract_strided_slice %26 {offsets = [1, 0], sizes = [432, 128], strides = [1, 1]} : vector<456x128xbf16> to vector<432x128xbf16>
    %c0_30 = arith.constant 0 : index
    %c128 = arith.constant 128 : index
    %30 = vector.load %arg11[%c0_30, %c128] : memref<432x384xbf16, #tpu.memory_space<vmem>>, vector<432x128xbf16>
    tpu.vector_store %arg11[%c0_30, %c128], %29 {strides = array<i32>} : memref<432x384xbf16, #tpu.memory_space<vmem>>, vector<432x128xbf16>,
    %31 = vector.extract_strided_slice %26 {offsets = [2, 0], sizes = [432, 128], strides = [1, 1]} : vector<456x128xbf16> to vector<432x128xbf16>
    %c0_31 = arith.constant 0 : index
    %c256 = arith.constant 256 : index
    %32 = vector.load %arg11[%c0_31, %c256] : memref<432x384xbf16, #tpu.memory_space<vmem>>, vector<432x128xbf16>
    tpu.vector_store %arg11[%c0_31, %c256], %31 {strides = array<i32>} : memref<432x384xbf16, #tpu.memory_space<vmem>>, vector<432x128xbf16>,
    %c0_32 = arith.constant 0 : index
    %c0_33 = arith.constant 0 : index
    %33 = vector.load %arg11[%c0_32, %c0_33] : memref<432x384xbf16, #tpu.memory_space<vmem>>, vector<384x384xbf16>
    %c0_34 = arith.constant 0 : index
    %c0_35 = arith.constant 0 : index
    %c0_36 = arith.constant 0 : index
    %34 = vector.load %arg5[%c0_34, %c0_35, %c0_36] : memref<3x384x128xbf16, #tpu.memory_space<vmem>>, vector<1x384x128xbf16>
    %35 = vector.shape_cast %34 : vector<1x384x128xbf16> to vector<384x128xbf16>
    %cst_37 = arith.constant dense<0.000000e+00> : vector<384x128xf32>
    %36 = tpu.matmul %33, %35, %cst_37 {dimension_numbers = #tpu.dot_dimension_numbers<[1], [0], [0], [1], [0, 0, 1, 1], [], []>} : vector<384x384xbf16>, vector<384x128xbf16>, vector<384x128xf32> -> vector<384x128xf32>
    %c0_38 = arith.constant 0 : index
    %c0_39 = arith.constant 0 : index
    %37 = vector.load %arg12[%c0_38, %c0_39] : memref<384x128xf32, #tpu.memory_space<vmem>>, vector<384x128xf32>
    tpu.vector_store %arg12[%c0_38, %c0_39], %36 {strides = array<i32>} : memref<384x128xf32, #tpu.memory_space<vmem>>, vector<384x128xf32>,
    %c24 = arith.constant 24 : index
    %c0_40 = arith.constant 0 : index
    %38 = vector.load %arg11[%c24, %c0_40] : memref<432x384xbf16, #tpu.memory_space<vmem>>, vector<384x384xbf16>
    %c1_41 = arith.constant 1 : index
    %c0_42 = arith.constant 0 : index
    %c0_43 = arith.constant 0 : index
    %39 = vector.load %arg5[%c1_41, %c0_42, %c0_43] : memref<3x384x128xbf16, #tpu.memory_space<vmem>>, vector<1x384x128xbf16>
    %40 = vector.shape_cast %39 : vector<1x384x128xbf16> to vector<384x128xbf16>
    %cst_44 = arith.constant dense<0.000000e+00> : vector<384x128xf32>
    %41 = tpu.matmul %38, %40, %cst_44 {dimension_numbers = #tpu.dot_dimension_numbers<[1], [0], [0], [1], [0, 0, 1, 1], [], []>} : vector<384x384xbf16>, vector<384x128xbf16>, vector<384x128xf32> -> vector<384x128xf32>
    %c0_45 = arith.constant 0 : index
    %c0_46 = arith.constant 0 : index
    %42 = vector.load %arg12[%c0_45, %c0_46] : memref<384x128xf32, #tpu.memory_space<vmem>>, vector<384x128xf32>
    %43 = arith.addf %42, %41 : vector<384x128xf32>
    %c0_47 = arith.constant 0 : index
    %c0_48 = arith.constant 0 : index
    %44 = vector.load %arg12[%c0_47, %c0_48] : memref<384x128xf32, #tpu.memory_space<vmem>>, vector<384x128xf32>
    tpu.vector_store %arg12[%c0_47, %c0_48], %43 {strides = array<i32>} : memref<384x128xf32, #tpu.memory_space<vmem>>, vector<384x128xf32>,
    %c48 = arith.constant 48 : index
    %c0_49 = arith.constant 0 : index
    %45 = vector.load %arg11[%c48, %c0_49] : memref<432x384xbf16, #tpu.memory_space<vmem>>, vector<384x384xbf16>
    %c2 = arith.constant 2 : index
    %c0_50 = arith.constant 0 : index
    %c0_51 = arith.constant 0 : index
    %46 = vector.load %arg5[%c2, %c0_50, %c0_51] : memref<3x384x128xbf16, #tpu.memory_space<vmem>>, vector<1x384x128xbf16>
    %47 = vector.shape_cast %46 : vector<1x384x128xbf16> to vector<384x128xbf16>
    %cst_52 = arith.constant dense<0.000000e+00> : vector<384x128xf32>
    %48 = tpu.matmul %45, %47, %cst_52 {dimension_numbers = #tpu.dot_dimension_numbers<[1], [0], [0], [1], [0, 0, 1, 1], [], []>} : vector<384x384xbf16>, vector<384x128xbf16>, vector<384x128xf32> -> vector<384x128xf32>
    %c0_53 = arith.constant 0 : index
    %c0_54 = arith.constant 0 : index
    %49 = vector.load %arg12[%c0_53, %c0_54] : memref<384x128xf32, #tpu.memory_space<vmem>>, vector<384x128xf32>
    %50 = arith.addf %49, %48 : vector<384x128xf32>
    %c0_55 = arith.constant 0 : index
    %c0_56 = arith.constant 0 : index
    %51 = vector.load %arg12[%c0_55, %c0_56] : memref<384x128xf32, #tpu.memory_space<vmem>>, vector<384x128xf32>
    tpu.vector_store %arg12[%c0_55, %c0_56], %50 {strides = array<i32>} : memref<384x128xf32, #tpu.memory_space<vmem>>, vector<384x128xf32>,
    %c0_57 = arith.constant 0 : index
    %c0_58 = arith.constant 0 : index
    %52 = vector.load %arg12[%c0_57, %c0_58] : memref<384x128xf32, #tpu.memory_space<vmem>>, vector<384x128xf32>
    %53 = vector.shape_cast %52 : vector<384x128xf32> to vector<16x24x128xf32>
    %54 = vector.extract_strided_slice %53 {offsets = [0, 0, 0], sizes = [16, 16, 128], strides = [1, 1, 1]} : vector<16x24x128xf32> to vector<16x16x128xf32>
    %55 = vector.shape_cast %54 : vector<16x16x128xf32> to vector<1x16x16x128xf32>
    %56 = arith.truncf %55 : vector<1x16x16x128xf32> to vector<1x16x16x128xbf16>
    %c0_59 = arith.constant 0 : index
    %c0_60 = arith.constant 0 : index
    %c0_61 = arith.constant 0 : index
    %c0_62 = arith.constant 0 : index
    %57 = vector.load %arg8[%c0_59, %c0_60, %c0_61, %c0_62] : memref<1x16x16x128xbf16, #tpu.memory_space<vmem>>, vector<1x16x16x128xbf16>
    tpu.vector_store %arg8[%c0_59, %c0_60, %c0_61, %c0_62], %56 {strides = array<i32>} : memref<1x16x16x128xbf16, #tpu.memory_space<vmem>>, vector<1x16x16x128xbf16>,
    %58 = vector.shape_cast %54 : vector<16x16x128xf32> to vector<256x128xf32>
    %cst_63 = arith.constant dense<0.000000e+00> : vector<128xf32>
    %59 = vector.multi_reduction <add>, %58, %cst_63 [0] : vector<256x128xf32> to vector<128xf32>
    %60 = vector.shape_cast %59 : vector<128xf32> to vector<1x128xf32>
    %61 = arith.mulf %58, %58 : vector<256x128xf32>
    %cst_64 = arith.constant dense<0.000000e+00> : vector<128xf32>
    %62 = vector.multi_reduction <add>, %61, %cst_64 [0] : vector<256x128xf32> to vector<128xf32>
    %63 = vector.shape_cast %62 : vector<128xf32> to vector<1x128xf32>
    %cst_65 = arith.constant 0.000000e+00 : f32
    %64 = vector.broadcast %cst_65 : f32 to vector<6x128xf32>
    %65 = tpu.concatenate %60, %63, %64 in 0 : vector<1x128xf32>, vector<1x128xf32>, vector<6x128xf32> -> vector<8x128xf32>
    %66 = vector.shape_cast %65 : vector<8x128xf32> to vector<1x1x8x128xf32>
    %c0_66 = arith.constant 0 : index
    %c0_67 = arith.constant 0 : index
    %c0_68 = arith.constant 0 : index
    %c0_69 = arith.constant 0 : index
    %67 = vector.load %arg9[%c0_66, %c0_67, %c0_68, %c0_69] : memref<1x1x8x128xf32, #tpu.memory_space<vmem>>, vector<1x1x8x128xf32>
    tpu.vector_store %arg9[%c0_66, %c0_67, %c0_68, %c0_69], %66 {strides = array<i32>} : memref<1x1x8x128xf32, #tpu.memory_space<vmem>>, vector<1x1x8x128xf32>,
    return
  }
  func.func @transform_0(%arg0: i32, %arg1: i32) -> (i32, i32, i32, i32) {
    %c0_i32 = arith.constant 0 : i32
    %c0_i32_0 = arith.constant 0 : i32
    %c0_i32_1 = arith.constant 0 : i32
    return %arg0, %arg1, %c0_i32, %c0_i32_0 : i32, i32, i32, i32
  }
  func.func @transform_1(%arg0: i32, %arg1: i32) -> (i32, i32, i32, i32) {
    %c16_i32 = arith.constant 16 : i32
    %0 = arith.muli %arg1, %c16_i32 : i32
    %c1_i32 = arith.constant 1 : i32
    %1 = arith.subi %0, %c1_i32 : i32
    %c0_i32 = arith.constant 0 : i32
    %2 = arith.maxsi %1, %c0_i32 : i32
    %c0_i32_0 = arith.constant 0 : i32
    %c0_i32_1 = arith.constant 0 : i32
    %c0_i32_2 = arith.constant 0 : i32
    return %arg0, %2, %c0_i32_0, %c0_i32_1 : i32, i32, i32, i32
  }
  func.func @transform_2(%arg0: i32, %arg1: i32) -> (i32, i32, i32, i32) {
    %c1_i32 = arith.constant 1 : i32
    %0 = arith.addi %arg1, %c1_i32 : i32
    %c16_i32 = arith.constant 16 : i32
    %1 = arith.muli %0, %c16_i32 : i32
    %c15_i32 = arith.constant 15 : i32
    %2 = arith.minsi %1, %c15_i32 : i32
    %c0_i32 = arith.constant 0 : i32
    %c0_i32_0 = arith.constant 0 : i32
    %c0_i32_1 = arith.constant 0 : i32
    return %arg0, %2, %c0_i32, %c0_i32_0 : i32, i32, i32, i32
  }
  func.func @transform_3(%arg0: i32, %arg1: i32) -> (i32, i32, i32) {
    %c0_i32 = arith.constant 0 : i32
    %c0_i32_0 = arith.constant 0 : i32
    %c0_i32_1 = arith.constant 0 : i32
    %c0_i32_2 = arith.constant 0 : i32
    return %c0_i32, %c0_i32_0, %c0_i32_1 : i32, i32, i32
  }
  func.func @transform_4(%arg0: i32, %arg1: i32) -> (i32, i32) {
    %c0_i32 = arith.constant 0 : i32
    %c0_i32_0 = arith.constant 0 : i32
    %c0_i32_1 = arith.constant 0 : i32
    return %c0_i32, %c0_i32_0 : i32, i32
  }
  func.func @transform_5(%arg0: i32, %arg1: i32) -> (i32, i32) {
    %c0_i32 = arith.constant 0 : i32
    %c0_i32_0 = arith.constant 0 : i32
    %c0_i32_1 = arith.constant 0 : i32
    return %c0_i32, %c0_i32_0 : i32, i32
  }
  func.func @transform_6(%arg0: i32, %arg1: i32) -> (i32, i32, i32, i32) {
    %c0_i32 = arith.constant 0 : i32
    %c0_i32_0 = arith.constant 0 : i32
    %c0_i32_1 = arith.constant 0 : i32
    return %arg0, %arg1, %c0_i32, %c0_i32_0 : i32, i32, i32, i32
  }
  func.func @transform_7(%arg0: i32, %arg1: i32) -> (i32, i32, i32, i32) {
    %c0_i32 = arith.constant 0 : i32
    %c0_i32_0 = arith.constant 0 : i32
    %c0_i32_1 = arith.constant 0 : i32
    return %arg0, %arg1, %c0_i32, %c0_i32_0 : i32, i32, i32, i32
  }
}

module attributes {stable_mosaic.version = 11 : i64} {
  func.func @_bn_relu_kernel(%arg0: i32, %arg1: i32, %arg2: memref<1x16x16x128xbf16, #tpu.memory_space<vmem>>, %arg3: memref<1x128xf32, #tpu.memory_space<vmem>>, %arg4: memref<1x128xf32, #tpu.memory_space<vmem>>, %arg5: memref<1x16x16x128xf32, #tpu.memory_space<vmem>>) attributes {dimension_semantics = [#tpu.dimension_semantics<parallel>, #tpu.dimension_semantics<parallel>], iteration_bounds = array<i64: 2, 1>, scalar_prefetch = 0 : i64, scratch_operands = 0 : i64, tpu.core_type = #tpu.core_type<tc>, window_params = [{transform_indices = @transform_0, window_bounds = array<i64: 1, 16, 16, 128>}, {pipeline_mode = #tpu.pipeline_mode<synchronous>, transform_indices = @transform_1, window_bounds = array<i64: 1, 128>}, {pipeline_mode = #tpu.pipeline_mode<synchronous>, transform_indices = @transform_2, window_bounds = array<i64: 1, 128>}, {transform_indices = @transform_3, window_bounds = array<i64: 1, 16, 16, 128>}]} {
    %c0 = arith.constant 0 : index
    %c0_0 = arith.constant 0 : index
    %c0_1 = arith.constant 0 : index
    %c0_2 = arith.constant 0 : index
    %0 = vector.load %arg2[%c0, %c0_0, %c0_1, %c0_2] : memref<1x16x16x128xbf16, #tpu.memory_space<vmem>>, vector<1x16x16x128xbf16>
    %1 = arith.extf %0 : vector<1x16x16x128xbf16> to vector<1x16x16x128xf32>
    %c0_3 = arith.constant 0 : index
    %c0_4 = arith.constant 0 : index
    %2 = vector.load %arg3[%c0_3, %c0_4] : memref<1x128xf32, #tpu.memory_space<vmem>>, vector<1x128xf32>
    %3 = vector.shape_cast %2 : vector<1x128xf32> to vector<1x1x1x128xf32>
    %4 = vector.broadcast %3 : vector<1x1x1x128xf32> to vector<1x16x16x128xf32>
    %5 = arith.mulf %1, %4 : vector<1x16x16x128xf32>
    %c0_5 = arith.constant 0 : index
    %c0_6 = arith.constant 0 : index
    %6 = vector.load %arg4[%c0_5, %c0_6] : memref<1x128xf32, #tpu.memory_space<vmem>>, vector<1x128xf32>
    %7 = vector.shape_cast %6 : vector<1x128xf32> to vector<1x1x1x128xf32>
    %8 = vector.broadcast %7 : vector<1x1x1x128xf32> to vector<1x16x16x128xf32>
    %9 = arith.addf %5, %8 : vector<1x16x16x128xf32>
    %cst = arith.constant 0.000000e+00 : f32
    %10 = vector.broadcast %cst : f32 to vector<1x16x16x128xf32>
    %11 = arith.maximumf %9, %10 : vector<1x16x16x128xf32>
    %c0_7 = arith.constant 0 : index
    %c0_8 = arith.constant 0 : index
    %c0_9 = arith.constant 0 : index
    %c0_10 = arith.constant 0 : index
    %12 = vector.load %arg5[%c0_7, %c0_8, %c0_9, %c0_10] : memref<1x16x16x128xf32, #tpu.memory_space<vmem>>, vector<1x16x16x128xf32>
    tpu.vector_store %arg5[%c0_7, %c0_8, %c0_9, %c0_10], %11 {strides = array<i32>} : memref<1x16x16x128xf32, #tpu.memory_space<vmem>>, vector<1x16x16x128xf32>,
    return
  }
  func.func @transform_0(%arg0: i32, %arg1: i32) -> (i32, i32, i32, i32) {
    %c0_i32 = arith.constant 0 : i32
    %c0_i32_0 = arith.constant 0 : i32
    %c0_i32_1 = arith.constant 0 : i32
    return %arg0, %arg1, %c0_i32, %c0_i32_0 : i32, i32, i32, i32
  }
  func.func @transform_1(%arg0: i32, %arg1: i32) -> (i32, i32) {
    %c0_i32 = arith.constant 0 : i32
    %c0_i32_0 = arith.constant 0 : i32
    %c0_i32_1 = arith.constant 0 : i32
    return %c0_i32, %c0_i32_0 : i32, i32
  }
  func.func @transform_2(%arg0: i32, %arg1: i32) -> (i32, i32) {
    %c0_i32 = arith.constant 0 : i32
    %c0_i32_0 = arith.constant 0 : i32
    %c0_i32_1 = arith.constant 0 : i32
    return %c0_i32, %c0_i32_0 : i32, i32
  }
  func.func @transform_3(%arg0: i32, %arg1: i32) -> (i32, i32, i32, i32) {
    %c0_i32 = arith.constant 0 : i32
    %c0_i32_0 = arith.constant 0 : i32
    %c0_i32_1 = arith.constant 0 : i32
    return %arg0, %arg1, %c0_i32, %c0_i32_0 : i32, i32, i32, i32
  }
}

module attributes {stable_mosaic.version = 11 : i64} {
  func.func @_conv_stats_kernel(%arg0: i32, %arg1: i32, %arg2: memref<1x16x16x128xbf16, #tpu.memory_space<vmem>>, %arg3: memref<1x1x16x128xbf16, #tpu.memory_space<vmem>>, %arg4: memref<1x1x16x128xbf16, #tpu.memory_space<vmem>>, %arg5: memref<3x384x128xbf16, #tpu.memory_space<vmem>>, %arg6: memref<1x128xf32, #tpu.memory_space<vmem>>, %arg7: memref<1x128xf32, #tpu.memory_space<vmem>>, %arg8: memref<1x16x16x128xbf16, #tpu.memory_space<vmem>>, %arg9: memref<1x1x8x128xf32, #tpu.memory_space<vmem>>, %arg10: memref<19x24x128xbf16, #tpu.memory_space<vmem>>, %arg11: memref<432x384xbf16, #tpu.memory_space<vmem>>, %arg12: memref<384x128xf32, #tpu.memory_space<vmem>>) attributes {dimension_semantics = [#tpu.dimension_semantics<parallel>, #tpu.dimension_semantics<parallel>], iteration_bounds = array<i64: 2, 1>, scalar_prefetch = 0 : i64, scratch_operands = 3 : i64, tpu.core_type = #tpu.core_type<tc>, window_params = [{transform_indices = @transform_0, window_bounds = array<i64: 1, 16, 16, 128>}, {transform_indices = @transform_1, window_bounds = array<i64: 1, 1, 16, 128>}, {transform_indices = @transform_2, window_bounds = array<i64: 1, 1, 16, 128>}, {pipeline_mode = #tpu.pipeline_mode<synchronous>, transform_indices = @transform_3, window_bounds = array<i64: 3, 384, 128>}, {pipeline_mode = #tpu.pipeline_mode<synchronous>, transform_indices = @transform_4, window_bounds = array<i64: 1, 128>}, {pipeline_mode = #tpu.pipeline_mode<synchronous>, transform_indices = @transform_5, window_bounds = array<i64: 1, 128>}, {transform_indices = @transform_6, window_bounds = array<i64: 1, 16, 16, 128>}, {transform_indices = @transform_7, window_bounds = array<i64: 1, 1, 8, 128>}]} {
    %cst = arith.constant 0.000000e+00 : bf16
    %0 = vector.broadcast %cst : bf16 to vector<19x1x128xbf16>
    %c0 = arith.constant 0 : index
    %c0_0 = arith.constant 0 : index
    %c0_1 = arith.constant 0 : index
    %1 = vector.load %arg10[%c0, %c0_0, %c0_1] : memref<19x24x128xbf16, #tpu.memory_space<vmem>>, vector<19x1x128xbf16>
    tpu.vector_store %arg10[%c0, %c0_0, %c0_1], %0 {strides = array<i32>} : memref<19x24x128xbf16, #tpu.memory_space<vmem>>, vector<19x1x128xbf16>,
    %c0_2 = arith.constant 0 : index
    %c17 = arith.constant 17 : index
    %c0_3 = arith.constant 0 : index
    %2 = vector.load %arg10[%c0_2, %c17, %c0_3] : memref<19x24x128xbf16, #tpu.memory_space<vmem>>, vector<19x1x128xbf16>
    tpu.vector_store %arg10[%c0_2, %c17, %c0_3], %0 {strides = array<i32>} : memref<19x24x128xbf16, #tpu.memory_space<vmem>>, vector<19x1x128xbf16>,
    %c0_4 = arith.constant 0 : index
    %c0_5 = arith.constant 0 : index
    %c0_6 = arith.constant 0 : index
    %c0_7 = arith.constant 0 : index
    %3 = vector.load %arg2[%c0_4, %c0_5, %c0_6, %c0_7] : memref<1x16x16x128xbf16, #tpu.memory_space<vmem>>, vector<1x16x16x128xbf16>
    %4 = vector.shape_cast %3 : vector<1x16x16x128xbf16> to vector<16x16x128xbf16>
    %5 = arith.extf %4 : vector<16x16x128xbf16> to vector<16x16x128xf32>
    %c0_8 = arith.constant 0 : index
    %c0_9 = arith.constant 0 : index
    %6 = vector.load %arg6[%c0_8, %c0_9] : memref<1x128xf32, #tpu.memory_space<vmem>>, vector<1x128xf32>
    %7 = vector.shape_cast %6 : vector<1x128xf32> to vector<1x1x128xf32>
    %8 = vector.broadcast %7 : vector<1x1x128xf32> to vector<16x16x128xf32>
    %9 = arith.mulf %5, %8 : vector<16x16x128xf32>
    %c0_10 = arith.constant 0 : index
    %c0_11 = arith.constant 0 : index
    %10 = vector.load %arg7[%c0_10, %c0_11] : memref<1x128xf32, #tpu.memory_space<vmem>>, vector<1x128xf32>
    %11 = vector.shape_cast %10 : vector<1x128xf32> to vector<1x1x128xf32>
    %12 = vector.broadcast %11 : vector<1x1x128xf32> to vector<16x16x128xf32>
    %13 = arith.addf %9, %12 : vector<16x16x128xf32>
    %cst_12 = arith.constant 0.000000e+00 : f32
    %14 = vector.broadcast %cst_12 : f32 to vector<16x16x128xf32>
    %15 = arith.maximumf %13, %14 : vector<16x16x128xf32>
    %16 = arith.truncf %15 : vector<16x16x128xf32> to vector<16x16x128xbf16>
    %c1 = arith.constant 1 : index
    %c1_13 = arith.constant 1 : index
    %c0_14 = arith.constant 0 : index
    %17 = vector.load %arg10[%c1, %c1_13, %c0_14] : memref<19x24x128xbf16, #tpu.memory_space<vmem>>, vector<16x16x128xbf16>
    tpu.vector_store %arg10[%c1, %c1_13, %c0_14], %16 {strides = array<i32>} : memref<19x24x128xbf16, #tpu.memory_space<vmem>>, vector<16x16x128xbf16>,
    %c0_15 = arith.constant 0 : index
    %c0_16 = arith.constant 0 : index
    %c0_17 = arith.constant 0 : index
    %c0_18 = arith.constant 0 : index
    %18 = vector.load %arg3[%c0_15, %c0_16, %c0_17, %c0_18] : memref<1x1x16x128xbf16, #tpu.memory_space<vmem>>, vector<1x1x16x128xbf16>
    %19 = vector.shape_cast %18 : vector<1x1x16x128xbf16> to vector<1x16x128xbf16>
    %20 = arith.extf %19 : vector<1x16x128xbf16> to vector<1x16x128xf32>
    %c0_19 = arith.constant 0 : index
    %c0_20 = arith.constant 0 : index
    %21 = vector.load %arg6[%c0_19, %c0_20] : memref<1x128xf32, #tpu.memory_space<vmem>>, vector<1x128xf32>
    %22 = vector.shape_cast %21 : vector<1x128xf32> to vector<1x1x128xf32>
    %23 = vector.broadcast %22 : vector<1x1x128xf32> to vector<1x16x128xf32>
    %24 = arith.mulf %20, %23 : vector<1x16x128xf32>
    %c0_21 = arith.constant 0 : index
    %c0_22 = arith.constant 0 : index
    %25 = vector.load %arg7[%c0_21, %c0_22] : memref<1x128xf32, #tpu.memory_space<vmem>>, vector<1x128xf32>
    %26 = vector.shape_cast %25 : vector<1x128xf32> to vector<1x1x128xf32>
    %27 = vector.broadcast %26 : vector<1x1x128xf32> to vector<1x16x128xf32>
    %28 = arith.addf %24, %27 : vector<1x16x128xf32>
    %cst_23 = arith.constant 0.000000e+00 : f32
    %29 = vector.broadcast %cst_23 : f32 to vector<1x16x128xf32>
    %30 = arith.maximumf %28, %29 : vector<1x16x128xf32>
    %c0_i32 = arith.constant 0 : i32
    %31 = arith.cmpi sgt, %arg1, %c0_i32 : i32
    %32 = arith.extui %31 : i1 to i32
    %33 = arith.sitofp %32 : i32 to f32
    %34 = vector.broadcast %33 : f32 to vector<1x16x128xf32>
    %35 = arith.mulf %30, %34 : vector<1x16x128xf32>
    %36 = arith.truncf %35 : vector<1x16x128xf32> to vector<1x16x128xbf16>
    %c0_24 = arith.constant 0 : index
    %c1_25 = arith.constant 1 : index
    %c0_26 = arith.constant 0 : index
    %37 = vector.load %arg10[%c0_24, %c1_25, %c0_26] : memref<19x24x128xbf16, #tpu.memory_space<vmem>>, vector<1x16x128xbf16>
    tpu.vector_store %arg10[%c0_24, %c1_25, %c0_26], %36 {strides = array<i32>} : memref<19x24x128xbf16, #tpu.memory_space<vmem>>, vector<1x16x128xbf16>,
    %c0_27 = arith.constant 0 : index
    %c0_28 = arith.constant 0 : index
    %c0_29 = arith.constant 0 : index
    %c0_30 = arith.constant 0 : index
    %38 = vector.load %arg4[%c0_27, %c0_28, %c0_29, %c0_30] : memref<1x1x16x128xbf16, #tpu.memory_space<vmem>>, vector<1x1x16x128xbf16>
    %39 = vector.shape_cast %38 : vector<1x1x16x128xbf16> to vector<1x16x128xbf16>
    %40 = arith.extf %39 : vector<1x16x128xbf16> to vector<1x16x128xf32>
    %c0_31 = arith.constant 0 : index
    %c0_32 = arith.constant 0 : index
    %41 = vector.load %arg6[%c0_31, %c0_32] : memref<1x128xf32, #tpu.memory_space<vmem>>, vector<1x128xf32>
    %42 = vector.shape_cast %41 : vector<1x128xf32> to vector<1x1x128xf32>
    %43 = vector.broadcast %42 : vector<1x1x128xf32> to vector<1x16x128xf32>
    %44 = arith.mulf %40, %43 : vector<1x16x128xf32>
    %c0_33 = arith.constant 0 : index
    %c0_34 = arith.constant 0 : index
    %45 = vector.load %arg7[%c0_33, %c0_34] : memref<1x128xf32, #tpu.memory_space<vmem>>, vector<1x128xf32>
    %46 = vector.shape_cast %45 : vector<1x128xf32> to vector<1x1x128xf32>
    %47 = vector.broadcast %46 : vector<1x1x128xf32> to vector<1x16x128xf32>
    %48 = arith.addf %44, %47 : vector<1x16x128xf32>
    %cst_35 = arith.constant 0.000000e+00 : f32
    %49 = vector.broadcast %cst_35 : f32 to vector<1x16x128xf32>
    %50 = arith.maximumf %48, %49 : vector<1x16x128xf32>
    %c0_i32_36 = arith.constant 0 : i32
    %51 = arith.cmpi slt, %arg1, %c0_i32_36 : i32
    %52 = arith.extui %51 : i1 to i32
    %53 = arith.sitofp %52 : i32 to f32
    %54 = vector.broadcast %53 : f32 to vector<1x16x128xf32>
    %55 = arith.mulf %50, %54 : vector<1x16x128xf32>
    %56 = arith.truncf %55 : vector<1x16x128xf32> to vector<1x16x128xbf16>
    %c17_37 = arith.constant 17 : index
    %c1_38 = arith.constant 1 : index
    %c0_39 = arith.constant 0 : index
    %57 = vector.load %arg10[%c17_37, %c1_38, %c0_39] : memref<19x24x128xbf16, #tpu.memory_space<vmem>>, vector<1x16x128xbf16>
    tpu.vector_store %arg10[%c17_37, %c1_38, %c0_39], %56 {strides = array<i32>} : memref<19x24x128xbf16, #tpu.memory_space<vmem>>, vector<1x16x128xbf16>,
    %c0_40 = arith.constant 0 : index
    %c0_41 = arith.constant 0 : index
    %c0_42 = arith.constant 0 : index
    %58 = vector.load %arg10[%c0_40, %c0_41, %c0_42] : memref<19x24x128xbf16, #tpu.memory_space<vmem>>, vector<19x24x128xbf16>
    %59 = vector.shape_cast %58 : vector<19x24x128xbf16> to vector<456x128xbf16>
    %60 = vector.extract_strided_slice %59 {offsets = [0, 0], sizes = [432, 128], strides = [1, 1]} : vector<456x128xbf16> to vector<432x128xbf16>
    %c0_43 = arith.constant 0 : index
    %c0_44 = arith.constant 0 : index
    %61 = vector.load %arg11[%c0_43, %c0_44] : memref<432x384xbf16, #tpu.memory_space<vmem>>, vector<432x128xbf16>
    tpu.vector_store %arg11[%c0_43, %c0_44], %60 {strides = array<i32>} : memref<432x384xbf16, #tpu.memory_space<vmem>>, vector<432x128xbf16>,
    %62 = vector.extract_strided_slice %59 {offsets = [1, 0], sizes = [432, 128], strides = [1, 1]} : vector<456x128xbf16> to vector<432x128xbf16>
    %c0_45 = arith.constant 0 : index
    %c128 = arith.constant 128 : index
    %63 = vector.load %arg11[%c0_45, %c128] : memref<432x384xbf16, #tpu.memory_space<vmem>>, vector<432x128xbf16>
    tpu.vector_store %arg11[%c0_45, %c128], %62 {strides = array<i32>} : memref<432x384xbf16, #tpu.memory_space<vmem>>, vector<432x128xbf16>,
    %64 = vector.extract_strided_slice %59 {offsets = [2, 0], sizes = [432, 128], strides = [1, 1]} : vector<456x128xbf16> to vector<432x128xbf16>
    %c0_46 = arith.constant 0 : index
    %c256 = arith.constant 256 : index
    %65 = vector.load %arg11[%c0_46, %c256] : memref<432x384xbf16, #tpu.memory_space<vmem>>, vector<432x128xbf16>
    tpu.vector_store %arg11[%c0_46, %c256], %64 {strides = array<i32>} : memref<432x384xbf16, #tpu.memory_space<vmem>>, vector<432x128xbf16>,
    %c0_47 = arith.constant 0 : index
    %c0_48 = arith.constant 0 : index
    %66 = vector.load %arg11[%c0_47, %c0_48] : memref<432x384xbf16, #tpu.memory_space<vmem>>, vector<384x384xbf16>
    %c0_49 = arith.constant 0 : index
    %c0_50 = arith.constant 0 : index
    %c0_51 = arith.constant 0 : index
    %67 = vector.load %arg5[%c0_49, %c0_50, %c0_51] : memref<3x384x128xbf16, #tpu.memory_space<vmem>>, vector<1x384x128xbf16>
    %68 = vector.shape_cast %67 : vector<1x384x128xbf16> to vector<384x128xbf16>
    %cst_52 = arith.constant dense<0.000000e+00> : vector<384x128xf32>
    %69 = tpu.matmul %66, %68, %cst_52 {dimension_numbers = #tpu.dot_dimension_numbers<[1], [0], [0], [1], [0, 0, 1, 1], [], []>} : vector<384x384xbf16>, vector<384x128xbf16>, vector<384x128xf32> -> vector<384x128xf32>
    %c0_53 = arith.constant 0 : index
    %c0_54 = arith.constant 0 : index
    %70 = vector.load %arg12[%c0_53, %c0_54] : memref<384x128xf32, #tpu.memory_space<vmem>>, vector<384x128xf32>
    tpu.vector_store %arg12[%c0_53, %c0_54], %69 {strides = array<i32>} : memref<384x128xf32, #tpu.memory_space<vmem>>, vector<384x128xf32>,
    %c24 = arith.constant 24 : index
    %c0_55 = arith.constant 0 : index
    %71 = vector.load %arg11[%c24, %c0_55] : memref<432x384xbf16, #tpu.memory_space<vmem>>, vector<384x384xbf16>
    %c1_56 = arith.constant 1 : index
    %c0_57 = arith.constant 0 : index
    %c0_58 = arith.constant 0 : index
    %72 = vector.load %arg5[%c1_56, %c0_57, %c0_58] : memref<3x384x128xbf16, #tpu.memory_space<vmem>>, vector<1x384x128xbf16>
    %73 = vector.shape_cast %72 : vector<1x384x128xbf16> to vector<384x128xbf16>
    %cst_59 = arith.constant dense<0.000000e+00> : vector<384x128xf32>
    %74 = tpu.matmul %71, %73, %cst_59 {dimension_numbers = #tpu.dot_dimension_numbers<[1], [0], [0], [1], [0, 0, 1, 1], [], []>} : vector<384x384xbf16>, vector<384x128xbf16>, vector<384x128xf32> -> vector<384x128xf32>
    %c0_60 = arith.constant 0 : index
    %c0_61 = arith.constant 0 : index
    %75 = vector.load %arg12[%c0_60, %c0_61] : memref<384x128xf32, #tpu.memory_space<vmem>>, vector<384x128xf32>
    %76 = arith.addf %75, %74 : vector<384x128xf32>
    %c0_62 = arith.constant 0 : index
    %c0_63 = arith.constant 0 : index
    %77 = vector.load %arg12[%c0_62, %c0_63] : memref<384x128xf32, #tpu.memory_space<vmem>>, vector<384x128xf32>
    tpu.vector_store %arg12[%c0_62, %c0_63], %76 {strides = array<i32>} : memref<384x128xf32, #tpu.memory_space<vmem>>, vector<384x128xf32>,
    %c48 = arith.constant 48 : index
    %c0_64 = arith.constant 0 : index
    %78 = vector.load %arg11[%c48, %c0_64] : memref<432x384xbf16, #tpu.memory_space<vmem>>, vector<384x384xbf16>
    %c2 = arith.constant 2 : index
    %c0_65 = arith.constant 0 : index
    %c0_66 = arith.constant 0 : index
    %79 = vector.load %arg5[%c2, %c0_65, %c0_66] : memref<3x384x128xbf16, #tpu.memory_space<vmem>>, vector<1x384x128xbf16>
    %80 = vector.shape_cast %79 : vector<1x384x128xbf16> to vector<384x128xbf16>
    %cst_67 = arith.constant dense<0.000000e+00> : vector<384x128xf32>
    %81 = tpu.matmul %78, %80, %cst_67 {dimension_numbers = #tpu.dot_dimension_numbers<[1], [0], [0], [1], [0, 0, 1, 1], [], []>} : vector<384x384xbf16>, vector<384x128xbf16>, vector<384x128xf32> -> vector<384x128xf32>
    %c0_68 = arith.constant 0 : index
    %c0_69 = arith.constant 0 : index
    %82 = vector.load %arg12[%c0_68, %c0_69] : memref<384x128xf32, #tpu.memory_space<vmem>>, vector<384x128xf32>
    %83 = arith.addf %82, %81 : vector<384x128xf32>
    %c0_70 = arith.constant 0 : index
    %c0_71 = arith.constant 0 : index
    %84 = vector.load %arg12[%c0_70, %c0_71] : memref<384x128xf32, #tpu.memory_space<vmem>>, vector<384x128xf32>
    tpu.vector_store %arg12[%c0_70, %c0_71], %83 {strides = array<i32>} : memref<384x128xf32, #tpu.memory_space<vmem>>, vector<384x128xf32>,
    %c0_72 = arith.constant 0 : index
    %c0_73 = arith.constant 0 : index
    %85 = vector.load %arg12[%c0_72, %c0_73] : memref<384x128xf32, #tpu.memory_space<vmem>>, vector<384x128xf32>
    %86 = vector.shape_cast %85 : vector<384x128xf32> to vector<16x24x128xf32>
    %87 = vector.extract_strided_slice %86 {offsets = [0, 0, 0], sizes = [16, 16, 128], strides = [1, 1, 1]} : vector<16x24x128xf32> to vector<16x16x128xf32>
    %88 = vector.shape_cast %87 : vector<16x16x128xf32> to vector<1x16x16x128xf32>
    %89 = arith.truncf %88 : vector<1x16x16x128xf32> to vector<1x16x16x128xbf16>
    %c0_74 = arith.constant 0 : index
    %c0_75 = arith.constant 0 : index
    %c0_76 = arith.constant 0 : index
    %c0_77 = arith.constant 0 : index
    %90 = vector.load %arg8[%c0_74, %c0_75, %c0_76, %c0_77] : memref<1x16x16x128xbf16, #tpu.memory_space<vmem>>, vector<1x16x16x128xbf16>
    tpu.vector_store %arg8[%c0_74, %c0_75, %c0_76, %c0_77], %89 {strides = array<i32>} : memref<1x16x16x128xbf16, #tpu.memory_space<vmem>>, vector<1x16x16x128xbf16>,
    %91 = vector.shape_cast %87 : vector<16x16x128xf32> to vector<256x128xf32>
    %cst_78 = arith.constant dense<0.000000e+00> : vector<128xf32>
    %92 = vector.multi_reduction <add>, %91, %cst_78 [0] : vector<256x128xf32> to vector<128xf32>
    %93 = vector.shape_cast %92 : vector<128xf32> to vector<1x128xf32>
    %94 = arith.mulf %91, %91 : vector<256x128xf32>
    %cst_79 = arith.constant dense<0.000000e+00> : vector<128xf32>
    %95 = vector.multi_reduction <add>, %94, %cst_79 [0] : vector<256x128xf32> to vector<128xf32>
    %96 = vector.shape_cast %95 : vector<128xf32> to vector<1x128xf32>
    %cst_80 = arith.constant 0.000000e+00 : f32
    %97 = vector.broadcast %cst_80 : f32 to vector<6x128xf32>
    %98 = tpu.concatenate %93, %96, %97 in 0 : vector<1x128xf32>, vector<1x128xf32>, vector<6x128xf32> -> vector<8x128xf32>
    %99 = vector.shape_cast %98 : vector<8x128xf32> to vector<1x1x8x128xf32>
    %c0_81 = arith.constant 0 : index
    %c0_82 = arith.constant 0 : index
    %c0_83 = arith.constant 0 : index
    %c0_84 = arith.constant 0 : index
    %100 = vector.load %arg9[%c0_81, %c0_82, %c0_83, %c0_84] : memref<1x1x8x128xf32, #tpu.memory_space<vmem>>, vector<1x1x8x128xf32>
    tpu.vector_store %arg9[%c0_81, %c0_82, %c0_83, %c0_84], %99 {strides = array<i32>} : memref<1x1x8x128xf32, #tpu.memory_space<vmem>>, vector<1x1x8x128xf32>,
    return
  }
  func.func @transform_0(%arg0: i32, %arg1: i32) -> (i32, i32, i32, i32) {
    %c0_i32 = arith.constant 0 : i32
    %c0_i32_0 = arith.constant 0 : i32
    %c0_i32_1 = arith.constant 0 : i32
    return %arg0, %arg1, %c0_i32, %c0_i32_0 : i32, i32, i32, i32
  }
  func.func @transform_1(%arg0: i32, %arg1: i32) -> (i32, i32, i32, i32) {
    %c16_i32 = arith.constant 16 : i32
    %0 = arith.muli %arg1, %c16_i32 : i32
    %c1_i32 = arith.constant 1 : i32
    %1 = arith.subi %0, %c1_i32 : i32
    %c0_i32 = arith.constant 0 : i32
    %2 = arith.maxsi %1, %c0_i32 : i32
    %c0_i32_0 = arith.constant 0 : i32
    %c0_i32_1 = arith.constant 0 : i32
    %c0_i32_2 = arith.constant 0 : i32
    return %arg0, %2, %c0_i32_0, %c0_i32_1 : i32, i32, i32, i32
  }
  func.func @transform_2(%arg0: i32, %arg1: i32) -> (i32, i32, i32, i32) {
    %c1_i32 = arith.constant 1 : i32
    %0 = arith.addi %arg1, %c1_i32 : i32
    %c16_i32 = arith.constant 16 : i32
    %1 = arith.muli %0, %c16_i32 : i32
    %c15_i32 = arith.constant 15 : i32
    %2 = arith.minsi %1, %c15_i32 : i32
    %c0_i32 = arith.constant 0 : i32
    %c0_i32_0 = arith.constant 0 : i32
    %c0_i32_1 = arith.constant 0 : i32
    return %arg0, %2, %c0_i32, %c0_i32_0 : i32, i32, i32, i32
  }
  func.func @transform_3(%arg0: i32, %arg1: i32) -> (i32, i32, i32) {
    %c0_i32 = arith.constant 0 : i32
    %c0_i32_0 = arith.constant 0 : i32
    %c0_i32_1 = arith.constant 0 : i32
    %c0_i32_2 = arith.constant 0 : i32
    return %c0_i32, %c0_i32_0, %c0_i32_1 : i32, i32, i32
  }
  func.func @transform_4(%arg0: i32, %arg1: i32) -> (i32, i32) {
    %c0_i32 = arith.constant 0 : i32
    %c0_i32_0 = arith.constant 0 : i32
    %c0_i32_1 = arith.constant 0 : i32
    return %c0_i32, %c0_i32_0 : i32, i32
  }
  func.func @transform_5(%arg0: i32, %arg1: i32) -> (i32, i32) {
    %c0_i32 = arith.constant 0 : i32
    %c0_i32_0 = arith.constant 0 : i32
    %c0_i32_1 = arith.constant 0 : i32
    return %c0_i32, %c0_i32_0 : i32, i32
  }
  func.func @transform_6(%arg0: i32, %arg1: i32) -> (i32, i32, i32, i32) {
    %c0_i32 = arith.constant 0 : i32
    %c0_i32_0 = arith.constant 0 : i32
    %c0_i32_1 = arith.constant 0 : i32
    return %arg0, %arg1, %c0_i32, %c0_i32_0 : i32, i32, i32, i32
  }
  func.func @transform_7(%arg0: i32, %arg1: i32) -> (i32, i32, i32, i32) {
    %c0_i32 = arith.constant 0 : i32
    %c0_i32_0 = arith.constant 0 : i32
    %c0_i32_1 = arith.constant 0 : i32
    return %arg0, %arg1, %c0_i32, %c0_i32_0 : i32, i32, i32, i32
  }
}

</mosaic_0001>

<bundles_post_ra>
// kernel: double_conv.5
= control target key start
LH: loop header
LB: loop body
LE: loop exit
PB: predicated region body
PF: predicated region fallthrough
CT: control target
= control target key end

     0   :  { %s679_s12 = smov 0   ;;  %s681_s13 = smov 0   ;;  %s842_s0 = inlined_call_operand.vmem [shape: bf16[2,16,16,128], index: 0, kind: input, shape index: {}]   ;;  %s843_s1 = inlined_call_operand.vmem [shape: f32[1,128], index: 1, kind: input, shape index: {}]   ;;  %s844_s2 = inlined_call_operand.vmem [shape: f32[1,128], index: 2, kind: input, shape index: {}]   ;;  %s845_s3 = inlined_call_operand.vmem [shape: f32[2,16,16,128], index: 3, kind: output, shape index: {}]  }
   0x1   :  { %s683_s14 = smov 0  }
   0x2 LB: > { %s25_s15 = sadd.s32 1, %s653_s13  ;;  %p521_p0 = scmp.ge.s32.totalorder %s657_s14, 1  ;;  %s657_s14 = sphi %s683_s14, %s13_s14   ;;  %s653_s13 = sphi %s681_s13, %s847_s13   ;;  %s649_s12 = sphi %s679_s12, %s846_s12  }
   0x3   : > { %p27_p1 = scmp.ge.s32.totalorder %s25_s15, 2  ;;  %p159_p2 = scmp.lt.s32.totalorder %s657_s14, 3 }
   0x5   : > { %s849_s15 = smov (%p27_p1, %s25_s15), 0  ;;  %p160_p3 = pnand %p521_p0, %p159_p2 }
   0x6   : > { %p194_p4 = scmp.lt.s32.totalorder (!%p160_p3), %s649_s12, 1  ;;  %v708_v0 = vld [vmem:[%s843_s1] ss:$0 sm:$0xff] (!%p160_p3) }
   0x7   : > { %163 = sbr.rel (%p160_p3) target bundleno = 54 (0x36), region = 32  ;;  %v717_v9 = vld [vmem:[%s844_s2] ss:$0 sm:$0xff] (!%p160_p3) }
   0xe   : > { %s851_s12 = smov (!%p194_p4, %s649_s12), 1 }
   0xf   : > { %s530_s16 = sshll.u32 %s851_s12, 7  ;;  %s531_s24 = sshll.u32 %s851_s12, 8 }
  0x10   : > { %s703_s19 = scalar_lea.vmem %s842_s0, %s530_s16  ;;  %s735_s27 = scalar_lea.vmem %s845_s3, %s531_s24 }
  0x11   : > { %v533_v1 = vld [vmem:[%s703_s19] sm:$0xff]   ;;  %v596_v2 = vld [vmem:[%s703_s19 + $0x8] sm:$0xff]   ;;  %v597_v3 = vld [vmem:[%s703_s19 + $0x10] sm:$0xff]  }
  0x12   : > { %v534_v4 = vunpack.c.l.bf16 %v533_v1  ;;  %v535_v5 = vunpack.c.h.bf16 %v533_v1  ;;  %v538_v6 = vunpack.c.l.bf16 %v596_v2  ;;  %v539_v7 = vunpack.c.h.bf16 %v596_v2  ;;  %v598_v8 = vld [vmem:[%s703_s19 + $0x18] sm:$0xff]   ;;  %v599_v30 = vld [vmem:[%s703_s19 + $0x20] sm:$0xff]   ;;  %v600_v31 = vld [vmem:[%s703_s19 + $0x28] sm:$0xff]  }
  0x13   : > { %v542_v10 = vunpack.c.l.bf16 %v597_v3  ;;  %v543_v11 = vunpack.c.h.bf16 %v597_v3  ;;  %v546_v12 = vunpack.c.l.bf16 %v598_v8  ;;  %v547_v13 = vunpack.c.h.bf16 %v598_v8  ;;  %v601_v36 = vld [vmem:[%s703_s19 + $0x30] sm:$0xff]   ;;  %v602_v37 = vld [vmem:[%s703_s19 + $0x38] sm:$0xff]   ;;  %v603_v3 = vld [vmem:[%s703_s19 + $0x40] sm:$0xff]  }
  0x14   : > { %v286_v14 = vmul.f32 %v534_v4, %v708_v0  ;;  %v287_v15 = vmul.f32 %v535_v5, %v708_v0  ;;  %v288_v16 = vmul.f32 %v538_v6, %v708_v0  ;;  %v289_v17 = vmul.f32 %v539_v7, %v708_v0  ;;  %v604_v4 = vld [vmem:[%s703_s19 + $0x48] sm:$0xff]  }
  0x15   : > { %v290_v18 = vmul.f32 %v542_v10, %v708_v0  ;;  %v291_v19 = vmul.f32 %v543_v11, %v708_v0  ;;  %v292_v20 = vmul.f32 %v546_v12, %v708_v0  ;;  %v293_v21 = vmul.f32 %v547_v13, %v708_v0  ;;  %v605_v10 = vld [vmem:[%s703_s19 + $0x50] sm:$0xff]   ;;  %v606_v11 = vld [vmem:[%s703_s19 + $0x58] sm:$0xff]  }
  0x16   : > { %v325_v22 = vadd.f32 %v717_v9, %v286_v14  ;;  %v326_v23 = vadd.f32 %v717_v9, %v287_v15  ;;  %v327_v24 = vadd.f32 %v717_v9, %v288_v16  ;;  %v328_v25 = vadd.f32 %v717_v9, %v289_v17 }
  0x17   : > { %v329_v26 = vadd.f32 %v717_v9, %v290_v18  ;;  %v330_v27 = vadd.f32 %v717_v9, %v291_v19  ;;  %v331_v28 = vadd.f32 %v717_v9, %v292_v20  ;;  %v332_v29 = vadd.f32 %v717_v9, %v293_v21 }
  0x18   : > { %v357_v32 = vmax.f32 %v325_v22, 0.0  ;;  %v358_v33 = vmax.f32 %v326_v23, 0.0  ;;  %v359_v34 = vmax.f32 %v327_v24, 0.0  ;;  %v360_v35 = vmax.f32 %v328_v25, 0.0 }
  0x19   : > { %v361_v38 = vmax.f32 %v329_v26, 0.0  ;;  %v362_v39 = vmax.f32 %v330_v27, 0.0  ;;  %v363_v40 = vmax.f32 %v331_v28, 0.0  ;;  %v364_v41 = vmax.f32 %v332_v29, 0.0 }
  0x1a   : > { %389 = vst [vmem:[%s735_s27] sm:$0xff] %v357_v32  ;;  %390 = vst [vmem:[%s735_s27 + $0x8] sm:$0xff] %v358_v33  ;;  %v550_v42 = vunpack.c.l.bf16 %v599_v30  ;;  %v551_v43 = vunpack.c.h.bf16 %v599_v30  ;;  %v554_v44 = vunpack.c.l.bf16 %v600_v31  ;;  %v555_v45 = vunpack.c.h.bf16 %v600_v31 }
  0x1b   : > { %391 = vst [vmem:[%s735_s27 + $0x10] sm:$0xff] %v359_v34  ;;  %392 = vst [vmem:[%s735_s27 + $0x18] sm:$0xff] %v360_v35  ;;  %v558_v46 = vunpack.c.l.bf16 %v601_v36  ;;  %v559_v47 = vunpack.c.h.bf16 %v601_v36  ;;  %v562_v48 = vunpack.c.l.bf16 %v602_v37  ;;  %v563_v49 = vunpack.c.h.bf16 %v602_v37 }
  0x1c   : > { %393 = vst [vmem:[%s735_s27 + $0x20] sm:$0xff] %v361_v38  ;;  %394 = vst [vmem:[%s735_s27 + $0x28] sm:$0xff] %v362_v39  ;;  %v294_v50 = vmul.f32 %v550_v42, %v708_v0  ;;  %v295_v51 = vmul.f32 %v551_v43, %v708_v0  ;;  %v296_v52 = vmul.f32 %v554_v44, %v708_v0  ;;  %v566_v16 = vunpack.c.l.bf16 %v603_v3 }
  0x1d   : > { %395 = vst [vmem:[%s735_s27 + $0x30] sm:$0xff] %v363_v40  ;;  %396 = vst [vmem:[%s735_s27 + $0x38] sm:$0xff] %v364_v41  ;;  %v297_v53 = vmul.f32 %v555_v45, %v708_v0  ;;  %v298_v54 = vmul.f32 %v558_v46, %v708_v0  ;;  %v299_v55 = vmul.f32 %v559_v47, %v708_v0  ;;  %v567_v17 = vunpack.c.h.bf16 %v603_v3  ;;  %v607_v40 = vld [vmem:[%s703_s19 + $0x60] sm:$0xff]   ;;  %v608_v41 = vld [vmem:[%s703_s19 + $0x68] sm:$0xff]  }
  0x1e   : > { %v300_v56 = vmul.f32 %v562_v48, %v708_v0  ;;  %v301_v57 = vmul.f32 %v563_v49, %v708_v0  ;;  %v333_v58 = vadd.f32 %v717_v9, %v294_v50  ;;  %v334_v59 = vadd.f32 %v717_v9, %v295_v51  ;;  %v609_v46 = vld [vmem:[%s703_s19 + $0x70] sm:$0xff]   ;;  %v610_v47 = vld [vmem:[%s703_s19 + $0x78] sm:$0xff]  }
  0x1f   : > { %v335_v60 = vadd.f32 %v717_v9, %v296_v52  ;;  %v336_v61 = vadd.f32 %v717_v9, %v297_v53  ;;  %v337_v62 = vadd.f32 %v717_v9, %v298_v54  ;;  %v338_v63 = vadd.f32 %v717_v9, %v299_v55 }
  0x20   : > { %v339_v1 = vadd.f32 %v717_v9, %v300_v56  ;;  %v340_v2 = vadd.f32 %v717_v9, %v301_v57  ;;  %v365_v5 = vmax.f32 %v333_v58, 0.0  ;;  %v366_v6 = vmax.f32 %v334_v59, 0.0 }
  0x21   : > { %v367_v7 = vmax.f32 %v335_v60, 0.0  ;;  %v368_v8 = vmax.f32 %v336_v61, 0.0  ;;  %v369_v12 = vmax.f32 %v337_v62, 0.0  ;;  %v370_v13 = vmax.f32 %v338_v63, 0.0 }
  0x22   : > { %v371_v14 = vmax.f32 %v339_v1, 0.0  ;;  %v372_v15 = vmax.f32 %v340_v2, 0.0  ;;  %397 = vst [vmem:[%s735_s27 + $0x40] sm:$0xff] %v365_v5  ;;  %398 = vst [vmem:[%s735_s27 + $0x48] sm:$0xff] %v366_v6  ;;  %v570_v18 = vunpack.c.l.bf16 %v604_v4  ;;  %v571_v19 = vunpack.c.h.bf16 %v604_v4 }
  0x23   : > { %399 = vst [vmem:[%s735_s27 + $0x50] sm:$0xff] %v367_v7  ;;  %400 = vst [vmem:[%s735_s27 + $0x58] sm:$0xff] %v368_v8  ;;  %v574_v20 = vunpack.c.l.bf16 %v605_v10  ;;  %v575_v21 = vunpack.c.h.bf16 %v605_v10  ;;  %v578_v22 = vunpack.c.l.bf16 %v606_v11  ;;  %v579_v23 = vunpack.c.h.bf16 %v606_v11 }
  0x24   : > { %401 = vst [vmem:[%s735_s27 + $0x60] sm:$0xff] %v369_v12  ;;  %402 = vst [vmem:[%s735_s27 + $0x68] sm:$0xff] %v370_v13  ;;  %v302_v24 = vmul.f32 %v566_v16, %v708_v0  ;;  %v303_v25 = vmul.f32 %v567_v17, %v708_v0  ;;  %v304_v26 = vmul.f32 %v570_v18, %v708_v0  ;;  %v582_v52 = vunpack.c.l.bf16 %v607_v40 }
  0x25   : > { %403 = vst [vmem:[%s735_s27 + $0x70] sm:$0xff] %v371_v14  ;;  %404 = vst [vmem:[%s735_s27 + $0x78] sm:$0xff] %v372_v15  ;;  %v305_v27 = vmul.f32 %v571_v19, %v708_v0  ;;  %v306_v28 = vmul.f32 %v574_v20, %v708_v0  ;;  %v307_v29 = vmul.f32 %v575_v21, %v708_v0  ;;  %v583_v53 = vunpack.c.h.bf16 %v607_v40 }
  0x26   : > { %v308_v30 = vmul.f32 %v578_v22, %v708_v0  ;;  %v309_v31 = vmul.f32 %v579_v23, %v708_v0  ;;  %v341_v32 = vadd.f32 %v717_v9, %v302_v24  ;;  %v342_v33 = vadd.f32 %v717_v9, %v303_v25 }
  0x27   : > { %v343_v34 = vadd.f32 %v717_v9, %v304_v26  ;;  %v344_v35 = vadd.f32 %v717_v9, %v305_v27  ;;  %v345_v36 = vadd.f32 %v717_v9, %v306_v28  ;;  %v346_v37 = vadd.f32 %v717_v9, %v307_v29 }
  0x28   : > { %v347_v38 = vadd.f32 %v717_v9, %v308_v30  ;;  %v348_v39 = vadd.f32 %v717_v9, %v309_v31  ;;  %v373_v42 = vmax.f32 %v341_v32, 0.0  ;;  %v374_v43 = vmax.f32 %v342_v33, 0.0 }
  0x29   : > { %v375_v44 = vmax.f32 %v343_v34, 0.0  ;;  %v376_v45 = vmax.f32 %v344_v35, 0.0  ;;  %v377_v48 = vmax.f32 %v345_v36, 0.0  ;;  %v378_v49 = vmax.f32 %v346_v37, 0.0 }
  0x2a   : > { %v379_v50 = vmax.f32 %v347_v38, 0.0  ;;  %v380_v51 = vmax.f32 %v348_v39, 0.0  ;;  %405 = vst [vmem:[%s735_s27 + $0x80] sm:$0xff] %v373_v42  ;;  %406 = vst [vmem:[%s735_s27 + $0x88] sm:$0xff] %v374_v43  ;;  %v586_v54 = vunpack.c.l.bf16 %v608_v41  ;;  %v587_v55 = vunpack.c.h.bf16 %v608_v41 }
  0x2b   : > { %407 = vst [vmem:[%s735_s27 + $0x90] sm:$0xff] %v375_v44  ;;  %408 = vst [vmem:[%s735_s27 + $0x98] sm:$0xff] %v376_v45  ;;  %v590_v56 = vunpack.c.l.bf16 %v609_v46  ;;  %v591_v57 = vunpack.c.h.bf16 %v609_v46  ;;  %v594_v58 = vunpack.c.l.bf16 %v610_v47  ;;  %v595_v59 = vunpack.c.h.bf16 %v610_v47 }
  0x2c   : > { %409 = vst [vmem:[%s735_s27 + $0xa0] sm:$0xff] %v377_v48  ;;  %410 = vst [vmem:[%s735_s27 + $0xa8] sm:$0xff] %v378_v49  ;;  %v310_v60 = vmul.f32 %v582_v52, %v708_v0  ;;  %v311_v61 = vmul.f32 %v583_v53, %v708_v0  ;;  %v312_v62 = vmul.f32 %v586_v54, %v708_v0 }
  0x2d   : > { %411 = vst [vmem:[%s735_s27 + $0xb0] sm:$0xff] %v379_v50  ;;  %412 = vst [vmem:[%s735_s27 + $0xb8] sm:$0xff] %v380_v51  ;;  %v313_v63 = vmul.f32 %v587_v55, %v708_v0  ;;  %v314_v1 = vmul.f32 %v590_v56, %v708_v0  ;;  %v315_v2 = vmul.f32 %v591_v57, %v708_v0 }
  0x2e   : > { %v316_v3 = vmul.f32 %v594_v58, %v708_v0  ;;  %v317_v4 = vmul.f32 %v595_v59, %v708_v0  ;;  %v349_v5 = vadd.f32 %v717_v9, %v310_v60  ;;  %v350_v6 = vadd.f32 %v717_v9, %v311_v61 }
  0x2f   : > { %v351_v7 = vadd.f32 %v717_v9, %v312_v62  ;;  %v352_v8 = vadd.f32 %v717_v9, %v313_v63  ;;  %v353_v10 = vadd.f32 %v717_v9, %v314_v1  ;;  %v354_v11 = vadd.f32 %v717_v9, %v315_v2 }
  0x30   : > { %v355_v0 = vadd.f32 %v717_v9, %v316_v3  ;;  %v356_v12 = vadd.f32 %v717_v9, %v317_v4  ;;  %v381_v13 = vmax.f32 %v349_v5, 0.0  ;;  %v382_v14 = vmax.f32 %v350_v6, 0.0 }
  0x31   : > { %v383_v15 = vmax.f32 %v351_v7, 0.0  ;;  %v384_v16 = vmax.f32 %v352_v8, 0.0  ;;  %v385_v17 = vmax.f32 %v353_v10, 0.0  ;;  %v386_v18 = vmax.f32 %v354_v11, 0.0 }
  0x32   : > { %v387_v19 = vmax.f32 %v355_v0, 0.0  ;;  %v388_v20 = vmax.f32 %v356_v12, 0.0  ;;  %413 = vst [vmem:[%s735_s27 + $0xc0] sm:$0xff] %v381_v13  ;;  %414 = vst [vmem:[%s735_s27 + $0xc8] sm:$0xff] %v382_v14 }
  0x33   : > { %415 = vst [vmem:[%s735_s27 + $0xd0] sm:$0xff] %v383_v15  ;;  %416 = vst [vmem:[%s735_s27 + $0xd8] sm:$0xff] %v384_v16 }
  0x34   : > { %417 = vst [vmem:[%s735_s27 + $0xe0] sm:$0xff] %v385_v17  ;;  %418 = vst [vmem:[%s735_s27 + $0xe8] sm:$0xff] %v386_v18 }
  0x35   : > { %419 = vst [vmem:[%s735_s27 + $0xf0] sm:$0xff] %v387_v19  ;;  %420 = vst [vmem:[%s735_s27 + $0xf8] sm:$0xff] %v388_v20 }
  0x36 PF: > { %s13_s14 = sadd.s32 1, %s657_s14   ;;  %s846_s12 = smov %s653_s13 }
  0x37   : > { %p10_p5 = scmp.ge.s32.totalorder %s13_s14, 4   ;;  %s847_s13 = smov %s849_s15 }
  0x39   :  { %12 = sbr.rel (!%p10_p5) target bundleno = 2 (0x2), region = 62 }

// kernel: double_conv.3
= control target key start
LH: loop header
LB: loop body
LE: loop exit
PB: predicated region body
PF: predicated region fallthrough
CT: control target
= control target key end

     0   :  { %s6096_s24 = smov 0   ;;  %s6098_s25 = smov 0   ;;  %s7804_s0 = inlined_call_operand.vmem [shape: f32[2,16,16,128], index: 0, kind: input, shape index: {}, may-alias: {0,1,2}]   ;;  %s7805_s1 = inlined_call_operand.vmem [shape: f32[2,16,16,128], index: 1, kind: input, shape index: {}, may-alias: {0,1,2}]   ;;  %s7806_s2 = inlined_call_operand.vmem [shape: f32[2,16,16,128], index: 2, kind: input, shape index: {}, may-alias: {0,1,2}]   ;;  %s7807_s3 = inlined_call_operand.vmem [shape: bf16[3,384,128], index: 3, kind: input, shape index: {}]   ;;  %s7808_s4 = inlined_call_operand.vmem [shape: f32[1,128], index: 4, kind: input, shape index: {}]   ;;  %s7809_s5 = inlined_call_operand.vmem [shape: f32[1,128], index: 5, kind: input, shape index: {}]   ;;  %s7810_s6 = inlined_call_operand.vmem [shape: bf16[2,16,16,128], index: 6, kind: output, shape index: {0}]   ;;  %s7811_s7 = inlined_call_operand.vmem [shape: f32[2,1,8,128], index: 7, kind: output, shape index: {1}]  }
   0x1   :  { %s6100_s26 = smov 0  }
   0x2 LB: > { %s30_s4 = sadd.s32 1, %s6049_s25  ;;  %p5129_p0 = scmp.ge.s32.totalorder %s6053_s26, 1  ;;  %s6053_s26 = sphi %s6100_s26, %s18_s26   ;;  %s6049_s25 = sphi %s6098_s25, %s7871_s25   ;;  %s6045_s24 = sphi %s6096_s24, %s7870_s24  }
   0x3   : > { %p32_p1 = scmp.ge.s32.totalorder %s30_s4, 2  ;;  %p328_p2 = scmp.lt.s32.totalorder %s6053_s26, 3 }
   0x5   : > { %s7873_s4 = smov (%p32_p1, %s30_s4), 0  ;;  %p329_p3 = pnand %p5129_p0, %p328_p2 }
   0x7   : > { %332 = sbr.rel (%p329_p3) target bundleno = 753 (0x2f1), region = 44 }
   0xe   : > { %v5903_v0 = vld [vmem:[%s7807_s3] sm:$0xff]   ;;  %v6055_v1 = vmov 0   ;;  %v5905_v3 = vld [vmem:[%s7807_s3 + $0x8] sm:$0xff]   ;;  %v5908_v5 = vld [vmem:[%s7807_s3 + $0x90] sm:$0xff]   ;;  %p404_p4 = scmp.lt.s32.totalorder %s6045_s24, 1  ;;  %vm467_vm0 = vcmask 1040384  }
   0xf   : > { %2130 = vmatprep.subr.bf16.mxu0 %v6055_v1  ;;  %v6121_v2 = vld [vmem:[%s7807_s3 + $0x80] sm:$0xff]   ;;  %v5906_v4 = vld [vmem:[%s7807_s3 + $0x88] sm:$0xff]   ;;  %v5907_v6 = vld [vmem:[%s7807_s3 + $0x10] sm:$0xff]   ;;  %vm468_vm1 = vsmask.f32 256  ;;  %vm1037_vm5 = vcmask 1043456  }
  0x10   : > { %2131 = vmatpush1.bf16.msra.mxu0 %v5903_v0  ;;  %5862 = vmatprep.subr.bf16.mxu1 %v6121_v2  ;;  %v5910_v7 = vld [vmem:[%s7807_s3 + $0x98] sm:$0xff]   ;;  %s7875_s24 = smov (!%p404_p4, %s6045_s24), 1  ;;  %v5912_v9 = vld [vmem:[%s7807_s3 + $0xa0] sm:$0xff]   ;;  %v5913_v11 = vld [vmem:[%s7807_s3 + $0x28] sm:$0xff]   ;;  %vm527_vm2 = vsmask.f32 7938 }
  0x11   : > { %2132 = vmatprep.subr.bf16.mxu0 %v6055_v1  ;;  %5870 = vmatpush3.bf16.msra.mxu1 %v6121_v2  ;;  %v5909_v8 = vld [vmem:[%s7807_s3 + $0x18] sm:$0xff]   ;;  %s6152_s21 = sshll.u32 %s7875_s24, 8  ;;  %v5911_v10 = vld [vmem:[%s7807_s3 + $0x20] sm:$0xff]   ;;  %v5914_v12 = vld [vmem:[%s7807_s3 + $0xa8] sm:$0xff]   ;;  %vm714_vm6 = vsmask.f32 4368 }
  0x12   : > { %5863 = vmatprep.subr.bf16.mxu1 %v5906_v4  ;;  %s6168_s9 = scalar_lea.vmem %s7804_s0, %s6152_s21  ;;  %v488_v13 = vld [vmem:[#allocation2 + $0x48] sm:$0x1]  ;;  %vm6172_vm3 = vmand %vm467_vm0, %vm468_vm1  ;;  %v544_v15 = vld [vmem:[#allocation2 + $0x44] sm:$0x1]  ;;  %vm1756_vm9 = vcmask 1046528   ;;  %s426_s22 = scalar_lea.vmem %s7805_s1, %s6152_s21  ;;  %vm4943_vm11 = vcmask 1041408  }
  0x13   : > { %v583_v16 = vld [vmem:[#allocation2 + $0xe0] sm:$0x1]  ;;  %v489_v17 = vsel %vm6172_vm3, 0, %v488_v13  ;;  %vm6181_vm4 = vmand %vm467_vm0, %vm527_vm2  ;;  %v595_v20 = vld [vmem:[%s6168_s9 + $0x48] sm:$0xff]  ;;  %vm1481_vm10 = vsmask.f32 7424 }
  0x14   : > { %2133 = vmatpush1.bf16.msra.mxu0 %v5905_v3  ;;  %v594_v19 = vld [vmem:[%s6168_s9 + $0x40] sm:$0xff]  ;;  %v5916_v21 = vld [vmem:[%s7807_s3 + $0xb0] sm:$0xff]   ;;  %490 = vst [vmem:[#allocation2 + $0x48] sm:$0x1] %v489_v17  ;;  %v545_v22 = vsel %vm6181_vm4, 0, %v544_v15  ;;  %v584_v23 = vsel %vm6181_vm4, 0, %v583_v16  ;;  %v5419_v27 = vpack.c.bf16 %v595_v20, %v595_v20  ;;  %vm6210_vm7 = vmor %vm468_vm1, %vm714_vm6 }
  0x15   : > { %2134 = vmatprep.subr.bf16.mxu0 %v6055_v1  ;;  %5871 = vmatpush3.bf16.msra.mxu1 %v5906_v4  ;;  %v596_v24 = vld [vmem:[%s6168_s9 + $0x50] sm:$0xff]  ;;  %v597_v25 = vld [vmem:[%s6168_s9 + $0x58] sm:$0xff]  ;;  %v5418_v26 = vpack.c.bf16 %v594_v19, %v594_v19  ;;  %546 = vst [vmem:[#allocation2 + $0x44] sm:$0x1] %v545_v22  ;;  %585 = vst [vmem:[#allocation2 + $0xe0] sm:$0x1] %v584_v23 }
  0x16   : > { %5864 = vmatprep.subr.bf16.mxu1 %v5908_v5  ;;  %v5420_v28 = vpack.c.bf16 %v596_v24, %v596_v24  ;;  %v5421_v29 = vpack.c.bf16 %v597_v25, %v597_v25  ;;  %v491_v30 = vld [vmem:[#allocation2 + $0x54] sm:$0x1]  ;;  %v547_v31 = vld [vmem:[#allocation2 + $0x50] sm:$0x1]  ;;  %v793_v35 = vshrl.u32 %v5419_v27, 16  ;;  %v796_v36 = vshll.u32 %v5419_v27, 16  ;;  %vm6221_vm8 = vmand %vm1037_vm5, %vm527_vm2 }
  0x17   : > { %v5915_v32 = vld [vmem:[%s7807_s3 + $0x30] sm:$0xff]   ;;  %v785_v33 = vshrl.u32 %v5418_v26, 16  ;;  %v788_v34 = vshll.u32 %v5418_v26, 16  ;;  %v598_v37 = vld [vmem:[%s6168_s9 + $0x60] sm:$0xff]  ;;  %v5918_v38 = vld [vmem:[%s7807_s3 + $0xb8] sm:$0xff]   ;;  %v492_v45 = vsel %vm6172_vm3, 0, %v491_v30 }
  0x18   : > { %2135 = vmatpush1.bf16.msra.mxu0 %v5907_v6  ;;  %v802_v39 = vshrl.u32 %v5420_v28, 16  ;;  %v805_v40 = vshll.u32 %v5420_v28, 16  ;;  %v810_v41 = vshrl.u32 %v5421_v29, 16  ;;  %v813_v42 = vshll.u32 %v5421_v29, 16  ;;  %493 = vst [vmem:[#allocation2 + $0x54] sm:$0x1] %v492_v45 }
  0x19   : > { %2136 = vmatprep.subr.bf16.mxu0 %v6055_v1  ;;  %5872 = vmatpush3.bf16.msra.mxu1 %v5908_v5  ;;  %v787_v43 = vrot.slane %v785_v33, 7  ;;  %v795_v44 = vrot.slane %v793_v35, 7  ;;  %v548_v46 = vsel %vm6181_vm4, 0, %v547_v31  ;;  %v5422_v50 = vpack.c.bf16 %v598_v37, %v598_v37  ;;  %v5917_v51 = vld [vmem:[%s7807_s3 + $0x38] sm:$0xff]   ;;  %v5919_v3 = vld [vmem:[%s7807_s3 + $0x40] sm:$0xff]   ;;  %v600_v13 = vld [vmem:[%s6168_s9 + $0x70] sm:$0xff] }
  0x1a   : > { %5865 = vmatprep.subr.bf16.mxu1 %v5910_v7  ;;  %v804_v48 = vrot.slane %v802_v39, 7  ;;  %v812_v49 = vrot.slane %v810_v41, 7  ;;  %549 = vst [vmem:[#allocation2 + $0x50] sm:$0x1] %v548_v46  ;;  %v601_v17 = vld [vmem:[%s6168_s9 + $0x78] sm:$0xff]  ;;  %v5424_v19 = vpack.c.bf16 %v600_v13, %v600_v13  ;;  %v5923_v30 = vld [vmem:[%s7807_s3 + $0x48] sm:$0xff]  }
  0x1b   : > { %v6217_v52 = vor.u32 %v788_v34, %v787_v43  ;;  %v791_v53 = vrot.slane %v787_v43, 4  ;;  %v798_v54 = vor.u32 %v796_v36, %v795_v44  ;;  %v800_v55 = vrot.slane %v795_v44, 4  ;;  %v1074_v60 = vld [vmem:[#allocation2 + $0x48] sm:$0xf]  ;;  %v5925_v36 = vld [vmem:[%s7807_s3 + $0x50] sm:$0xff]   ;;  %v5931_v13 = vld [vmem:[%s7807_s3 + $0x60] sm:$0xff]  }
  0x1c   : > { %2137 = vmatpush1.bf16.msra.mxu0 %v5909_v8  ;;  %v807_v57 = vor.u32 %v805_v40, %v804_v48  ;;  %v808_v58 = vrot.slane %v804_v48, 4  ;;  %v815_v59 = vor.u32 %v813_v42, %v812_v49  ;;  %v1071_v62 = vld [vmem:[#allocation2 + $0x44] sm:$0x1]  ;;  %v819_v63 = vshrl.u32 %v5422_v50, 16  ;;  %v550_v8 = vld [vmem:[#allocation2 + $0x5c] sm:$0x1] }
  0x1d   : > { %2138 = vmatprep.subr.bf16.mxu0 %v6055_v1  ;;  %5873 = vmatpush3.bf16.msra.mxu1 %v5910_v7  ;;  %v799_v61 = vsel %vm6210_vm7, %v791_v53, %v798_v54  ;;  %v822_v0 = vshll.u32 %v5422_v50, 16  ;;  %v817_v5 = vrot.slane %v812_v49, 4  ;;  %v1072_v6 = vsel %vm6172_vm3, %v800_v55, %v1071_v62  ;;  %v497_v49 = vld [vmem:[#allocation2 + $0x6c] sm:$0x1]  ;;  %v553_v55 = vld [vmem:[#allocation2 + $0x68] sm:$0x1] }
  0x1e   : > { %5866 = vmatprep.subr.bf16.mxu1 %v5912_v9  ;;  %v816_v4 = vsel %vm6210_vm7, %v808_v58, %v815_v59  ;;  %1070 = vst [vmem:[#allocation2 + $0x40] sm:$0xf] %v799_v61  ;;  %v1075_v7 = vsel %vm6221_vm8, %v807_v57, %v1074_v60  ;;  %1073 = vst [vmem:[#allocation2 + $0x44] sm:$0x1] %v1072_v6  ;;  %v5425_v24 = vpack.c.bf16 %v601_v17, %v601_v17  ;;  %v602_v57 = vld [vmem:[%s6168_s9 + $0x80] sm:$0xff]  ;;  %v603_v58 = vld [vmem:[%s6168_s9 + $0x88] sm:$0xff] }
  0x1f   : > { %1076 = vst [vmem:[#allocation2 + $0x48] sm:$0xf] %v1075_v7  ;;  %1077 = vst [vmem:[#allocation2 + $0x4c] sm:$0xf] %v816_v4  ;;  %v1081_v22 = vld [vmem:[#allocation2 + $0x54] sm:$0xf]  ;;  %v5426_v62 = vpack.c.bf16 %v602_v57, %v602_v57  ;;  %v5427_v6 = vpack.c.bf16 %v603_v58, %v603_v58 }
  0x20   : > { %2139 = vmatpush1.bf16.msra.mxu0 %v5911_v10  ;;  %v551_v10 = vsel %vm6181_vm4, 0, %v550_v8  ;;  %v836_v28 = vshrl.u32 %v5424_v19, 16  ;;  %v839_v31 = vshll.u32 %v5424_v19, 16  ;;  %v847_v33 = vshll.u32 %v5425_v24, 16  ;;  %v5929_v4 = vld [vmem:[%s7807_s3 + $0x58] sm:$0xff]   ;;  %v5926_v17 = vld [vmem:[%s7807_s3 + $0xc8] sm:$0xff]  }
  0x21   : > { %2140 = vmatprep.subr.bf16.mxu0 %v6055_v1  ;;  %5874 = vmatpush3.bf16.msra.mxu1 %v5912_v9  ;;  %v821_v9 = vrot.slane %v819_v63, 7  ;;  %552 = vst [vmem:[#allocation2 + $0x5c] sm:$0x1] %v551_v10  ;;  %v498_v60 = vsel %vm6172_vm3, 0, %v497_v49  ;;  %v554_v61 = vsel %vm6181_vm4, 0, %v553_v55  ;;  %v853_v7 = vshrl.u32 %v5426_v62, 16 }
  0x22   : > { %5867 = vmatprep.subr.bf16.mxu1 %v5914_v12  ;;  %v838_v35 = vrot.slane %v836_v28, 7  ;;  %v556_v63 = vld [vmem:[#allocation2 + $0x74] sm:$0x1]  ;;  %499 = vst [vmem:[#allocation2 + $0x6c] sm:$0x1] %v498_v60  ;;  %v856_v8 = vshll.u32 %v5426_v62, 16 }
  0x23   : > { %v824_v20 = vor.u32 %v822_v0, %v821_v9  ;;  %v825_v23 = vrot.slane %v821_v9, 4  ;;  %555 = vst [vmem:[#allocation2 + $0x68] sm:$0x1] %v554_v61  ;;  %v5924_v10 = vld [vmem:[%s7807_s3 + $0xc0] sm:$0xff]   ;;  %v5937_v55 = vld [vmem:[%s7807_s3 + $0x70] sm:$0xff]   ;;  %v5932_v60 = vld [vmem:[%s7807_s3 + $0xd8] sm:$0xff]  }
  0x24   : > { %2141 = vmatpush1.bf16.msra.mxu0 %v5913_v11  ;;  %v599_v11 = vld [vmem:[%s6168_s9 + $0x68] sm:$0xff]  ;;  %v841_v39 = vor.u32 %v839_v31, %v838_v35  ;;  %v842_v44 = vrot.slane %v838_v35, 4  ;;  %s5409_s13 = sshll.u32 %s7875_s24, 7  ;;  %s5138_s17 = sshll.u32 %s7875_s24, 3 }
  0x25   : > { %2142 = vmatprep.subr.bf16.mxu0 %v6055_v1  ;;  %5875 = vmatpush3.bf16.msra.mxu1 %v5914_v12  ;;  %v494_v12 = vld [vmem:[#allocation2 + $0x60] sm:$0x1]  ;;  %v5423_v15 = vpack.c.bf16 %v599_v11, %v599_v11  ;;  %v1082_v29 = vsel %vm6221_vm8, %v824_v20, %v1081_v22  ;;  %v861_v11 = vshrl.u32 %v5427_v6, 16  ;;  %v5982_v47 = vld [vmem:[%s7807_s3 + $0x1e8] sm:$0xff]   ;;  %s7704_s16 = scalar_lea.vmem %s7810_s6, %s5409_s13  ;;  %s465_s20 = scalar_lea.vmem %s7811_s7, %s5138_s17 }
  0x26   : > { %5868 = vmatprep.subr.bf16.mxu1 %v5916_v21  ;;  %v495_v16 = vsel %vm6172_vm3, 0, %v494_v12  ;;  %1083 = vst [vmem:[#allocation2 + $0x54] sm:$0xf] %v1082_v29  ;;  %v6259_v40 = vld [vmem:[#allocation2 + $0x40] sm:$0xff]   ;;  %v5921_v41 = vld [vmem:[#allocation2 + $0x48] sm:$0xff]   ;;  %v864_v12 = vshll.u32 %v5427_v6, 16 }
  0x27   : > { %496 = vst [vmem:[#allocation2 + $0x60] sm:$0x1] %v495_v16  ;;  %v827_v26 = vshrl.u32 %v5423_v15, 16  ;;  %v830_v27 = vshll.u32 %v5423_v15, 16  ;;  %v1772_v50 = vrot.slane %v6259_v40, 1  ;;  %1459 = vst [vmem:[#allocation3 + $0xc0] sm:$0xff] %v6259_v40 }
  0x28   : > { %2143 = vmatpush1.bf16.msra.mxu0 %v5915_v32  ;;  %v844_v32 = vshrl.u32 %v5425_v24, 16  ;;  %v1085_v43 = vld [vmem:[#allocation2 + $0x5c] sm:$0x1]  ;;  %1460 = vst [vmem:[#allocation3 + $0xd8] sm:$0xff] %v5921_v41  ;;  %v855_v15 = vrot.slane %v853_v7, 7  ;;  %v863_v20 = vrot.slane %v861_v11, 7 }
  0x29   : > { %2144 = vmatprep.subr.bf16.mxu0 %v6055_v1  ;;  %5876 = vmatpush3.bf16.msra.mxu1 %v5916_v21  ;;  %v1078_v21 = vld [vmem:[#allocation2 + $0x50] sm:$0x1]  ;;  %v829_v34 = vrot.slane %v827_v26, 7  ;;  %v1151_v11 = vld [vmem:[%s426_s22] sm:$0xff] }
  0x2a   : > { %5869 = vmatprep.subr.bf16.mxu1 %v5918_v38  ;;  %v1079_v25 = vsel %vm6172_vm3, %v817_v5, %v1078_v21  ;;  %v6257_v37 = vrot.slane %v844_v32, 7  ;;  %v557_v5 = vsel %vm6181_vm4, 0, %v556_v63  ;;  %v858_v21 = vor.u32 %v856_v8, %v855_v15 }
  0x2b   : > { %1080 = vst [vmem:[#allocation2 + $0x50] sm:$0x1] %v1079_v25  ;;  %v834_v42 = vrot.slane %v829_v34, 4  ;;  %558 = vst [vmem:[#allocation2 + $0x74] sm:$0x1] %v557_v5  ;;  %v859_v22 = vrot.slane %v855_v15, 4  ;;  %v866_v25 = vor.u32 %v864_v12, %v863_v20 }
  0x2c   : > { %2145 = vmatpush1.bf16.msra.mxu0 %v5917_v51  ;;  %v849_v45 = vor.u32 %v847_v33, %v6257_v37  ;;  %v1774_v51 = vrot.slane %v5921_v41, 1  ;;  %v851_v19 = vrot.slane %v6257_v37, 4  ;;  %v868_v26 = vrot.slane %v863_v20, 4  ;;  %v1095_v33 = vld [vmem:[#allocation2 + $0x6c] sm:$0xf]  ;;  %v5936_v20 = vld [vmem:[%s7807_s3 + $0xe0] sm:$0xff]  }
  0x2d   : > { %2146 = vmatprep.subr.bf16.mxu0 %v6055_v1  ;;  %5877 = vmatpush3.bf16.msra.mxu1 %v5918_v38  ;;  %v832_v38 = vor.u32 %v830_v27, %v829_v34  ;;  %v1086_v53 = vsel %vm6172_vm3, %v834_v42, %v1085_v43  ;;  %v5935_v27 = vld [vmem:[%s7807_s3 + $0x68] sm:$0xff]   ;;  %v867_v34 = vsel %vm6210_vm7, %v859_v22, %v866_v25  ;;  %v500_v41 = vld [vmem:[#allocation2 + $0x78] sm:$0x1]  ;;  %v503_v43 = vld [vmem:[#allocation2 + $0x84] sm:$0x1] }
  0x2e   : > { %3190 = vmatprep.subr.bf16.mxu1 %v6055_v1  ;;  %v1088_v48 = vld [vmem:[#allocation2 + $0x60] sm:$0xf]  ;;  %v850_v54 = vsel %vm6210_vm7, %v842_v44, %v849_v45  ;;  %1087 = vst [vmem:[#allocation2 + $0x5c] sm:$0x1] %v1086_v53  ;;  %v1775_v0 = vsel %vm1756_vm9, %v1772_v50, %v1774_v51  ;;  %1098 = vst [vmem:[#allocation2 + $0x70] sm:$0xf] %v867_v34 }
  0x2f   : > { %v833_v46 = vsel %vm6210_vm7, %v825_v23, %v832_v38  ;;  %v1089_v59 = vsel %vm6221_vm8, %v841_v39, %v1088_v48  ;;  %1091 = vst [vmem:[#allocation2 + $0x64] sm:$0xf] %v850_v54  ;;  %1847 = vst [vmem:[#allocation3 + $0xd0] sm:$0xff] %v1775_v0  ;;  %5702 = vmatprep.mubr.bf16.mxu1 %v1775_v0  ;;  %v604_v23 = vld [vmem:[%s6168_s9 + $0x90] sm:$0xff]  ;;  %v1096_v38 = vsel %vm6221_vm8, %v858_v21, %v1095_v33  ;;  %v606_v44 = vld [vmem:[%s6168_s9 + $0xa0] sm:$0xff] }
  0x30   : > { %2147 = vmatpush1.bf16.msra.mxu0 %v5919_v3  ;;  %1084 = vst [vmem:[#allocation2 + $0x58] sm:$0xf] %v833_v46  ;;  %1090 = vst [vmem:[#allocation2 + $0x60] sm:$0xf] %v1089_v59  ;;  %v5428_v28 = vpack.c.bf16 %v604_v23, %v604_v23  ;;  %v5930_v46 = vld [vmem:[%s7807_s3 + $0xd0] sm:$0xff]   ;;  %v501_v48 = vsel %vm6172_vm3, 0, %v500_v41  ;;  %v5430_v63 = vpack.c.bf16 %v606_v44, %v606_v44 }
  0x31   : > { %2148 = vmatprep.subr.bf16.mxu0 %v6055_v1  ;;  %1097 = vst [vmem:[#allocation2 + $0x6c] sm:$0xf] %v1096_v38  ;;  %v559_v53 = vld [vmem:[#allocation2 + $0x80] sm:$0x1]  ;;  %502 = vst [vmem:[#allocation2 + $0x78] sm:$0x1] %v501_v48 }
  0x32   : > { %v6282_v3 = vld [vmem:[#allocation2 + $0x50] sm:$0xff]   ;;  %v870_v49 = vshrl.u32 %v5428_v28, 16  ;;  %v504_v59 = vsel %vm6172_vm3, 0, %v503_v43  ;;  %v560_v62 = vsel %vm6181_vm4, 0, %v559_v53  ;;  %v887_v7 = vshrl.u32 %v5430_v63, 16  ;;  %v607_v53 = vld [vmem:[%s6168_s9 + $0xa8] sm:$0xff] }
  0x33   : > { %v1776_v9 = vrot.slane %v6282_v3, 1  ;;  %1461 = vst [vmem:[#allocation3 + $0xf0] sm:$0xff] %v6282_v3  ;;  %v1099_v35 = vld [vmem:[#allocation2 + $0x74] sm:$0x1]  ;;  %505 = vst [vmem:[#allocation2 + $0x84] sm:$0x1] %v504_v59 }
  0x34   : > { %2149 = vmatpush1.bf16.msra.mxu0 %v5923_v30  ;;  %v1092_v30 = vld [vmem:[#allocation2 + $0x68] sm:$0x1]  ;;  %v1100_v39 = vsel %vm6172_vm3, %v868_v26, %v1099_v35  ;;  %v872_v61 = vrot.slane %v870_v49, 7  ;;  %561 = vst [vmem:[#allocation2 + $0x80] sm:$0x1] %v560_v62  ;;  %v890_v8 = vshll.u32 %v5430_v63, 16 }
  0x35   : > { %2150 = vmatprep.subr.bf16.mxu0 %v6055_v1  ;;  %v1777_v16 = vsel %vm1756_vm9, %v1774_v51, %v1776_v9  ;;  %v1093_v32 = vsel %vm6172_vm3, %v851_v19, %v1092_v30  ;;  %1101 = vst [vmem:[#allocation2 + $0x74] sm:$0x1] %v1100_v39  ;;  %v873_v51 = vshll.u32 %v5428_v28, 16  ;;  %v470_v3 = vld [vmem:[#allocation2] sm:$0x1]  ;;  %v1152_v19 = vld [vmem:[%s426_s22 + $0x8] sm:$0xff] }
  0x36   : > { %1848 = vst [vmem:[#allocation3 + $0xe8] sm:$0xff] %v1777_v16  ;;  %5703 = vmatmul.mubr.bf16.vlgmr.msra.gmra.mrb[0].mxu1 %v1777_v16  ;;  %1094 = vst [vmem:[#allocation2 + $0x68] sm:$0x1] %v1093_v32  ;;  %v876_v6 = vrot.slane %v872_v61, 4  ;;  %v471_v15 = vsel %vm6172_vm3, 0, %v470_v3  ;;  %v6361_v21 = vrot.slane %v887_v7, 7 }
  0x37   : > { %3191 = vmatpush1.bf16.msra.mxu1 %v5924_v10  ;;  %v5927_v24 = vld [vmem:[#allocation2 + $0x58] sm:$0xff]   ;;  %v6309_v29 = vld [vmem:[#allocation2 + $0x60] sm:$0xff]   ;;  %v875_v5 = vor.u32 %v873_v51, %v872_v61  ;;  %v473_v10 = vld [vmem:[#allocation2 + $0xc] sm:$0x1]  ;;  %472 = vst [vmem:[#allocation2] sm:$0x1] %v471_v15 }
  0x38   : > { %2151 = vmatpush1.bf16.msra.mxu0 %v5925_v36  ;;  %3192 = vmatprep.subr.bf16.mxu1 %v6055_v1  ;;  %v1778_v31 = vrot.slane %v5927_v24, 1  ;;  %1462 = vst [vmem:[#allocation3 + $0x108] sm:$0xff] %v5927_v24  ;;  %v605_v36 = vld [vmem:[%s6168_s9 + $0x98] sm:$0xff]  ;;  %v1780_v37 = vrot.slane %v6309_v29, 1  ;;  %1463 = vst [vmem:[#allocation3 + $0x120] sm:$0xff] %v6309_v29  ;;  %v474_v16 = vsel %vm6172_vm3, 0, %v473_v10  ;;  %v892_v30 = vor.u32 %v890_v8, %v6361_v21 }
  0x39   : > { %2152 = vmatprep.subr.bf16.mxu0 %v6055_v1  ;;  %v5429_v42 = vpack.c.bf16 %v605_v36, %v605_v36  ;;  %475 = vst [vmem:[#allocation2 + $0xc] sm:$0x1] %v474_v16  ;;  %v1157_v26 = vmul.f32 0.0, %v1151_v11  ;;  %v1102_v28 = vld [vmem:[#allocation2 + $0x78] sm:$0xf]  ;;  %v1158_v33 = vmul.f32 0.0, %v1152_v19 }
  0x3a   : > { %v1779_v45 = vsel %vm1756_vm9, %v1776_v9, %v1778_v31  ;;  %v1781_v54 = vsel %vm1756_vm9, %v1778_v31, %v1780_v37  ;;  %v5941_v9 = vld [vmem:[%s7807_s3 + $0x78] sm:$0xff]   ;;  %v1103_v35 = vsel %vm6221_vm8, %v875_v5, %v1102_v28  ;;  %v1109_v36 = vld [vmem:[#allocation2 + $0x84] sm:$0xf]  ;;  %v562_v51 = vld [vmem:[#allocation2 + $0x8c] sm:$0x1]  ;;  %v893_v7 = vrot.slane %v6361_v21, 4 }
  0x3b   : > { %3193 = vmatpush1.bf16.msra.mxu1 %v5926_v17  ;;  %1849 = vst [vmem:[#allocation3 + $0x100] sm:$0xff] %v1779_v45  ;;  %5706 = vmatprep.mubr.bf16.mxu1 %v1779_v45  ;;  %v878_v57 = vshrl.u32 %v5429_v42, 16  ;;  %v881_v58 = vshll.u32 %v5429_v42, 16  ;;  %1850 = vst [vmem:[#allocation3 + $0x118] sm:$0xff] %v1781_v54  ;;  %v529_v17 = vld [vmem:[#allocation2 + $0x8] sm:$0x1]  ;;  %v5442_v38 = vpack.c.bf16 %v1157_v26, %v1157_v26 }
  0x3c   : > { %2153 = vmatpush1.bf16.msra.mxu0 %v5929_v4  ;;  %3194 = vmatprep.subr.bf16.mxu1 %v6055_v1  ;;  %v586_v4 = vld [vmem:[%s6168_s9] sm:$0xff]  ;;  %v530_v22 = vsel %vm6181_vm4, 0, %v529_v17  ;;  %1104 = vst [vmem:[#allocation2 + $0x78] sm:$0xf] %v1103_v35  ;;  %v1110_v42 = vsel %vm6221_vm8, %v892_v30, %v1109_v36  ;;  %v5443_v44 = vpack.c.bf16 %v1158_v33, %v1158_v33  ;;  %v609_v59 = vld [vmem:[%s6168_s9 + $0xb8] sm:$0xff]  ;;  %v563_v63 = vsel %vm6181_vm4, 0, %v562_v51 }
  0x3d   : > { %2154 = vmatprep.subr.bf16.mxu0 %v6055_v1  ;;  %v880_v0 = vrot.slane %v878_v57, 7  ;;  %v5410_v23 = vpack.c.bf16 %v586_v4, %v586_v4  ;;  %v5933_v24 = vld [vmem:[#allocation2 + $0x68] sm:$0xff]   ;;  %531 = vst [vmem:[#allocation2 + $0x8] sm:$0x1] %v530_v22  ;;  %v1106_v41 = vld [vmem:[#allocation2 + $0x80] sm:$0x1]  ;;  %v5433_v19 = vpack.c.bf16 %v609_v59, %v609_v59 }
  0x3e   : > { %5707 = vmatmul.mubr.bf16.gmra.mrb[4].mxu1 %v1781_v54  ;;  %v1782_v34 = vrot.slane %v5933_v24, 1  ;;  %1464 = vst [vmem:[#allocation3 + $0x138] sm:$0xff] %v5933_v24  ;;  %1111 = vst [vmem:[#allocation2 + $0x84] sm:$0xf] %v1110_v42  ;;  %v1166_v48 = vshrl.u32 %v5442_v38, 16  ;;  %v1169_v49 = vshll.u32 %v5442_v38, 16 }
  0x3f   : > { %3195 = vmatpush1.bf16.msra.mxu1 %v5930_v46  ;;  %v883_v12 = vor.u32 %v881_v58, %v880_v0  ;;  %v717_v31 = vshrl.u32 %v5410_v23, 16  ;;  %v720_v32 = vshll.u32 %v5410_v23, 16  ;;  %v608_v54 = vld [vmem:[%s6168_s9 + $0xb0] sm:$0xff]  ;;  %v1174_v57 = vshrl.u32 %v5443_v44, 16  ;;  %v1185_v62 = vld [vmem:[#allocation2] sm:$0xf] }
  0x40   : > { %2155 = vmatpush1.bf16.msra.mxu0 %v5931_v13  ;;  %3196 = vmatprep.subr.bf16.mxu1 %v6055_v1  ;;  %v885_v13 = vrot.slane %v880_v0, 4  ;;  %v1783_v45 = vsel %vm1756_vm9, %v1780_v37, %v1782_v34  ;;  %v5938_v37 = vld [vmem:[%s7807_s3 + $0xe8] sm:$0xff]   ;;  %v1177_v58 = vshll.u32 %v5443_v44, 16  ;;  %v1168_v61 = vrot.slane %v1166_v48, 7  ;;  %564 = vst [vmem:[#allocation2 + $0x8c] sm:$0x1] %v563_v63 }
  0x41   : > { %2156 = vmatprep.subr.bf16.mxu0 %v6055_v1  ;;  %v884_v25 = vsel %vm6210_vm7, %v876_v6, %v883_v12  ;;  %v6378_v43 = vrot.slane %v717_v31, 7  ;;  %1851 = vst [vmem:[#allocation3 + $0x130] sm:$0xff] %v1783_v45  ;;  %5710 = vmatprep.mubr.bf16.mxu1 %v1783_v45  ;;  %v5431_v0 = vpack.c.bf16 %v607_v53, %v607_v53  ;;  %v1176_v5 = vrot.slane %v1174_v57, 7  ;;  %v5942_v10 = vld [vmem:[%s7807_s3 + $0xf0] sm:$0xff]   ;;  %v610_v33 = vld [vmem:[%s6168_s9 + $0xc0] sm:$0xff]  ;;  %v5945_v36 = vld [vmem:[%s7807_s3 + $0xf8] sm:$0xff]  }
  0x42   : > { %1105 = vst [vmem:[#allocation2 + $0x7c] sm:$0xf] %v884_v25  ;;  %v1107_v46 = vsel %vm6172_vm3, %v885_v13, %v1106_v41  ;;  %v5432_v3 = vpack.c.bf16 %v608_v54, %v608_v54  ;;  %v1171_v11 = vor.u32 %v1169_v49, %v1168_v61  ;;  %v1172_v12 = vrot.slane %v1168_v61, 4  ;;  %v611_v49 = vld [vmem:[%s6168_s9 + $0xc8] sm:$0xff]  ;;  %v509_v59 = vld [vmem:[#allocation2 + $0x9c] sm:$0x1] }
  0x43   : > { %3197 = vmatpush1.bf16.msra.mxu1 %v5932_v60  ;;  %1108 = vst [vmem:[#allocation2 + $0x80] sm:$0x1] %v1107_v46  ;;  %v1039_v60 = vld [vmem:[#allocation2 + $0xc] sm:$0xf]  ;;  %v895_v13 = vshrl.u32 %v5431_v0, 16  ;;  %v898_v15 = vshll.u32 %v5431_v0, 16  ;;  %v1179_v16 = vor.u32 %v1177_v58, %v1176_v5  ;;  %v5434_v61 = vpack.c.bf16 %v610_v33, %v610_v33 }
  0x44   : > { %2157 = vmatpush1.bf16.msra.mxu0 %v5935_v27  ;;  %v6368_v27 = vld [vmem:[#allocation2 + $0x70] sm:$0xff]   ;;  %3198 = vmatprep.subr.bf16.mxu1 %v6055_v1  ;;  %v1189_v6 = vld [vmem:[#allocation2 + $0x8] sm:$0x1]  ;;  %v1181_v17 = vrot.slane %v1176_v5, 4  ;;  %v1186_v22 = vsel %vm6221_vm8, %v1171_v11, %v1185_v62  ;;  %v907_v24 = vshll.u32 %v5432_v3, 16  ;;  %v912_v31 = vshrl.u32 %v5433_v19, 16 }
  0x45   : > { %2158 = vmatprep.subr.bf16.mxu0 %v6055_v1  ;;  %v1784_v39 = vrot.slane %v6368_v27, 1  ;;  %1465 = vst [vmem:[#allocation3 + $0x150] sm:$0xff] %v6368_v27  ;;  %v897_v23 = vrot.slane %v895_v13, 7  ;;  %v1180_v26 = vsel %vm6210_vm7, %v1172_v12, %v1179_v16  ;;  %1187 = vst [vmem:[#allocation2] sm:$0xf] %v1186_v22  ;;  %v915_v42 = vshll.u32 %v5433_v19, 16 }
  0x46   : > { %v1190_v28 = vsel %vm6172_vm3, %v1181_v17, %v1189_v6  ;;  %1188 = vst [vmem:[#allocation2 + $0x4] sm:$0xf] %v1180_v26  ;;  %v6423_v46 = vrot.slane %v912_v31, 7  ;;  %v568_v5 = vld [vmem:[#allocation2 + $0xa4] sm:$0x1]  ;;  %v588_v6 = vld [vmem:[%s6168_s9 + $0x10] sm:$0xff]  ;;  %v5435_v11 = vpack.c.bf16 %v611_v49, %v611_v49 }
  0x47   : > { %v1785_v29 = vsel %vm1756_vm9, %v1782_v34, %v1784_v39  ;;  %3199 = vmatpush1.bf16.msra.mxu1 %v5936_v20  ;;  %v904_v20 = vshrl.u32 %v5432_v3, 16  ;;  %1191 = vst [vmem:[#allocation2 + $0x8] sm:$0x1] %v1190_v28  ;;  %v900_v38 = vor.u32 %v898_v15, %v897_v23  ;;  %v902_v41 = vrot.slane %v897_v23, 4  ;;  %v5950_v17 = vld [vmem:[%s7807_s3 + $0x108] sm:$0xff]   ;;  %v589_v22 = vld [vmem:[%s6168_s9 + $0x18] sm:$0xff] }
  0x48   : > { %2159 = vmatpush1.bf16.msra.mxu0 %v5937_v55  ;;  %v722_v55 = vor.u32 %v720_v32, %v6378_v43  ;;  %1852 = vst [vmem:[#allocation3 + $0x148] sm:$0xff] %v1785_v29  ;;  %5711 = vmatmul.mubr.bf16.gmra.mrb[8].mxu1 %v1785_v29  ;;  %v532_v32 = vld [vmem:[#allocation2 + $0x14] sm:$0x1]  ;;  %v1113_v29 = vld [vmem:[#allocation2 + $0x8c] sm:$0x1]  ;;  %v919_v62 = vrot.slane %v6423_v46, 4  ;;  %v5412_v23 = vpack.c.bf16 %v588_v6, %v588_v6 }
  0x49   : > { %2160 = vmatprep.subr.bf16.mxu0 %v6055_v1  ;;  %3200 = vmatprep.subr.bf16.mxu1 %v6055_v1  ;;  %v5939_v21 = vld [vmem:[#allocation2 + $0x78] sm:$0xff]   ;;  %v906_v30 = vrot.slane %v904_v20, 7  ;;  %v533_v48 = vsel %vm6181_vm4, 0, %v532_v32  ;;  %v901_v54 = vsel %vm6210_vm7, %v893_v7, %v900_v38  ;;  %v1114_v27 = vsel %vm6172_vm3, %v902_v41, %v1113_v29  ;;  %v5948_v7 = vld [vmem:[%s7807_s3 + $0x100] sm:$0xff]  }
  0x4a   : > { %v1040_v4 = vsel %vm6221_vm8, %v722_v55, %v1039_v60  ;;  %v1786_v34 = vrot.slane %v5939_v21, 1  ;;  %1466 = vst [vmem:[#allocation3 + $0x168] sm:$0xff] %v5939_v21  ;;  %v6418_v35 = vld [vmem:[#allocation2 + $0x80] sm:$0xff]   ;;  %534 = vst [vmem:[#allocation2 + $0x14] sm:$0x1] %v533_v48  ;;  %v510_v3 = vsel %vm6172_vm3, 0, %v509_v59 }
  0x4b   : > { %1041 = vst [vmem:[#allocation2 + $0xc] sm:$0xf] %v1040_v4  ;;  %3201 = vmatpush1.bf16.msra.mxu1 %v5938_v37  ;;  %v909_v44 = vor.u32 %v907_v24, %v906_v30  ;;  %v910_v45 = vrot.slane %v906_v30, 4  ;;  %v1788_v53 = vrot.slane %v6418_v35, 1  ;;  %1467 = vst [vmem:[#allocation3 + $0x180] sm:$0xff] %v6418_v35  ;;  %v723_v37 = vrot.slane %v6378_v43, 4 }
  0x4c   : > { %2161 = vmatpush1.bf16.msra.mxu0 %v5941_v9  ;;  %v587_v9 = vld [vmem:[%s6168_s9 + $0x8] sm:$0xff]  ;;  %3202 = vmatprep.subr.bf16.mxu1 %v6055_v1  ;;  %v1787_v51 = vsel %vm1756_vm9, %v1784_v39, %v1786_v34  ;;  %1112 = vst [vmem:[#allocation2 + $0x88] sm:$0xf] %v901_v54  ;;  %v917_v39 = vor.u32 %v915_v42, %v6423_v46  ;;  %1115 = vst [vmem:[#allocation2 + $0x8c] sm:$0x1] %v1114_v27  ;;  %v929_v20 = vshrl.u32 %v5435_v11, 16 }
  0x4d   : > { %5670 = vmatprep.subr.bf16.mxu0 %v6121_v2  ;;  %v506_v2 = vld [vmem:[#allocation2 + $0x90] sm:$0x1]  ;;  %v6411_v25 = vpack.c.bf16 %v587_v9, %v587_v9  ;;  %1853 = vst [vmem:[#allocation3 + $0x160] sm:$0xff] %v1787_v51  ;;  %5714 = vmatprep.mubr.bf16.mxu1 %v1787_v51  ;;  %v565_v60 = vld [vmem:[#allocation2 + $0x98] sm:$0x1]  ;;  %v924_v9 = vshll.u32 %v5434_v61, 16 }
  0x4e   : > { %v507_v8 = vsel %vm6172_vm3, 0, %v506_v2  ;;  %v1789_v2 = vsel %vm1756_vm9, %v1786_v34, %v1788_v53  ;;  %v918_v63 = vsel %vm6210_vm7, %v910_v45, %v917_v39  ;;  %v566_v4 = vsel %vm6181_vm4, 0, %v565_v60  ;;  %511 = vst [vmem:[#allocation2 + $0x9c] sm:$0x1] %v510_v3  ;;  %v6460_v12 = vld [vmem:[#allocation2] sm:$0xff]   ;;  %v612_v3 = vld [vmem:[%s6168_s9 + $0xd0] sm:$0xff] }
  0x4f   : > { %508 = vst [vmem:[#allocation2 + $0x90] sm:$0x1] %v507_v8  ;;  %3203 = vmatpush1.bf16.msra.mxu1 %v5942_v10  ;;  %v725_v57 = vshrl.u32 %v6411_v25, 16  ;;  %v728_v58 = vshll.u32 %v6411_v25, 16  ;;  %1854 = vst [vmem:[#allocation3 + $0x178] sm:$0xff] %v1789_v2  ;;  %v921_v8 = vshrl.u32 %v5434_v61, 16  ;;  %v5413_v39 = vpack.c.bf16 %v589_v22, %v589_v22 }
  0x50   : > { %3204 = vmatprep.subr.bf16.mxu1 %v6055_v1  ;;  %5715 = vmatmul.mubr.bf16.gmra.mrb[12].mxu1 %v1789_v2  ;;  %1119 = vst [vmem:[#allocation2 + $0x94] sm:$0xf] %v918_v63  ;;  %567 = vst [vmem:[#allocation2 + $0x98] sm:$0x1] %v566_v4  ;;  %v569_v10 = vsel %vm6181_vm4, 0, %v568_v5  ;;  %v932_v21 = vshll.u32 %v5435_v11, 16 }
  0x51   : > { %v727_v0 = vrot.slane %v725_v57, 7  ;;  %570 = vst [vmem:[#allocation2 + $0xa4] sm:$0x1] %v569_v10  ;;  %v923_v19 = vrot.slane %v921_v8, 7  ;;  %v1483_v24 = vshrl.u32 %v6460_v12, 16  ;;  %v1485_v25 = vshll.u32 %v6460_v12, 16 }
  0x52   : > { %v6463_v16 = vld [vmem:[#allocation2 + $0x8] sm:$0xff]   ;;  %1451 = vst [vmem:[#allocation3] sm:$0xff] %v6460_v12  ;;  %v1043_v28 = vld [vmem:[#allocation2 + $0x14] sm:$0x1]  ;;  %v476_v33 = vld [vmem:[#allocation2 + $0x18] sm:$0x1] }
  0x53   : > { %3205 = vmatpush1.bf16.msra.mxu1 %v5945_v36  ;;  %v730_v13 = vor.u32 %v728_v58, %v727_v0  ;;  %v732_v15 = vrot.slane %v727_v0, 4  ;;  %v1490_v30 = vshll.u32 %v6463_v16, 16  ;;  %1452 = vst [vmem:[#allocation3 + $0x18] sm:$0xff] %v6463_v16  ;;  %v1494_v32 = vshrl.u32 %v6463_v16, 16  ;;  %v6479_v36 = vld [vmem:[#allocation2 + $0x88] sm:$0xff]   ;;  %v613_v4 = vld [vmem:[%s6168_s9 + $0xd8] sm:$0xff] }
  0x54   : > { %3206 = vmatprep.subr.bf16.mxu1 %v6055_v1  ;;  %v1487_v34 = vrot.slane %v1485_v25, 1  ;;  %v926_v38 = vor.u32 %v924_v9, %v923_v19  ;;  %v927_v41 = vrot.slane %v923_v19, 4  ;;  %v931_v42 = vrot.slane %v929_v20, 7  ;;  %1468 = vst [vmem:[#allocation3 + $0x198] sm:$0xff] %v6479_v36  ;;  %v512_v0 = vld [vmem:[#allocation2 + $0xa8] sm:$0x1] }
  0x55   : > { %v731_v26 = vsel %vm6210_vm7, %v723_v37, %v730_v13  ;;  %v1044_v31 = vsel %vm6172_vm3, %v732_v15, %v1043_v28  ;;  %v477_v45 = vsel %vm6172_vm3, 0, %v476_v33  ;;  %v734_v48 = vshrl.u32 %v5412_v23, 16  ;;  %v1123_v57 = vld [vmem:[#allocation2 + $0x9c] sm:$0xf]  ;;  %v614_v10 = vld [vmem:[%s6168_s9 + $0xe0] sm:$0xff]  ;;  %v6004_v25 = vld [vmem:[%s7807_s3 + $0x88] sm:$0xff]  }
  0x56   : > { %v1116_v55 = vld [vmem:[#allocation2 + $0x90] sm:$0xf]  ;;  %1042 = vst [vmem:[#allocation2 + $0x10] sm:$0xf] %v731_v26  ;;  %1045 = vst [vmem:[#allocation2 + $0x14] sm:$0x1] %v1044_v31  ;;  %v1488_v51 = vor.u32 %v1487_v34, %v1483_v24  ;;  %v934_v27 = vor.u32 %v932_v21, %v931_v42  ;;  %v1124_v46 = vsel %vm6221_vm8, %v926_v38, %v1123_v57 }
  0x57   : > { %v1117_v43 = vsel %vm6221_vm8, %v909_v44, %v1116_v55  ;;  %3207 = vmatpush1.bf16.msra.mxu1 %v5948_v7  ;;  %v1492_v44 = vrot.slane %v1490_v30, 1  ;;  %v737_v49 = vshll.u32 %v5412_v23, 16  ;;  %v1790_v54 = vrot.slane %v6479_v36, 1  ;;  %v1120_v37 = vld [vmem:[#allocation2 + $0x98] sm:$0x1]  ;;  %v6003_v11 = vld [vmem:[%s7807_s3 + $0x80] sm:$0xff]  }
  0x58   : > { %1118 = vst [vmem:[#allocation2 + $0x90] sm:$0xf] %v1117_v43  ;;  %3208 = vmatprep.subr.bf16.mxu1 %v6055_v1  ;;  %478 = vst [vmem:[#allocation2 + $0x18] sm:$0x1] %v477_v45  ;;  %v1121_v55 = vsel %vm6172_vm3, %v919_v62, %v1120_v37  ;;  %v936_v58 = vrot.slane %v931_v42, 4  ;;  %v6492_v43 = vrot.slane %v734_v48, 7  ;;  %v935_v35 = vsel %vm6210_vm7, %v927_v41, %v934_v27 }
  0x59   : > { %v1127_v2 = vld [vmem:[#allocation2 + $0xa4] sm:$0x1]  ;;  %v1493_v59 = vsel %vm1481_vm10, %v1488_v51, %v1492_v44  ;;  %v1791_v60 = vsel %vm1756_vm9, %v1788_v53, %v1790_v54  ;;  %1122 = vst [vmem:[#allocation2 + $0x98] sm:$0x1] %v1121_v55  ;;  %v5953_v62 = vld [vmem:[%s7807_s3 + $0x110] sm:$0xff]   ;;  %v742_v6 = vshrl.u32 %v5413_v39, 16  ;;  %v5436_v15 = vpack.c.bf16 %v612_v3, %v612_v3 }
  0x5a   : > { %2162 = vmatprep.mubr.bf16.mxu0 %v1493_v59  ;;  %1855 = vst [vmem:[#allocation3 + $0x190] sm:$0xff] %v1791_v60  ;;  %5718 = vmatprep.mubr.bf16.mxu1 %v1791_v60  ;;  %1125 = vst [vmem:[#allocation2 + $0x9c] sm:$0xf] %v1124_v46  ;;  %v1128_v53 = vsel %vm6172_vm3, %v936_v58, %v1127_v2  ;;  %v739_v63 = vor.u32 %v737_v49, %v6492_v43  ;;  %v745_v7 = vshll.u32 %v5413_v39, 16  ;;  %v5955_v8 = vld [vmem:[%s7807_s3 + $0x118] sm:$0xff]   ;;  %v590_v42 = vld [vmem:[%s6168_s9 + $0x20] sm:$0xff] }
  0x5b   : > { %3209 = vmatpush1.bf16.msra.mxu1 %v5950_v17  ;;  %2163 = vmatmul.mubr.bf16.vlgmr.msra.gmra.mrb[0].mxu0 %v6460_v12  ;;  %1126 = vst [vmem:[#allocation2 + $0xa0] sm:$0xf] %v935_v35  ;;  %1129 = vst [vmem:[#allocation2 + $0xa4] sm:$0x1] %v1128_v53  ;;  %v513_v9 = vsel %vm6172_vm3, 0, %v512_v0  ;;  %v740_v13 = vrot.slane %v6492_v43, 4  ;;  %v5437_v17 = vpack.c.bf16 %v613_v4, %v613_v4 }
  0x5c   : > { %3210 = vmatprep.subr.bf16.mxu1 %v6055_v1  ;;  %5671 = vmatpush3.bf16.msra.mxu0 %v6003_v11  ;;  %514 = vst [vmem:[#allocation2 + $0xa8] sm:$0x1] %v513_v9  ;;  %v515_v19 = vld [vmem:[#allocation2 + $0xb4] sm:$0x1]  ;;  %v6529_v20 = vpack.c.bf16 %v614_v10, %v614_v10  ;;  %v1496_v21 = vor.u32 %v1494_v32, %v1492_v44  ;;  %v6533_v22 = vrot.slane %v742_v6, 7  ;;  %v938_v31 = vshrl.u32 %v5436_v15, 16 }
  0x5d   : > { %v6526_v12 = vld [vmem:[#allocation2 + $0x10] sm:$0xff]   ;;  %v516_v23 = vsel %vm6172_vm3, 0, %v515_v19  ;;  %5672 = vmatprep.subr.bf16.mxu0 %v6004_v25  ;;  %v941_v32 = vshll.u32 %v5436_v15, 16  ;;  %v946_v38 = vshrl.u32 %v5437_v17, 16  ;;  %v949_v41 = vshll.u32 %v5437_v17, 16  ;;  %v5958_v39 = vld [vmem:[%s7807_s3 + $0x120] sm:$0xff]  }
  0x5e   : > { %v571_v24 = vld [vmem:[#allocation2 + $0xb0] sm:$0x1]  ;;  %v1498_v26 = vshll.u32 %v6526_v12, 16  ;;  %1453 = vst [vmem:[#allocation3 + $0x30] sm:$0xff] %v6526_v12  ;;  %v1502_v30 = vshrl.u32 %v6526_v12, 16  ;;  %v747_v33 = vor.u32 %v745_v7, %v6533_v22  ;;  %v940_v45 = vrot.slane %v938_v31, 7 }
  0x5f   : > { %v6486_v29 = vld [vmem:[#allocation2 + $0x90] sm:$0xff]   ;;  %3211 = vmatpush1.bf16.msra.mxu1 %v5953_v62  ;;  %v1046_v28 = vld [vmem:[#allocation2 + $0x18] sm:$0xf]  ;;  %517 = vst [vmem:[#allocation2 + $0xb4] sm:$0x1] %v516_v23  ;;  %v572_v48 = vsel %vm6181_vm4, 0, %v571_v24  ;;  %v6571_v59 = vpack.c.bf16 %v590_v42, %v590_v42 }
  0x60   : > { %v1792_v61 = vrot.slane %v6486_v29, 1  ;;  %1469 = vst [vmem:[#allocation3 + $0x1b0] sm:$0xff] %v6486_v29  ;;  %3212 = vmatprep.subr.bf16.mxu1 %v6055_v1  ;;  %v1047_v34 = vsel %vm6221_vm8, %v739_v63, %v1046_v28  ;;  %v6548_v44 = vrot.slane %v1498_v26, 1  ;;  %v955_v49 = vshrl.u32 %v6529_v20, 16  ;;  %5673 = vmatpush3.bf16.msra.mxu0 %v6004_v25  ;;  %573 = vst [vmem:[#allocation2 + $0xb0] sm:$0x1] %v572_v48 }
  0x61   : > { %1048 = vst [vmem:[#allocation2 + $0x18] sm:$0xf] %v1047_v34  ;;  %v6553_v51 = vld [vmem:[#allocation2 + $0x98] sm:$0xff]   ;;  %v6557_v37 = vrot.slane %v946_v38, 7  ;;  %v958_v27 = vshll.u32 %v6529_v20, 16  ;;  %v6005_v55 = vld [vmem:[%s7807_s3 + $0x90] sm:$0xff]   ;;  %v943_v2 = vor.u32 %v941_v32, %v940_v45 }
  0x62   : > { %v1793_v5 = vsel %vm1756_vm9, %v1790_v54, %v1792_v61  ;;  %v748_v54 = vsel %vm6210_vm7, %v740_v13, %v747_v33  ;;  %5674 = vmatprep.subr.bf16.mxu0 %v6005_v55  ;;  %v1501_v57 = vsel %vm1481_vm10, %v1496_v21, %v6548_v44  ;;  %v6568_v58 = vld [vmem:[#allocation2 + $0xa0] sm:$0xff]   ;;  %v944_v43 = vrot.slane %v940_v45, 4  ;;  %1470 = vst [vmem:[#allocation3 + $0x1c8] sm:$0xff] %v6553_v51  ;;  %v5960_v53 = vld [vmem:[%s7807_s3 + $0x128] sm:$0xff]   ;;  %v616_v13 = vld [vmem:[%s6168_s9 + $0xf0] sm:$0xff] }
  0x63   : > { %1856 = vst [vmem:[#allocation3 + $0x1a8] sm:$0xff] %v1793_v5  ;;  %5719 = vmatmul.mubr.bf16.gmra.mrb[16].mxu1 %v1793_v5  ;;  %1049 = vst [vmem:[#allocation2 + $0x1c] sm:$0xf] %v748_v54  ;;  %2170 = vmatprep.mubr.bf16.mxu0 %v1501_v57  ;;  %v1794_v60 = vrot.slane %v6553_v51, 1  ;;  %v951_v46 = vor.u32 %v949_v41, %v6557_v37  ;;  %v1130_v62 = vld [vmem:[#allocation2 + $0xa8] sm:$0xf]  ;;  %v5440_v26 = vpack.c.bf16 %v616_v13, %v616_v13 }
  0x64   : > { %3213 = vmatpush1.bf16.msra.mxu1 %v5955_v8  ;;  %1730 = vst [vmem:[#allocation3 + $0x20] sm:$0xff] %v1501_v57  ;;  %v6576_v35 = vrot.slane %v955_v49, 7  ;;  %v615_v63 = vld [vmem:[%s6168_s9 + $0xe8] sm:$0xff]  ;;  %2171 = vmatmul.mubr.bf16.gmra.mrb[4].mxu0 %v6463_v16  ;;  %v1796_v0 = vrot.slane %v6568_v58, 1  ;;  %1471 = vst [vmem:[#allocation3 + $0x1e0] sm:$0xff] %v6568_v58  ;;  %v1131_v3 = vsel %vm6221_vm8, %v943_v2, %v1130_v62  ;;  %v953_v4 = vrot.slane %v6557_v37, 4 }
  0x65   : > { %3214 = vmatprep.subr.bf16.mxu1 %v6055_v1  ;;  %v479_v5 = vld [vmem:[#allocation2 + $0x24] sm:$0x1]  ;;  %v535_v6 = vld [vmem:[#allocation2 + $0x20] sm:$0x1]  ;;  %v5439_v7 = vpack.c.bf16 %v615_v63, %v615_v63  ;;  %v1795_v8 = vsel %vm1756_vm9, %v1792_v61, %v1794_v60  ;;  %v952_v9 = vsel %vm6210_vm7, %v944_v43, %v951_v46  ;;  %1132 = vst [vmem:[#allocation2 + $0xa8] sm:$0xf] %v1131_v3 }
  0x66   : > { %v960_v16 = vor.u32 %v958_v27, %v6576_v35  ;;  %v1137_v10 = vld [vmem:[#allocation2 + $0xb4] sm:$0xf]  ;;  %v480_v11 = vsel %vm6172_vm3, 0, %v479_v5  ;;  %5675 = vmatpush3.bf16.msra.mxu0 %v6005_v55  ;;  %1857 = vst [vmem:[#allocation3 + $0x1c0] sm:$0xff] %v1795_v8  ;;  %5722 = vmatprep.mubr.bf16.mxu1 %v1795_v8  ;;  %v1797_v61 = vsel %vm1756_vm9, %v1794_v60, %v1796_v0  ;;  %1133 = vst [vmem:[#allocation2 + $0xac] sm:$0xf] %v952_v9 }
  0x67   : > { %481 = vst [vmem:[#allocation2 + $0x24] sm:$0x1] %v480_v11  ;;  %v536_v15 = vsel %vm6181_vm4, 0, %v535_v6  ;;  %v751_v17 = vshrl.u32 %v6571_v59, 16  ;;  %v754_v19 = vshll.u32 %v6571_v59, 16  ;;  %v617_v20 = vld [vmem:[%s6168_s9 + $0xf8] sm:$0xff]  ;;  %v1504_v45 = vor.u32 %v1502_v30, %v6548_v44 }
  0x68   : > { %3215 = vmatpush1.bf16.msra.mxu1 %v5958_v39  ;;  %1858 = vst [vmem:[#allocation3 + $0x1d8] sm:$0xff] %v1797_v61  ;;  %v1138_v21 = vsel %vm6221_vm8, %v960_v16, %v1137_v10  ;;  %537 = vst [vmem:[#allocation2 + $0x20] sm:$0x1] %v536_v15  ;;  %v574_v23 = vld [vmem:[#allocation2 + $0xbc] sm:$0x1]  ;;  %v961_v24 = vrot.slane %v6576_v35, 4  ;;  %v5441_v38 = vpack.c.bf16 %v617_v20, %v617_v20 }
  0x69   : > { %3216 = vmatprep.subr.bf16.mxu1 %v6055_v1  ;;  %v963_v25 = vshrl.u32 %v5439_v7, 16  ;;  %v6006_v28 = vld [vmem:[%s7807_s3 + $0x98] sm:$0xff]   ;;  %v1134_v31 = vld [vmem:[#allocation2 + $0xb0] sm:$0x1]  ;;  %1139 = vst [vmem:[#allocation2 + $0xb4] sm:$0xf] %v1138_v21 }
  0x6a   : > { %5676 = vmatprep.subr.bf16.mxu0 %v6006_v28  ;;  %v6612_v32 = vrot.slane %v751_v17, 7  ;;  %v575_v33 = vsel %vm6181_vm4, 0, %v574_v23  ;;  %v966_v34 = vshll.u32 %v5439_v7, 16  ;;  %v5963_v41 = vld [vmem:[%s7807_s3 + $0x130] sm:$0xff]   ;;  %v6619_v42 = vld [vmem:[#allocation2 + $0x18] sm:$0xff]   ;;  %v1135_v48 = vsel %vm6172_vm3, %v953_v4, %v1134_v31  ;;  %v591_v30 = vld [vmem:[%s6168_s9 + $0x28] sm:$0xff] }
  0x6b   : > { %5723 = vmatmul.mubr.bf16.gmra.mrb[20].mxu1 %v1797_v61  ;;  %576 = vst [vmem:[#allocation2 + $0xbc] sm:$0x1] %v575_v33  ;;  %v965_v49 = vrot.slane %v963_v25, 7  ;;  %v518_v54 = vld [vmem:[#allocation2 + $0xc0] sm:$0x1]  ;;  %5677 = vmatpush3.bf16.msra.mxu0 %v6006_v28  ;;  %v749_v37 = vrot.slane %v6533_v22, 4  ;;  %v5415_v4 = vpack.c.bf16 %v591_v30, %v591_v30 }
  0x6c   : > { %3217 = vmatpush1.bf16.msra.mxu1 %v5960_v53  ;;  %1136 = vst [vmem:[#allocation2 + $0xb0] sm:$0x1] %v1135_v48  ;;  %v756_v27 = vor.u32 %v754_v19, %v6612_v32  ;;  %v519_v39 = vsel %vm6172_vm3, 0, %v518_v54  ;;  %v972_v55 = vshrl.u32 %v5440_v26, 16  ;;  %v6007_v44 = vld [vmem:[%s7807_s3 + $0xa0] sm:$0xff]   ;;  %v1506_v57 = vshll.u32 %v6619_v42, 16 }
  0x6d   : > { %3218 = vmatprep.subr.bf16.mxu1 %v6055_v1  ;;  %5678 = vmatprep.subr.bf16.mxu0 %v6007_v44  ;;  %1454 = vst [vmem:[#allocation3 + $0x48] sm:$0xff] %v6619_v42  ;;  %v968_v2 = vor.u32 %v966_v34, %v965_v49  ;;  %v970_v22 = vrot.slane %v965_v49, 4  ;;  %520 = vst [vmem:[#allocation2 + $0xc0] sm:$0x1] %v519_v39  ;;  %v975_v43 = vshll.u32 %v5440_v26, 16  ;;  %v980_v60 = vshrl.u32 %v5441_v38, 16 }
  0x6e   : > { %v974_v59 = vrot.slane %v972_v55, 7  ;;  %v983_v46 = vshll.u32 %v5441_v38, 16  ;;  %v5965_v62 = vld [vmem:[%s7807_s3 + $0x138] sm:$0xff]   ;;  %v6640_v35 = vrot.slane %v1506_v57, 1  ;;  %v6642_v53 = vld [vmem:[#allocation2 + $0xa8] sm:$0xff]   ;;  %v592_v15 = vld [vmem:[%s6168_s9 + $0x30] sm:$0xff] }
  0x6f   : > { %v1053_v63 = vld [vmem:[#allocation2 + $0x24] sm:$0xf]  ;;  %v969_v3 = vsel %vm6210_vm7, %v961_v24, %v968_v2  ;;  %5679 = vmatpush3.bf16.msra.mxu0 %v6007_v44  ;;  %v1050_v5 = vld [vmem:[#allocation2 + $0x20] sm:$0x1]  ;;  %v6648_v8 = vrot.slane %v980_v60, 7  ;;  %v6008_v16 = vld [vmem:[%s7807_s3 + $0xa8] sm:$0xff]  }
  0x70   : > { %3219 = vmatpush1.bf16.msra.mxu1 %v5963_v41  ;;  %v1054_v6 = vsel %vm6221_vm8, %v756_v27, %v1053_v63  ;;  %1140 = vst [vmem:[#allocation2 + $0xb8] sm:$0xf] %v969_v3  ;;  %v978_v7 = vrot.slane %v974_v59, 4  ;;  %v538_v9 = vld [vmem:[#allocation2 + $0x2c] sm:$0x1]  ;;  %5680 = vmatprep.subr.bf16.mxu0 %v6008_v16  ;;  %v6656_v10 = vsel %vm1481_vm10, %v1504_v45, %v6640_v35  ;;  %v1798_v11 = vrot.slane %v6642_v53, 1 }
  0x71   : > { %3220 = vmatprep.subr.bf16.mxu1 %v6055_v1  ;;  %1472 = vst [vmem:[#allocation3 + $0x1f8] sm:$0xff] %v6642_v53  ;;  %v1051_v13 = vsel %vm6172_vm3, %v749_v37, %v1050_v5  ;;  %1055 = vst [vmem:[#allocation2 + $0x24] sm:$0xf] %v1054_v6  ;;  %v977_v61 = vor.u32 %v975_v43, %v974_v59  ;;  %2178 = vmatprep.mubr.bf16.mxu0 %v6656_v10  ;;  %v539_v20 = vsel %vm6181_vm4, 0, %v538_v9  ;;  %v593_v21 = vld [vmem:[%s6168_s9 + $0x38] sm:$0xff]  ;;  %v6687_v27 = vld [vmem:[#allocation3 + $0xc0] sm:$0xff] }
  0x72   : > { %1052 = vst [vmem:[#allocation2 + $0x20] sm:$0x1] %v1051_v13  ;;  %v1141_v17 = vld [vmem:[#allocation2 + $0xbc] sm:$0x1]  ;;  %v985_v19 = vor.u32 %v983_v46, %v6648_v8  ;;  %2179 = vmatmul.mubr.bf16.gmra.mrb[8].mxu0 %v6526_v12  ;;  %v1799_v23 = vsel %vm1756_vm9, %v1796_v0, %v1798_v11  ;;  %540 = vst [vmem:[#allocation2 + $0x2c] sm:$0x1] %v539_v20  ;;  %v5416_v0 = vpack.c.bf16 %v592_v15, %v592_v15 }
  0x73   : > { %v6672_v24 = vld [vmem:[#allocation2 + $0xb0] sm:$0xff]   ;;  %v1142_v25 = vsel %vm6172_vm3, %v970_v22, %v1141_v17  ;;  %v759_v26 = vshrl.u32 %v5415_v4, 16  ;;  %v762_v28 = vshll.u32 %v5415_v4, 16  ;;  %1859 = vst [vmem:[#allocation3 + $0x1f0] sm:$0xff] %v1799_v23  ;;  %5726 = vmatprep.mubr.bf16.mxu1 %v1799_v23  ;;  %v6678_v34 = vld [vmem:[#allocation3 + $0x20] sm:$0xf0]  ;;  %v5417_v38 = vpack.c.bf16 %v593_v21, %v593_v21  ;;  %5681 = vmatpush3.bf16.msra.mxu0 %v6008_v16 }
  0x74   : > { %3221 = vmatpush1.bf16.msra.mxu1 %v5965_v62  ;;  %1143 = vst [vmem:[#allocation2 + $0xbc] sm:$0x1] %v1142_v25  ;;  %v986_v31 = vsel %vm6210_vm7, %v978_v7, %v985_v19  ;;  %v1144_v33 = vld [vmem:[#allocation2 + $0xc0] sm:$0xf]  ;;  %v1800_v41 = vrot.slane %v6672_v24, 1  ;;  %1473 = vst [vmem:[#allocation3 + $0x210] sm:$0xff] %v6672_v24 }
  0x75   : > { %4049 = vmatprep.subr.bf16.mxu1 %v6055_v1  ;;  %v1145_v45 = vsel %vm6221_vm8, %v977_v61, %v1144_v33  ;;  %1147 = vst [vmem:[#allocation2 + $0xc4] sm:$0xf] %v986_v31  ;;  %v757_v48 = vrot.slane %v6612_v32, 4  ;;  %v761_v49 = vrot.slane %v759_v26, 7  ;;  %v1510_v54 = vshrl.u32 %v6619_v42, 16  ;;  %v6010_v55 = vld [vmem:[%s7807_s3 + $0xb0] sm:$0xff]  }
  0x76   : > { %1146 = vst [vmem:[#allocation2 + $0xc0] sm:$0xf] %v1145_v45  ;;  %v768_v37 = vshrl.u32 %v5416_v0, 16  ;;  %v1546_v39 = vshll.u32 %v6687_v27, 16  ;;  %5682 = vmatprep.subr.bf16.mxu0 %v6010_v55  ;;  %v1801_v30 = vsel %vm1756_vm9, %v1798_v11, %v1800_v41  ;;  %v2830_v32 = vrot.slane %v6678_v34, 4  ;;  %v6011_v7 = vld [vmem:[%s7807_s3 + $0xb8] sm:$0xff]  }
  0x77   : > { %v764_v44 = vor.u32 %v762_v28, %v761_v49  ;;  %v766_v57 = vrot.slane %v761_v49, 4  ;;  %1860 = vst [vmem:[#allocation3 + $0x208] sm:$0xff] %v1801_v30  ;;  %5727 = vmatmul.mubr.bf16.gmra.mrb[24].mxu1 %v1801_v30  ;;  %v482_v2 = vld [vmem:[#allocation2 + $0x30] sm:$0x1]  ;;  %v776_v43 = vshrl.u32 %v5417_v38, 16  ;;  %v771_v62 = vshll.u32 %v5416_v0, 16  ;;  %5683 = vmatpush3.bf16.msra.mxu0 %v6010_v55 }
  0x78   : > { %v770_v22 = vrot.slane %v768_v37, 7  ;;  %v483_v46 = vsel %vm6172_vm3, 0, %v482_v2  ;;  %v779_v63 = vshll.u32 %v5417_v38, 16  ;;  %v485_v6 = vld [vmem:[#allocation2 + $0x3c] sm:$0x1]  ;;  %5684 = vmatprep.subr.bf16.mxu0 %v6011_v7  ;;  %v1512_v9 = vor.u32 %v1510_v54, %v6640_v35  ;;  %v6013_v30 = vld [vmem:[#allocation3 + $0xf0] sm:$0xff] }
  0x79   : > { %v6695_v59 = vld [vmem:[#allocation2 + $0x20] sm:$0xff]   ;;  %v765_v60 = vsel %vm6210_vm7, %v757_v48, %v764_v44  ;;  %v1057_v3 = vld [vmem:[#allocation2 + $0x2c] sm:$0x1]  ;;  %484 = vst [vmem:[#allocation2 + $0x30] sm:$0x1] %v483_v46  ;;  %v6701_v5 = vrot.slane %v776_v43, 7 }
  0x7a   : > { %1056 = vst [vmem:[#allocation2 + $0x28] sm:$0xf] %v765_v60  ;;  %v774_v4 = vrot.slane %v770_v22, 4  ;;  %v1514_v16 = vshll.u32 %v6695_v59, 16  ;;  %1455 = vst [vmem:[#allocation3 + $0x60] sm:$0xff] %v6695_v59  ;;  %v1058_v13 = vsel %vm6172_vm3, %v766_v57, %v1057_v3  ;;  %v2831_v15 = vrot.slane %v6656_v10, 4 }
  0x7b   : > { %v6709_v11 = vld [vmem:[#allocation2 + $0xb8] sm:$0xff]   ;;  %v6713_v61 = vld [vmem:[#allocation3 + $0x18] sm:$0xf0]  ;;  %1059 = vst [vmem:[#allocation2 + $0x2c] sm:$0x1] %v1058_v13  ;;  %v781_v17 = vor.u32 %v779_v63, %v6701_v5  ;;  %v486_v19 = vsel %vm6172_vm3, 0, %v485_v6  ;;  %5685 = vmatpush3.bf16.msra.mxu0 %v6011_v7  ;;  %v773_v26 = vor.u32 %v771_v62, %v770_v22 }
  0x7c   : > { %v541_v35 = vld [vmem:[#allocation2 + $0x38] sm:$0x1]  ;;  %v1516_v20 = vrot.slane %v1514_v16, 1  ;;  %v1802_v21 = vrot.slane %v6709_v11, 1  ;;  %1474 = vst [vmem:[#allocation3 + $0x228] sm:$0xff] %v6709_v11  ;;  %v6727_v31 = vrot.slane %v1546_v39, 1  ;;  %v2832_v49 = vsel %vm1037_vm5, %v2830_v32, %v2831_v15 }
  0x7d   : > { %v6721_v23 = vld [vmem:[#allocation2 + $0xc0] sm:$0xff]   ;;  %487 = vst [vmem:[#allocation2 + $0x3c] sm:$0x1] %v486_v19  ;;  %v542_v25 = vsel %vm6181_vm4, 0, %v541_v35  ;;  %v782_v28 = vsel %vm6210_vm7, %v774_v4, %v781_v17  ;;  %v1550_v33 = vshrl.u32 %v6687_v27, 16  ;;  %v2827_v45 = vrot.slane %v6713_v61, 4 }
  0x7e   : > { %543 = vst [vmem:[#allocation2 + $0x38] sm:$0x1] %v542_v25  ;;  %v6731_v34 = vsel %vm1481_vm10, %v1512_v9, %v1516_v20  ;;  %v1803_v0 = vsel %vm1756_vm9, %v1800_v41, %v1802_v21  ;;  %v1804_v38 = vrot.slane %v6721_v23, 1  ;;  %1475 = vst [vmem:[#allocation3 + $0x240] sm:$0xff] %v6721_v23  ;;  %v1518_v48 = vshrl.u32 %v6695_v59, 16  ;;  %v6012_v54 = vld [vmem:[#allocation3 + $0xd8] sm:$0xff] }
  0x7f   : > { %1063 = vst [vmem:[#allocation2 + $0x34] sm:$0xf] %v782_v28  ;;  %1732 = vst [vmem:[#allocation3 + $0x50] sm:$0xff] %v6731_v34  ;;  %2186 = vmatprep.mubr.bf16.mxu0 %v6731_v34  ;;  %5730 = vmatprep.mubr.bf16.mxu1 %v1803_v0  ;;  %v1552_v41 = vor.u32 %v1550_v33, %v6727_v31  ;;  %v1554_v37 = vshll.u32 %v6012_v54, 16  ;;  %v1558_v55 = vshrl.u32 %v6012_v54, 16  ;;  %v1562_v44 = vshll.u32 %v6013_v30, 16 }
  0x80   : > { %1861 = vst [vmem:[#allocation3 + $0x220] sm:$0xff] %v1803_v0  ;;  %2187 = vmatmul.mubr.bf16.gmra.mrb[12].mxu0 %v6619_v42  ;;  %v1805_v27 = vsel %vm1756_vm9, %v1802_v21, %v1804_v38  ;;  %v1060_v39 = vld [vmem:[#allocation2 + $0x30] sm:$0xf]  ;;  %v783_v32 = vrot.slane %v6701_v5, 4  ;;  %v1566_v22 = vshrl.u32 %v6013_v30, 16  ;;  %v2828_v60 = vrot.slane %v6526_v12, 4 }
  0x81   : > { %1862 = vst [vmem:[#allocation3 + $0x238] sm:$0xff] %v1805_v27  ;;  %5731 = vmatmul.mubr.bf16.gmra.mrb[28].mxu1 %v1805_v27  ;;  %v1061_v57 = vsel %vm6221_vm8, %v773_v26, %v1060_v39  ;;  %v1556_v2 = vrot.slane %v1554_v37, 1  ;;  %v1564_v46 = vrot.slane %v1562_v44, 1  ;;  %v6014_v62 = vld [vmem:[#allocation3 + $0x108] sm:$0xff]  ;;  %v1520_v9 = vor.u32 %v1518_v48, %v1516_v20  ;;  %v5966_v25 = vld [vmem:[%s7807_s3 + $0x180] sm:$0xff]   ;;  %s5408_s9 = sadd.s32 240, %s6152_s21 }
  0x82   : > { %v6751_v43 = vld [vmem:[#allocation2 + $0x28] sm:$0xff]   ;;  %3222 = vmatprep.mubr.bf16.mxu1 %v2832_v49  ;;  %1062 = vst [vmem:[#allocation2 + $0x30] sm:$0xf] %v1061_v57  ;;  %v1570_v63 = vshll.u32 %v6014_v62, 16  ;;  %v1574_v7 = vshrl.u32 %v6014_v62, 16  ;;  %v2838_v16 = vrot.slane %v6731_v34, 4  ;;  %v2829_v21 = vsel %vm1037_vm5, %v2827_v45, %v2828_v60  ;;  %s6949_s30 = scalar_lea.vmem %s7806_s2, %s5408_s9 }
  0x83   : > { %v6755_v4 = vsel %vm1481_vm10, %v1552_v41, %v1556_v2  ;;  %v1560_v6 = vor.u32 %v1558_v55, %v1556_v2  ;;  %v1522_v5 = vshll.u32 %v6751_v43, 16  ;;  %1456 = vst [vmem:[#allocation3 + $0x78] sm:$0xff] %v6751_v43  ;;  %v1568_v19 = vor.u32 %v1566_v22, %v1564_v46  ;;  %v6016_v37 = vld [vmem:[#allocation3 + $0x138] sm:$0xff]  ;;  %v5969_v10 = vld [vmem:[%s7807_s3 + $0x188] sm:$0xff]  }
  0x84   : > { %v1067_v3 = vld [vmem:[#allocation2 + $0x3c] sm:$0xf]  ;;  %1737 = vst [vmem:[#allocation3 + $0xc8] sm:$0xff] %v6755_v4  ;;  %v1572_v35 = vrot.slane %v1570_v63, 1  ;;  %v1526_v28 = vshrl.u32 %v6751_v43, 16  ;;  %v2839_v45 = vsel %vm1037_vm5, %v2831_v15, %v2838_v16  ;;  %v2836_v54 = vrot.slane %v6619_v42, 4 }
  0x85   : > { %v1064_v13 = vld [vmem:[#allocation2 + $0x38] sm:$0x1]  ;;  %v1068_v12 = vsel %vm6221_vm8, %v6217_v52, %v1067_v3  ;;  %v6767_v17 = vsel %vm1481_vm10, %v1560_v6, %v1564_v46  ;;  %v1524_v20 = vrot.slane %v1522_v5, 1  ;;  %v6015_v52 = vld [vmem:[#allocation3 + $0x120] sm:$0xff]  ;;  %v1586_v27 = vshll.u32 %v6016_v37, 16 }
  0x86   : > { %v1065_v61 = vsel %vm6172_vm3, %v783_v32, %v1064_v13  ;;  %1069 = vst [vmem:[#allocation2 + $0x3c] sm:$0xf] %v1068_v12  ;;  %1738 = vst [vmem:[#allocation3 + $0xe0] sm:$0xff] %v6767_v17  ;;  %v1578_v26 = vshll.u32 %v6015_v52, 16  ;;  %v6776_v33 = vsel %vm1481_vm10, %v1568_v19, %v1572_v35  ;;  %v1576_v34 = vor.u32 %v1574_v7, %v1572_v35  ;;  %v6017_v63 = vld [vmem:[#allocation3 + $0x150] sm:$0xff] }
  0x87   : > { %1066 = vst [vmem:[#allocation2 + $0x38] sm:$0x1] %v1065_v61  ;;  %v6779_v0 = vsel %vm1481_vm10, %v1520_v9, %v1524_v20  ;;  %1739 = vst [vmem:[#allocation3 + $0xf8] sm:$0xff] %v6776_v33  ;;  %v1582_v49 = vshrl.u32 %v6015_v52, 16  ;;  %v1528_v30 = vor.u32 %v1526_v28, %v1524_v20  ;;  %v1588_v32 = vrot.slane %v1586_v27, 1  ;;  %v5970_v7 = vld [vmem:[%s7807_s3 + $0x190] sm:$0xff]  }
  0x88   : > { %v1580_v48 = vrot.slane %v1578_v26, 1  ;;  %1733 = vst [vmem:[#allocation3 + $0x68] sm:$0xff] %v6779_v0  ;;  %2194 = vmatprep.mubr.bf16.mxu0 %v6779_v0  ;;  %v2844_v15 = vrot.slane %v6779_v0, 4  ;;  %v1590_v2 = vshrl.u32 %v6016_v37, 16  ;;  %v2837_v46 = vsel %vm1037_vm5, %v2828_v60, %v2836_v54  ;;  %v6018_v20 = vld [vmem:[#allocation3 + $0x168] sm:$0xff] }
  0x89   : > { %3223 = vmatmul.mubr.bf16.vlgmr.msra.gmra.mrb[32].mxu1 %v2829_v21  ;;  %v6787_v41 = vld [vmem:[#allocation2 + $0x30] sm:$0xff]   ;;  %2195 = vmatmul.mubr.bf16.gmra.mrb[16].mxu0 %v6695_v59  ;;  %v1594_v3 = vshll.u32 %v6017_v63, 16  ;;  %v1598_v13 = vshrl.u32 %v6017_v63, 16  ;;  %v1602_v21 = vshll.u32 %v6018_v20, 16  ;;  %v1606_v27 = vshrl.u32 %v6018_v20, 16 }
  0x8a   : > { %4050 = vmatpush1.bf16.msra.mxu1 %v5966_v25  ;;  %v6796_v39 = vsel %vm1481_vm10, %v1576_v34, %v1580_v48  ;;  %v1584_v55 = vor.u32 %v1582_v49, %v1580_v48  ;;  %v1530_v44 = vshll.u32 %v6787_v41, 16  ;;  %1457 = vst [vmem:[#allocation3 + $0x90] sm:$0xff] %v6787_v41  ;;  %3230 = vmatprep.mubr.bf16.mxu1 %v2839_v45  ;;  %v1534_v57 = vshrl.u32 %v6787_v41, 16  ;;  %v5971_v34 = vld [vmem:[%s7807_s3 + $0x198] sm:$0xff]  }
  0x8b   : > { %4051 = vmatprep.subr.bf16.mxu1 %v6055_v1  ;;  %1740 = vst [vmem:[#allocation3 + $0x110] sm:$0xff] %v6796_v39  ;;  %v2845_v6 = vsel %vm1037_vm5, %v2838_v16, %v2844_v15  ;;  %v1592_v5 = vor.u32 %v1590_v2, %v1588_v32  ;;  %v1596_v16 = vrot.slane %v1594_v3, 1  ;;  %v2842_v25 = vrot.slane %v6695_v59, 4 }
  0x8c   : > { %v1532_v22 = vrot.slane %v1530_v44, 1  ;;  %v6813_v9 = vsel %vm1481_vm10, %v1584_v55, %v1588_v32  ;;  %v1604_v48 = vrot.slane %v1602_v21, 1  ;;  %v5972_v32 = vld [vmem:[%s7807_s3 + $0x1a0] sm:$0xff]   ;;  %v2848_v63 = vrot.slane %v6751_v43, 4 }
  0x8d   : > { %1741 = vst [vmem:[#allocation3 + $0x128] sm:$0xff] %v6813_v9  ;;  %v6835_v0 = vsel %vm1481_vm10, %v1592_v5, %v1596_v16  ;;  %v1600_v45 = vor.u32 %v1598_v13, %v1596_v16  ;;  %v2892_v49 = vrot.slane %v6813_v9, 4  ;;  %v2843_v44 = vsel %vm1037_vm5, %v2836_v54, %v2842_v25 }
  0x8e   : > { %v6806_v62 = vld [vmem:[#allocation2 + $0x38] sm:$0xff]   ;;  %4052 = vmatpush1.bf16.msra.mxu1 %v5969_v10  ;;  %v6816_v12 = vsel %vm1481_vm10, %v1528_v30, %v1532_v22  ;;  %v1536_v60 = vor.u32 %v1534_v57, %v1532_v22  ;;  %1742 = vst [vmem:[#allocation3 + $0x140] sm:$0xff] %v6835_v0  ;;  %v6019_v10 = vld [vmem:[#allocation3 + $0x180] sm:$0xff]  ;;  %v2898_v30 = vrot.slane %v6835_v0, 4  ;;  %v1608_v2 = vor.u32 %v1606_v27, %v1604_v48  ;;  %v5974_v27 = vld [vmem:[%s7807_s3 + $0x1b0] sm:$0xff]  }
  0x8f   : > { %v1538_v61 = vshll.u32 %v6806_v62, 16  ;;  %1458 = vst [vmem:[#allocation3 + $0xa8] sm:$0xff] %v6806_v62  ;;  %v1542_v19 = vshrl.u32 %v6806_v62, 16  ;;  %4053 = vmatprep.subr.bf16.mxu1 %v6055_v1  ;;  %1734 = vst [vmem:[#allocation3 + $0x80] sm:$0xff] %v6816_v12  ;;  %2202 = vmatprep.mubr.bf16.mxu0 %v6816_v12  ;;  %v2850_v52 = vrot.slane %v6816_v12, 4  ;;  %v1610_v55 = vshll.u32 %v6019_v10, 16 }
  0x90   : > { %v6862_v54 = vsel %vm1037_vm5, %v2892_v49, %v2898_v30  ;;  %v1622_v13 = vshrl.u32 %v6479_v36, 16  ;;  %v1626_v12 = vshll.u32 %v6486_v29, 16  ;;  %v1630_v16 = vshrl.u32 %v6486_v29, 16 }
  0x91   : > { %3231 = vmatmul.mubr.bf16.gmra.mrb[36].mxu1 %v2837_v46  ;;  %v1540_v35 = vrot.slane %v1538_v61, 1  ;;  %2203 = vmatmul.mubr.bf16.gmra.mrb[20].mxu0 %v6751_v43  ;;  %v2851_v57 = vsel %vm1037_vm5, %v2844_v15, %v2850_v52  ;;  %v1612_v22 = vrot.slane %v1610_v55, 1  ;;  %v1614_v46 = vshrl.u32 %v6019_v10, 16  ;;  %v5973_v61 = vld [vmem:[%s7807_s3 + $0x1a8] sm:$0xff]  }
  0x92   : > { %3238 = vmatprep.mubr.bf16.mxu1 %v2845_v6  ;;  %4054 = vmatpush1.bf16.msra.mxu1 %v5970_v7  ;;  %v1618_v15 = vshll.u32 %v6479_v36, 16  ;;  %v1628_v20 = vrot.slane %v1626_v12, 1  ;;  %v2849_v21 = vsel %vm1037_vm5, %v2842_v25, %v2848_v63  ;;  %v1638_v29 = vshrl.u32 %v6553_v51, 16 }
  0x93   : > { %v6829_v26 = vsel %vm1481_vm10, %v1536_v60, %v1540_v35  ;;  %v1544_v28 = vor.u32 %v1542_v19, %v1540_v35  ;;  %4055 = vmatprep.subr.bf16.mxu1 %v6055_v1  ;;  %v6868_v3 = vsel %vm1481_vm10, %v1608_v2, %v1612_v22  ;;  %v1616_v6 = vor.u32 %v1614_v46, %v1612_v22 }
  0x94   : > { %1735 = vst [vmem:[#allocation3 + $0x98] sm:$0xff] %v6829_v26  ;;  %2210 = vmatprep.mubr.bf16.mxu0 %v6829_v26  ;;  %1744 = vst [vmem:[#allocation3 + $0x170] sm:$0xff] %v6868_v3  ;;  %v1620_v5 = vrot.slane %v1618_v15, 1  ;;  %v2856_v60 = vrot.slane %v6829_v26, 4  ;;  %v1634_v26 = vshll.u32 %v6553_v51, 16  ;;  %v1646_v55 = vshrl.u32 %v6568_v58, 16 }
  0x95   : > { %v6844_v37 = vsel %vm1481_vm10, %v1544_v28, %v6727_v31  ;;  %v6856_v31 = vsel %vm1481_vm10, %v1600_v45, %v1604_v48  ;;  %v1642_v45 = vshll.u32 %v6568_v58, 16  ;;  %v2854_v51 = vrot.slane %v6787_v41, 4  ;;  %v5975_v58 = vld [vmem:[%s7807_s3 + $0x1b8] sm:$0xff]  }
  0x96   : > { %1736 = vst [vmem:[#allocation3 + $0xb0] sm:$0xff] %v6844_v37  ;;  %4056 = vmatpush1.bf16.msra.mxu1 %v5971_v34  ;;  %1743 = vst [vmem:[#allocation3 + $0x158] sm:$0xff] %v6856_v31  ;;  %v2904_v7 = vrot.slane %v6856_v31, 4  ;;  %v6888_v36 = vsel %vm1481_vm10, %v1616_v6, %v1620_v5  ;;  %v1624_v35 = vor.u32 %v1622_v13, %v1620_v5  ;;  %v1636_v25 = vrot.slane %v1634_v26, 1  ;;  %v6930_v5 = vld [vmem:[#allocation3 + $0xc0] sm:$0xff] }
  0x97   : > { %4057 = vmatprep.subr.bf16.mxu1 %v6055_v1  ;;  %1745 = vst [vmem:[#allocation3 + $0x188] sm:$0xff] %v6888_v36  ;;  %v1632_v34 = vor.u32 %v1630_v16, %v1628_v20  ;;  %v2857_v48 = vsel %vm1037_vm5, %v2850_v52, %v2856_v60  ;;  %v1644_v10 = vrot.slane %v1642_v45, 1  ;;  %v1654_v46 = vshrl.u32 %v6642_v53, 16 }
  0x98   : > { %v6883_v19 = vsel %vm1037_vm5, %v2898_v30, %v2904_v7  ;;  %v6896_v28 = vsel %vm1481_vm10, %v1624_v35, %v1628_v20  ;;  %v1650_v30 = vshll.u32 %v6642_v53, 16  ;;  %v1658_v15 = vshll.u32 %v6672_v24, 16  ;;  %v5976_v20 = vld [vmem:[%s7807_s3 + $0x1c0] sm:$0xff]  }
  0x99   : > { %3239 = vmatmul.mubr.bf16.gmra.mrb[40].mxu1 %v2843_v44  ;;  %2211 = vmatmul.mubr.bf16.gmra.mrb[24].mxu0 %v6787_v41  ;;  %1746 = vst [vmem:[#allocation3 + $0x1a0] sm:$0xff] %v6896_v28  ;;  %v6910_v52 = vsel %vm1481_vm10, %v1632_v34, %v1636_v25  ;;  %v1640_v44 = vor.u32 %v1638_v29, %v1636_v25  ;;  %v1666_v53 = vshll.u32 %v6709_v11, 16  ;;  %v1670_v26 = vshrl.u32 %v6709_v11, 16  ;;  %v521_v34 = vld [vmem:[#allocation2 + $0xcc] sm:$0x1]  ;;  %v6968_v11 = vld [vmem:[%s7807_s3 + $0x140] sm:$0xff]  }
  0x9a   : > { %3246 = vmatprep.mubr.bf16.mxu1 %v2851_v57  ;;  %2218 = vmatprep.mubr.bf16.mxu0 %v6844_v37  ;;  %v2862_v57 = vrot.slane %v6844_v37, 4  ;;  %1747 = vst [vmem:[#allocation3 + $0x1b8] sm:$0xff] %v6910_v52  ;;  %v1652_v2 = vrot.slane %v1650_v30, 1  ;;  %v1660_v12 = vrot.slane %v1658_v15, 1  ;;  %v2855_v16 = vsel %vm1037_vm5, %v2848_v63, %v2854_v51  ;;  %v577_v29 = vld [vmem:[#allocation2 + $0xc8] sm:$0x1] }
  0x9b   : > { %4058 = vmatpush1.bf16.msra.mxu1 %v5972_v32  ;;  %v1648_v32 = vor.u32 %v1646_v55, %v1644_v10  ;;  %v6920_v22 = vsel %vm1481_vm10, %v1640_v44, %v1644_v10  ;;  %v1668_v63 = vrot.slane %v1666_v53, 1  ;;  %v2860_v45 = vrot.slane %v6806_v62, 4  ;;  %v1192_v10 = vld [vmem:[%s6949_s30] sm:$0xff]  ;;  %5734 = vmatprep.subr.bf16.mxu0 %v6968_v11 }
  0x9c   : > { %4059 = vmatprep.subr.bf16.mxu1 %v6055_v1  ;;  %1748 = vst [vmem:[#allocation3 + $0x1d0] sm:$0xff] %v6920_v22  ;;  %v1656_v13 = vor.u32 %v1654_v46, %v1652_v2  ;;  %v2863_v35 = vsel %vm1037_vm5, %v2856_v60, %v2862_v57  ;;  %v1674_v60 = vshll.u32 %v6721_v23, 16  ;;  %v6020_v30 = vld [vmem:[#allocation3] sm:$0xff]  ;;  %v2868_v15 = vrot.slane %v6755_v4, 4 }
  0x9d   : > { %v6928_v6 = vsel %vm1481_vm10, %v1648_v32, %v1652_v2  ;;  %v1672_v25 = vor.u32 %v1670_v26, %v1668_v63  ;;  %v1757_v44 = vrot.slane %v6020_v30, 1  ;;  %v6021_v32 = vld [vmem:[#allocation3 + $0x18] sm:$0xff]  ;;  %v2866_v37 = vrot.slane %v6930_v5, 4 }
  0x9e   : > { %1749 = vst [vmem:[#allocation3 + $0x1e8] sm:$0xff] %v6928_v6  ;;  %v6973_v55 = vrot.slane %v1674_v60, 1  ;;  %v1758_v2 = vrot.slane %v6021_v32, 1  ;;  %v7004_v60 = vld [vmem:[#allocation3 + $0xd8] sm:$0xff]  ;;  %v2874_v32 = vrot.slane %v6767_v17, 4  ;;  %v2880_v56 = vrot.slane %v6776_v33, 4 }
  0x9f   : > { %4060 = vmatpush1.bf16.msra.mxu1 %v5973_v61  ;;  %v1662_v61 = vshrl.u32 %v6672_v24, 16  ;;  %v6952_v24 = vsel %vm1481_vm10, %v1656_v13, %v1660_v12  ;;  %v580_v13 = vld [vmem:[#allocation2 + $0xd4] sm:$0x1] }
  0xa0   : > { %4061 = vmatprep.subr.bf16.mxu1 %v6055_v1  ;;  %1750 = vst [vmem:[#allocation3 + $0x200] sm:$0xff] %v6952_v24  ;;  %v6984_v53 = vsel %vm1756_vm9, %v1757_v44, %v1758_v2 }
  0xa1   : > { %3247 = vmatmul.mubr.bf16.gmra.mrb[44].mxu1 %v2849_v21  ;;  %2219 = vmatmul.mubr.bf16.gmra.mrb[28].mxu0 %v6806_v62  ;;  %v1664_v21 = vor.u32 %v1662_v61, %v1660_v12  ;;  %v1193_v12 = vld [vmem:[%s6949_s30 + $0x8] sm:$0xff]  ;;  %v6981_v61 = vsel %vm1481_vm10, %v1672_v25, %v6973_v55  ;;  %v2869_v25 = vsel %vm1037_vm5, %v2862_v57, %v2868_v15 }
  0xa2   : > { %3254 = vmatprep.mubr.bf16.mxu1 %v2857_v48  ;;  %2226 = vmatprep.mubr.bf16.mxu0 %v6755_v4  ;;  %v5977_v48 = vld [vmem:[%s7807_s3 + $0x1c8] sm:$0xff]   ;;  %v2861_v4 = vsel %vm1037_vm5, %v2854_v51, %v2860_v45  ;;  %1752 = vst [vmem:[#allocation3 + $0x230] sm:$0xff] %v6981_v61  ;;  %v581_v51 = vsel %vm6181_vm4, 0, %v580_v13  ;;  %v1199_v26 = vmul.f32 0.0, %v1193_v12 }
  0xa3   : > { %4062 = vmatpush1.bf16.msra.mxu1 %v5974_v27  ;;  %v6963_v27 = vsel %vm1481_vm10, %v1664_v21, %v1668_v63  ;;  %v1762_v21 = vrot.slane %v6619_v42, 1  ;;  %v1198_v63 = vmul.f32 0.0, %v1192_v10  ;;  %v1764_v42 = vrot.slane %v6695_v59, 1  ;;  %582 = vst [vmem:[#allocation2 + $0xd4] sm:$0x1] %v581_v51 }
  0xa4   : > { %4063 = vmatprep.subr.bf16.mxu1 %v6055_v1  ;;  %1751 = vst [vmem:[#allocation3 + $0x218] sm:$0xff] %v6963_v27  ;;  %v5445_v10 = vpack.c.bf16 %v1199_v26, %v1199_v26  ;;  %v2875_v51 = vsel %vm1037_vm5, %v2868_v15, %v2874_v32  ;;  %v5980_v26 = vld [vmem:[%s7807_s3 + $0x1e0] sm:$0xff]  }
  0xa5   : > { %v7019_v57 = vsel %vm1756_vm9, %v1762_v21, %v1764_v42 }
  0xa6   : > { %1842 = vst [vmem:[#allocation3 + $0x58] sm:$0xff] %v7019_v57  ;;  %v1215_v44 = vshrl.u32 %v5445_v10, 16 }
  0xa7   : > { %4064 = vmatpush1.bf16.msra.mxu1 %v5975_v58  ;;  %v6022_v58 = vld [vmem:[#allocation3 + $0x30] sm:$0xff] }
  0xa8   : > { %4065 = vmatprep.subr.bf16.mxu1 %v6055_v1  ;;  %v1760_v46 = vrot.slane %v6022_v58, 1  ;;  %v1217_v58 = vrot.slane %v1215_v44, 7  ;;  %v2881_v44 = vsel %vm1037_vm5, %v2874_v32, %v2880_v56 }
  0xa9   : > { %3255 = vmatmul.mubr.bf16.gmra.mrb[48].mxu1 %v2855_v16  ;;  %2227 = vmatmul.mubr.bf16.gmra.mrb[32].mxu0 %v6930_v5  ;;  %v5979_v5 = vld [vmem:[%s7807_s3 + $0x1d8] sm:$0xff]  }
  0xaa   : > { %3262 = vmatprep.mubr.bf16.mxu1 %v2863_v35  ;;  %2234 = vmatprep.mubr.bf16.mxu0 %v6767_v17  ;;  %v6987_v16 = vsel %vm1756_vm9, %v1758_v2, %v1760_v46  ;;  %v522_v35 = vsel %vm6172_vm3, 0, %v521_v34  ;;  %v5978_v34 = vld [vmem:[%s7807_s3 + $0x1d0] sm:$0xff]   ;;  %v7015_v18 = vsel %vm1756_vm9, %v1760_v46, %v1762_v21  ;;  %v1218_v2 = vshll.u32 %v5445_v10, 16 }
  0xab   : > { %4066 = vmatpush1.bf16.msra.mxu1 %v5976_v20  ;;  %1840 = vst [vmem:[#allocation3 + $0x28] sm:$0xff] %v6987_v16  ;;  %v578_v20 = vsel %vm6181_vm4, 0, %v577_v29  ;;  %523 = vst [vmem:[#allocation2 + $0xcc] sm:$0x1] %v522_v35  ;;  %v5444_v29 = vpack.c.bf16 %v1198_v63, %v1198_v63  ;;  %v2867_v46 = vsel %vm1037_vm5, %v2860_v45, %v2866_v37  ;;  %v1231_v21 = vld [vmem:[#allocation2 + $0xd4] sm:$0x1] }
  0xac   : > { %4067 = vmatprep.subr.bf16.mxu1 %v6055_v1  ;;  %579 = vst [vmem:[#allocation2 + $0xc8] sm:$0x1] %v578_v20  ;;  %v7036_v63 = vld [vmem:[#allocation3 + $0xf0] sm:$0xff]  ;;  %v1768_v45 = vrot.slane %v6787_v41, 1 }
  0xad   : > { %v1207_v59 = vshrl.u32 %v5444_v29, 16  ;;  %v1210_v30 = vshll.u32 %v5444_v29, 16  ;;  %v2878_v32 = vrot.slane %v7036_v63, 4 }
  0xaf   : > { %4068 = vmatpush1.bf16.msra.mxu1 %v5977_v48  ;;  %v987_v48 = vrot.slane %v6648_v8, 4  ;;  %v1209_v8 = vrot.slane %v1207_v59, 7  ;;  %v1678_v59 = vshrl.u32 %v6721_v23, 16 }
  0xb0   : > { %4069 = vmatprep.subr.bf16.mxu1 %v6055_v1 }
  0xb1   : > { %3263 = vmatmul.mubr.bf16.gmra.mrb[52].mxu1 %v2861_v4  ;;  %2235 = vmatmul.mubr.bf16.gmra.mrb[36].mxu0 %v7004_v60  ;;  %v1766_v4 = vrot.slane %v6751_v43, 1  ;;  %v1212_v35 = vor.u32 %v1210_v30, %v1209_v8  ;;  %v1213_v20 = vrot.slane %v1209_v8, 4  ;;  %v1222_v43 = vrot.slane %v1217_v58, 4  ;;  %v1899_v30 = vld [vmem:[#allocation3 + $0x108] sm:$0xff] }
  0xb2   : > { %3270 = vmatprep.mubr.bf16.mxu1 %v2869_v25  ;;  %2242 = vmatprep.mubr.bf16.mxu0 %v6776_v33  ;;  %v1227_v12 = vld [vmem:[#allocation2 + $0xcc] sm:$0xf]  ;;  %v1220_v25 = vor.u32 %v1218_v2, %v1217_v58  ;;  %v5986_v33 = vld [vmem:[%s7807_s3 + $0x1f0] sm:$0xff]   ;;  %v1680_v8 = vor.u32 %v1678_v59, %v6973_v55 }
  0xb3   : > { %4070 = vmatpush1.bf16.msra.mxu1 %v5978_v34  ;;  %v1148_v13 = vld [vmem:[#allocation2 + $0xc8] sm:$0x1]  ;;  %v7045_v34 = vsel %vm1756_vm9, %v1764_v42, %v1766_v4  ;;  %v1228_v29 = vsel %vm6221_vm8, %v1212_v35, %v1227_v12  ;;  %v7051_v15 = vsel %vm1756_vm9, %v1766_v4, %v1768_v45  ;;  %v1232_v10 = vsel %vm6172_vm3, %v1222_v43, %v1231_v21  ;;  %v1908_v43 = vld [vmem:[#allocation3 + $0x150] sm:$0xff] }
  0xb4   : > { %4071 = vmatprep.subr.bf16.mxu1 %v6055_v1  ;;  %v1149_v17 = vsel %vm6172_vm3, %v987_v48, %v1148_v13  ;;  %1843 = vst [vmem:[#allocation3 + $0x70] sm:$0xff] %v7045_v34  ;;  %1229 = vst [vmem:[#allocation2 + $0xcc] sm:$0xf] %v1228_v29  ;;  %v1221_v41 = vsel %vm6210_vm7, %v1213_v20, %v1220_v25  ;;  %v2872_v42 = vrot.slane %v7004_v60, 4  ;;  %v1770_v60 = vrot.slane %v6806_v62, 1  ;;  %v1902_v35 = vld [vmem:[#allocation3 + $0x120] sm:$0xff] }
  0xb5   : > { %1150 = vst [vmem:[#allocation2 + $0xc8] sm:$0x1] %v1149_v17  ;;  %1844 = vst [vmem:[#allocation3 + $0x88] sm:$0xff] %v7051_v15  ;;  %v1911_v29 = vld [vmem:[#allocation3 + $0x168] sm:$0xff] }
  0xb6   : > { %1230 = vst [vmem:[#allocation2 + $0xd0] sm:$0xf] %v1221_v41  ;;  %1233 = vst [vmem:[#allocation2 + $0xd4] sm:$0x1] %v1232_v10  ;;  %v2873_v48 = vsel %vm1037_vm5, %v2866_v37, %v2872_v42  ;;  %v7077_v2 = vsel %vm1756_vm9, %v1768_v45, %v1770_v60  ;;  %v7082_v37 = vsel %vm1756_vm9, %v1770_v60, %v1772_v50  ;;  %v2886_v50 = vrot.slane %v6796_v39, 4  ;;  %v1920_v60 = vld [vmem:[#allocation3 + $0x1b0] sm:$0xff] }
  0xb7   : > { %4072 = vmatpush1.bf16.msra.mxu1 %v5979_v5  ;;  %1845 = vst [vmem:[#allocation3 + $0xa0] sm:$0xff] %v7077_v2  ;;  %1846 = vst [vmem:[#allocation3 + $0xb8] sm:$0xff] %v7082_v37  ;;  %v2879_v4 = vsel %vm1037_vm5, %v2872_v42, %v2878_v32  ;;  %v2890_v45 = vrot.slane %v1902_v35, 4  ;;  %v2910_v41 = vrot.slane %v6868_v3, 4  ;;  %v1914_v42 = vld [vmem:[#allocation3 + $0x180] sm:$0xff] }
  0xb8   : > { %4073 = vmatprep.subr.bf16.mxu1 %v6055_v1  ;;  %v2887_v20 = vsel %vm1037_vm5, %v2880_v56, %v2886_v50  ;;  %v2908_v56 = vrot.slane %v1911_v29, 4  ;;  %v2914_v59 = vrot.slane %v1914_v42, 4 }
  0xb9   : > { %3271 = vmatmul.mubr.bf16.gmra.mrb[56].mxu1 %v2867_v46  ;;  %2243 = vmatmul.mubr.bf16.gmra.mrb[40].mxu0 %v7036_v63  ;;  %v5991_v46 = vld [vmem:[%s7807_s3 + $0x1f8] sm:$0xff]  }
  0xba   : > { %3278 = vmatprep.mubr.bf16.mxu1 %v2875_v51  ;;  %2250 = vmatprep.mubr.bf16.mxu0 %v6796_v39  ;;  %v1905_v51 = vld [vmem:[#allocation3 + $0x138] sm:$0xff] }
  0xbb   : > { %4074 = vmatpush1.bf16.msra.mxu1 %v5980_v26  ;;  %v2893_v26 = vsel %vm1037_vm5, %v2886_v50, %v2892_v49  ;;  %v2902_v49 = vrot.slane %v1908_v43, 4 }
  0xbc   : > { %4075 = vmatprep.subr.bf16.mxu1 %v6055_v1  ;;  %v7074_v5 = vld [vmem:[#allocation2 + $0xc8] sm:$0xff]  }
  0xbd   : > { %v7086_v62 = vld [vmem:[#allocation2 + $0xd0] sm:$0xff]   ;;  %v1682_v58 = vshll.u32 %v7074_v5, 16  ;;  %1476 = vst [vmem:[#allocation3 + $0x258] sm:$0xff] %v7074_v5  ;;  %v1686_v40 = vshrl.u32 %v7074_v5, 16 }
  0xbe   : > { %v1690_v13 = vshll.u32 %v7086_v62, 16  ;;  %1477 = vst [vmem:[#allocation3 + $0x270] sm:$0xff] %v7086_v62 }
  0xbf   : > { %4076 = vmatpush1.bf16.msra.mxu1 %v5982_v47  ;;  %v1684_v55 = vrot.slane %v1682_v58, 1  ;;  %v2909_v47 = vsel %vm1037_vm5, %v2902_v49, %v2908_v56  ;;  %v2934_v58 = vrot.slane %v6920_v22, 4 }
  0xc0   : > { %4077 = vmatprep.subr.bf16.mxu1 %v6055_v1  ;;  %v7101_v12 = vrot.slane %v1690_v13, 1 }
  0xc1   : > { %3279 = vmatmul.mubr.bf16.gmra.mrb[60].mxu1 %v2873_v48  ;;  %2251 = vmatmul.mubr.bf16.gmra.mrb[44].mxu0 %v1899_v30  ;;  %v7105_v17 = vsel %vm1481_vm10, %v1680_v8, %v1684_v55  ;;  %v1688_v39 = vor.u32 %v1686_v40, %v1684_v55  ;;  %v1917_v48 = vld [vmem:[#allocation3 + $0x198] sm:$0xff] }
  0xc2   : > { %3286 = vmatprep.mubr.bf16.mxu1 %v2881_v44  ;;  %2258 = vmatprep.mubr.bf16.mxu0 %v6813_v9  ;;  %1753 = vst [vmem:[#allocation3 + $0x248] sm:$0xff] %v7105_v17  ;;  %v2928_v44 = vrot.slane %v6910_v52, 4 }
  0xc3   : > { %4078 = vmatpush1.bf16.msra.mxu1 %v5986_v33  ;;  %v1693_v21 = vsel %vm1481_vm10, %v1688_v39, %v7101_v12 }
  0xc4   : > { %4079 = vmatprep.subr.bf16.mxu1 %v6055_v1  ;;  %1754 = vst [vmem:[#allocation3 + $0x260] sm:$0xff] %v1693_v21  ;;  %v2884_v1 = vrot.slane %v1899_v30, 4  ;;  %v1929_v21 = vld [vmem:[#allocation3 + $0x1f8] sm:$0xff] }
  0xc6   : > { %v2885_v63 = vsel %vm1037_vm5, %v2878_v32, %v2884_v1  ;;  %v2891_v25 = vsel %vm1037_vm5, %v2884_v1, %v2890_v45  ;;  %v1923_v32 = vld [vmem:[#allocation3 + $0x1c8] sm:$0xff] }
  0xc7   : > { %4080 = vmatpush1.bf16.msra.mxu1 %v5991_v46  ;;  %v1926_v46 = vld [vmem:[#allocation3 + $0x1e0] sm:$0xff]  ;;  %v2932_v39 = vrot.slane %v1923_v32, 4 }
  0xc9   : > { %3287 = vmatmul.mubr.bf16.gmra.mrb[64].mxu1 %v2879_v4  ;;  %2259 = vmatmul.mubr.bf16.gmra.mrb[48].mxu0 %v1902_v35 }
  0xca   : > { %3294 = vmatprep.mubr.bf16.mxu1 %v2887_v20  ;;  %2266 = vmatprep.mubr.bf16.mxu0 %v6835_v0  ;;  %v2896_v0 = vrot.slane %v1905_v51, 4 }
  0xcc   : > { %v2897_v9 = vsel %vm1037_vm5, %v2890_v45, %v2896_v0  ;;  %v2903_v10 = vsel %vm1037_vm5, %v2896_v0, %v2902_v49  ;;  %v2938_v45 = vrot.slane %v1926_v46, 4 }
  0xce   : > { %v2939_v0 = vsel %vm1037_vm5, %v2932_v39, %v2938_v45 }
  0xd1   : > { %3295 = vmatmul.mubr.bf16.gmra.mrb[68].mxu1 %v2885_v63  ;;  %2267 = vmatmul.mubr.bf16.gmra.mrb[52].mxu0 %v1905_v51 }
  0xd2   : > { %3302 = vmatprep.mubr.bf16.mxu1 %v2893_v26  ;;  %2274 = vmatprep.mubr.bf16.mxu0 %v6856_v31  ;;  %v2922_v31 = vrot.slane %v6896_v28, 4 }
  0xd4   : > { %v2929_v8 = vsel %vm1037_vm5, %v2922_v31, %v2928_v44 }
  0xd9   : > { %3303 = vmatmul.mubr.bf16.gmra.mrb[72].mxu1 %v2891_v25  ;;  %2275 = vmatmul.mubr.bf16.gmra.mrb[56].mxu0 %v1908_v43  ;;  %v2946_v25 = vrot.slane %v6952_v24, 4  ;;  %v7812_v43 = vrot.slane %v7086_v62, 1 }
  0xda   : > { %3310 = vmatprep.mubr.bf16.mxu1 %v6862_v54  ;;  %2282 = vmatprep.mubr.bf16.mxu0 %v6868_v3  ;;  %v2911_v54 = vsel %vm1037_vm5, %v2904_v7, %v2910_v41  ;;  %v2915_v7 = vsel %vm1037_vm5, %v2908_v56, %v2914_v59 }
  0xe1   : > { %3311 = vmatmul.mubr.bf16.gmra.mrb[76].mxu1 %v2897_v9  ;;  %2283 = vmatmul.mubr.bf16.gmra.mrb[60].mxu0 %v1911_v29  ;;  %v1932_v29 = vld [vmem:[#allocation3 + $0x210] sm:$0xff] }
  0xe2   : > { %3318 = vmatprep.mubr.bf16.mxu1 %v6883_v19  ;;  %2290 = vmatprep.mubr.bf16.mxu0 %v6888_v36  ;;  %v2916_v19 = vrot.slane %v6888_v36, 4  ;;  %v2920_v36 = vrot.slane %v1917_v48, 4 }
  0xe4   : > { %v2917_v3 = vsel %vm1037_vm5, %v2910_v41, %v2916_v19  ;;  %v2923_v30 = vsel %vm1037_vm5, %v2916_v19, %v2922_v31  ;;  %v2921_v33 = vsel %vm1037_vm5, %v2914_v59, %v2920_v36 }
  0xe9   : > { %3319 = vmatmul.mubr.bf16.gmra.mrb[80].mxu1 %v2903_v10  ;;  %2291 = vmatmul.mubr.bf16.gmra.mrb[64].mxu0 %v1914_v42  ;;  %v2952_v42 = vrot.slane %v6963_v27, 4 }
  0xea   : > { %3326 = vmatprep.mubr.bf16.mxu1 %v2911_v54  ;;  %2298 = vmatprep.mubr.bf16.mxu0 %v6896_v28  ;;  %v2926_v28 = vrot.slane %v1920_v60, 4 }
  0xec   : > { %v2927_v40 = vsel %vm1037_vm5, %v2920_v36, %v2926_v28  ;;  %v2933_v35 = vsel %vm1037_vm5, %v2926_v28, %v2932_v39  ;;  %v5984_v36 = vld [vmem:[%s7807_s3 + $0x150] sm:$0xff]   ;;  %v2701_v28 = vld [vmem:[#allocation3 + $0x260] sm:$0xf] }
  0xf1   : > { %3327 = vmatmul.mubr.bf16.gmra.mrb[84].mxu1 %v2909_v47  ;;  %2299 = vmatmul.mubr.bf16.gmra.mrb[68].mxu0 %v1917_v48  ;;  %v1935_v47 = vld [vmem:[#allocation3 + $0x228] sm:$0xff]  ;;  %v2953_v48 = vsel %vm1037_vm5, %v2946_v25, %v2952_v42 }
  0xf2   : > { %3334 = vmatprep.mubr.bf16.mxu1 %v2917_v3  ;;  %2306 = vmatprep.mubr.bf16.mxu0 %v6910_v52  ;;  %v2935_v52 = vsel %vm1037_vm5, %v2928_v44, %v2934_v58  ;;  %v2950_v3 = vrot.slane %v1932_v29, 4 }
  0xf9   : > { %3335 = vmatmul.mubr.bf16.gmra.mrb[88].mxu1 %v2915_v7  ;;  %2307 = vmatmul.mubr.bf16.gmra.mrb[72].mxu0 %v1920_v60 }
  0xfa   : > { %3342 = vmatprep.mubr.bf16.mxu1 %v2923_v30  ;;  %2314 = vmatprep.mubr.bf16.mxu0 %v6920_v22  ;;  %v2940_v22 = vrot.slane %v6928_v6, 4  ;;  %v5983_v30 = vld [vmem:[%s7807_s3 + $0x148] sm:$0xff]  }
  0xfc   : > { %v2941_v1 = vsel %vm1037_vm5, %v2934_v58, %v2940_v22  ;;  %v2947_v49 = vsel %vm1037_vm5, %v2940_v22, %v2946_v25  ;;  %v2970_v22 = vrot.slane %v2701_v28, 4 }
 0x101   : > { %3343 = vmatmul.mubr.bf16.gmra.mrb[92].mxu1 %v2921_v33  ;;  %2315 = vmatmul.mubr.bf16.gmra.mrb[76].mxu0 %v1923_v32  ;;  %v2697_v32 = vld [vmem:[#allocation3 + $0x240] sm:$0xff] }
 0x102   : > { %3350 = vmatprep.mubr.bf16.mxu1 %v2929_v8  ;;  %2322 = vmatprep.mubr.bf16.mxu0 %v6928_v6  ;;  %v1806_v6 = vrot.slane %v7074_v5, 1 }
 0x104   : > { %v1809_v9 = vsel %vm1756_vm9, %v1806_v6, %v7812_v43  ;;  %v7178_v56 = vsel %vm1756_vm9, %v1804_v38, %v1806_v6  ;;  %v2630_v6 = vld [vmem:[#allocation3 + $0x28] sm:$0xf0] }
 0x105   : > { %1864 = vst [vmem:[#allocation3 + $0x268] sm:$0xff] %v1809_v9  ;;  %1863 = vst [vmem:[#allocation3 + $0x250] sm:$0xff] %v7178_v56 }
 0x109   : > { %v7143_v50 = vpop.f32.mrb[0].mxu1  ;;  %3351 = vmatmul.mubr.bf16.gmra.mrb[96].mxu1 %v2927_v40  ;;  %2323 = vmatmul.mubr.bf16.gmra.mrb[80].mxu0 %v1926_v46  ;;  %v2962_v46 = vrot.slane %v2697_v32, 4  ;;  %v3788_v32 = vld [vmem:[#allocation3 + $0x68] sm:$0xff] }
 0x10a   : > { %v7146_v13 = vpop.f32.mrb[1].mxu1  ;;  %3358 = vmatprep.mubr.bf16.mxu1 %v2935_v52  ;;  %2330 = vmatprep.mubr.bf16.mxu0 %v6952_v24  ;;  %v2944_v24 = vrot.slane %v1929_v21, 4 }
 0x10b   : > { %v7148_v55 = vpop.f32.mrb[2].mxu1 }
 0x10c   : > { %v2456_v4 = vpop.f32.mrb[3].mxu1  ;;  %v2945_v19 = vsel %vm1037_vm5, %v2938_v45, %v2944_v24  ;;  %v2951_v31 = vsel %vm1037_vm5, %v2944_v24, %v2950_v3  ;;  %v2833_v24 = vrot.slane %v2630_v6, 4 }
 0x111   : > { %v7153_v20 = vpop.f32.mrb[4].mxu1  ;;  %3359 = vmatmul.mubr.bf16.gmra.mrb[100].mxu1 %v2933_v35  ;;  %2331 = vmatmul.mubr.bf16.gmra.mrb[84].mxu0 %v1929_v21  ;;  %v5987_v35 = vld [vmem:[%s7807_s3 + $0x160] sm:$0xff]  }
 0x112   : > { %v2469_v63 = vpop.f32.mrb[5].mxu1  ;;  %3366 = vmatprep.mubr.bf16.mxu1 %v2941_v1  ;;  %2338 = vmatprep.mubr.bf16.mxu0 %v6963_v27  ;;  %v2958_v27 = vrot.slane %v6981_v61, 4 }
 0x113   : > { %v5709_v51 = vpop.f32.mrb[6].mxu1  ;;  %v2700_v63 = vld [vmem:[#allocation3 + $0x258] sm:$0xf] }
 0x114   : > { %v7156_v26 = vpop.f32.mrb[7].mxu1  ;;  %v2959_v60 = vsel %vm1037_vm5, %v2952_v42, %v2958_v27  ;;  %v5989_v51 = vld [vmem:[%s7807_s3 + $0x168] sm:$0xff]   ;;  %v2834_v42 = vrot.slane %v7015_v18, 4 }
 0x119   : > { %3367 = vmatmul.mubr.bf16.gmra.mrb[104].mxu1 %v2939_v0  ;;  %2339 = vmatmul.mubr.bf16.gmra.mrb[88].mxu0 %v1932_v29  ;;  %v2968_v0 = vrot.slane %v2700_v63, 4 }
 0x11a   : > { %3374 = vmatprep.mubr.bf16.mxu1 %v2947_v49  ;;  %2346 = vmatprep.mubr.bf16.mxu0 %v6981_v61  ;;  %v2956_v61 = vrot.slane %v1935_v47, 4 }
 0x11b   : > { %v5712_v41 = vpop.f32.mrb[8].mxu1 }
 0x11c   : > { %v7167_v10 = vpop.f32.mrb[9].mxu1  ;;  %v2957_v44 = vsel %vm1037_vm5, %v2950_v3, %v2956_v61  ;;  %v2963_v21 = vsel %vm1037_vm5, %v2956_v61, %v2962_v46  ;;  %v5990_v41 = vld [vmem:[%s7807_s3 + $0x170] sm:$0xff]  }
 0x11d   : > { %v7169_v5 = vpop.f32.mrb[10].mxu1 }
 0x11e   : > { %v7173_v54 = vpop.f32.mrb[11].mxu1 }
 0x121   : > { %3375 = vmatmul.mubr.bf16.gmra.mrb[108].mxu1 %v2945_v19  ;;  %2347 = vmatmul.mubr.bf16.gmra.mrb[92].mxu0 %v1935_v47 }
 0x122   : > { %3382 = vmatprep.mubr.bf16.mxu1 %v2953_v48  ;;  %5686 = vmatprep.mubr.bf16.mxu0 %v6984_v53  ;;  %v2964_v53 = vrot.slane %v7105_v17, 4  ;;  %v2969_v48 = vsel %vm1037_vm5, %v2962_v46, %v2968_v0 }
 0x123   : > { %v7185_v59 = vpop.f32.mrb[12].mxu1 }
 0x124   : > { %v7187_v23 = vpop.f32.mrb[13].mxu1  ;;  %v2971_v1 = vsel %vm1037_vm5, %v2964_v53, %v2970_v22 }
 0x125   : > { %v7189_v38 = vpop.f32.mrb[14].mxu1 }
 0x126   : > { %v2504_v7 = vpop.f32.mrb[15].mxu1 }
 0x127   : > { %v2835_v7 = vsel %vm1037_vm5, %v2833_v24, %v2834_v42 }
 0x129   : > { %3383 = vmatmul.mubr.bf16.gmra.mrb[112].mxu1 %v2951_v31  ;;  %5687 = vmatmul.mubr.bf16.vlgmr.msra.gmra.mrb[96].mxu0 %v6987_v16  ;;  %v2965_v16 = vsel %vm1037_vm5, %v2958_v27, %v2964_v53  ;;  %v3785_v27 = vld [vmem:[#allocation3 + $0x50] sm:$0xff] }
 0x12a   : > { %3390 = vmatprep.mubr.bf16.mxu1 %v2959_v60  ;;  %5735 = vmatpush3.bf16.msra.mxu0 %v6968_v11  ;;  %v5985_v11 = vld [vmem:[%s7807_s3 + $0x158] sm:$0xff]   ;;  %v5994_v60 = vld [vmem:[%s7807_s3 + $0x200] sm:$0xff]  }
 0x12b   : > { %5690 = vmatprep.mubr.bf16.mxu0 %v7015_v18  ;;  %5736 = vmatprep.subr.bf16.mxu0 %v5983_v30  ;;  %v5993_v31 = vld [vmem:[%s7807_s3 + $0x178] sm:$0xff]   ;;  %v2840_v18 = vrot.slane %v7019_v57, 4 }
 0x12e   : > { %5737 = vmatpush3.bf16.msra.mxu0 %v5983_v30  ;;  %v7204_v33 = vpop.f32.mrb[0].mxu0  ;;  %v2846_v30 = vrot.slane %v7045_v34, 4 }
 0x12f   : > { %5738 = vmatprep.subr.bf16.mxu0 %v5984_v36  ;;  %v2166_v8 = vpop.f32.mrb[1].mxu0 }
 0x130   : > { %v7212_v58 = vpop.f32.mrb[2].mxu0  ;;  %v5995_v8 = vld [vmem:[%s7807_s3 + $0x208] sm:$0xff]  }
 0x131   : > { %3391 = vmatmul.mubr.bf16.gmra.mrb[116].mxu1 %v2957_v44  ;;  %5691 = vmatmul.mubr.bf16.gmra.mrb[100].mxu0 %v7019_v57  ;;  %v2169_v52 = vpop.f32.mrb[3].mxu0  ;;  %v2841_v44 = vsel %vm1037_vm5, %v2834_v42, %v2840_v18  ;;  %v2847_v57 = vsel %vm1037_vm5, %v2840_v18, %v2846_v30  ;;  %v7291_v18 = vld [vmem:[#allocation3 + $0xe8] sm:$0xff] }
 0x132   : > { %3398 = vmatprep.mubr.bf16.mxu1 %v2965_v16  ;;  %5739 = vmatpush3.bf16.msra.mxu0 %v5984_v36  ;;  %v3784_v36 = vld [vmem:[#allocation3 + $0x48] sm:$0xff]  ;;  %v2858_v52 = vrot.slane %v7077_v2, 4 }
 0x133   : > { %5694 = vmatprep.mubr.bf16.mxu0 %v7045_v34  ;;  %5740 = vmatprep.subr.bf16.mxu0 %v5985_v11 }
 0x136   : > { %v7210_v17 = vpop.f32.mrb[16].mxu1  ;;  %5741 = vmatpush3.bf16.msra.mxu0 %v5985_v11 }
 0x137   : > { %v2517_v40 = vpop.f32.mrb[17].mxu1  ;;  %5742 = vmatprep.subr.bf16.mxu0 %v5987_v35  ;;  %v2172_v45 = vpop.f32.mrb[4].mxu0 }
 0x138   : > { %v5721_v4 = vpop.f32.mrb[18].mxu1  ;;  %v2174_v25 = vpop.f32.mrb[5].mxu0  ;;  %v2852_v40 = vrot.slane %v7051_v15, 4  ;;  %v2864_v45 = vrot.slane %v7082_v37, 4 }
 0x139   : > { %v7216_v39 = vpop.f32.mrb[19].mxu1  ;;  %3399 = vmatmul.mubr.bf16.gmra.mrb[120].mxu1 %v2963_v21  ;;  %5695 = vmatmul.mubr.bf16.gmra.mrb[104].mxu0 %v7051_v15  ;;  %v7227_v9 = vpop.f32.mrb[6].mxu0  ;;  %v5996_v4 = vld [vmem:[%s7807_s3 + $0x210] sm:$0xff]   ;;  %v5997_v15 = vld [vmem:[%s7807_s3 + $0x218] sm:$0xff]  }
 0x13a   : > { %3406 = vmatprep.mubr.bf16.mxu1 %v2971_v1  ;;  %5743 = vmatpush3.bf16.msra.mxu0 %v5987_v35  ;;  %v2177_v29 = vpop.f32.mrb[7].mxu0  ;;  %v3787_v35 = vld [vmem:[#allocation3 + $0x60] sm:$0xff]  ;;  %v2853_v21 = vsel %vm1037_vm5, %v2846_v30, %v2852_v40  ;;  %v2859_v63 = vsel %vm1037_vm5, %v2852_v40, %v2858_v52  ;;  %v3793_v40 = vld [vmem:[#allocation3 + $0x90] sm:$0xff] }
 0x13b   : > { %5698 = vmatprep.mubr.bf16.mxu0 %v7077_v2  ;;  %5744 = vmatprep.subr.bf16.mxu0 %v5989_v51  ;;  %v3791_v1 = vld [vmem:[#allocation3 + $0x80] sm:$0xff] }
 0x13c   : > { %v5998_v29 = vld [vmem:[%s7807_s3 + $0x220] sm:$0xff]  }
 0x13d   : > { %v7296_v30 = vld [vmem:[#allocation3 + $0x100] sm:$0xff] }
 0x13e   : > { %v5724_v49 = vpop.f32.mrb[20].mxu1  ;;  %5745 = vmatpush3.bf16.msra.mxu0 %v5989_v51  ;;  %v7274_v51 = vld [vmem:[#allocation3 + $0xd0] sm:$0xff] }
 0x13f   : > { %v7234_v19 = vpop.f32.mrb[21].mxu1  ;;  %5746 = vmatprep.subr.bf16.mxu0 %v5990_v41  ;;  %v2870_v0 = vrot.slane %v7274_v51, 4 }
 0x140   : > { %v7236_v47 = vpop.f32.mrb[22].mxu1 }
 0x141   : > { %v7239_v3 = vpop.f32.mrb[23].mxu1  ;;  %3407 = vmatmul.mubr.bf16.gmra.mrb[124].mxu1 %v2969_v48  ;;  %5699 = vmatmul.mubr.bf16.gmra.mrb[108].mxu0 %v7082_v37  ;;  %v3790_v48 = vld [vmem:[#allocation3 + $0x78] sm:$0xff] }
 0x142   : > { %4081 = vmatprep.mubr.bf16.mxu1 %v3785_v27  ;;  %5747 = vmatpush3.bf16.msra.mxu0 %v5990_v41  ;;  %v2865_v27 = vsel %vm1037_vm5, %v2858_v52, %v2864_v45 }
 0x143   : > { %5750 = vmatprep.mubr.bf16.mxu0 %v2835_v7  ;;  %5748 = vmatprep.subr.bf16.mxu0 %v5993_v31  ;;  %v2871_v7 = vsel %vm1037_vm5, %v2864_v45, %v2870_v0  ;;  %v7316_v45 = vld [vmem:[#allocation3 + $0x130] sm:$0xff] }
 0x145   : > { %v7251_v61 = vpop.f32.mrb[8].mxu0 }
 0x146   : > { %v2182_v53 = vpop.f32.mrb[9].mxu0  ;;  %5749 = vmatpush3.bf16.msra.mxu0 %v5993_v31  ;;  %v3794_v31 = vld [vmem:[#allocation3 + $0x98] sm:$0xff] }
 0x147   : > { %v2183_v16 = vpop.f32.mrb[10].mxu0  ;;  %5798 = vmatprep.subr.bf16.mxu0 %v5994_v60  ;;  %v2876_v53 = vrot.slane %v7291_v18, 4 }
 0x148   : > { %v2185_v11 = vpop.f32.mrb[11].mxu0  ;;  %v6000_v16 = vld [vmem:[%s7807_s3 + $0x230] sm:$0xff]  }
 0x149   : > { %4082 = vmatmul.mubr.bf16.vlgmr.msra.gmra.mrb[128].mxu1 %v3784_v36  ;;  %5751 = vmatmul.mubr.bf16.vlgmr.msra.gmra.mrb[112].mxu0 %v2841_v44  ;;  %v2882_v44 = vrot.slane %v7296_v30, 4 }
 0x14a   : > { %v7258_v34 = vpop.f32.mrb[24].mxu1  ;;  %4089 = vmatprep.mubr.bf16.mxu1 %v3788_v32  ;;  %5799 = vmatpush3.bf16.msra.mxu0 %v5994_v60  ;;  %v5999_v60 = vld [vmem:[%s7807_s3 + $0x228] sm:$0xff]  }
 0x14b   : > { %5754 = vmatprep.mubr.bf16.mxu0 %v2847_v57  ;;  %v7260_v28 = vpop.f32.mrb[25].mxu1  ;;  %5800 = vmatprep.subr.bf16.mxu0 %v5995_v8 }
 0x14c   : > { %v7263_v46 = vpop.f32.mrb[26].mxu1 }
 0x14d   : > { %v2552_v22 = vpop.f32.mrb[27].mxu1 }
 0x14e   : > { %5801 = vmatpush3.bf16.msra.mxu0 %v5995_v8 }
 0x14f   : > { %5802 = vmatprep.subr.bf16.mxu0 %v5996_v4 }
 0x151   : > { %4090 = vmatmul.mubr.bf16.gmra.mrb[132].mxu1 %v3787_v35  ;;  %5755 = vmatmul.mubr.bf16.gmra.mrb[116].mxu0 %v2853_v21  ;;  %v3797_v35 = vld [vmem:[#allocation3 + $0xb0] sm:$0xff] }
 0x152   : > { %4097 = vmatprep.mubr.bf16.mxu1 %v3791_v1  ;;  %5758 = vmatprep.mubr.bf16.mxu0 %v2859_v63  ;;  %v2883_v1 = vsel %vm1037_vm5, %v2876_v53, %v2882_v44  ;;  %v7311_v63 = vld [vmem:[#allocation3 + $0x118] sm:$0xff] }
 0x153   : > { %v7276_v2 = vpop.f32.mrb[12].mxu0  ;;  %5803 = vmatpush3.bf16.msra.mxu0 %v5996_v4  ;;  %v2877_v4 = vsel %vm1037_vm5, %v2870_v0, %v2876_v53  ;;  %v3800_v53 = vld [vmem:[#allocation3 + $0xc8] sm:$0xff] }
 0x154   : > { %v2190_v25 = vpop.f32.mrb[13].mxu0  ;;  %v7279_v6 = vpop.f32.mrb[28].mxu1  ;;  %5804 = vmatprep.subr.bf16.mxu0 %v5997_v15 }
 0x155   : > { %v7285_v49 = vpop.f32.mrb[14].mxu0  ;;  %v2565_v41 = vpop.f32.mrb[29].mxu1  ;;  %v2888_v25 = vrot.slane %v7311_v63, 4 }
 0x156   : > { %v2193_v24 = vpop.f32.mrb[15].mxu0  ;;  %v5733_v42 = vpop.f32.mrb[30].mxu1 }
 0x157   : > { %v7288_v37 = vpop.f32.mrb[31].mxu1  ;;  %5805 = vmatpush3.bf16.msra.mxu0 %v5997_v15  ;;  %v6001_v15 = vld [vmem:[%s7807_s3 + $0x238] sm:$0xff]  }
 0x158   : > { %5806 = vmatprep.subr.bf16.mxu0 %v5998_v29 }
 0x159   : > { %4098 = vmatmul.mubr.bf16.gmra.mrb[136].mxu1 %v3790_v48  ;;  %5759 = vmatmul.mubr.bf16.gmra.mrb[120].mxu0 %v2865_v27  ;;  %v3796_v27 = vld [vmem:[#allocation3 + $0xa8] sm:$0xff] }
 0x15a   : > { %4105 = vmatprep.mubr.bf16.mxu1 %v3794_v31  ;;  %5762 = vmatprep.mubr.bf16.mxu0 %v2871_v7  ;;  %v2889_v7 = vsel %vm1037_vm5, %v2882_v44, %v2888_v25 }
 0x15b   : > { %5807 = vmatpush3.bf16.msra.mxu0 %v5998_v29  ;;  %v2894_v29 = vrot.slane %v7316_v45, 4 }
 0x15c   : > { %v7299_v36 = vpop.f32.mrb[32].mxu1  ;;  %5808 = vmatprep.subr.bf16.mxu0 %v5999_v60  ;;  %v2196_v32 = vpop.f32.mrb[16].mxu0 }
 0x15d   : > { %7821 = vst [vmem:[#allocation5_spill] sm:$0xff] %v7299_v36  ;;  %v3226_v11 = vpop.f32.mrb[33].mxu1  ;;  %v2198_v57 = vpop.f32.mrb[17].mxu0 }
 0x15e   : > { %v7305_v8 = vpop.f32.mrb[34].mxu1  ;;  %v7307_v52 = vpop.f32.mrb[18].mxu0  ;;  %v7326_v11 = vld [vmem:[#allocation3 + $0x148] sm:$0xff]  ;;  %v7328_v57 = vld [vmem:[#allocation3 + $0x160] sm:$0xff] }
 0x15f   : > { %7822 = vst [vmem:[#allocation6_spill] sm:$0xff] %v7305_v8  ;;  %v3229_v22 = vpop.f32.mrb[35].mxu1  ;;  %5809 = vmatpush3.bf16.msra.mxu0 %v5999_v60  ;;  %v2201_v21 = vpop.f32.mrb[19].mxu0  ;;  %v2906_v44 = vrot.slane %v7328_v57, 4 }
 0x160   : > { %5810 = vmatprep.subr.bf16.mxu0 %v6000_v16 }
 0x161   : > { %4106 = vmatmul.mubr.bf16.gmra.mrb[140].mxu1 %v3793_v40  ;;  %5763 = vmatmul.mubr.bf16.gmra.mrb[124].mxu0 %v2877_v4  ;;  %v2900_v40 = vrot.slane %v7326_v11, 4 }
 0x162   : > { %4113 = vmatprep.mubr.bf16.mxu1 %v3797_v35  ;;  %5766 = vmatprep.mubr.bf16.mxu0 %v2883_v1 }
 0x163   : > { %5811 = vmatpush3.bf16.msra.mxu0 %v6000_v16  ;;  %v2895_v16 = vsel %vm1037_vm5, %v2888_v25, %v2894_v29 }
 0x164   : > { %v3232_v0 = vpop.f32.mrb[36].mxu1  ;;  %5812 = vmatprep.subr.bf16.mxu0 %v6001_v15  ;;  %v7320_v41 = vpop.f32.mrb[20].mxu0 }
 0x165   : > { %v3234_v24 = vpop.f32.mrb[37].mxu1  ;;  %v2206_v42 = vpop.f32.mrb[21].mxu0  ;;  %v2901_v0 = vsel %vm1037_vm5, %v2894_v29, %v2900_v40 }
 0x166   : > { %v7322_v48 = vpop.f32.mrb[38].mxu1  ;;  %v2207_v31 = vpop.f32.mrb[22].mxu0  ;;  %v3803_v42 = vld [vmem:[#allocation3 + $0xe0] sm:$0xff] }
 0x167   : > { %7823 = vst [vmem:[#allocation7_spill] sm:$0xff] %v7322_v48  ;;  %v3237_v60 = vpop.f32.mrb[39].mxu1  ;;  %5813 = vmatpush3.bf16.msra.mxu0 %v6001_v15  ;;  %v2209_v32 = vpop.f32.mrb[23].mxu0  ;;  %v3799_v15 = vld [vmem:[#allocation3 + $0xc0] sm:$0xff]  ;;  %v2907_v31 = vsel %vm1037_vm5, %v2900_v40, %v2906_v44  ;;  %v3809_v48 = vld [vmem:[#allocation3 + $0x110] sm:$0xff] }
 0x168   : > { %v7342_v60 = vld [vmem:[#allocation3 + $0x190] sm:$0xff] }
 0x169   : > { %4114 = vmatmul.mubr.bf16.gmra.mrb[144].mxu1 %v3796_v27  ;;  %5767 = vmatmul.mubr.bf16.gmra.mrb[128].mxu0 %v2889_v7  ;;  %v7340_v7 = vld [vmem:[#allocation3 + $0x178] sm:$0xff] }
 0x16a   : > { %4121 = vmatprep.mubr.bf16.mxu1 %v3800_v53  ;;  %5770 = vmatprep.mubr.bf16.mxu0 %v2895_v16  ;;  %v524_v53 = vld [vmem:[#allocation2 + $0xd8] sm:$0x1]  ;;  %v2912_v32 = vrot.slane %v7340_v7, 4 }
 0x16b   : > { %v525_v16 = vsel %vm6172_vm3, 0, %v524_v53  ;;  %v7356_v53 = vld [vmem:[#allocation3 + $0x1a8] sm:$0xff] }
 0x16c   : > { %v7331_v4 = vpop.f32.mrb[40].mxu1  ;;  %v7334_v22 = vpop.f32.mrb[24].mxu0  ;;  %526 = vst [vmem:[#allocation2 + $0xd8] sm:$0x1] %v525_v16  ;;  %v2924_v16 = vrot.slane %v7356_v53, 4 }
 0x16d   : > { %7824 = vst [vmem:[#allocation8_spill] sm:$0xff] %v7331_v4  ;;  %7825 = vst [vmem:[#allocation9_spill] sm:$0xff] %v7334_v22  ;;  %v3242_v35 = vpop.f32.mrb[41].mxu1  ;;  %v2214_v21 = vpop.f32.mrb[25].mxu0  ;;  %v7358_v4 = vld [vmem:[#allocation3 + $0x1c0] sm:$0xff]  ;;  %v7371_v22 = vld [vmem:[#allocation3 + $0x1d8] sm:$0xff] }
 0x16e   : > { %v3243_v1 = vpop.f32.mrb[42].mxu1  ;;  %v7336_v25 = vpop.f32.mrb[26].mxu0  ;;  %v2918_v35 = vrot.slane %v7342_v60, 4 }
 0x16f   : > { %7826 = vst [vmem:[#allocation10_spill] sm:$0xff] %v7336_v25  ;;  %v3245_v24 = vpop.f32.mrb[43].mxu1  ;;  %v2217_v27 = vpop.f32.mrb[27].mxu0 }
 0x170   : > { %v3802_v24 = vld [vmem:[#allocation3 + $0xd8] sm:$0xff]  ;;  %v2919_v14 = vsel %vm1037_vm5, %v2912_v32, %v2918_v35 }
 0x171   : > { %4122 = vmatmul.mubr.bf16.gmra.mrb[148].mxu1 %v3799_v15  ;;  %5771 = vmatmul.mubr.bf16.gmra.mrb[132].mxu0 %v2901_v0 }
 0x172   : > { %4129 = vmatprep.mubr.bf16.mxu1 %v3803_v42  ;;  %5774 = vmatprep.mubr.bf16.mxu0 %v2907_v31  ;;  %v2913_v42 = vsel %vm1037_vm5, %v2906_v44, %v2912_v32  ;;  %v3806_v31 = vld [vmem:[#allocation3 + $0xf8] sm:$0xff] }
 0x174   : > { %v7347_v29 = vpop.f32.mrb[44].mxu1  ;;  %v2220_v40 = vpop.f32.mrb[28].mxu0 }
 0x175   : > { %7827 = vst [vmem:[#allocation11_spill] sm:$0xff] %v7347_v29  ;;  %v3250_v21 = vpop.f32.mrb[45].mxu1  ;;  %v2222_v1 = vpop.f32.mrb[29].mxu0  ;;  %v6002_v40 = vld [vmem:[#allocation2 + $0xd8] ss:$0 sps:$4 sm:$0xff]  }
 0x176   : > { %v7350_v15 = vpop.f32.mrb[46].mxu1  ;;  %v7352_v0 = vpop.f32.mrb[30].mxu0  ;;  %v2930_v1 = vrot.slane %v7358_v4, 4 }
 0x177   : > { %7828 = vst [vmem:[#allocation12_spill] sm:$0xff] %v7350_v15  ;;  %7829 = vst [vmem:[#allocation13_spill] sm:$0xff] %v7352_v0  ;;  %v3253_v27 = vpop.f32.mrb[47].mxu1  ;;  %v2225_v43 = vpop.f32.mrb[31].mxu0  ;;  %v1698_v15 = vshll.u32 %v6002_v40, 16 }
 0x178   : > { %v1694_v43 = vshrl.u32 %v7086_v62, 16  ;;  %v2931_v0 = vsel %vm1037_vm5, %v2924_v16, %v2930_v1 }
 0x179   : > { %4130 = vmatmul.mubr.bf16.gmra.mrb[152].mxu1 %v3802_v24  ;;  %5775 = vmatmul.mubr.bf16.gmra.mrb[136].mxu0 %v2913_v42  ;;  %v3805_v42 = vld [vmem:[#allocation3 + $0xf0] sm:$0xff]  ;;  %v1700_v25 = vrot.slane %v1698_v15, 1 }
 0x17a   : > { %4137 = vmatprep.mubr.bf16.mxu1 %v3806_v31  ;;  %5778 = vmatprep.mubr.bf16.mxu0 %v2919_v14  ;;  %v2925_v14 = vsel %vm1037_vm5, %v2918_v35, %v2924_v16  ;;  %v1696_v36 = vor.u32 %v1694_v43, %v7101_v12  ;;  %v2936_v12 = vrot.slane %v7371_v22, 4 }
 0x17c   : > { %v3256_v21 = vpop.f32.mrb[48].mxu1  ;;  %v2228_v44 = vpop.f32.mrb[32].mxu0 }
 0x17d   : > { %v3258_v27 = vpop.f32.mrb[49].mxu1  ;;  %v7364_v32 = vadd.f32 %v7146_v13, %v2228_v44  ;;  %v2230_v24 = vpop.f32.mrb[33].mxu0  ;;  %v1810_v21 = vrot.slane %v6002_v40, 1  ;;  %v7373_v13 = vld [vmem:[#allocation3 + $0x1f0] sm:$0xff]  ;;  %v7831_v44 = vrot.slane %v7086_v62, 1 }
 0x17e   : > { %v7366_v29 = vpop.f32.mrb[50].mxu1  ;;  %v2231_v31 = vpop.f32.mrb[34].mxu0  ;;  %v2942_v15 = vrot.slane %v7373_v13, 4 }
 0x17f   : > { %7830 = vst [vmem:[#allocation14_spill] sm:$0xff] %v7364_v32  ;;  %v3261_v8 = vpop.f32.mrb[51].mxu1  ;;  %v2233_v27 = vpop.f32.mrb[35].mxu0  ;;  %v7378_v24 = vsel %vm1756_vm9, %v7831_v44, %v1810_v21  ;;  %v3808_v31 = vld [vmem:[#allocation3 + $0x108] sm:$0xff]  ;;  %v7410_v32 = vld [vmem:[#allocation3 + $0x238] sm:$0xff] }
 0x180   : > { %v7381_v8 = vsel %vm1481_vm10, %v1696_v36, %v1700_v25  ;;  %v2937_v36 = vsel %vm1037_vm5, %v2930_v1, %v2936_v12  ;;  %v2943_v27 = vsel %vm1037_vm5, %v2936_v12, %v2942_v15  ;;  %v7395_v44 = vld [vmem:[#allocation3 + $0x208] sm:$0xff]  ;;  %v3811_v12 = vld [vmem:[#allocation3 + $0x120] sm:$0xff] }
 0x181   : > { %4138 = vmatmul.mubr.bf16.gmra.mrb[156].mxu1 %v3805_v42  ;;  %5779 = vmatmul.mubr.bf16.gmra.mrb[140].mxu0 %v2925_v14 }
 0x182   : > { %4145 = vmatprep.mubr.bf16.mxu1 %v3809_v48  ;;  %5782 = vmatprep.mubr.bf16.mxu0 %v2931_v0  ;;  %v3812_v48 = vld [vmem:[#allocation3 + $0x128] sm:$0xff] }
 0x184   : > { %v7384_v35 = vpop.f32.mrb[52].mxu1  ;;  %v2236_v16 = vpop.f32.mrb[36].mxu0 }
 0x185   : > { %v3266_v40 = vpop.f32.mrb[53].mxu1  ;;  %v7388_v43 = vadd.f32 %v7143_v50, %v2236_v16  ;;  %v2238_v62 = vpop.f32.mrb[37].mxu0  ;;  %v2948_v50 = vrot.slane %v7395_v44, 4 }
 0x186   : > { %v3267_v42 = vpop.f32.mrb[54].mxu1  ;;  %v2239_v21 = vpop.f32.mrb[38].mxu0  ;;  %v7397_v40 = vld [vmem:[#allocation3 + $0x220] sm:$0xff] }
 0x187   : > { %7832 = vst [vmem:[#allocation15_spill] sm:$0xff] %v7388_v43  ;;  %v3269_v25 = vpop.f32.mrb[55].mxu1  ;;  %v7392_v0 = vadd.f32 %v7148_v55, %v2239_v21  ;;  %v2241_v14 = vpop.f32.mrb[39].mxu0  ;;  %v2954_v1 = vrot.slane %v7397_v40, 4 }
 0x189   : > { %7833 = vst [vmem:[#allocation16_spill] sm:$0xff] %v7392_v0  ;;  %4146 = vmatmul.mubr.bf16.gmra.mrb[160].mxu1 %v3808_v31  ;;  %5783 = vmatmul.mubr.bf16.gmra.mrb[144].mxu0 %v2937_v36  ;;  %v2949_v31 = vsel %vm1037_vm5, %v2942_v15, %v2948_v50  ;;  %v3815_v0 = vld [vmem:[#allocation3 + $0x140] sm:$0xff] }
 0x18a   : > { %4153 = vmatprep.mubr.bf16.mxu1 %v3812_v48  ;;  %5786 = vmatprep.mubr.bf16.mxu0 %v2943_v27  ;;  %v2955_v27 = vsel %vm1037_vm5, %v2948_v50, %v2954_v1  ;;  %v3814_v50 = vld [vmem:[#allocation3 + $0x138] sm:$0xff] }
 0x18c   : > { %v7400_v16 = vpop.f32.mrb[56].mxu1  ;;  %v2244_v62 = vpop.f32.mrb[40].mxu0 }
 0x18d   : > { %v3274_v55 = vpop.f32.mrb[57].mxu1  ;;  %v2246_v42 = vpop.f32.mrb[41].mxu0  ;;  %v2960_v62 = vrot.slane %v7410_v32, 4 }
 0x18e   : > { %v7403_v21 = vpop.f32.mrb[58].mxu1  ;;  %v2247_v25 = vpop.f32.mrb[42].mxu0  ;;  %v2966_v42 = vrot.slane %v7178_v56, 4 }
 0x18f   : > { %7834 = vst [vmem:[#allocation17_spill] sm:$0xff] %v7403_v21  ;;  %v3277_v14 = vpop.f32.mrb[59].mxu1  ;;  %v7407_v36 = vadd.f32 %v7156_v26, %v2247_v25  ;;  %v2249_v48 = vpop.f32.mrb[43].mxu0  ;;  %v3821_v21 = vld [vmem:[#allocation3 + $0x170] sm:$0xff] }
 0x191   : > { %7835 = vst [vmem:[#allocation18_spill] sm:$0xff] %v7407_v36  ;;  %4154 = vmatmul.mubr.bf16.gmra.mrb[164].mxu1 %v3811_v12  ;;  %5787 = vmatmul.mubr.bf16.gmra.mrb[148].mxu0 %v2949_v31  ;;  %v2961_v12 = vsel %vm1037_vm5, %v2954_v1, %v2960_v62  ;;  %v2967_v36 = vsel %vm1037_vm5, %v2960_v62, %v2966_v42 }
 0x192   : > { %4161 = vmatprep.mubr.bf16.mxu1 %v3815_v0  ;;  %5790 = vmatprep.mubr.bf16.mxu0 %v2955_v27  ;;  %v3818_v0 = vld [vmem:[#allocation3 + $0x158] sm:$0xff] }
 0x194   : > { %v3280_v55 = vpop.f32.mrb[60].mxu1  ;;  %v2252_v15 = vpop.f32.mrb[44].mxu0 }
 0x195   : > { %v3282_v14 = vpop.f32.mrb[61].mxu1  ;;  %v7415_v43 = vadd.f32 %v7153_v20, %v2252_v15  ;;  %v2254_v26 = vpop.f32.mrb[45].mxu0  ;;  %v2702_v55 = vld [vmem:[#allocation3 + $0x268] sm:$0xf] }
 0x196   : > { %v7417_v25 = vpop.f32.mrb[62].mxu1  ;;  %v2255_v48 = vpop.f32.mrb[46].mxu0  ;;  %v2972_v56 = vrot.slane %v2702_v55, 4 }
 0x197   : > { %7836 = vst [vmem:[#allocation19_spill] sm:$0xff] %v7415_v43  ;;  %v3285_v31 = vpop.f32.mrb[63].mxu1  ;;  %v2257_v27 = vpop.f32.mrb[47].mxu0 }
 0x198   : > { %v3817_v31 = vld [vmem:[#allocation3 + $0x150] sm:$0xff]  ;;  %v2973_v27 = vsel %vm1037_vm5, %v2966_v42, %v2972_v56 }
 0x199   : > { %4162 = vmatmul.mubr.bf16.gmra.mrb[168].mxu1 %v3814_v50  ;;  %5791 = vmatmul.mubr.bf16.gmra.mrb[152].mxu0 %v2961_v12  ;;  %v6023_v12 = vld [vmem:[#allocation3 + $0x58] sm:$0xff] }
 0x19a   : > { %4169 = vmatprep.mubr.bf16.mxu1 %v3818_v0  ;;  %5794 = vmatprep.mubr.bf16.mxu0 %v2967_v36 }
 0x19c   : > { %v7421_v20 = vpop.f32.mrb[64].mxu1  ;;  %v2260_v15 = vpop.f32.mrb[48].mxu0 }
 0x19d   : > { %v3290_v14 = vpop.f32.mrb[65].mxu1  ;;  %v7424_v26 = vadd.f32 %v7167_v10, %v2260_v15  ;;  %v2262_v48 = vpop.f32.mrb[49].mxu0 }
 0x19e   : > { %v3291_v1 = vpop.f32.mrb[66].mxu1  ;;  %v2263_v43 = vpop.f32.mrb[50].mxu0  ;;  %v3820_v48 = vld [vmem:[#allocation3 + $0x168] sm:$0xff] }
 0x19f   : > { %v3293_v62 = vpop.f32.mrb[67].mxu1  ;;  %v7428_v50 = vadd.f32 %v7173_v54, %v2263_v43  ;;  %v2265_v36 = vpop.f32.mrb[51].mxu0  ;;  %v3824_v1 = vld [vmem:[#allocation3 + $0x188] sm:$0xff] }
 0x1a1   : > { %4170 = vmatmul.mubr.bf16.gmra.mrb[172].mxu1 %v3817_v31  ;;  %5795 = vmatmul.mubr.bf16.gmra.mrb[156].mxu0 %v2973_v27  ;;  %v6024_v31 = vld [vmem:[#allocation3 + $0x70] sm:$0xff] }
 0x1a2   : > { %4177 = vmatprep.mubr.bf16.mxu1 %v3821_v21  ;;  %5814 = vmatprep.mubr.bf16.mxu0 %v6023_v12  ;;  %v6025_v21 = vld [vmem:[#allocation3 + $0x88] sm:$0xff] }
 0x1a4   : > { %v7430_v0 = vpop.f32.mrb[68].mxu1  ;;  %v2268_v10 = vpop.f32.mrb[52].mxu0 }
 0x1a5   : > { %v3298_v55 = vpop.f32.mrb[69].mxu1  ;;  %v2270_v15 = vpop.f32.mrb[53].mxu0 }
 0x1a6   : > { %v7432_v14 = vpop.f32.mrb[70].mxu1  ;;  %v2271_v42 = vpop.f32.mrb[54].mxu0  ;;  %v3823_v15 = vld [vmem:[#allocation3 + $0x180] sm:$0xff] }
 0x1a7   : > { %v3301_v56 = vpop.f32.mrb[71].mxu1  ;;  %v7435_v54 = vadd.f32 %v7169_v5, %v2271_v42  ;;  %v2273_v43 = vpop.f32.mrb[55].mxu0  ;;  %v3827_v42 = vld [vmem:[#allocation3 + $0x1a0] sm:$0xff] }
 0x1a9   : > { %4178 = vmatmul.mubr.bf16.gmra.mrb[176].mxu1 %v3820_v48  ;;  %5815 = vmatmul.mubr.bf16.vlgmr.msra.gmra.mrb[160].mxu0 %v6024_v31  ;;  %v6026_v48 = vld [vmem:[#allocation3 + $0xa0] sm:$0xff] }
 0x1aa   : > { %4185 = vmatprep.mubr.bf16.mxu1 %v3824_v1  ;;  %5818 = vmatprep.mubr.bf16.mxu0 %v6025_v21  ;;  %v6027_v1 = vld [vmem:[#allocation3 + $0xb8] sm:$0xff] }
 0x1ac   : > { %v3304_v27 = vpop.f32.mrb[72].mxu1  ;;  %v2276_v62 = vpop.f32.mrb[56].mxu0 }
 0x1ad   : > { %v3306_v36 = vpop.f32.mrb[73].mxu1  ;;  %v7438_v12 = vadd.f32 %v7187_v23, %v2276_v62  ;;  %v2278_v10 = vpop.f32.mrb[57].mxu0 }
 0x1ae   : > { %v7440_v55 = vpop.f32.mrb[74].mxu1  ;;  %v2279_v56 = vpop.f32.mrb[58].mxu0  ;;  %v3826_v10 = vld [vmem:[#allocation3 + $0x198] sm:$0xff] }
 0x1af   : > { %7837 = vst [vmem:[#allocation20_spill] sm:$0xff] %v7438_v12  ;;  %v3309_v5 = vpop.f32.mrb[75].mxu1  ;;  %v2281_v43 = vpop.f32.mrb[59].mxu0  ;;  %v3830_v12 = vld [vmem:[#allocation3 + $0x1b8] sm:$0xff] }
 0x1b1   : > { %4186 = vmatmul.mubr.bf16.gmra.mrb[180].mxu1 %v3823_v15  ;;  %5819 = vmatmul.mubr.bf16.gmra.mrb[164].mxu0 %v6026_v48 }
 0x1b2   : > { %4193 = vmatprep.mubr.bf16.mxu1 %v3827_v42  ;;  %5822 = vmatprep.mubr.bf16.mxu0 %v6027_v1 }
 0x1b4   : > { %v7442_v31 = vpop.f32.mrb[76].mxu1  ;;  %v2284_v21 = vpop.f32.mrb[60].mxu0 }
 0x1b5   : > { %v3314_v27 = vpop.f32.mrb[77].mxu1  ;;  %v7445_v23 = vadd.f32 %v7185_v59, %v2284_v21  ;;  %v2286_v62 = vpop.f32.mrb[61].mxu0 }
 0x1b6   : > { %v3315_v36 = vpop.f32.mrb[78].mxu1  ;;  %v2287_v56 = vpop.f32.mrb[62].mxu0  ;;  %v3829_v27 = vld [vmem:[#allocation3 + $0x1b0] sm:$0xff] }
 0x1b7   : > { %v3317_v5 = vpop.f32.mrb[79].mxu1  ;;  %v7448_v15 = vadd.f32 %v7189_v38, %v2287_v56  ;;  %v2289_v43 = vpop.f32.mrb[63].mxu0 }
 0x1b8   : > { %v3833_v5 = vld [vmem:[#allocation3 + $0x1d0] sm:$0xff] }
 0x1b9   : > { %4194 = vmatmul.mubr.bf16.gmra.mrb[184].mxu1 %v3826_v10  ;;  %5823 = vmatmul.mubr.bf16.gmra.mrb[168].mxu0 %v7274_v51 }
 0x1ba   : > { %4201 = vmatprep.mubr.bf16.mxu1 %v3830_v12  ;;  %5826 = vmatprep.mubr.bf16.mxu0 %v7291_v18 }
 0x1bc   : > { %v7452_v42 = vpop.f32.mrb[80].mxu1  ;;  %v2292_v59 = vpop.f32.mrb[64].mxu0 }
 0x1bd   : > { %v3322_v48 = vpop.f32.mrb[81].mxu1  ;;  %v2294_v1 = vpop.f32.mrb[65].mxu0 }
 0x1be   : > { %v7454_v21 = vpop.f32.mrb[82].mxu1  ;;  %v2295_v62 = vpop.f32.mrb[66].mxu0  ;;  %v3832_v48 = vld [vmem:[#allocation3 + $0x1c8] sm:$0xff] }
 0x1bf   : > { %v3325_v36 = vpop.f32.mrb[83].mxu1  ;;  %v7457_v38 = vadd.f32 %v7216_v39, %v2295_v62  ;;  %v2297_v10 = vpop.f32.mrb[67].mxu0  ;;  %v3836_v62 = vld [vmem:[#allocation3 + $0x1e8] sm:$0xff] }
 0x1c1   : > { %4202 = vmatmul.mubr.bf16.gmra.mrb[188].mxu1 %v3829_v27  ;;  %5827 = vmatmul.mubr.bf16.gmra.mrb[172].mxu0 %v7296_v30 }
 0x1c2   : > { %4209 = vmatprep.mubr.bf16.mxu1 %v3833_v5  ;;  %5830 = vmatprep.mubr.bf16.mxu0 %v7311_v63 }
 0x1c4   : > { %v3328_v51 = vpop.f32.mrb[84].mxu1  ;;  %v2300_v18 = vpop.f32.mrb[68].mxu0 }
 0x1c5   : > { %v3330_v12 = vpop.f32.mrb[85].mxu1  ;;  %v7462_v56 = vadd.f32 %v7210_v17, %v2300_v18  ;;  %v2302_v43 = vpop.f32.mrb[69].mxu0  ;;  %v3835_v51 = vld [vmem:[#allocation3 + $0x1e0] sm:$0xff] }
 0x1c6   : > { %v7464_v59 = vpop.f32.mrb[86].mxu1  ;;  %v2303_v1 = vpop.f32.mrb[70].mxu0  ;;  %v3839_v43 = vld [vmem:[#allocation3 + $0x200] sm:$0xff] }
 0x1c7   : > { %v3333_v39 = vpop.f32.mrb[87].mxu1  ;;  %v2305_v36 = vpop.f32.mrb[71].mxu0 }
 0x1c8   : > { %v3838_v36 = vld [vmem:[#allocation3 + $0x1f8] sm:$0xff] }
 0x1c9   : > { %4210 = vmatmul.mubr.bf16.gmra.mrb[192].mxu1 %v3832_v48  ;;  %5831 = vmatmul.mubr.bf16.gmra.mrb[176].mxu0 %v7316_v45 }
 0x1ca   : > { %4217 = vmatprep.mubr.bf16.mxu1 %v3836_v62  ;;  %5834 = vmatprep.mubr.bf16.mxu0 %v7326_v11 }
 0x1cc   : > { %v7468_v30 = vpop.f32.mrb[88].mxu1  ;;  %v2308_v63 = vpop.f32.mrb[72].mxu0 }
 0x1cd   : > { %v3338_v27 = vpop.f32.mrb[89].mxu1  ;;  %v7471_v17 = vadd.f32 %v7234_v19, %v2308_v63  ;;  %v2310_v5 = vpop.f32.mrb[73].mxu0 }
 0x1ce   : > { %v3339_v10 = vpop.f32.mrb[90].mxu1  ;;  %v2311_v18 = vpop.f32.mrb[74].mxu0  ;;  %v3842_v5 = vld [vmem:[#allocation3 + $0x218] sm:$0xff] }
 0x1cf   : > { %v3341_v12 = vpop.f32.mrb[91].mxu1  ;;  %v7474_v48 = vadd.f32 %v7239_v3, %v2311_v18  ;;  %v2313_v45 = vpop.f32.mrb[75].mxu0 }
 0x1d0   : > { %v3841_v45 = vld [vmem:[#allocation3 + $0x210] sm:$0xff] }
 0x1d1   : > { %4218 = vmatmul.mubr.bf16.gmra.mrb[196].mxu1 %v3835_v51  ;;  %5835 = vmatmul.mubr.bf16.gmra.mrb[180].mxu0 %v7328_v57 }
 0x1d2   : > { %4225 = vmatprep.mubr.bf16.mxu1 %v3839_v43  ;;  %5838 = vmatprep.mubr.bf16.mxu0 %v7340_v7 }
 0x1d4   : > { %v7478_v11 = vpop.f32.mrb[92].mxu1  ;;  %v2316_v19 = vpop.f32.mrb[76].mxu0 }
 0x1d5   : > { %v3346_v1 = vpop.f32.mrb[93].mxu1  ;;  %v2318_v39 = vpop.f32.mrb[77].mxu0 }
 0x1d6   : > { %v7480_v62 = vpop.f32.mrb[94].mxu1  ;;  %v2319_v63 = vpop.f32.mrb[78].mxu0  ;;  %v3845_v1 = vld [vmem:[#allocation3 + $0x230] sm:$0xff] }
 0x1d7   : > { %v3349_v27 = vpop.f32.mrb[95].mxu1  ;;  %v7483_v3 = vadd.f32 %v7236_v47, %v2319_v63  ;;  %v2321_v10 = vpop.f32.mrb[79].mxu0 }
 0x1d9   : > { %4226 = vmatmul.mubr.bf16.gmra.mrb[200].mxu1 %v3838_v36  ;;  %5839 = vmatmul.mubr.bf16.gmra.mrb[184].mxu0 %v7342_v60 }
 0x1da   : > { %4233 = vmatprep.mubr.bf16.mxu1 %v3842_v5  ;;  %5842 = vmatprep.mubr.bf16.mxu0 %v7356_v53  ;;  %v3844_v5 = vld [vmem:[#allocation3 + $0x228] sm:$0xff] }
 0x1dc   : > { %v3352_v57 = vpop.f32.mrb[96].mxu1  ;;  %v2324_v7 = vpop.f32.mrb[80].mxu0 }
 0x1dd   : > { %v3354_v51 = vpop.f32.mrb[97].mxu1  ;;  %v7488_v18 = vadd.f32 %v7260_v28, %v2324_v7  ;;  %v2326_v12 = vpop.f32.mrb[81].mxu0  ;;  %v3848_v7 = vld [vmem:[#allocation3 + $0x248] sm:$0xff] }
 0x1de   : > { %v7490_v43 = vpop.f32.mrb[98].mxu1  ;;  %v2327_v19 = vpop.f32.mrb[82].mxu0 }
 0x1df   : > { %7838 = vst [vmem:[#allocation21_spill] sm:$0xff] %v7488_v18  ;;  %v3357_v47 = vpop.f32.mrb[99].mxu1  ;;  %v2329_v39 = vpop.f32.mrb[83].mxu0 }
 0x1e0   : > { %v3847_v47 = vld [vmem:[#allocation3 + $0x240] sm:$0xff] }
 0x1e1   : > { %4234 = vmatmul.mubr.bf16.gmra.mrb[204].mxu1 %v3841_v45  ;;  %5843 = vmatmul.mubr.bf16.gmra.mrb[188].mxu0 %v7358_v4 }
 0x1e2   : > { %4241 = vmatprep.mubr.bf16.mxu1 %v3845_v1  ;;  %5846 = vmatprep.mubr.bf16.mxu0 %v7371_v22 }
 0x1e4   : > { %v7494_v60 = vpop.f32.mrb[100].mxu1  ;;  %v2332_v53 = vpop.f32.mrb[84].mxu0 }
 0x1e5   : > { %v3362_v36 = vpop.f32.mrb[101].mxu1  ;;  %v7497_v28 = vadd.f32 %v7258_v34, %v2332_v53  ;;  %v2334_v63 = vpop.f32.mrb[85].mxu0 }
 0x1e6   : > { %v3363_v27 = vpop.f32.mrb[102].mxu1  ;;  %v2335_v10 = vpop.f32.mrb[86].mxu0 }
 0x1e7   : > { %v3365_v57 = vpop.f32.mrb[103].mxu1  ;;  %v7500_v51 = vadd.f32 %v7263_v46, %v2335_v10  ;;  %v2337_v4 = vpop.f32.mrb[87].mxu0 }
 0x1e8   : > { %v3850_v57 = vld [vmem:[#allocation3 + $0x258] sm:$0xff] }
 0x1e9   : > { %7839 = vst [vmem:[#allocation22_spill] sm:$0xff] %v7500_v51  ;;  %4242 = vmatmul.mubr.bf16.gmra.mrb[208].mxu1 %v3844_v5  ;;  %5847 = vmatmul.mubr.bf16.gmra.mrb[192].mxu0 %v7373_v13  ;;  %v6028_v13 = vld [vmem:[#allocation3 + $0x260] sm:$0xff] }
 0x1ea   : > { %4249 = vmatprep.mubr.bf16.mxu1 %v3848_v7  ;;  %5850 = vmatprep.mubr.bf16.mxu0 %v7395_v44 }
 0x1ec   : > { %v7504_v22 = vpop.f32.mrb[104].mxu1  ;;  %v2340_v34 = vpop.f32.mrb[88].mxu0 }
 0x1ed   : > { %v3370_v12 = vpop.f32.mrb[105].mxu1  ;;  %v2342_v45 = vpop.f32.mrb[89].mxu0  ;;  %v6029_v34 = vld [vmem:[#allocation3 + $0x250] sm:$0xff] }
 0x1ee   : > { %v7506_v19 = vpop.f32.mrb[106].mxu1  ;;  %v2343_v1 = vpop.f32.mrb[90].mxu0 }
 0x1ef   : > { %v3373_v39 = vpop.f32.mrb[107].mxu1  ;;  %v7509_v46 = vadd.f32 %v7288_v37, %v2343_v1  ;;  %v2345_v53 = vpop.f32.mrb[91].mxu0  ;;  %v3853_v1 = vld [vmem:[#allocation3 + $0x270] sm:$0xff] }
 0x1f1   : > { %7840 = vst [vmem:[#allocation23_spill] sm:$0xff] %v7509_v46  ;;  %4250 = vmatmul.mubr.bf16.gmra.mrb[212].mxu1 %v3847_v47  ;;  %5851 = vmatmul.mubr.bf16.gmra.mrb[196].mxu0 %v7397_v40  ;;  %v6030_v40 = vld [vmem:[#allocation3 + $0x268] sm:$0xff] }
 0x1f2   : > { %4257 = vmatprep.mubr.bf16.mxu1 %v6028_v13  ;;  %5854 = vmatprep.mubr.bf16.mxu0 %v7410_v32 }
 0x1f4   : > { %v3376_v44 = vpop.f32.mrb[108].mxu1  ;;  %v2348_v36 = vpop.f32.mrb[92].mxu0 }
 0x1f5   : > { %v3378_v63 = vpop.f32.mrb[109].mxu1  ;;  %v7514_v27 = vadd.f32 %v7279_v6, %v2348_v36  ;;  %v2350_v5 = vpop.f32.mrb[93].mxu0 }
 0x1f6   : > { %v7516_v10 = vpop.f32.mrb[110].mxu1  ;;  %v2351_v37 = vpop.f32.mrb[94].mxu0 }
 0x1f7   : > { %7841 = vst [vmem:[#allocation24_spill] sm:$0xff] %v7514_v27  ;;  %v3381_v7 = vpop.f32.mrb[111].mxu1  ;;  %v2353_v4 = vpop.f32.mrb[95].mxu0 }
 0x1f9   : > { %4258 = vmatmul.mubr.bf16.gmra.mrb[216].mxu1 %v3850_v57  ;;  %5855 = vmatmul.mubr.bf16.gmra.mrb[200].mxu0 %v6029_v34 }
 0x1fa   : > { %4265 = vmatprep.mubr.bf16.mxu1 %v7381_v8  ;;  %5858 = vmatprep.mubr.bf16.mxu0 %v6030_v40 }
 0x1fc   : > { %v7519_v32 = vpop.f32.mrb[112].mxu1  ;;  %v5688_v12 = vpop.f32.mrb[96].mxu0 }
 0x1fd   : > { %v3386_v45 = vpop.f32.mrb[113].mxu1  ;;  %v2389_v6 = vpop.f32.mrb[97].mxu0 }
 0x1fe   : > { %v3387_v47 = vpop.f32.mrb[114].mxu1  ;;  %v2390_v39 = vadd.f32 %v2389_v6, %v7204_v33  ;;  %v5689_v53 = vpop.f32.mrb[98].mxu0 }
 0x1ff   : > { %v3389_v13 = vpop.f32.mrb[115].mxu1  ;;  %v2401_v44 = vadd.f32 %v5689_v53, %v7227_v9  ;;  %v2392_v36 = vpop.f32.mrb[99].mxu0 }
 0x200   : > { %v2393_v63 = vadd.f32 %v2392_v36, %v7212_v58 }
 0x201   : > { %4266 = vmatmul.mubr.bf16.gmra.mrb[220].mxu1 %v3853_v1  ;;  %5859 = vmatmul.mubr.bf16.gmra.mrb[204].mxu0 %v7378_v24 }
 0x204   : > { %v7525_v8 = vpop.f32.mrb[116].mxu1  ;;  %v5692_v5 = vpop.f32.mrb[100].mxu0 }
 0x205   : > { %v3394_v57 = vpop.f32.mrb[117].mxu1  ;;  %v2414_v37 = vadd.f32 %v5692_v5, %v7276_v2  ;;  %v2405_v7 = vpop.f32.mrb[101].mxu0 }
 0x206   : > { %v7528_v4 = vpop.f32.mrb[118].mxu1  ;;  %v2406_v33 = vadd.f32 %v2405_v7, %v7251_v61  ;;  %v5693_v34 = vpop.f32.mrb[102].mxu0 }
 0x207   : > { %v3397_v40 = vpop.f32.mrb[119].mxu1  ;;  %v2417_v9 = vadd.f32 %v5693_v34, %v7285_v49  ;;  %v2408_v12 = vpop.f32.mrb[103].mxu0  ;;  %v7844_v34 = vld [vmem:[#allocation9_spill] sm:$0xff] }
 0x20c   : > { %v3400_v58 = vpop.f32.mrb[120].mxu1  ;;  %v5696_v45 = vpop.f32.mrb[104].mxu0 }
 0x20d   : > { %v3402_v6 = vpop.f32.mrb[121].mxu1  ;;  %v2430_v24 = vadd.f32 %v5696_v45, %v7320_v41  ;;  %v2421_v47 = vpop.f32.mrb[105].mxu0 }
 0x20e   : > { %v7533_v1 = vpop.f32.mrb[122].mxu1  ;;  %v5697_v53 = vpop.f32.mrb[106].mxu0  ;;  %v7845_v6 = vld [vmem:[#allocation13_spill] sm:$0xff]  ;;  %v7846_v47 = vld [vmem:[#allocation10_spill] sm:$0xff] }
 0x20f   : > { %7842 = vst [vmem:[#allocation25_spill] sm:$0xff] %v7533_v1  ;;  %v3405_v2 = vpop.f32.mrb[123].mxu1  ;;  %v2424_v13 = vpop.f32.mrb[107].mxu0 }
 0x210   : > { %v2425_v36 = vadd.f32 %v2424_v13, %v7307_v52 }
 0x214   : > { %v7536_v5 = vpop.f32.mrb[124].mxu1  ;;  %v5700_v61 = vpop.f32.mrb[108].mxu0 }
 0x215   : > { %7843 = vst [vmem:[#allocation26_spill] sm:$0xff] %v7536_v5  ;;  %v3410_v57 = vpop.f32.mrb[125].mxu1  ;;  %v2437_v7 = vpop.f32.mrb[109].mxu0  ;;  %v7849_v61 = vld [vmem:[#allocation5_spill] sm:$0xff]  ;;  %v7850_v5 = vld [vmem:[#allocation7_spill] sm:$0xff] }
 0x216   : > { %v3411_v49 = vpop.f32.mrb[126].mxu1  ;;  %v2438_v40 = vadd.f32 %v2437_v7, %v7844_v34  ;;  %v5701_v12 = vpop.f32.mrb[110].mxu0 }
 0x217   : > { %v3413_v58 = vpop.f32.mrb[127].mxu1  ;;  %v2449_v41 = vadd.f32 %v5701_v12, %v7845_v6  ;;  %v2440_v45 = vpop.f32.mrb[111].mxu0  ;;  %v7851_v12 = vld [vmem:[#allocation6_spill] sm:$0xff] }
 0x218   : > { %v2441_v46 = vadd.f32 %v2440_v45, %v7846_v47 }
 0x21c   : > { %v7541_v53 = vpop.f32.mrb[128].mxu1  ;;  %v5752_v2 = vpop.f32.mrb[112].mxu0 }
 0x21d   : > { %7847 = vst [vmem:[#allocation9_spill] sm:$0xff] %v7541_v53  ;;  %v4085_v1 = vpop.f32.mrb[129].mxu1  ;;  %v3449_v52 = vpop.f32.mrb[113].mxu0  ;;  %v7852_v53 = vld [vmem:[#allocation11_spill] sm:$0xff] }
 0x21e   : > { %v7543_v13 = vpop.f32.mrb[130].mxu1  ;;  %v3450_v57 = vadd.f32 %v3449_v52, %v7849_v61  ;;  %v5753_v27 = vpop.f32.mrb[114].mxu0  ;;  %v7853_v61 = vld [vmem:[#allocation8_spill] sm:$0xff] }
 0x21f   : > { %7848 = vst [vmem:[#allocation13_spill] sm:$0xff] %v7543_v13  ;;  %v4088_v49 = vpop.f32.mrb[131].mxu1  ;;  %v3461_v7 = vadd.f32 %v5753_v27, %v7850_v5  ;;  %v3452_v34 = vpop.f32.mrb[115].mxu0 }
 0x220   : > { %v7547_v58 = vadd.f32 %v3450_v57, %v2390_v39  ;;  %v3453_v6 = vadd.f32 %v3452_v34, %v7851_v12  ;;  %v7854_v57 = vld [vmem:[#allocation12_spill] sm:$0xff] }
 0x221   : > { %v7550_v51 = vadd.f32 %v3461_v7, %v2401_v44 }
 0x222   : > { %v7552_v45 = vadd.f32 %v3453_v6, %v2393_v63 }
 0x224   : > { %v4091_v47 = vpop.f32.mrb[132].mxu1  ;;  %v5756_v1 = vpop.f32.mrb[116].mxu0 }
 0x225   : > { %v4093_v2 = vpop.f32.mrb[133].mxu1  ;;  %v3474_v13 = vadd.f32 %v5756_v1, %v7852_v53  ;;  %v3465_v18 = vpop.f32.mrb[117].mxu0 }
 0x226   : > { %v7555_v52 = vpop.f32.mrb[134].mxu1  ;;  %v3466_v49 = vadd.f32 %v3465_v18, %v7853_v61  ;;  %v5757_v27 = vpop.f32.mrb[118].mxu0 }
 0x227   : > { %v4096_v5 = vpop.f32.mrb[135].mxu1  ;;  %v7558_v39 = vadd.f32 %v3474_v13, %v2414_v37  ;;  %v3477_v34 = vadd.f32 %v5757_v27, %v7854_v57  ;;  %v3468_v44 = vpop.f32.mrb[119].mxu0 }
 0x228   : > { %v7561_v7 = vadd.f32 %v3466_v49, %v2406_v33 }
 0x229   : > { %v7563_v63 = vadd.f32 %v3477_v34, %v2417_v9 }
 0x22c   : > { %v7565_v12 = vpop.f32.mrb[136].mxu1  ;;  %v5760_v6 = vpop.f32.mrb[120].mxu0 }
 0x22d   : > { %v4101_v53 = vpop.f32.mrb[137].mxu1  ;;  %v3490_v47 = vadd.f32 %v5760_v6, %v7384_v35  ;;  %v3481_v1 = vpop.f32.mrb[121].mxu0 }
 0x22e   : > { %v4102_v2 = vpop.f32.mrb[138].mxu1  ;;  %v5761_v18 = vpop.f32.mrb[122].mxu0  ;;  %v7855_v1 = vld [vmem:[#allocation17_spill] sm:$0xff] }
 0x22f   : > { %v4104_v61 = vpop.f32.mrb[139].mxu1  ;;  %v7568_v5 = vadd.f32 %v3490_v47, %v2430_v24  ;;  %v3484_v37 = vpop.f32.mrb[123].mxu0 }
 0x230   : > { %v3485_v13 = vadd.f32 %v3484_v37, %v7366_v29 }
 0x232   : > { %v7571_v27 = vadd.f32 %v3485_v13, %v2425_v36 }
 0x234   : > { %v7573_v33 = vpop.f32.mrb[140].mxu1  ;;  %v5764_v9 = vpop.f32.mrb[124].mxu0 }
 0x235   : > { %v4109_v49 = vpop.f32.mrb[141].mxu1  ;;  %v3497_v57 = vpop.f32.mrb[125].mxu0 }
 0x236   : > { %v7575_v34 = vpop.f32.mrb[142].mxu1  ;;  %v3498_v35 = vadd.f32 %v3497_v57, %v7400_v16  ;;  %v5765_v44 = vpop.f32.mrb[126].mxu0 }
 0x237   : > { %v4112_v6 = vpop.f32.mrb[143].mxu1  ;;  %v3509_v53 = vadd.f32 %v5765_v44, %v7417_v25  ;;  %v3500_v24 = vpop.f32.mrb[127].mxu0 }
 0x238   : > { %v7579_v47 = vadd.f32 %v3498_v35, %v2438_v40  ;;  %v3501_v29 = vadd.f32 %v3500_v24, %v7855_v1  ;;  %v7856_v40 = vld [vmem:[#allocation15_spill] sm:$0xff] }
 0x239   : > { %v7582_v36 = vadd.f32 %v3509_v53, %v2449_v41  ;;  %v7858_v53 = vld [vmem:[#allocation16_spill] sm:$0xff] }
 0x23a   : > { %v7584_v2 = vadd.f32 %v3501_v29, %v2441_v46  ;;  %v7857_v46 = vld [vmem:[#allocation14_spill] sm:$0xff] }
 0x23c   : > { %v4115_v18 = vpop.f32.mrb[144].mxu1  ;;  %v5768_v61 = vpop.f32.mrb[128].mxu0 }
 0x23d   : > { %v4117_v37 = vpop.f32.mrb[145].mxu1  ;;  %v3522_v13 = vadd.f32 %v5768_v61, %v7430_v0  ;;  %v3513_v9 = vpop.f32.mrb[129].mxu0 }
 0x23e   : > { %v7587_v16 = vpop.f32.mrb[146].mxu1  ;;  %v3514_v49 = vadd.f32 %v3513_v9, %v7421_v20  ;;  %v5769_v25 = vpop.f32.mrb[130].mxu0  ;;  %v7859_v9 = vld [vmem:[#allocation19_spill] sm:$0xff] }
 0x23f   : > { %v4120_v57 = vpop.f32.mrb[147].mxu1  ;;  %v7591_v35 = vadd.f32 %v3522_v13, %v7856_v40  ;;  %v3525_v41 = vadd.f32 %v5769_v25, %v7432_v14  ;;  %v3516_v44 = vpop.f32.mrb[131].mxu0  ;;  %v7860_v25 = vld [vmem:[#allocation18_spill] sm:$0xff] }
 0x240   : > { %v7595_v6 = vadd.f32 %v3514_v49, %v7857_v46 }
 0x241   : > { %v7598_v24 = vadd.f32 %v3525_v41, %v7858_v53 }
 0x244   : > { %v7600_v0 = vpop.f32.mrb[148].mxu1  ;;  %v5772_v1 = vpop.f32.mrb[132].mxu0 }
 0x245   : > { %v4125_v29 = vpop.f32.mrb[149].mxu1  ;;  %v3538_v20 = vadd.f32 %v5772_v1, %v7442_v31  ;;  %v3529_v18 = vpop.f32.mrb[133].mxu0 }
 0x246   : > { %v4126_v61 = vpop.f32.mrb[150].mxu1  ;;  %v5773_v37 = vpop.f32.mrb[134].mxu0 }
 0x247   : > { %v4128_v13 = vpop.f32.mrb[151].mxu1  ;;  %v7604_v57 = vadd.f32 %v3538_v20, %v7859_v9  ;;  %v3532_v14 = vpop.f32.mrb[135].mxu0 }
 0x248   : > { %v3533_v49 = vadd.f32 %v3532_v14, %v7440_v55 }
 0x24a   : > { %v7608_v40 = vadd.f32 %v3533_v49, %v7860_v25 }
 0x24c   : > { %v7610_v41 = vpop.f32.mrb[152].mxu1  ;;  %v5776_v44 = vpop.f32.mrb[136].mxu0 }
 0x24d   : > { %v4133_v46 = vpop.f32.mrb[153].mxu1  ;;  %v3545_v53 = vpop.f32.mrb[137].mxu0 }
 0x24e   : > { %v7612_v29 = vpop.f32.mrb[154].mxu1  ;;  %v3546_v31 = vadd.f32 %v3545_v53, %v7452_v42  ;;  %v5777_v1 = vpop.f32.mrb[138].mxu0 }
 0x24f   : > { %v4136_v18 = vpop.f32.mrb[155].mxu1  ;;  %v3557_v20 = vadd.f32 %v5777_v1, %v7464_v59  ;;  %v3548_v61 = vpop.f32.mrb[139].mxu0 }
 0x250   : > { %v7617_v37 = vadd.f32 %v3546_v31, %v7424_v26  ;;  %v3549_v55 = vadd.f32 %v3548_v61, %v7454_v21 }
 0x251   : > { %v7621_v13 = vadd.f32 %v3557_v20, %v7435_v54 }
 0x252   : > { %v7624_v9 = vadd.f32 %v3549_v55, %v7428_v50  ;;  %v7861_v50 = vld [vmem:[#allocation20_spill] sm:$0xff] }
 0x254   : > { %v4139_v14 = vpop.f32.mrb[156].mxu1  ;;  %v5780_v49 = vpop.f32.mrb[140].mxu0 }
 0x255   : > { %v4141_v25 = vpop.f32.mrb[157].mxu1  ;;  %v3570_v42 = vadd.f32 %v5780_v49, %v7478_v11  ;;  %v3561_v44 = vpop.f32.mrb[141].mxu0 }
 0x256   : > { %v7627_v46 = vpop.f32.mrb[158].mxu1  ;;  %v3562_v59 = vadd.f32 %v3561_v44, %v7468_v30  ;;  %v5781_v26 = vpop.f32.mrb[142].mxu0 }
 0x257   : > { %v4144_v53 = vpop.f32.mrb[159].mxu1  ;;  %v7631_v21 = vadd.f32 %v3570_v42, %v7445_v23  ;;  %v3573_v54 = vadd.f32 %v5781_v26, %v7480_v62  ;;  %v3564_v31 = vpop.f32.mrb[143].mxu0 }
 0x258   : > { %v7635_v1 = vadd.f32 %v3562_v59, %v7861_v50 }
 0x259   : > { %v7638_v18 = vadd.f32 %v3573_v54, %v7448_v15 }
 0x25c   : > { %v7640_v11 = vpop.f32.mrb[160].mxu1  ;;  %v5784_v20 = vpop.f32.mrb[144].mxu0 }
 0x25d   : > { %v4149_v61 = vpop.f32.mrb[161].mxu1  ;;  %v3586_v30 = vadd.f32 %v5784_v20, %v7494_v60  ;;  %v3577_v55 = vpop.f32.mrb[145].mxu0 }
 0x25e   : > { %v4150_v14 = vpop.f32.mrb[162].mxu1  ;;  %v5785_v49 = vpop.f32.mrb[146].mxu0 }
 0x25f   : > { %v4152_v23 = vpop.f32.mrb[163].mxu1  ;;  %v7644_v25 = vadd.f32 %v3586_v30, %v7462_v56  ;;  %v3580_v62 = vpop.f32.mrb[147].mxu0 }
 0x260   : > { %v3581_v42 = vadd.f32 %v3580_v62, %v7490_v43 }
 0x262   : > { %v7648_v44 = vadd.f32 %v3581_v42, %v7457_v38 }
 0x264   : > { %v7650_v15 = vpop.f32.mrb[164].mxu1  ;;  %v5788_v59 = vpop.f32.mrb[148].mxu0 }
 0x265   : > { %v4157_v26 = vpop.f32.mrb[165].mxu1  ;;  %v3593_v53 = vpop.f32.mrb[149].mxu0 }
 0x266   : > { %v7652_v54 = vpop.f32.mrb[166].mxu1  ;;  %v3594_v60 = vadd.f32 %v3593_v53, %v7504_v22  ;;  %v5789_v31 = vpop.f32.mrb[150].mxu0  ;;  %v7863_v53 = vld [vmem:[#allocation22_spill] sm:$0xff] }
 0x267   : > { %v4160_v50 = vpop.f32.mrb[167].mxu1  ;;  %v3605_v56 = vadd.f32 %v5789_v31, %v7516_v10  ;;  %v3596_v20 = vpop.f32.mrb[151].mxu0 }
 0x268   : > { %v7657_v61 = vadd.f32 %v3594_v60, %v7471_v17  ;;  %v3597_v38 = vadd.f32 %v3596_v20, %v7506_v19 }
 0x269   : > { %v7661_v43 = vadd.f32 %v3605_v56, %v7483_v3  ;;  %v7864_v56 = vld [vmem:[#allocation26_spill] sm:$0xff] }
 0x26a   : > { %v7664_v30 = vadd.f32 %v3597_v38, %v7474_v48  ;;  %v7862_v48 = vld [vmem:[#allocation21_spill] sm:$0xff] }
 0x26c   : > { %v4163_v55 = vpop.f32.mrb[168].mxu1  ;;  %v5792_v14 = vpop.f32.mrb[152].mxu0 }
 0x26d   : > { %v4165_v49 = vpop.f32.mrb[169].mxu1  ;;  %v3618_v22 = vadd.f32 %v5792_v14, %v7525_v8  ;;  %v3609_v23 = vpop.f32.mrb[153].mxu0  ;;  %v7865_v14 = vld [vmem:[#allocation24_spill] sm:$0xff] }
 0x26e   : > { %v7667_v62 = vpop.f32.mrb[170].mxu1  ;;  %v3610_v10 = vadd.f32 %v3609_v23, %v7519_v32  ;;  %v5793_v17 = vpop.f32.mrb[154].mxu0 }
 0x26f   : > { %v4168_v42 = vpop.f32.mrb[171].mxu1  ;;  %v7671_v19 = vadd.f32 %v3618_v22, %v7497_v28  ;;  %v3621_v3 = vadd.f32 %v5793_v17, %v7528_v4  ;;  %v3612_v59 = vpop.f32.mrb[155].mxu0  ;;  %v7866_v22 = vld [vmem:[#allocation25_spill] sm:$0xff] }
 0x270   : > { %v7675_v26 = vadd.f32 %v3610_v10, %v7862_v48  ;;  %v7867_v10 = vld [vmem:[#allocation23_spill] sm:$0xff] }
 0x271   : > { %v7678_v60 = vadd.f32 %v3621_v3, %v7863_v53 }
 0x274   : > { %v7680_v8 = vpop.f32.mrb[172].mxu1  ;;  %v5796_v31 = vpop.f32.mrb[156].mxu0 }
 0x275   : > { %v4173_v50 = vpop.f32.mrb[173].mxu1  ;;  %v3634_v32 = vadd.f32 %v5796_v31, %v7864_v56  ;;  %v3625_v20 = vpop.f32.mrb[157].mxu0  ;;  %v7868_v31 = vld [vmem:[#allocation9_spill] sm:$0xff] }
 0x276   : > { %v4174_v38 = vpop.f32.mrb[174].mxu1  ;;  %v5797_v55 = vpop.f32.mrb[158].mxu0 }
 0x277   : > { %v4176_v28 = vpop.f32.mrb[175].mxu1  ;;  %v7684_v4 = vadd.f32 %v3634_v32, %v7865_v14  ;;  %v3628_v49 = vpop.f32.mrb[159].mxu0 }
 0x278   : > { %v3629_v23 = vadd.f32 %v3628_v49, %v7866_v22  ;;  %v7869_v28 = vld [vmem:[#allocation13_spill] sm:$0xff] }
 0x27a   : > { %v7688_v17 = vadd.f32 %v3629_v23, %v7867_v10 }
 0x27c   : > { %v7690_v42 = vpop.f32.mrb[176].mxu1  ;;  %v5816_v3 = vpop.f32.mrb[160].mxu0 }
 0x27d   : > { %v4181_v59 = vpop.f32.mrb[177].mxu1  ;;  %v4308_v48 = vpop.f32.mrb[161].mxu0 }
 0x27e   : > { %v7692_v53 = vpop.f32.mrb[178].mxu1  ;;  %v4309_v50 = vadd.f32 %v4308_v48, %v7868_v31  ;;  %v5817_v56 = vpop.f32.mrb[162].mxu0 }
 0x27f   : > { %v4184_v20 = vpop.f32.mrb[179].mxu1  ;;  %v4320_v32 = vadd.f32 %v5817_v56, %v7555_v52  ;;  %v4311_v38 = vpop.f32.mrb[163].mxu0 }
 0x280   : > { %v4547_v55 = vadd.f32 %v4309_v50, %v7547_v58  ;;  %v4312_v14 = vadd.f32 %v4311_v38, %v7869_v28 }
 0x281   : > { %v4550_v49 = vadd.f32 %v4320_v32, %v7550_v51 }
 0x282   : > { %v4548_v22 = vadd.f32 %v4312_v14, %v7552_v45  ;;  %v4872_v10 = vmul.f32 %v4547_v55, %v4547_v55 }
 0x283   : > { %v4874_v51 = vmul.f32 %v4550_v49, %v4550_v49 }
 0x284   : > { %v4187_v23 = vpop.f32.mrb[180].mxu1  ;;  %v5481_v3 = vpack.c.bf16 %v4548_v22, %v4547_v55  ;;  %v4835_v52 = vadd.f32 %v4548_v22, %v4547_v55  ;;  %v4873_v59 = vmul.f32 %v4548_v22, %v4548_v22  ;;  %v5820_v48 = vpop.f32.mrb[164].mxu0 }
 0x285   : > { %v4189_v58 = vpop.f32.mrb[181].mxu1  ;;  %v4333_v31 = vadd.f32 %v5820_v48, %v7573_v33  ;;  %v4324_v50 = vpop.f32.mrb[165].mxu0 }
 0x286   : > { %v7707_v56 = vpop.f32.mrb[182].mxu1  ;;  %5482 = vst [vmem:[%s7704_s16] sm:$0xff] %v5481_v3   ;;  %v4904_v45 = vadd.f32 %v4873_v59, %v4872_v10  ;;  %v4325_v20 = vadd.f32 %v4324_v50, %v7565_v12  ;;  %v4836_v32 = vadd.f32 %v4835_v52, %v4550_v49  ;;  %v5821_v38 = vpop.f32.mrb[166].mxu0 }
 0x287   : > { %v4192_v28 = vpop.f32.mrb[183].mxu1  ;;  %v4553_v14 = vadd.f32 %v4333_v31, %v7558_v39  ;;  %v4336_v55 = vadd.f32 %v5821_v38, %v7575_v34  ;;  %v4327_v22 = vpop.f32.mrb[167].mxu0 }
 0x288   : > { %v4551_v33 = vadd.f32 %v4325_v20, %v7561_v7  ;;  %v4905_v23 = vadd.f32 %v4904_v45, %v4874_v51 }
 0x289   : > { %v4554_v48 = vadd.f32 %v4336_v55, %v7563_v63  ;;  %v4876_v52 = vmul.f32 %v4553_v14, %v4553_v14 }
 0x28a   : > { %v5486_v58 = vpack.c.bf16 %v4551_v33, %v4550_v49  ;;  %v4837_v3 = vadd.f32 %v4836_v32, %v4551_v33  ;;  %v4875_v10 = vmul.f32 %v4551_v33, %v4551_v33 }
 0x28b   : > { %v5491_v59 = vpack.c.bf16 %v4554_v48, %v4553_v14  ;;  %v4877_v45 = vmul.f32 %v4554_v48, %v4554_v48 }
 0x28c   : > { %v7715_v12 = vpop.f32.mrb[184].mxu1  ;;  %5559 = vst [vmem:[%s7704_s16 + $0x8] sm:$0xff] %v5486_v58   ;;  %v4906_v50 = vadd.f32 %v4905_v23, %v4875_v10  ;;  %v4838_v28 = vadd.f32 %v4837_v3, %v4553_v14  ;;  %v5824_v39 = vpop.f32.mrb[168].mxu0 }
 0x28d   : > { %v4197_v31 = vpop.f32.mrb[185].mxu1  ;;  %5560 = vst [vmem:[%s7704_s16 + $0x10] sm:$0xff] %v5491_v59   ;;  %v4349_v34 = vadd.f32 %v5824_v39, %v7600_v0  ;;  %v4340_v38 = vpop.f32.mrb[169].mxu0 }
 0x28e   : > { %v4198_v7 = vpop.f32.mrb[186].mxu1  ;;  %v4839_v51 = vadd.f32 %v4838_v28, %v4554_v48  ;;  %v4907_v63 = vadd.f32 %v4906_v50, %v4876_v52  ;;  %v5825_v49 = vpop.f32.mrb[170].mxu0 }
 0x28f   : > { %v4200_v20 = vpop.f32.mrb[187].mxu1  ;;  %v4557_v32 = vadd.f32 %v4349_v34, %v7568_v5  ;;  %v4343_v55 = vpop.f32.mrb[171].mxu0 }
 0x290   : > { %v4908_v22 = vadd.f32 %v4907_v63, %v4877_v45  ;;  %v4344_v33 = vadd.f32 %v4343_v55, %v7587_v16 }
 0x291   : > { %v4879_v50 = vmul.f32 %v4557_v32, %v4557_v32 }
 0x292   : > { %v4556_v14 = vadd.f32 %v4344_v33, %v7571_v27 }
 0x294   : > { %v7723_v23 = vpop.f32.mrb[188].mxu1  ;;  %v5496_v58 = vpack.c.bf16 %v4557_v32, %v4556_v14  ;;  %v4840_v0 = vadd.f32 %v4839_v51, %v4556_v14  ;;  %v4878_v3 = vmul.f32 %v4556_v14, %v4556_v14  ;;  %v5828_v10 = vpop.f32.mrb[172].mxu0 }
 0x295   : > { %v4205_v59 = vpop.f32.mrb[189].mxu1  ;;  %v4356_v48 = vpop.f32.mrb[173].mxu0 }
 0x296   : > { %v7725_v52 = vpop.f32.mrb[190].mxu1  ;;  %5561 = vst [vmem:[%s7704_s16 + $0x18] sm:$0xff] %v5496_v58   ;;  %v4909_v28 = vadd.f32 %v4908_v22, %v4878_v3  ;;  %v4357_v5 = vadd.f32 %v4356_v48, %v7610_v41  ;;  %v4841_v39 = vadd.f32 %v4840_v0, %v4557_v32  ;;  %v5829_v31 = vpop.f32.mrb[174].mxu0 }
 0x297   : > { %v4208_v16 = vpop.f32.mrb[191].mxu1  ;;  %v4368_v27 = vadd.f32 %v5829_v31, %v7627_v46  ;;  %v4359_v34 = vpop.f32.mrb[175].mxu0 }
 0x298   : > { %v4559_v38 = vadd.f32 %v4357_v5, %v7579_v47  ;;  %v4910_v7 = vadd.f32 %v4909_v28, %v4879_v50  ;;  %v4360_v51 = vadd.f32 %v4359_v34, %v7612_v29 }
 0x299   : > { %v4562_v45 = vadd.f32 %v4368_v27, %v7582_v36 }
 0x29a   : > { %v4842_v63 = vadd.f32 %v4841_v39, %v4559_v38  ;;  %v4880_v49 = vmul.f32 %v4559_v38, %v4559_v38  ;;  %v4560_v20 = vadd.f32 %v4360_v51, %v7584_v2 }
 0x29b   : > { %v4882_v29 = vmul.f32 %v4562_v45, %v4562_v45 }
 0x29c   : > { %v4211_v55 = vpop.f32.mrb[192].mxu1  ;;  %v4911_v41 = vadd.f32 %v4910_v7, %v4880_v49  ;;  %v5501_v32 = vpack.c.bf16 %v4560_v20, %v4559_v38  ;;  %v4843_v22 = vadd.f32 %v4842_v63, %v4560_v20  ;;  %v4881_v33 = vmul.f32 %v4560_v20, %v4560_v20  ;;  %v5832_v14 = vpop.f32.mrb[176].mxu0 }
 0x29d   : > { %v4213_v46 = vpop.f32.mrb[193].mxu1  ;;  %v4381_v58 = vadd.f32 %v5832_v14, %v7650_v15  ;;  %v4372_v47 = vpop.f32.mrb[177].mxu0 }
 0x29e   : > { %v7735_v0 = vpop.f32.mrb[194].mxu1  ;;  %5562 = vst [vmem:[%s7704_s16 + $0x20] sm:$0xff] %v5501_v32   ;;  %v4912_v3 = vadd.f32 %v4911_v41, %v4881_v33  ;;  %v4373_v36 = vadd.f32 %v4372_v47, %v7640_v11  ;;  %v4844_v10 = vadd.f32 %v4843_v22, %v4562_v45  ;;  %v5833_v2 = vpop.f32.mrb[178].mxu0 }
 0x29f   : > { %v4216_v59 = vpop.f32.mrb[195].mxu1  ;;  %v4565_v48 = vadd.f32 %v4381_v58, %v7591_v35  ;;  %v4384_v50 = vadd.f32 %v5833_v2, %v7652_v54  ;;  %v4375_v28 = vpop.f32.mrb[179].mxu0 }
 0x2a0   : > { %v4563_v15 = vadd.f32 %v4373_v36, %v7595_v6  ;;  %v4913_v5 = vadd.f32 %v4912_v3, %v4882_v29 }
 0x2a1   : > { %v4566_v39 = vadd.f32 %v4384_v50, %v7598_v24  ;;  %v4884_v38 = vmul.f32 %v4565_v48, %v4565_v48 }
 0x2a2   : > { %v5506_v31 = vpack.c.bf16 %v4563_v15, %v4562_v45  ;;  %v4845_v16 = vadd.f32 %v4844_v10, %v4563_v15  ;;  %v4883_v27 = vmul.f32 %v4563_v15, %v4563_v15 }
 0x2a3   : > { %v5511_v34 = vpack.c.bf16 %v4566_v39, %v4565_v48  ;;  %v4885_v55 = vmul.f32 %v4566_v39, %v4566_v39 }
 0x2a4   : > { %v7743_v11 = vpop.f32.mrb[196].mxu1  ;;  %5563 = vst [vmem:[%s7704_s16 + $0x28] sm:$0xff] %v5506_v31   ;;  %v4914_v7 = vadd.f32 %v4913_v5, %v4883_v27  ;;  %v4846_v51 = vadd.f32 %v4845_v16, %v4565_v48  ;;  %v5836_v35 = vpop.f32.mrb[180].mxu0 }
 0x2a5   : > { %v4221_v63 = vpop.f32.mrb[197].mxu1  ;;  %5564 = vst [vmem:[%s7704_s16 + $0x30] sm:$0xff] %v5511_v34   ;;  %v4397_v54 = vadd.f32 %v5836_v35, %v7680_v8  ;;  %v4388_v49 = vpop.f32.mrb[181].mxu0 }
 0x2a6   : > { %v4222_v6 = vpop.f32.mrb[198].mxu1  ;;  %v4847_v20 = vadd.f32 %v4846_v51, %v4566_v39  ;;  %v4915_v24 = vadd.f32 %v4914_v7, %v4884_v38  ;;  %v5837_v45 = vpop.f32.mrb[182].mxu0 }
 0x2a7   : > { %v4224_v41 = vpop.f32.mrb[199].mxu1  ;;  %v4569_v32 = vadd.f32 %v4397_v54, %v7604_v57  ;;  %v4391_v22 = vpop.f32.mrb[183].mxu0 }
 0x2a8   : > { %v4916_v33 = vadd.f32 %v4915_v24, %v4885_v55  ;;  %v4392_v14 = vadd.f32 %v4391_v22, %v7667_v62 }
 0x2a9   : > { %v4887_v59 = vmul.f32 %v4569_v32, %v4569_v32 }
 0x2aa   : > { %v4568_v46 = vadd.f32 %v4392_v14, %v7608_v40 }
 0x2ac   : > { %v7751_v58 = vpop.f32.mrb[200].mxu1  ;;  %v5516_v47 = vpack.c.bf16 %v4569_v32, %v4568_v46  ;;  %v4848_v8 = vadd.f32 %v4847_v20, %v4568_v46  ;;  %v4886_v29 = vmul.f32 %v4568_v46, %v4568_v46  ;;  %v5840_v3 = vpop.f32.mrb[184].mxu0 }
 0x2ad   : > { %v4229_v36 = vpop.f32.mrb[201].mxu1  ;;  %v4404_v10 = vpop.f32.mrb[185].mxu0 }
 0x2ae   : > { %v7753_v2 = vpop.f32.mrb[202].mxu1  ;;  %5565 = vst [vmem:[%s7704_s16 + $0x38] sm:$0xff] %v5516_v47   ;;  %v4917_v48 = vadd.f32 %v4916_v33, %v4886_v29  ;;  %v4405_v57 = vadd.f32 %v4404_v10, %v7690_v42  ;;  %v4849_v50 = vadd.f32 %v4848_v8, %v4569_v32  ;;  %v5841_v28 = vpop.f32.mrb[186].mxu0 }
 0x2af   : > { %v4232_v62 = vpop.f32.mrb[203].mxu1  ;;  %v4416_v40 = vadd.f32 %v5841_v28, %v7707_v56  ;;  %v4407_v15 = vpop.f32.mrb[187].mxu0 }
 0x2b0   : > { %v4571_v5 = vadd.f32 %v4405_v57, %v7617_v37  ;;  %v4918_v39 = vadd.f32 %v4917_v48, %v4887_v59  ;;  %v4408_v31 = vadd.f32 %v4407_v15, %v7692_v53 }
 0x2b1   : > { %v4574_v16 = vadd.f32 %v4416_v40, %v7621_v13 }
 0x2b2   : > { %v4850_v27 = vadd.f32 %v4849_v50, %v4571_v5  ;;  %v4888_v34 = vmul.f32 %v4571_v5, %v4571_v5  ;;  %v4572_v38 = vadd.f32 %v4408_v31, %v7624_v9 }
 0x2b3   : > { %v4890_v20 = vmul.f32 %v4574_v16, %v4574_v16 }
 0x2b4   : > { %v4235_v7 = vpop.f32.mrb[204].mxu1  ;;  %v4919_v42 = vadd.f32 %v4918_v39, %v4888_v34  ;;  %v5521_v51 = vpack.c.bf16 %v4572_v38, %v4571_v5  ;;  %v4851_v35 = vadd.f32 %v4850_v27, %v4572_v38  ;;  %v4889_v63 = vmul.f32 %v4572_v38, %v4572_v38  ;;  %v5844_v54 = vpop.f32.mrb[188].mxu0 }
 0x2b5   : > { %v4237_v56 = vpop.f32.mrb[205].mxu1  ;;  %v4429_v49 = vadd.f32 %v5844_v54, %v7723_v23  ;;  %v4420_v37 = vpop.f32.mrb[189].mxu0 }
 0x2b6   : > { %v4238_v6 = vpop.f32.mrb[206].mxu1  ;;  %5566 = vst [vmem:[%s7704_s16 + $0x40] sm:$0xff] %v5521_v51   ;;  %v4920_v53 = vadd.f32 %v4919_v42, %v4889_v63  ;;  %v4421_v13 = vadd.f32 %v4420_v37, %v7715_v12  ;;  %v4852_v55 = vadd.f32 %v4851_v35, %v4574_v16  ;;  %v5845_v24 = vpop.f32.mrb[190].mxu0 }
 0x2b7   : > { %v4240_v9 = vpop.f32.mrb[207].mxu1  ;;  %v4577_v45 = vadd.f32 %v4429_v49, %v7631_v21  ;;  %v4432_v41 = vadd.f32 %v5845_v24, %v7725_v52  ;;  %v4423_v32 = vpop.f32.mrb[191].mxu0 }
 0x2b8   : > { %v4575_v22 = vadd.f32 %v4421_v13, %v7635_v1  ;;  %v4921_v23 = vadd.f32 %v4920_v53, %v4890_v20 }
 0x2b9   : > { %v4578_v33 = vadd.f32 %v4432_v41, %v7638_v18  ;;  %v4892_v29 = vmul.f32 %v4577_v45, %v4577_v45 }
 0x2ba   : > { %v5526_v14 = vpack.c.bf16 %v4575_v22, %v4574_v16  ;;  %v4853_v46 = vadd.f32 %v4852_v55, %v4575_v22  ;;  %v4891_v47 = vmul.f32 %v4575_v22, %v4575_v22 }
 0x2bb   : > { %v5531_v8 = vpack.c.bf16 %v4578_v33, %v4577_v45  ;;  %v4893_v57 = vmul.f32 %v4578_v33, %v4578_v33 }
 0x2bc   : > { %v4243_v12 = vpop.f32.mrb[208].mxu1  ;;  %5567 = vst [vmem:[%s7704_s16 + $0x48] sm:$0xff] %v5526_v14   ;;  %v4922_v3 = vadd.f32 %v4921_v23, %v4891_v47  ;;  %v4854_v36 = vadd.f32 %v4853_v46, %v4577_v45  ;;  %v5848_v10 = vpop.f32.mrb[192].mxu0 }
 0x2bd   : > { %v4245_v21 = vpop.f32.mrb[209].mxu1  ;;  %5568 = vst [vmem:[%s7704_s16 + $0x50] sm:$0xff] %v5531_v8   ;;  %v4445_v52 = vadd.f32 %v5848_v10, %v7743_v11  ;;  %v4436_v59 = vpop.f32.mrb[193].mxu0 }
 0x2be   : > { %v4246_v48 = vpop.f32.mrb[210].mxu1  ;;  %v4855_v1 = vadd.f32 %v4854_v36, %v4578_v33  ;;  %v4923_v50 = vadd.f32 %v4922_v3, %v4892_v29  ;;  %v5849_v18 = vpop.f32.mrb[194].mxu0 }
 0x2bf   : > { %v4248_v28 = vpop.f32.mrb[211].mxu1  ;;  %v4581_v62 = vadd.f32 %v4445_v52, %v7644_v25  ;;  %v4439_v40 = vpop.f32.mrb[195].mxu0 }
 0x2c0   : > { %v4924_v15 = vadd.f32 %v4923_v50, %v4893_v57  ;;  %v4440_v5 = vadd.f32 %v4439_v40, %v7735_v0 }
 0x2c1   : > { %v4895_v51 = vmul.f32 %v4581_v62, %v4581_v62 }
 0x2c2   : > { %v4580_v39 = vadd.f32 %v4440_v5, %v7648_v44 }
 0x2c4   : > { %v4251_v31 = vpop.f32.mrb[212].mxu1  ;;  %v5536_v16 = vpack.c.bf16 %v4581_v62, %v4580_v39  ;;  %v4856_v27 = vadd.f32 %v4855_v1, %v4580_v39  ;;  %v4894_v11 = vmul.f32 %v4580_v39, %v4580_v39  ;;  %v5852_v34 = vpop.f32.mrb[196].mxu0 }
 0x2c5   : > { %v4253_v38 = vpop.f32.mrb[213].mxu1  ;;  %v4452_v7 = vpop.f32.mrb[197].mxu0 }
 0x2c6   : > { %v4254_v42 = vpop.f32.mrb[214].mxu1  ;;  %5569 = vst [vmem:[%s7704_s16 + $0x58] sm:$0xff] %v5536_v16   ;;  %v4925_v35 = vadd.f32 %v4924_v15, %v4894_v11  ;;  %v4453_v63 = vadd.f32 %v4452_v7, %v7751_v58  ;;  %v4857_v25 = vadd.f32 %v4856_v27, %v4581_v62  ;;  %v5853_v54 = vpop.f32.mrb[198].mxu0 }
 0x2c7   : > { %v4256_v56 = vpop.f32.mrb[215].mxu1  ;;  %v4464_v49 = vadd.f32 %v5853_v54, %v4238_v6  ;;  %v4455_v0 = vpop.f32.mrb[199].mxu0 }
 0x2c8   : > { %v4583_v44 = vadd.f32 %v4453_v63, %v7657_v61  ;;  %v4926_v37 = vadd.f32 %v4925_v35, %v4895_v51  ;;  %v4456_v20 = vadd.f32 %v4455_v0, %v7753_v2 }
 0x2c9   : > { %v4586_v53 = vadd.f32 %v4464_v49, %v7661_v43 }
 0x2ca   : > { %v4858_v13 = vadd.f32 %v4857_v25, %v4583_v44  ;;  %v4896_v55 = vmul.f32 %v4583_v44, %v4583_v44  ;;  %v4584_v24 = vadd.f32 %v4456_v20, %v7664_v30 }
 0x2cb   : > { %v4898_v14 = vmul.f32 %v4586_v53, %v4586_v53 }
 0x2cc   : > { %v4259_v9 = vpop.f32.mrb[216].mxu1  ;;  %v4927_v45 = vadd.f32 %v4926_v37, %v4896_v55  ;;  %v5541_v58 = vpack.c.bf16 %v4584_v24, %v4583_v44  ;;  %v4859_v41 = vadd.f32 %v4858_v13, %v4584_v24  ;;  %v4897_v32 = vmul.f32 %v4584_v24, %v4584_v24  ;;  %v5856_v22 = vpop.f32.mrb[200].mxu0 }
 0x2cd   : > { %v4261_v6 = vpop.f32.mrb[217].mxu1  ;;  %v4477_v23 = vadd.f32 %v5856_v22, %v4251_v31  ;;  %v4468_v33 = vpop.f32.mrb[201].mxu0 }
 0x2ce   : > { %v4262_v61 = vpop.f32.mrb[218].mxu1  ;;  %5570 = vst [vmem:[%s7704_s16 + $0x60] sm:$0xff] %v5541_v58   ;;  %v4928_v2 = vadd.f32 %v4927_v45, %v4897_v32  ;;  %v4469_v46 = vadd.f32 %v4468_v33, %v4243_v12  ;;  %v4860_v43 = vadd.f32 %v4859_v41, %v4586_v53  ;;  %v5857_v47 = vpop.f32.mrb[202].mxu0 }
 0x2cf   : > { %v4264_v8 = vpop.f32.mrb[219].mxu1  ;;  %v4589_v30 = vadd.f32 %v4477_v23, %v7671_v19  ;;  %v4480_v29 = vadd.f32 %v5857_v47, %v4254_v42  ;;  %v4471_v3 = vpop.f32.mrb[203].mxu0 }
 0x2d0   : > { %v4587_v36 = vadd.f32 %v4469_v46, %v7675_v26  ;;  %v4929_v10 = vadd.f32 %v4928_v2, %v4898_v14 }
 0x2d1   : > { %v4590_v21 = vadd.f32 %v4480_v29, %v7678_v60  ;;  %v4900_v12 = vmul.f32 %v4589_v30, %v4589_v30 }
 0x2d2   : > { %v5546_v52 = vpack.c.bf16 %v4587_v36, %v4586_v53  ;;  %v4861_v59 = vadd.f32 %v4860_v43, %v4587_v36  ;;  %v4899_v48 = vmul.f32 %v4587_v36, %v4587_v36 }
 0x2d3   : > { %v5551_v1 = vpack.c.bf16 %v4590_v21, %v4589_v30  ;;  %v4901_v5 = vmul.f32 %v4590_v21, %v4590_v21 }
 0x2d4   : > { %v4267_v57 = vpop.f32.mrb[220].mxu1  ;;  %5571 = vst [vmem:[%s7704_s16 + $0x68] sm:$0xff] %v5546_v52   ;;  %v4930_v50 = vadd.f32 %v4929_v10, %v4899_v48  ;;  %v4862_v18 = vadd.f32 %v4861_v59, %v4589_v30  ;;  %v5860_v28 = vpop.f32.mrb[204].mxu0 }
 0x2d5   : > { %v4269_v62 = vpop.f32.mrb[221].mxu1  ;;  %5572 = vst [vmem:[%s7704_s16 + $0x70] sm:$0xff] %v5551_v1   ;;  %v4484_v19 = vpop.f32.mrb[205].mxu0  ;;  %v4493_v40 = vadd.f32 %v5860_v28, %v4267_v57 }
 0x2d6   : > { %v4270_v15 = vpop.f32.mrb[222].mxu1  ;;  %v4863_v26 = vadd.f32 %v4862_v18, %v4590_v21  ;;  %v4931_v39 = vadd.f32 %v4930_v50, %v4900_v12  ;;  %v5861_v60 = vpop.f32.mrb[206].mxu0 }
 0x2d7   : > { %v4272_v31 = vpop.f32.mrb[223].mxu1  ;;  %v4487_v16 = vpop.f32.mrb[207].mxu0  ;;  %v4593_v27 = vadd.f32 %v4493_v40, %v7684_v4 }
 0x2d8   : > { %v4932_v11 = vadd.f32 %v4931_v39, %v4901_v5  ;;  %v4488_v34 = vadd.f32 %v4487_v16, %v4262_v61 }
 0x2d9   : > { %v4903_v25 = vmul.f32 %v4593_v27, %v4593_v27 }
 0x2da   : > { %v4592_v38 = vadd.f32 %v4488_v34, %v7688_v17 }
 0x2dc   : > { %v4864_v7 = vadd.f32 %v4863_v26, %v4592_v38  ;;  %v4902_v42 = vmul.f32 %v4592_v38, %v4592_v38  ;;  %v5556_v51 = vpack.c.bf16 %v4593_v27, %v4592_v38 }
 0x2de   : > { %v4933_v35 = vadd.f32 %v4932_v11, %v4902_v42  ;;  %5573 = vst [vmem:[%s7704_s16 + $0x78] sm:$0xff] %v5556_v51   ;;  %v4865_v63 = vadd.f32 %v4864_v7, %v4593_v27 }
 0x2e0   : > { %v4866_v54 = vrot.slane %v4865_v63, 4  ;;  %v4934_v56 = vadd.f32 %v4933_v35, %v4903_v25 }
 0x2e2   : > { %v4867_v49 = vadd.f32 %v4866_v54, %v4865_v63  ;;  %v4935_v0 = vrot.slane %v4934_v56, 4 }
 0x2e4   : > { %v4868_v44 = vrot.slane %v4867_v49, 2  ;;  %v4936_v37 = vadd.f32 %v4935_v0, %v4934_v56 }
 0x2e6   : > { %v4869_v20 = vadd.f32 %v4868_v44, %v4867_v49  ;;  %v4937_v4 = vrot.slane %v4936_v37, 2 }
 0x2e8   : > { %v4870_v53 = vrot.slane %v4869_v20, 1  ;;  %v4938_v13 = vadd.f32 %v4937_v4, %v4936_v37 }
 0x2ea   : > { %v4939_v17 = vrot.slane %v4938_v13, 1  ;;  %v4871_v55 = vadd.f32 %v4870_v53, %v4869_v20 }
 0x2ec   : > { %v4940_v24 = vadd.f32 %v4939_v17, %v4938_v13 }
 0x2ee   : > { %v4942_v9 = vsel %vm467_vm0, %v4871_v55, %v4940_v24 }
 0x2ef   : > { %v4944_v45 = vsel %vm4943_vm11, %v4942_v9, 0.0 }
 0x2f0   : > { %4945 = vst [vmem:[%s465_s20] sm:$0xff] %v4944_v45 }
 0x2f1 PF: > { %s18_s26 = sadd.s32 1, %s6053_s26   ;;  %s7870_s24 = smov %s6049_s25 }
 0x2f2   : > { %p15_p5 = scmp.ge.s32.totalorder %s18_s26, 4   ;;  %s7871_s25 = smov %s7873_s4 }
 0x2f4   :  { %17 = sbr.rel (!%p15_p5) target bundleno = 2 (0x2), region = 96 }

// kernel: double_conv.4
= control target key start
LH: loop header
LB: loop body
LE: loop exit
PB: predicated region body
PF: predicated region fallthrough
CT: control target
= control target key end

     0   :  { %s6377_s24 = smov 0   ;;  %s6379_s25 = smov 0   ;;  %s8178_s0 = inlined_call_operand.vmem [shape: bf16[2,16,16,128], index: 0, kind: input, shape index: {}, may-alias: {0,1,2}]   ;;  %s8179_s1 = inlined_call_operand.vmem [shape: bf16[2,16,16,128], index: 1, kind: input, shape index: {}, may-alias: {0,1,2}]   ;;  %s8180_s2 = inlined_call_operand.vmem [shape: bf16[2,16,16,128], index: 2, kind: input, shape index: {}, may-alias: {0,1,2}]   ;;  %s8181_s3 = inlined_call_operand.vmem [shape: bf16[3,384,128], index: 3, kind: input, shape index: {}]   ;;  %s8182_s4 = inlined_call_operand.vmem [shape: f32[1,128], index: 4, kind: input, shape index: {}]   ;;  %s8183_s5 = inlined_call_operand.vmem [shape: f32[1,128], index: 5, kind: input, shape index: {}]   ;;  %s8184_s6 = inlined_call_operand.vmem [shape: bf16[2,16,16,128], index: 6, kind: output, shape index: {0}]   ;;  %s8185_s7 = inlined_call_operand.vmem [shape: f32[2,1,8,128], index: 7, kind: output, shape index: {1}]  }
   0x1   :  { %s6381_s26 = smov 0  }
   0x2 LB: > { %s30_s27 = sadd.s32 1, %s6330_s25  ;;  %p5315_p0 = scmp.ge.s32.totalorder %s6334_s26, 1  ;;  %s6334_s26 = sphi %s6381_s26, %s18_s26   ;;  %s6330_s25 = sphi %s6379_s25, %s8241_s25   ;;  %s6326_s24 = sphi %s6377_s24, %s8240_s24  }
   0x3   : > { %p32_p1 = scmp.ge.s32.totalorder %s30_s27, 2  ;;  %p328_p2 = scmp.lt.s32.totalorder %s6334_s26, 3 }
   0x5   : > { %s8243_s27 = smov (%p32_p1, %s30_s27), 0  ;;  %p329_p3 = pnand %p5315_p0, %p328_p2 }
   0x7   : > { %332 = sbr.rel (%p329_p3) target bundleno = 775 (0x307), region = 44 }
   0xe   : > { %v6182_v0 = vld [vmem:[%s8181_s3] sm:$0xff]   ;;  %v6336_v1 = vmov 0   ;;  %v6183_v2 = vld [vmem:[%s8181_s3 + $0x8] sm:$0xff]   ;;  %v6184_v5 = vld [vmem:[%s8181_s3 + $0x10] sm:$0xff]   ;;  %p404_p4 = scmp.lt.s32.totalorder %s6326_s24, 1  ;;  %vm467_vm0 = vcmask 1040384  }
   0xf   : > { %2316 = vmatprep.subr.bf16.mxu0 %v6336_v1  ;;  %v6408_v3 = vld [vmem:[%s8181_s3 + $0x80] sm:$0xff]   ;;  %v6187_v4 = vld [vmem:[%s8181_s3 + $0x88] sm:$0xff]   ;;  %v6189_v6 = vld [vmem:[%s8181_s3 + $0x90] sm:$0xff]   ;;  %vm468_vm1 = vsmask.f32 256  ;;  %vm1179_vm6 = vcmask 1043456  }
  0x10   : > { %2317 = vmatpush1.bf16.msra.mxu0 %v6182_v0  ;;  %6141 = vmatprep.subr.bf16.mxu1 %v6408_v3  ;;  %v6186_v7 = vld [vmem:[%s8181_s3 + $0x18] sm:$0xff]   ;;  %s8245_s24 = smov (!%p404_p4, %s6326_s24), 1  ;;  %v6188_v9 = vld [vmem:[%s8181_s3 + $0x20] sm:$0xff]   ;;  %v6190_v11 = vld [vmem:[%s8181_s3 + $0x28] sm:$0xff]   ;;  %vm527_vm2 = vsmask.f32 7938 }
  0x11   : > { %2318 = vmatprep.subr.bf16.mxu0 %v6336_v1  ;;  %6149 = vmatpush3.bf16.msra.mxu1 %v6408_v3  ;;  %v6191_v8 = vld [vmem:[%s8181_s3 + $0x98] sm:$0xff]   ;;  %v6193_v10 = vld [vmem:[%s8181_s3 + $0xa0] sm:$0xff]   ;;  %s6441_s29 = sshll.u32 %s8245_s24, 7  ;;  %v6195_v12 = vld [vmem:[%s8181_s3 + $0xa8] sm:$0xff]   ;;  %vm856_vm5 = vsmask.f32 4368 }
  0x12   : > { %6142 = vmatprep.subr.bf16.mxu1 %v6187_v4  ;;  %s6453_s13 = scalar_lea.vmem %s8178_s0, %s6441_s29  ;;  %v488_v13 = vld [vmem:[#allocation2 + $0x48] sm:$0x1]  ;;  %vm6458_vm3 = vmand %vm467_vm0, %vm468_vm1  ;;  %v544_v15 = vld [vmem:[#allocation2 + $0x44] sm:$0x1]  ;;  %vm1942_vm9 = vcmask 1046528   ;;  %s426_s17 = scalar_lea.vmem %s8179_s1, %s6441_s29  ;;  %vm5129_vm11 = vcmask 1041408  }
  0x13   : > { %v583_v16 = vld [vmem:[#allocation2 + $0xe0] sm:$0x1]  ;;  %v489_v17 = vsel %vm6458_vm3, 0, %v488_v13  ;;  %vm6466_vm4 = vmand %vm467_vm0, %vm527_vm2  ;;  %v5827_v20 = vld [vmem:[%s6453_s13 + $0x28] sm:$0xff]   ;;  %vm1667_vm10 = vsmask.f32 7424  ;;  %s8083_s12 = scalar_lea.vmem %s8184_s6, %s6441_s29 }
  0x14   : > { %2319 = vmatpush1.bf16.msra.mxu0 %v6183_v2  ;;  %v5826_v19 = vld [vmem:[%s6453_s13 + $0x20] sm:$0xff]   ;;  %v6192_v21 = vld [vmem:[%s8181_s3 + $0x30] sm:$0xff]   ;;  %490 = vst [vmem:[#allocation2 + $0x48] sm:$0x1] %v489_v17  ;;  %v545_v23 = vsel %vm6466_vm4, 0, %v544_v15  ;;  %v584_v24 = vsel %vm6466_vm4, 0, %v583_v16  ;;  %v5692_v28 = vunpack.c.l.bf16 %v5827_v20  ;;  %v5693_v29 = vunpack.c.h.bf16 %v5827_v20  ;;  %vm6535_vm7 = vmor %vm468_vm1, %vm856_vm5 }
  0x15   : > { %2320 = vmatprep.subr.bf16.mxu0 %v6336_v1  ;;  %6150 = vmatpush3.bf16.msra.mxu1 %v6187_v4  ;;  %v6197_v22 = vld [vmem:[%s8181_s3 + $0xb0] sm:$0xff]   ;;  %v5688_v25 = vunpack.c.l.bf16 %v5826_v19  ;;  %v5689_v26 = vunpack.c.h.bf16 %v5826_v19  ;;  %v6485_v27 = vld [vmem:[%s8182_s4] ss:$0 sm:$0xff]  ;;  %546 = vst [vmem:[#allocation2 + $0x44] sm:$0x1] %v545_v23  ;;  %v6194_v33 = vld [vmem:[%s8181_s3 + $0x38] sm:$0xff]  }
  0x16   : > { %6143 = vmatprep.subr.bf16.mxu1 %v6189_v6  ;;  %585 = vst [vmem:[#allocation2 + $0xe0] sm:$0x1] %v584_v24  ;;  %v6491_v30 = vld [vmem:[%s8183_s5] ss:$0 sm:$0xff]  ;;  %v491_v31 = vld [vmem:[#allocation2 + $0x54] sm:$0x1]  ;;  %v667_v39 = vmul.f32 %v5692_v28, %v6485_v27  ;;  %v668_v40 = vmul.f32 %v5693_v29, %v6485_v27  ;;  %vm6546_vm8 = vmand %vm1179_vm6, %vm527_vm2 }
  0x17   : > { %v547_v32 = vld [vmem:[#allocation2 + $0x50] sm:$0x1]  ;;  %v665_v34 = vmul.f32 %v5688_v25, %v6485_v27  ;;  %v666_v35 = vmul.f32 %v5689_v26, %v6485_v27  ;;  %v492_v36 = vsel %vm6458_vm3, 0, %v491_v31  ;;  %v6199_v43 = vld [vmem:[%s8181_s3 + $0xb8] sm:$0xff]   ;;  %v6196_v58 = vld [vmem:[%s8181_s3 + $0x40] sm:$0xff]   ;;  %s5600_s30 = sadd.s32 120, %s6441_s29 }
  0x18   : > { %2321 = vmatpush1.bf16.msra.mxu0 %v6184_v5  ;;  %v548_v37 = vsel %vm6466_vm4, 0, %v547_v32  ;;  %v5828_v38 = vld [vmem:[%s6453_s13 + $0x30] sm:$0xff]   ;;  %493 = vst [vmem:[#allocation2 + $0x54] sm:$0x1] %v492_v36  ;;  %v706_v46 = vadd.f32 %v6491_v30, %v667_v39  ;;  %v707_v47 = vadd.f32 %v6491_v30, %v668_v40  ;;  %v550_v51 = vld [vmem:[#allocation2 + $0x5c] sm:$0x1]  ;;  %s443_s14 = scalar_lea.vmem %s8180_s2, %s5600_s30 }
  0x19   : > { %2322 = vmatprep.subr.bf16.mxu0 %v6336_v1  ;;  %6151 = vmatpush3.bf16.msra.mxu1 %v6189_v6  ;;  %549 = vst [vmem:[#allocation2 + $0x50] sm:$0x1] %v548_v37  ;;  %v5696_v41 = vunpack.c.l.bf16 %v5828_v38  ;;  %v5697_v42 = vunpack.c.h.bf16 %v5828_v38  ;;  %v704_v44 = vadd.f32 %v6491_v30, %v665_v34  ;;  %v705_v45 = vadd.f32 %v6491_v30, %v666_v35  ;;  %v6516_v53 = vld [vmem:[%s6453_s13 + $0x38] sm:$0xff]   ;;  %v494_v62 = vld [vmem:[#allocation2 + $0x60] sm:$0x1]  ;;  %v6198_v16 = vld [vmem:[%s8181_s3 + $0x48] sm:$0xff]  }
  0x1a   : > { %6144 = vmatprep.subr.bf16.mxu1 %v6191_v8  ;;  %v738_v54 = vmax.f32 %v706_v46, 0.0  ;;  %v739_v55 = vmax.f32 %v707_v47, 0.0  ;;  %v551_v57 = vsel %vm6466_vm4, 0, %v550_v51  ;;  %v5700_v63 = vunpack.c.l.bf16 %v6516_v53  ;;  %v6200_v36 = vld [vmem:[%s8181_s3 + $0x50] sm:$0xff]   ;;  %v553_v46 = vld [vmem:[#allocation2 + $0x68] sm:$0x1] }
  0x1b   : > { %v669_v48 = vmul.f32 %v5696_v41, %v6485_v27  ;;  %v736_v49 = vmax.f32 %v704_v44, 0.0  ;;  %v737_v50 = vmax.f32 %v705_v45, 0.0  ;;  %v670_v52 = vmul.f32 %v5697_v42, %v6485_v27  ;;  %552 = vst [vmem:[#allocation2 + $0x5c] sm:$0x1] %v551_v57  ;;  %v1216_v20 = vld [vmem:[#allocation2 + $0x48] sm:$0xf] }
  0x1c   : > { %2323 = vmatpush1.bf16.msra.mxu0 %v6186_v7  ;;  %v5612_v0 = vpack.c.bf16 %v738_v54, %v738_v54  ;;  %v5613_v2 = vpack.c.bf16 %v739_v55, %v739_v55  ;;  %v495_v5 = vsel %vm6458_vm3, 0, %v494_v62  ;;  %v1213_v15 = vld [vmem:[#allocation2 + $0x44] sm:$0x1]  ;;  %v5701_v26 = vunpack.c.h.bf16 %v6516_v53  ;;  %v497_v45 = vld [vmem:[#allocation2 + $0x6c] sm:$0x1]  ;;  %v6267_v34 = vld [vmem:[%s8181_s3 + $0x1f0] sm:$0xff]  }
  0x1d   : > { %2324 = vmatprep.subr.bf16.mxu0 %v6336_v1  ;;  %6152 = vmatpush3.bf16.msra.mxu1 %v6191_v8  ;;  %v708_v56 = vadd.f32 %v6491_v30, %v669_v48  ;;  %v5610_v59 = vpack.c.bf16 %v736_v49, %v736_v49  ;;  %v5611_v60 = vpack.c.bf16 %v737_v50, %v737_v50  ;;  %v556_v53 = vld [vmem:[#allocation2 + $0x74] sm:$0x1]  ;;  %v498_v57 = vsel %vm6458_vm3, 0, %v497_v45  ;;  %s5324_s29 = sshll.u32 %s8245_s24, 3 }
  0x1e   : > { %6145 = vmatprep.subr.bf16.mxu1 %v6193_v10  ;;  %v709_v61 = vadd.f32 %v6491_v30, %v670_v52  ;;  %496 = vst [vmem:[#allocation2 + $0x60] sm:$0x1] %v495_v5  ;;  %v955_v13 = vshll.u32 %v5613_v2, 16  ;;  %v671_v28 = vmul.f32 %v5700_v63, %v6485_v27  ;;  %v5830_v52 = vld [vmem:[%s6453_s13 + $0x40] sm:$0xff]   ;;  %v672_v55 = vmul.f32 %v5701_v26, %v6485_v27  ;;  %v6205_v63 = vld [vmem:[%s8181_s3 + $0x58] sm:$0xff]   ;;  %s465_s16 = scalar_lea.vmem %s8185_s7, %s5324_s29 }
  0x1f   : > { %v740_v4 = vmax.f32 %v708_v56, 0.0  ;;  %v927_v6 = vshrl.u32 %v5610_v59, 16  ;;  %v930_v7 = vshll.u32 %v5610_v59, 16  ;;  %v935_v8 = vshrl.u32 %v5611_v60, 16  ;;  %v1223_v50 = vld [vmem:[#allocation2 + $0x54] sm:$0xf] }
  0x20   : > { %2325 = vmatpush1.bf16.msra.mxu0 %v6188_v9  ;;  %v938_v9 = vshll.u32 %v5611_v60, 16  ;;  %v1220_v35 = vld [vmem:[#allocation2 + $0x50] sm:$0x1]  ;;  %v710_v56 = vadd.f32 %v6491_v30, %v671_v28  ;;  %499 = vst [vmem:[#allocation2 + $0x6c] sm:$0x1] %v498_v57  ;;  %v554_v60 = vsel %vm6466_vm4, 0, %v553_v46 }
  0x21   : > { %2326 = vmatprep.subr.bf16.mxu0 %v6336_v1  ;;  %6153 = vmatpush3.bf16.msra.mxu1 %v6193_v10  ;;  %v944_v10 = vshrl.u32 %v5612_v0, 16  ;;  %v929_v17 = vrot.slane %v927_v6, 7  ;;  %v937_v19 = vrot.slane %v935_v8, 7  ;;  %555 = vst [vmem:[#allocation2 + $0x68] sm:$0x1] %v554_v60  ;;  %v5705_v8 = vunpack.c.h.bf16 %v5830_v52 }
  0x22   : > { %6146 = vmatprep.subr.bf16.mxu1 %v6195_v12 }
  0x23   : > { %v946_v24 = vrot.slane %v944_v10, 7  ;;  %v6542_v29 = vor.u32 %v930_v7, %v929_v17  ;;  %v933_v31 = vrot.slane %v929_v17, 4  ;;  %v940_v32 = vor.u32 %v938_v9, %v937_v19  ;;  %v470_v9 = vld [vmem:[#allocation2] sm:$0x1] }
  0x24   : > { %2327 = vmatpush1.bf16.msra.mxu0 %v6190_v11  ;;  %v947_v11 = vshll.u32 %v5612_v0, 16  ;;  %v557_v7 = vsel %vm6466_vm4, 0, %v556_v53  ;;  %v6584_v10 = vld [vmem:[%s6453_s13] sm:$0xff]   ;;  %v6211_v53 = vld [vmem:[%s8181_s3 + $0x68] sm:$0xff]  }
  0x25   : > { %2328 = vmatprep.subr.bf16.mxu0 %v6336_v1  ;;  %6154 = vmatpush3.bf16.msra.mxu1 %v6195_v12  ;;  %v952_v12 = vshrl.u32 %v5613_v2, 16  ;;  %v950_v38 = vrot.slane %v946_v24, 4  ;;  %v941_v41 = vsel %vm6535_vm7, %v933_v31, %v940_v32  ;;  %v711_v2 = vadd.f32 %v6491_v30, %v672_v55  ;;  %558 = vst [vmem:[#allocation2 + $0x74] sm:$0x1] %v557_v7  ;;  %v6590_v17 = vld [vmem:[%s426_s17] sm:$0xff]  }
  0x26   : > { %6147 = vmatprep.subr.bf16.mxu1 %v6197_v22  ;;  %v949_v37 = vor.u32 %v947_v11, %v946_v24  ;;  %1212 = vst [vmem:[#allocation2 + $0x40] sm:$0xf] %v941_v41  ;;  %v674_v24 = vmul.f32 %v5705_v8, %v6485_v27  ;;  %v473_v31 = vld [vmem:[#allocation2 + $0xc] sm:$0x1]  ;;  %v529_v32 = vld [vmem:[#allocation2 + $0x8] sm:$0x1] }
  0x27   : > { %v954_v25 = vrot.slane %v952_v12, 7  ;;  %v1227_v12 = vld [vmem:[#allocation2 + $0x5c] sm:$0x1]  ;;  %v1230_v46 = vld [vmem:[#allocation2 + $0x60] sm:$0xf] }
  0x28   : > { %2329 = vmatpush1.bf16.msra.mxu0 %v6192_v21  ;;  %v5614_v21 = vpack.c.bf16 %v740_v4, %v740_v4  ;;  %v1217_v48 = vsel %vm6546_vm8, %v949_v37, %v1216_v20  ;;  %v742_v4 = vmax.f32 %v710_v56, 0.0  ;;  %v1234_v57 = vld [vmem:[#allocation2 + $0x68] sm:$0x1] }
  0x29   : > { %2330 = vmatprep.subr.bf16.mxu0 %v6336_v1  ;;  %6155 = vmatpush3.bf16.msra.mxu1 %v6197_v22  ;;  %v741_v22 = vmax.f32 %v709_v61, 0.0  ;;  %v957_v39 = vor.u32 %v955_v13, %v954_v25  ;;  %v959_v40 = vrot.slane %v954_v25, 4  ;;  %1218 = vst [vmem:[#allocation2 + $0x48] sm:$0xf] %v1217_v48  ;;  %v5704_v61 = vunpack.c.l.bf16 %v5830_v52 }
  0x2a   : > { %6148 = vmatprep.subr.bf16.mxu1 %v6199_v43  ;;  %v964_v44 = vshll.u32 %v5614_v21, 16  ;;  %v743_v13 = vmax.f32 %v711_v2, 0.0  ;;  %v6629_v2 = vld [vmem:[%s6453_s13 + $0x48] sm:$0xff]  }
  0x2b   : > { %v958_v47 = vsel %vm6535_vm7, %v950_v38, %v957_v39  ;;  %v1221_v49 = vsel %vm6458_vm3, %v959_v40, %v1220_v35  ;;  %v5615_v51 = vpack.c.bf16 %v741_v22, %v741_v22  ;;  %v673_v6 = vmul.f32 %v5704_v61, %v6485_v27 }
  0x2c   : > { %2331 = vmatpush1.bf16.msra.mxu0 %v6194_v33  ;;  %v942_v33 = vrot.slane %v937_v19, 4  ;;  %1219 = vst [vmem:[#allocation2 + $0x4c] sm:$0xf] %v958_v47  ;;  %1222 = vst [vmem:[#allocation2 + $0x50] sm:$0x1] %v1221_v49  ;;  %v6207_v19 = vld [vmem:[%s8181_s3 + $0x60] sm:$0xff]   ;;  %v5617_v26 = vpack.c.bf16 %v743_v13, %v743_v13  ;;  %v5736_v35 = vunpack.c.l.bf16 %v6590_v17  ;;  %v713_v40 = vadd.f32 %v6491_v30, %v674_v24 }
  0x2d   : > { %2332 = vmatprep.subr.bf16.mxu0 %v6336_v1  ;;  %6156 = vmatpush3.bf16.msra.mxu1 %v6199_v43  ;;  %v961_v43 = vshrl.u32 %v5614_v21, 16  ;;  %v972_v59 = vshll.u32 %v5615_v51, 16  ;;  %v712_v22 = vadd.f32 %v6491_v30, %v673_v6  ;;  %v5737_v49 = vunpack.c.h.bf16 %v6590_v17  ;;  %v500_v17 = vld [vmem:[#allocation2 + $0x78] sm:$0x1] }
  0x2e   : > { %3376 = vmatprep.subr.bf16.mxu1 %v6336_v1  ;;  %v1214_v42 = vsel %vm6458_vm3, %v942_v33, %v1213_v15  ;;  %v5616_v15 = vpack.c.bf16 %v742_v4, %v742_v4  ;;  %v5672_v33 = vunpack.c.l.bf16 %v6584_v10  ;;  %v6204_v4 = vld [vmem:[%s8181_s3 + $0xc0] sm:$0xff]   ;;  %v5708_v24 = vunpack.c.l.bf16 %v6629_v2 }
  0x2f   : > { %1215 = vst [vmem:[#allocation2 + $0x44] sm:$0x1] %v1214_v42  ;;  %v963_v54 = vrot.slane %v961_v43, 7  ;;  %v986_v43 = vshrl.u32 %v5617_v26, 16  ;;  %v744_v47 = vmax.f32 %v712_v22, 0.0 }
  0x30   : > { %2333 = vmatpush1.bf16.msra.mxu0 %v6196_v58  ;;  %v969_v58 = vshrl.u32 %v5615_v51, 16  ;;  %v978_v28 = vshrl.u32 %v5616_v15, 16  ;;  %v981_v39 = vshll.u32 %v5616_v15, 16  ;;  %v657_v48 = vmul.f32 %v5672_v33, %v6485_v27  ;;  %v1237_v15 = vld [vmem:[#allocation2 + $0x6c] sm:$0xf] }
  0x31   : > { %2334 = vmatprep.subr.bf16.mxu0 %v6336_v1  ;;  %v966_v62 = vor.u32 %v964_v44, %v963_v54  ;;  %v967_v0 = vrot.slane %v963_v54, 4  ;;  %v989_v44 = vshll.u32 %v5617_v26, 16  ;;  %v988_v52 = vrot.slane %v986_v43, 7  ;;  %v6217_v43 = vld [vmem:[%s8181_s3 + $0x78] sm:$0xff]  }
  0x32   : > { %v971_v5 = vrot.slane %v969_v58, 7  ;;  %v980_v42 = vrot.slane %v978_v28, 7  ;;  %v745_v54 = vmax.f32 %v713_v40, 0.0  ;;  %v5618_v56 = vpack.c.bf16 %v744_v47, %v744_v47 }
  0x33   : > { %v1224_v11 = vsel %vm6546_vm8, %v966_v62, %v1223_v50  ;;  %v474_v58 = vsel %vm6458_vm3, 0, %v473_v31  ;;  %v991_v61 = vor.u32 %v989_v44, %v988_v52  ;;  %v696_v8 = vadd.f32 %v6491_v30, %v657_v48 }
  0x34   : > { %2335 = vmatpush1.bf16.msra.mxu0 %v6198_v16  ;;  %v471_v16 = vsel %vm6458_vm3, 0, %v470_v9  ;;  %1225 = vst [vmem:[#allocation2 + $0x54] sm:$0xf] %v1224_v11  ;;  %v974_v20 = vor.u32 %v972_v59, %v971_v5  ;;  %v976_v21 = vrot.slane %v971_v5, 4  ;;  %v983_v50 = vor.u32 %v981_v39, %v980_v42  ;;  %475 = vst [vmem:[#allocation2 + $0xc] sm:$0x1] %v474_v58 }
  0x35   : > { %2336 = vmatprep.subr.bf16.mxu0 %v6336_v1  ;;  %472 = vst [vmem:[#allocation2] sm:$0x1] %v471_v16  ;;  %v984_v51 = vrot.slane %v980_v42, 4  ;;  %v530_v59 = vsel %vm6466_vm4, 0, %v529_v32  ;;  %v6213_v5 = vld [vmem:[%s8181_s3 + $0x70] sm:$0xff]   ;;  %v995_v6 = vshrl.u32 %v5618_v56, 16  ;;  %v1304_v9 = vmul.f32 %v5736_v35, %v6485_v27 }
  0x36   : > { %v6597_v25 = vld [vmem:[#allocation2 + $0x40] sm:$0xff]   ;;  %v975_v37 = vsel %vm6535_vm7, %v967_v0, %v974_v20  ;;  %v1228_v38 = vsel %vm6458_vm3, %v976_v21, %v1227_v12  ;;  %v1231_v62 = vsel %vm6546_vm8, %v983_v50, %v1230_v46  ;;  %v5619_v0 = vpack.c.bf16 %v745_v54, %v745_v54  ;;  %531 = vst [vmem:[#allocation2 + $0x8] sm:$0x1] %v530_v59  ;;  %v1241_v32 = vld [vmem:[#allocation2 + $0x74] sm:$0x1]  ;;  %v6206_v39 = vld [vmem:[%s8181_s3 + $0xc8] sm:$0xff]  }
  0x37   : > { %v1958_v41 = vrot.slane %v6597_v25, 1  ;;  %1645 = vst [vmem:[#allocation3 + $0xc0] sm:$0xff] %v6597_v25  ;;  %1226 = vst [vmem:[#allocation2 + $0x58] sm:$0xf] %v975_v37  ;;  %v998_v7 = vshll.u32 %v5618_v56, 16  ;;  %v992_v12 = vsel %vm6535_vm7, %v984_v51, %v991_v61  ;;  %v997_v20 = vrot.slane %v995_v6, 7 }
  0x38   : > { %2337 = vmatpush1.bf16.msra.mxu0 %v6200_v36  ;;  %v6601_v36 = vld [vmem:[#allocation2 + $0x48] sm:$0xff]   ;;  %1229 = vst [vmem:[#allocation2 + $0x5c] sm:$0x1] %v1228_v38  ;;  %1232 = vst [vmem:[#allocation2 + $0x60] sm:$0xf] %v1231_v62  ;;  %v1003_v16 = vshrl.u32 %v5619_v0, 16  ;;  %v1305_v21 = vmul.f32 %v5737_v49, %v6485_v27  ;;  %v1313_v22 = vadd.f32 %v6491_v30, %v1304_v9  ;;  %v5709_v59 = vunpack.c.h.bf16 %v6629_v2 }
  0x39   : > { %2338 = vmatprep.subr.bf16.mxu0 %v6336_v1  ;;  %v1960_v45 = vrot.slane %v6601_v36, 1  ;;  %1646 = vst [vmem:[#allocation3 + $0xd8] sm:$0xff] %v6601_v36  ;;  %1233 = vst [vmem:[#allocation2 + $0x64] sm:$0xf] %v992_v12  ;;  %v1006_v31 = vshll.u32 %v5619_v0, 16  ;;  %v728_v33 = vmax.f32 %v696_v8, 0.0  ;;  %v1000_v36 = vor.u32 %v998_v7, %v997_v20 }
  0x3a   : > { %v1005_v28 = vrot.slane %v1003_v16, 7  ;;  %v1001_v37 = vrot.slane %v997_v20, 4  ;;  %v1314_v38 = vadd.f32 %v6491_v30, %v1305_v21  ;;  %v501_v49 = vsel %vm6458_vm3, 0, %v500_v17  ;;  %v503_v50 = vld [vmem:[#allocation2 + $0x84] sm:$0x1]  ;;  %v6669_v51 = vld [vmem:[%s6453_s13 + $0x50] sm:$0xff]  }
  0x3b   : > { %v1961_v55 = vsel %vm1942_vm9, %v1958_v41, %v1960_v45  ;;  %v6203_v60 = vld [vmem:[#allocation2 + $0x50] sm:$0xff]   ;;  %v5602_v44 = vpack.c.bf16 %v728_v33, %v728_v33  ;;  %v1238_v47 = vsel %vm6546_vm8, %v1000_v36, %v1237_v15  ;;  %502 = vst [vmem:[#allocation2 + $0x78] sm:$0x1] %v501_v49  ;;  %v559_v61 = vld [vmem:[#allocation2 + $0x80] sm:$0x1]  ;;  %v5712_v0 = vunpack.c.l.bf16 %v6669_v51 }
  0x3c   : > { %2339 = vmatpush1.bf16.msra.mxu0 %v6205_v63  ;;  %2033 = vst [vmem:[#allocation3 + $0xd0] sm:$0xff] %v1961_v55  ;;  %5981 = vmatprep.mubr.bf16.mxu1 %v1961_v55  ;;  %v993_v63 = vrot.slane %v988_v52, 4  ;;  %v1962_v11 = vrot.slane %v6203_v60, 1  ;;  %1647 = vst [vmem:[#allocation3 + $0xf0] sm:$0xff] %v6203_v60  ;;  %v1008_v40 = vor.u32 %v1006_v31, %v1005_v28  ;;  %v1010_v42 = vrot.slane %v1005_v28, 4  ;;  %v6210_v52 = vld [vmem:[%s8181_s3 + $0xd0] sm:$0xff]  }
  0x3d   : > { %2340 = vmatprep.subr.bf16.mxu0 %v6336_v1  ;;  %v1316_v48 = vmax.f32 %v1314_v38, 0.0  ;;  %1239 = vst [vmem:[#allocation2 + $0x6c] sm:$0xf] %v1238_v47  ;;  %v859_v55 = vshrl.u32 %v5602_v44, 16  ;;  %v862_v56 = vshll.u32 %v5602_v44, 16  ;;  %v675_v60 = vmul.f32 %v5708_v24, %v6485_v27  ;;  %v6212_v24 = vld [vmem:[%s8181_s3 + $0xd8] sm:$0xff]  }
  0x3e   : > { %v1235_v13 = vsel %vm6458_vm3, %v993_v63, %v1234_v57  ;;  %v1963_v26 = vsel %vm1942_vm9, %v1960_v45, %v1962_v11  ;;  %v1315_v45 = vmax.f32 %v1313_v22, 0.0  ;;  %v1242_v54 = vsel %vm6458_vm3, %v1010_v42, %v1241_v32  ;;  %v1181_v6 = vld [vmem:[#allocation2 + $0xc] sm:$0xf]  ;;  %v532_v15 = vld [vmem:[#allocation2 + $0x14] sm:$0x1]  ;;  %v6216_v49 = vld [vmem:[%s8181_s3 + $0xe0] sm:$0xff]  }
  0x3f   : > { %1236 = vst [vmem:[#allocation2 + $0x68] sm:$0x1] %v1235_v13  ;;  %2034 = vst [vmem:[#allocation3 + $0xe8] sm:$0xff] %v1963_v26  ;;  %5982 = vmatmul.mubr.bf16.vlgmr.msra.gmra.mrb[0].mxu1 %v1963_v26  ;;  %v1322_v58 = vmul.f32 0.0, %v1316_v48  ;;  %v6680_v63 = vrot.slane %v859_v55, 7  ;;  %v676_v2 = vmul.f32 %v5709_v59, %v6485_v27  ;;  %v714_v9 = vadd.f32 %v6491_v30, %v675_v60 }
  0x40   : > { %2341 = vmatpush1.bf16.msra.mxu0 %v6207_v19  ;;  %v6643_v19 = vld [vmem:[#allocation2 + $0x58] sm:$0xff]   ;;  %3377 = vmatpush1.bf16.msra.mxu1 %v6204_v4  ;;  %1243 = vst [vmem:[#allocation2 + $0x74] sm:$0x1] %v1242_v54  ;;  %v1321_v57 = vmul.f32 0.0, %v1315_v45  ;;  %v6209_v62 = vld [vmem:[#allocation2 + $0x60] sm:$0xff]   ;;  %v5673_v4 = vunpack.c.h.bf16 %v6584_v10  ;;  %v504_v13 = vsel %vm6458_vm3, 0, %v503_v50 }
  0x41   : > { %2342 = vmatprep.subr.bf16.mxu0 %v6336_v1  ;;  %v1964_v35 = vrot.slane %v6643_v19, 1  ;;  %1648 = vst [vmem:[#allocation3 + $0x108] sm:$0xff] %v6643_v19  ;;  %3378 = vmatprep.subr.bf16.mxu1 %v6336_v1  ;;  %v5635_v8 = vpack.c.bf16 %v1322_v58, %v1322_v58  ;;  %1649 = vst [vmem:[#allocation3 + $0x120] sm:$0xff] %v6209_v62  ;;  %v864_v12 = vor.u32 %v862_v56, %v6680_v63  ;;  %v1353_v47 = vld [vmem:[#allocation2 + $0x8] sm:$0x1] }
  0x42   : > { %v5634_v7 = vpack.c.bf16 %v1321_v57, %v1321_v57  ;;  %v560_v10 = vsel %vm6466_vm4, 0, %v559_v61  ;;  %505 = vst [vmem:[#allocation2 + $0x84] sm:$0x1] %v504_v13  ;;  %v715_v28 = vadd.f32 %v6491_v30, %v676_v2  ;;  %v746_v31 = vmax.f32 %v714_v9, 0.0  ;;  %v562_v57 = vld [vmem:[#allocation2 + $0x8c] sm:$0x1] }
  0x43   : > { %v1965_v46 = vsel %vm1942_vm9, %v1962_v11, %v1964_v35  ;;  %v1966_v11 = vrot.slane %v6209_v62, 1  ;;  %v1338_v20 = vshrl.u32 %v5635_v8, 16  ;;  %v1341_v21 = vshll.u32 %v5635_v8, 16  ;;  %561 = vst [vmem:[#allocation2 + $0x80] sm:$0x1] %v560_v10  ;;  %v6220_v9 = vld [vmem:[%s8181_s3 + $0xe8] sm:$0xff]  }
  0x44   : > { %2343 = vmatpush1.bf16.msra.mxu0 %v6211_v53  ;;  %2035 = vst [vmem:[#allocation3 + $0x100] sm:$0xff] %v1965_v46  ;;  %5985 = vmatprep.mubr.bf16.mxu1 %v1965_v46  ;;  %v1009_v53 = vsel %vm6535_vm7, %v1001_v37, %v1008_v40  ;;  %v1330_v16 = vshrl.u32 %v5634_v7, 16  ;;  %v1333_v17 = vshll.u32 %v5634_v7, 16  ;;  %v1182_v26 = vsel %vm6546_vm8, %v864_v12, %v1181_v6  ;;  %v506_v62 = vld [vmem:[#allocation2 + $0x90] sm:$0x1] }
  0x45   : > { %2344 = vmatprep.subr.bf16.mxu0 %v6336_v1  ;;  %1240 = vst [vmem:[#allocation2 + $0x70] sm:$0xf] %v1009_v53  ;;  %3379 = vmatpush1.bf16.msra.mxu1 %v6206_v39  ;;  %v1967_v22 = vsel %vm1942_vm9, %v1964_v35, %v1966_v11  ;;  %1183 = vst [vmem:[#allocation2 + $0xc] sm:$0xf] %v1182_v26  ;;  %v1340_v33 = vrot.slane %v1338_v20, 7  ;;  %v677_v35 = vmul.f32 %v5712_v0, %v6485_v27  ;;  %v5833_v0 = vld [vmem:[%s6453_s13 + $0x58] sm:$0xff]  }
  0x46   : > { %3380 = vmatprep.subr.bf16.mxu1 %v6336_v1  ;;  %2036 = vst [vmem:[#allocation3 + $0x118] sm:$0xff] %v1967_v22  ;;  %v6214_v32 = vld [vmem:[#allocation2 + $0x68] sm:$0xff]   ;;  %v1332_v19 = vrot.slane %v1330_v16, 7  ;;  %v533_v36 = vsel %vm6466_vm4, 0, %v532_v15  ;;  %v747_v38 = vmax.f32 %v715_v28, 0.0  ;;  %v5620_v39 = vpack.c.bf16 %v746_v31, %v746_v31 }
  0x47   : > { %5986 = vmatmul.mubr.bf16.gmra.mrb[4].mxu1 %v1967_v22  ;;  %534 = vst [vmem:[#allocation2 + $0x14] sm:$0x1] %v533_v36  ;;  %v658_v40 = vmul.f32 %v5673_v4, %v6485_v27  ;;  %1650 = vst [vmem:[#allocation3 + $0x138] sm:$0xff] %v6214_v32  ;;  %v1343_v46 = vor.u32 %v1341_v21, %v1340_v33  ;;  %v1345_v50 = vrot.slane %v1340_v33, 4  ;;  %v865_v8 = vrot.slane %v6680_v63, 4  ;;  %v6743_v28 = vld [vmem:[%s6453_s13 + $0x8] sm:$0xff]  }
  0x48   : > { %2345 = vmatpush1.bf16.msra.mxu0 %v6213_v5  ;;  %v5713_v5 = vunpack.c.h.bf16 %v6669_v51  ;;  %v1335_v44 = vor.u32 %v1333_v17, %v1332_v19  ;;  %v1336_v45 = vrot.slane %v1332_v19, 4  ;;  %v5621_v51 = vpack.c.bf16 %v747_v38, %v747_v38  ;;  %v476_v2 = vld [vmem:[#allocation2 + $0x18] sm:$0x1]  ;;  %v6223_v38 = vld [vmem:[%s8181_s3 + $0xf0] sm:$0xff]  }
  0x49   : > { %2346 = vmatprep.subr.bf16.mxu0 %v6336_v1  ;;  %3381 = vmatpush1.bf16.msra.mxu1 %v6210_v52  ;;  %v1012_v52 = vshrl.u32 %v5620_v39, 16  ;;  %v1015_v56 = vshll.u32 %v5620_v39, 16  ;;  %v1354_v59 = vsel %vm6458_vm3, %v1345_v50, %v1353_v47  ;;  %v716_v6 = vadd.f32 %v6491_v30, %v677_v35  ;;  %v1251_v50 = vld [vmem:[#allocation2 + $0x84] sm:$0xf] }
  0x4a   : > { %3382 = vmatprep.subr.bf16.mxu1 %v6336_v1  ;;  %v678_v42 = vmul.f32 %v5713_v5, %v6485_v27  ;;  %v1344_v54 = vsel %vm6535_vm7, %v1336_v45, %v1343_v46  ;;  %v1020_v61 = vshrl.u32 %v5621_v51, 16  ;;  %1355 = vst [vmem:[#allocation2 + $0x8] sm:$0x1] %v1354_v59  ;;  %v1023_v4 = vshll.u32 %v5621_v51, 16  ;;  %v1244_v5 = vld [vmem:[#allocation2 + $0x78] sm:$0xf] }
  0x4b   : > { %1352 = vst [vmem:[#allocation2 + $0x4] sm:$0xf] %v1344_v54  ;;  %v1014_v60 = vrot.slane %v1012_v52, 7  ;;  %v697_v7 = vadd.f32 %v6491_v30, %v658_v40  ;;  %v563_v10 = vsel %vm6466_vm4, 0, %v562_v57  ;;  %v748_v15 = vmax.f32 %v716_v6, 0.0 }
  0x4c   : > { %2347 = vmatpush1.bf16.msra.mxu0 %v6217_v43  ;;  %v6707_v37 = vld [vmem:[#allocation2 + $0x70] sm:$0xff]   ;;  %v1968_v43 = vrot.slane %v6214_v32, 1  ;;  %v1022_v13 = vrot.slane %v1020_v61, 7  ;;  %v1248_v16 = vld [vmem:[#allocation2 + $0x80] sm:$0x1]  ;;  %v717_v20 = vadd.f32 %v6491_v30, %v678_v42  ;;  %v507_v21 = vsel %vm6458_vm3, 0, %v506_v62 }
  0x4d   : > { %5949 = vmatprep.subr.bf16.mxu0 %v6408_v3  ;;  %v1349_v3 = vld [vmem:[#allocation2] sm:$0xf]  ;;  %3383 = vmatpush1.bf16.msra.mxu1 %v6212_v24  ;;  %v1970_v48 = vrot.slane %v6707_v37, 1  ;;  %1651 = vst [vmem:[#allocation3 + $0x150] sm:$0xff] %v6707_v37  ;;  %v1018_v12 = vrot.slane %v1014_v60, 4  ;;  %v729_v17 = vmax.f32 %v697_v7, 0.0  ;;  %v5622_v31 = vpack.c.bf16 %v748_v15, %v748_v15 }
  0x4e   : > { %v1969_v53 = vsel %vm1942_vm9, %v1966_v11, %v1968_v43  ;;  %3384 = vmatprep.subr.bf16.mxu1 %v6336_v1  ;;  %v1350_v55 = vsel %vm6546_vm8, %v1335_v44, %v1349_v3  ;;  %v1017_v11 = vor.u32 %v1015_v56, %v1014_v60  ;;  %564 = vst [vmem:[#allocation2 + $0x8c] sm:$0x1] %v563_v10  ;;  %v1027_v26 = vrot.slane %v1022_v13, 4  ;;  %v1185_v60 = vld [vmem:[#allocation2 + $0x14] sm:$0x1] }
  0x4f   : > { %2037 = vst [vmem:[#allocation3 + $0x130] sm:$0xff] %v1969_v53  ;;  %5989 = vmatprep.mubr.bf16.mxu1 %v1969_v53  ;;  %v1971_v58 = vsel %vm1942_vm9, %v1968_v43, %v1970_v48  ;;  %1351 = vst [vmem:[#allocation2] sm:$0xf] %v1350_v55  ;;  %v1025_v22 = vor.u32 %v1023_v4, %v1022_v13  ;;  %v5716_v3 = vunpack.c.l.bf16 %v5833_v0  ;;  %v749_v19 = vmax.f32 %v717_v20, 0.0  ;;  %v6225_v53 = vld [vmem:[%s8181_s3 + $0xf8] sm:$0xff]   ;;  %v6228_v13 = vld [vmem:[%s8181_s3 + $0x100] sm:$0xff]  }
  0x50   : > { %2038 = vst [vmem:[#allocation3 + $0x148] sm:$0xff] %v1971_v58  ;;  %5990 = vmatmul.mubr.bf16.gmra.mrb[8].mxu1 %v1971_v58  ;;  %v1245_v24 = vsel %vm6546_vm8, %v1017_v11, %v1244_v5  ;;  %508 = vst [vmem:[#allocation2 + $0x90] sm:$0x1] %v507_v21  ;;  %v5603_v32 = vpack.c.bf16 %v729_v17, %v729_v17  ;;  %v5717_v33 = vunpack.c.h.bf16 %v5833_v0  ;;  %v477_v40 = vsel %vm6458_vm3, 0, %v476_v2  ;;  %v509_v20 = vld [vmem:[#allocation2 + $0x9c] sm:$0x1] }
  0x51   : > { %3385 = vmatpush1.bf16.msra.mxu1 %v6216_v49  ;;  %1246 = vst [vmem:[#allocation2 + $0x78] sm:$0xf] %v1245_v24  ;;  %v1026_v35 = vsel %vm6535_vm7, %v1018_v12, %v1025_v22  ;;  %v1249_v36 = vsel %vm6458_vm3, %v1027_v26, %v1248_v16  ;;  %v679_v39 = vmul.f32 %v5716_v3, %v6485_v27  ;;  %v1029_v43 = vshrl.u32 %v5622_v31, 16  ;;  %v6760_v47 = vld [vmem:[#allocation2 + $0x8] sm:$0xff]   ;;  %v565_v21 = vld [vmem:[#allocation2 + $0x98] sm:$0x1] }
  0x52   : > { %3386 = vmatprep.subr.bf16.mxu1 %v6336_v1  ;;  %1247 = vst [vmem:[#allocation2 + $0x7c] sm:$0xf] %v1026_v35  ;;  %1250 = vst [vmem:[#allocation2 + $0x80] sm:$0x1] %v1249_v36  ;;  %v5623_v44 = vpack.c.bf16 %v749_v19, %v749_v19  ;;  %v680_v45 = vmul.f32 %v5717_v33, %v6485_v27  ;;  %v5676_v46 = vunpack.c.l.bf16 %v6743_v28  ;;  %v1032_v49 = vshll.u32 %v5622_v31, 16  ;;  %v6780_v22 = vld [vmem:[%s6453_s13 + $0x60] sm:$0xff]  }
  0x53   : > { %478 = vst [vmem:[#allocation2 + $0x18] sm:$0x1] %v477_v40  ;;  %v867_v51 = vshrl.u32 %v5603_v32, 16  ;;  %v870_v52 = vshll.u32 %v5603_v32, 16  ;;  %v718_v54 = vadd.f32 %v6491_v30, %v679_v39  ;;  %v1031_v27 = vrot.slane %v1029_v43, 7  ;;  %1638 = vst [vmem:[#allocation3 + $0x18] sm:$0xff] %v6760_v47 }
  0x54   : > { %v1037_v57 = vshrl.u32 %v5623_v44, 16  ;;  %v1676_v58 = vshll.u32 %v6760_v47, 16  ;;  %v1680_v61 = vshrl.u32 %v6760_v47, 16  ;;  %v1040_v62 = vshll.u32 %v5623_v44, 16  ;;  %v6230_v40 = vld [vmem:[%s8181_s3 + $0x108] sm:$0xff]  }
  0x55   : > { %3387 = vmatpush1.bf16.msra.mxu1 %v6220_v9  ;;  %v869_v59 = vrot.slane %v867_v51, 7  ;;  %v1034_v4 = vor.u32 %v1032_v49, %v1031_v27  ;;  %v1035_v5 = vrot.slane %v1031_v27, 4  ;;  %v1255_v7 = vld [vmem:[#allocation2 + $0x8c] sm:$0x1]  ;;  %v719_v12 = vadd.f32 %v6491_v30, %v680_v45  ;;  %v568_v43 = vld [vmem:[#allocation2 + $0xa4] sm:$0x1] }
  0x56   : > { %v6755_v42 = vld [vmem:[#allocation2] sm:$0xff]   ;;  %3388 = vmatprep.subr.bf16.mxu1 %v6336_v1  ;;  %v1039_v6 = vrot.slane %v1037_v57, 7  ;;  %v1678_v2 = vrot.slane %v1676_v58, 1  ;;  %v750_v31 = vmax.f32 %v718_v54, 0.0  ;;  %v5677_v36 = vunpack.c.h.bf16 %v6743_v28  ;;  %v6834_v27 = vld [vmem:[%s6453_s13 + $0x10] sm:$0xff]   ;;  %v6837_v57 = vld [vmem:[%s6453_s13 + $0x68] sm:$0xff]  }
  0x57   : > { %v1669_v55 = vshrl.u32 %v6755_v42, 16  ;;  %v1671_v56 = vshll.u32 %v6755_v42, 16  ;;  %1637 = vst [vmem:[#allocation3] sm:$0xff] %v6755_v42  ;;  %v872_v9 = vor.u32 %v870_v52, %v869_v59  ;;  %v874_v11 = vrot.slane %v869_v59, 4  ;;  %v1258_v59 = vld [vmem:[#allocation2 + $0x90] sm:$0xf] }
  0x58   : > { %v1252_v15 = vsel %vm6546_vm8, %v1034_v4, %v1251_v50  ;;  %v1042_v16 = vor.u32 %v1040_v62, %v1039_v6  ;;  %v1044_v17 = vrot.slane %v1039_v6, 4  ;;  %v6790_v3 = vor.u32 %v1680_v61, %v1678_v2  ;;  %v6283_v50 = vld [vmem:[%s8181_s3 + $0x80] sm:$0xff]  }
  0x59   : > { %3389 = vmatpush1.bf16.msra.mxu1 %v6223_v38  ;;  %v1673_v0 = vrot.slane %v1671_v56, 1  ;;  %v6782_v24 = vld [vmem:[#allocation2 + $0x78] sm:$0xff]   ;;  %1253 = vst [vmem:[#allocation2 + $0x84] sm:$0xf] %v1252_v15  ;;  %v873_v30 = vsel %vm6535_vm7, %v865_v8, %v872_v9  ;;  %v1186_v26 = vsel %vm6458_vm3, %v874_v11, %v1185_v60  ;;  %v751_v8 = vmax.f32 %v719_v12, 0.0 }
  0x5a   : > { %3390 = vmatprep.subr.bf16.mxu1 %v6336_v1  ;;  %1184 = vst [vmem:[#allocation2 + $0x10] sm:$0xf] %v873_v30  ;;  %1187 = vst [vmem:[#allocation2 + $0x14] sm:$0x1] %v1186_v26  ;;  %v1043_v19 = vsel %vm6535_vm7, %v1035_v5, %v1042_v16  ;;  %v1256_v63 = vsel %vm6458_vm3, %v1044_v17, %v1255_v7  ;;  %v1972_v33 = vrot.slane %v6782_v24, 1  ;;  %v510_v45 = vsel %vm6458_vm3, 0, %v509_v20 }
  0x5b   : > { %v1674_v10 = vor.u32 %v1673_v0, %v1669_v55  ;;  %1652 = vst [vmem:[#allocation3 + $0x168] sm:$0xff] %v6782_v24  ;;  %1254 = vst [vmem:[#allocation2 + $0x88] sm:$0xf] %v1043_v19  ;;  %v5624_v35 = vpack.c.bf16 %v750_v31, %v750_v31  ;;  %v6804_v38 = vld [vmem:[%s8182_s4] ss:$0 sm:$0xff]  ;;  %v5625_v44 = vpack.c.bf16 %v751_v8, %v751_v8  ;;  %v566_v28 = vsel %vm6466_vm4, 0, %v565_v21 }
  0x5c   : > { %1257 = vst [vmem:[#allocation2 + $0x8c] sm:$0x1] %v1256_v63  ;;  %v659_v39 = vmul.f32 %v6804_v38, %v5676_v46  ;;  %v5720_v49 = vunpack.c.l.bf16 %v6780_v22  ;;  %v1973_v46 = vsel %vm1942_vm9, %v1970_v48, %v1972_v33  ;;  %v660_v52 = vmul.f32 %v6804_v38, %v5677_v36  ;;  %511 = vst [vmem:[#allocation2 + $0x9c] sm:$0x1] %v510_v45  ;;  %v6828_v48 = vld [vmem:[%s8183_s5] ss:$0 sm:$0xff] }
  0x5d   : > { %3391 = vmatpush1.bf16.msra.mxu1 %v6225_v53  ;;  %v1679_v32 = vsel %vm1667_vm10, %v1674_v10, %v1678_v2  ;;  %v1049_v51 = vshll.u32 %v5624_v35, 16  ;;  %567 = vst [vmem:[#allocation2 + $0x98] sm:$0x1] %v566_v28  ;;  %v479_v53 = vld [vmem:[#allocation2 + $0x24] sm:$0x1]  ;;  %2039 = vst [vmem:[#allocation3 + $0x160] sm:$0xff] %v1973_v46  ;;  %5993 = vmatprep.mubr.bf16.mxu1 %v1973_v46  ;;  %v5721_v62 = vunpack.c.h.bf16 %v6780_v22  ;;  %v5680_v15 = vunpack.c.l.bf16 %v6834_v27 }
  0x5e   : > { %3392 = vmatprep.subr.bf16.mxu1 %v6336_v1  ;;  %2348 = vmatprep.mubr.bf16.mxu0 %v1679_v32  ;;  %v1054_v37 = vshrl.u32 %v5625_v44, 16  ;;  %v1057_v54 = vshll.u32 %v5625_v44, 16  ;;  %v698_v55 = vadd.f32 %v6828_v48, %v659_v39  ;;  %v681_v56 = vmul.f32 %v6804_v38, %v5720_v49  ;;  %v6285_v0 = vld [vmem:[%s8181_s3 + $0x88] sm:$0xff]   ;;  %v6233_v2 = vld [vmem:[%s8181_s3 + $0x110] sm:$0xff]  }
  0x5f   : > { %2349 = vmatmul.mubr.bf16.vlgmr.msra.gmra.mrb[0].mxu0 %v6755_v42  ;;  %v1046_v42 = vshrl.u32 %v5624_v35, 16  ;;  %v699_v60 = vadd.f32 %v6828_v48, %v660_v52  ;;  %v569_v61 = vsel %vm6466_vm4, 0, %v568_v43  ;;  %v480_v9 = vsel %vm6458_vm3, 0, %v479_v53  ;;  %v6286_v30 = vld [vmem:[%s8181_s3 + $0x90] sm:$0xff]  }
  0x60   : > { %5950 = vmatpush3.bf16.msra.mxu0 %v6283_v50  ;;  %v6222_v4 = vld [vmem:[#allocation2 + $0x80] sm:$0xff]   ;;  %v6846_v5 = vrot.slane %v1054_v37, 7  ;;  %v730_v6 = vmax.f32 %v698_v55, 0.0  ;;  %v6849_v7 = vadd.f32 %v6828_v48, %v681_v56  ;;  %570 = vst [vmem:[#allocation2 + $0xa4] sm:$0x1] %v569_v61  ;;  %v682_v10 = vmul.f32 %v6804_v38, %v5721_v62 }
  0x61   : > { %3393 = vmatpush1.bf16.msra.mxu1 %v6228_v13  ;;  %v1048_v58 = vrot.slane %v1046_v42, 7  ;;  %5951 = vmatprep.subr.bf16.mxu0 %v6285_v0  ;;  %v6856_v11 = vld [vmem:[#allocation2 + $0x10] sm:$0xff]   ;;  %481 = vst [vmem:[#allocation2 + $0x24] sm:$0x1] %v480_v9  ;;  %v1974_v16 = vrot.slane %v6222_v4, 1  ;;  %1653 = vst [vmem:[#allocation3 + $0x180] sm:$0xff] %v6222_v4  ;;  %v5724_v22 = vunpack.c.l.bf16 %v6837_v57  ;;  %v661_v4 = vmul.f32 %v6804_v38, %v5680_v15 }
  0x62   : > { %3394 = vmatprep.subr.bf16.mxu1 %v6336_v1  ;;  %v1059_v20 = vor.u32 %v1057_v54, %v6846_v5  ;;  %v5604_v21 = vpack.c.bf16 %v730_v6, %v730_v6  ;;  %v1684_v26 = vshll.u32 %v6856_v11, 16  ;;  %1639 = vst [vmem:[#allocation3 + $0x30] sm:$0xff] %v6856_v11  ;;  %v731_v32 = vmax.f32 %v699_v60, 0.0  ;;  %v512_v42 = vld [vmem:[#allocation2 + $0xa8] sm:$0x1]  ;;  %v6238_v9 = vld [vmem:[%s8181_s3 + $0x120] sm:$0xff]  }
  0x63   : > { %v1051_v12 = vor.u32 %v1049_v51, %v1048_v58  ;;  %v1052_v13 = vrot.slane %v1048_v58, 4  ;;  %v6860_v17 = vld [vmem:[#allocation2 + $0x88] sm:$0xff]   ;;  %v1688_v19 = vshrl.u32 %v6856_v11, 16  ;;  %v1975_v63 = vsel %vm1942_vm9, %v1972_v33, %v1974_v16  ;;  %v6235_v33 = vld [vmem:[%s8181_s3 + $0x118] sm:$0xff]   ;;  %v515_v61 = vld [vmem:[#allocation2 + $0xb4] sm:$0x1] }
  0x64   : > { %5952 = vmatpush3.bf16.msra.mxu0 %v6285_v0  ;;  %v1976_v8 = vrot.slane %v6860_v17, 1  ;;  %1654 = vst [vmem:[#allocation3 + $0x198] sm:$0xff] %v6860_v17  ;;  %v876_v36 = vshrl.u32 %v5604_v21, 16  ;;  %v1262_v39 = vld [vmem:[#allocation2 + $0x98] sm:$0x1]  ;;  %2040 = vst [vmem:[#allocation3 + $0x178] sm:$0xff] %v1975_v63  ;;  %5994 = vmatmul.mubr.bf16.gmra.mrb[12].mxu1 %v1975_v63  ;;  %v5605_v44 = vpack.c.bf16 %v731_v32, %v731_v32 }
  0x65   : > { %3395 = vmatpush1.bf16.msra.mxu1 %v6230_v40  ;;  %5953 = vmatprep.subr.bf16.mxu0 %v6286_v30  ;;  %v1259_v31 = vsel %vm6546_vm8, %v1051_v12, %v1258_v59  ;;  %v1060_v35 = vsel %vm6535_vm7, %v1052_v13, %v1059_v20  ;;  %v535_v40 = vld [vmem:[#allocation2 + $0x20] sm:$0x1]  ;;  %v1686_v43 = vrot.slane %v1684_v26, 1  ;;  %v879_v45 = vshll.u32 %v5604_v21, 16  ;;  %v6287_v51 = vld [vmem:[%s8181_s3 + $0x98] sm:$0xff]  }
  0x66   : > { %3396 = vmatprep.subr.bf16.mxu1 %v6336_v1  ;;  %1260 = vst [vmem:[#allocation2 + $0x90] sm:$0xf] %v1259_v31  ;;  %1261 = vst [vmem:[#allocation2 + $0x94] sm:$0xf] %v1060_v35  ;;  %v752_v24 = vmax.f32 %v6849_v7, 0.0  ;;  %v1977_v28 = vsel %vm1942_vm9, %v1974_v16, %v1976_v8  ;;  %v878_v49 = vrot.slane %v876_v36, 7  ;;  %v721_v50 = vadd.f32 %v6828_v48, %v682_v10 }
  0x67   : > { %v1061_v46 = vrot.slane %v6846_v5, 4  ;;  %v1687_v52 = vsel %vm1667_vm10, %v6790_v3, %v1686_v43  ;;  %2041 = vst [vmem:[#allocation3 + $0x190] sm:$0xff] %v1977_v28  ;;  %5997 = vmatprep.mubr.bf16.mxu1 %v1977_v28  ;;  %v884_v53 = vshrl.u32 %v5605_v44, 16  ;;  %v887_v37 = vshll.u32 %v5605_v44, 16  ;;  %v1188_v54 = vld [vmem:[#allocation2 + $0x18] sm:$0xf] }
  0x68   : > { %5954 = vmatpush3.bf16.msra.mxu0 %v6286_v30  ;;  %v6894_v55 = vor.u32 %v1688_v19, %v1686_v43  ;;  %1916 = vst [vmem:[#allocation3 + $0x20] sm:$0xff] %v1687_v52  ;;  %2356 = vmatprep.mubr.bf16.mxu0 %v1687_v52  ;;  %v881_v56 = vor.u32 %v879_v45, %v878_v49  ;;  %v882_v58 = vrot.slane %v878_v49, 4  ;;  %v753_v62 = vmax.f32 %v721_v50, 0.0  ;;  %v1265_v13 = vld [vmem:[#allocation2 + $0x9c] sm:$0xf]  ;;  %v6288_v20 = vld [vmem:[%s8181_s3 + $0xa0] sm:$0xff]  }
  0x69   : > { %3397 = vmatpush1.bf16.msra.mxu1 %v6233_v2  ;;  %5955 = vmatprep.subr.bf16.mxu0 %v6287_v51  ;;  %v5626_v59 = vpack.c.bf16 %v752_v24, %v752_v24  ;;  %v1263_v60 = vsel %vm6458_vm3, %v1061_v46, %v1262_v39  ;;  %v6900_v3 = vrot.slane %v884_v53, 7  ;;  %v536_v0 = vsel %vm6466_vm4, 0, %v535_v40  ;;  %v6928_v19 = vld [vmem:[%s6453_s13 + $0x70] sm:$0xff]   ;;  %v6240_v40 = vld [vmem:[%s8181_s3 + $0x128] sm:$0xff]  }
  0x6a   : > { %3398 = vmatprep.subr.bf16.mxu1 %v6336_v1  ;;  %2357 = vmatmul.mubr.bf16.gmra.mrb[4].mxu0 %v6760_v47  ;;  %1264 = vst [vmem:[#allocation2 + $0x98] sm:$0x1] %v1263_v60  ;;  %v1189_v5 = vsel %vm6546_vm8, %v881_v56, %v1188_v54  ;;  %537 = vst [vmem:[#allocation2 + $0x20] sm:$0x1] %v536_v0  ;;  %v513_v2 = vsel %vm6458_vm3, 0, %v512_v42  ;;  %v5627_v10 = vpack.c.bf16 %v753_v62, %v753_v62  ;;  %v6289_v49 = vld [vmem:[%s8181_s3 + $0xa8] sm:$0xff]  }
  0x6b   : > { %v1063_v6 = vshrl.u32 %v5626_v59, 16  ;;  %v1066_v7 = vshll.u32 %v5626_v59, 16  ;;  %v571_v47 = vld [vmem:[#allocation2 + $0xb0] sm:$0x1]  ;;  %v889_v12 = vor.u32 %v887_v37, %v6900_v3  ;;  %1190 = vst [vmem:[#allocation2 + $0x18] sm:$0xf] %v1189_v5  ;;  %v700_v15 = vadd.f32 %v6828_v48, %v661_v4 }
  0x6c   : > { %5956 = vmatpush3.bf16.msra.mxu0 %v6287_v51  ;;  %v891_v16 = vrot.slane %v6900_v3, 4  ;;  %514 = vst [vmem:[#allocation2 + $0xa8] sm:$0x1] %v513_v2  ;;  %v5725_v26 = vunpack.c.h.bf16 %v6837_v57  ;;  %v683_v31 = vmul.f32 %v6804_v38, %v5724_v22  ;;  %v516_v32 = vsel %vm6458_vm3, 0, %v515_v61  ;;  %v1269_v42 = vld [vmem:[#allocation2 + $0xa4] sm:$0x1] }
  0x6d   : > { %3399 = vmatpush1.bf16.msra.mxu1 %v6235_v33  ;;  %5957 = vmatprep.subr.bf16.mxu0 %v6288_v20  ;;  %v6919_v21 = vld [vmem:[#allocation2 + $0x90] sm:$0xff]   ;;  %v1065_v30 = vrot.slane %v1063_v6, 7  ;;  %v890_v63 = vsel %vm6535_vm7, %v882_v58, %v889_v12  ;;  %v1071_v35 = vshrl.u32 %v5627_v10, 16  ;;  %v1074_v36 = vshll.u32 %v5627_v10, 16  ;;  %517 = vst [vmem:[#allocation2 + $0xb4] sm:$0x1] %v516_v32 }
  0x6e   : > { %3400 = vmatprep.subr.bf16.mxu1 %v6336_v1  ;;  %v732_v39 = vmax.f32 %v700_v15, 0.0  ;;  %v1978_v57 = vrot.slane %v6919_v21, 1  ;;  %1655 = vst [vmem:[#allocation3 + $0x1b0] sm:$0xff] %v6919_v21  ;;  %1191 = vst [vmem:[#allocation2 + $0x1c] sm:$0xf] %v890_v63  ;;  %v684_v44 = vmul.f32 %v6804_v38, %v5725_v26  ;;  %v722_v33 = vadd.f32 %v6828_v48, %v683_v31  ;;  %v6975_v15 = vld [vmem:[%s6453_s13 + $0x78] sm:$0xff]  }
  0x6f   : > { %v1068_v22 = vor.u32 %v1066_v7, %v1065_v30  ;;  %v1069_v43 = vrot.slane %v1065_v30, 4  ;;  %v1073_v45 = vrot.slane %v1071_v35, 7  ;;  %v572_v28 = vsel %vm6466_vm4, 0, %v571_v47  ;;  %v538_v53 = vld [vmem:[#allocation2 + $0x2c] sm:$0x1]  ;;  %v6290_v7 = vld [vmem:[%s8181_s3 + $0xb0] sm:$0xff]  }
  0x70   : > { %5958 = vmatpush3.bf16.msra.mxu0 %v6288_v20  ;;  %v5606_v24 = vpack.c.bf16 %v732_v39, %v732_v39  ;;  %v1979_v46 = vsel %vm1942_vm9, %v1976_v8, %v1978_v57  ;;  %v723_v51 = vadd.f32 %v6828_v48, %v684_v44  ;;  %573 = vst [vmem:[#allocation2 + $0xb0] sm:$0x1] %v572_v28  ;;  %v5728_v52 = vunpack.c.l.bf16 %v6928_v19  ;;  %v6243_v8 = vld [vmem:[%s8181_s3 + $0x130] sm:$0xff]   ;;  %v574_v62 = vld [vmem:[#allocation2 + $0xbc] sm:$0x1] }
  0x71   : > { %3401 = vmatpush1.bf16.msra.mxu1 %v6238_v9  ;;  %5959 = vmatprep.subr.bf16.mxu0 %v6289_v49  ;;  %v1266_v50 = vsel %vm6546_vm8, %v1068_v22, %v1265_v13  ;;  %2042 = vst [vmem:[#allocation3 + $0x1a8] sm:$0xff] %v1979_v46  ;;  %v1076_v37 = vor.u32 %v1074_v36, %v1073_v45  ;;  %v1078_v54 = vrot.slane %v1073_v45, 4  ;;  %v1192_v17 = vld [vmem:[#allocation2 + $0x20] sm:$0x1]  ;;  %v754_v60 = vmax.f32 %v722_v33, 0.0  ;;  %v6245_v32 = vld [vmem:[%s8181_s3 + $0x138] sm:$0xff]  }
  0x72   : > { %3402 = vmatprep.subr.bf16.mxu1 %v6336_v1  ;;  %5998 = vmatmul.mubr.bf16.gmra.mrb[16].mxu1 %v1979_v46  ;;  %1267 = vst [vmem:[#allocation2 + $0x9c] sm:$0xf] %v1266_v50  ;;  %v893_v56 = vshrl.u32 %v5606_v24, 16  ;;  %v896_v58 = vshll.u32 %v5606_v24, 16  ;;  %v1193_v59 = vsel %vm6458_vm3, %v891_v16, %v1192_v17  ;;  %v755_v61 = vmax.f32 %v723_v51, 0.0  ;;  %v6291_v44 = vld [vmem:[%s8181_s3 + $0xb8] sm:$0xff]  }
  0x73   : > { %v685_v3 = vmul.f32 %v6804_v38, %v5728_v52  ;;  %v1077_v0 = vsel %vm6535_vm7, %v1069_v43, %v1076_v37  ;;  %v1270_v4 = vsel %vm6458_vm3, %v1078_v54, %v1269_v42  ;;  %1194 = vst [vmem:[#allocation2 + $0x20] sm:$0x1] %v1193_v59  ;;  %v539_v6 = vsel %vm6466_vm4, 0, %v538_v53  ;;  %v1195_v2 = vld [vmem:[#allocation2 + $0x24] sm:$0xf] }
  0x74   : > { %5960 = vmatpush3.bf16.msra.mxu0 %v6289_v49  ;;  %v6964_v5 = vrot.slane %v893_v56, 7  ;;  %1268 = vst [vmem:[#allocation2 + $0xa0] sm:$0xf] %v1077_v0  ;;  %1271 = vst [vmem:[#allocation2 + $0xa4] sm:$0x1] %v1270_v4  ;;  %v5628_v47 = vpack.c.bf16 %v754_v60, %v754_v60  ;;  %v5629_v9 = vpack.c.bf16 %v755_v61, %v755_v61  ;;  %v5681_v13 = vunpack.c.h.bf16 %v6834_v27 }
  0x75   : > { %3403 = vmatpush1.bf16.msra.mxu1 %v6240_v40  ;;  %5961 = vmatprep.subr.bf16.mxu0 %v6290_v7  ;;  %v724_v12 = vadd.f32 %v6828_v48, %v685_v3  ;;  %540 = vst [vmem:[#allocation2 + $0x2c] sm:$0x1] %v539_v6  ;;  %v518_v10 = vld [vmem:[#allocation2 + $0xc0] sm:$0x1]  ;;  %v6977_v16 = vld [vmem:[#allocation2 + $0x18] sm:$0xff]   ;;  %v575_v26 = vsel %vm6466_vm4, 0, %v574_v62  ;;  %v5729_v31 = vunpack.c.h.bf16 %v6928_v19  ;;  %v5732_v52 = vunpack.c.l.bf16 %v6975_v15 }
  0x76   : > { %3404 = vmatprep.subr.bf16.mxu1 %v6336_v1  ;;  %v898_v20 = vor.u32 %v896_v58, %v6964_v5  ;;  %v899_v30 = vrot.slane %v6964_v5, 4  ;;  %v1080_v63 = vshrl.u32 %v5628_v47, 16  ;;  %v1083_v27 = vshll.u32 %v5628_v47, 16  ;;  %576 = vst [vmem:[#allocation2 + $0xbc] sm:$0x1] %v575_v26  ;;  %1640 = vst [vmem:[#allocation3 + $0x48] sm:$0xff] %v6977_v16 }
  0x77   : > { %v1088_v35 = vshrl.u32 %v5629_v9, 16  ;;  %v1091_v36 = vshll.u32 %v5629_v9, 16  ;;  %v1692_v39 = vshll.u32 %v6977_v16, 16  ;;  %v1696_v19 = vshrl.u32 %v6977_v16, 16  ;;  %v1272_v22 = vld [vmem:[#allocation2 + $0xa8] sm:$0xf] }
  0x78   : > { %5962 = vmatpush3.bf16.msra.mxu0 %v6290_v7  ;;  %v1196_v40 = vsel %vm6546_vm8, %v898_v20, %v1195_v2  ;;  %v756_v43 = vmax.f32 %v724_v12, 0.0  ;;  %v1082_v24 = vrot.slane %v1080_v63, 7  ;;  %v1276_v28 = vld [vmem:[#allocation2 + $0xb0] sm:$0x1]  ;;  %v662_v49 = vmul.f32 %v6804_v38, %v5681_v13  ;;  %v5825_v7 = vld [vmem:[%s6453_s13 + $0x18] sm:$0xff]  }
  0x79   : > { %3405 = vmatpush1.bf16.msra.mxu1 %v6243_v8  ;;  %5963 = vmatprep.subr.bf16.mxu0 %v6291_v44  ;;  %v6996_v45 = vld [vmem:[#allocation2 + $0x98] sm:$0xff]   ;;  %1197 = vst [vmem:[#allocation2 + $0x24] sm:$0xf] %v1196_v40  ;;  %v1090_v33 = vrot.slane %v1088_v35, 7  ;;  %v686_v46 = vmul.f32 %v6804_v38, %v5729_v31  ;;  %v1694_v50 = vrot.slane %v1692_v39, 1  ;;  %v519_v51 = vsel %vm6458_vm3, 0, %v518_v10 }
  0x7a   : > { %3406 = vmatprep.subr.bf16.mxu1 %v6336_v1  ;;  %v5630_v42 = vpack.c.bf16 %v756_v43, %v756_v43  ;;  %v1980_v53 = vrot.slane %v6996_v45, 1  ;;  %1656 = vst [vmem:[#allocation3 + $0x1c8] sm:$0xff] %v6996_v45  ;;  %v1085_v37 = vor.u32 %v1083_v27, %v1082_v24  ;;  %v1086_v54 = vrot.slane %v1082_v24, 4  ;;  %520 = vst [vmem:[#allocation2 + $0xc0] sm:$0x1] %v519_v51 }
  0x7b   : > { %v1093_v56 = vor.u32 %v1091_v36, %v1090_v33  ;;  %v7007_v58 = vsel %vm1667_vm10, %v6894_v55, %v1694_v50  ;;  %v7009_v17 = vld [vmem:[#allocation2 + $0xa0] sm:$0xff]   ;;  %v1095_v8 = vrot.slane %v1090_v33, 4  ;;  %v701_v59 = vadd.f32 %v6828_v48, %v662_v49  ;;  %v482_v62 = vld [vmem:[#allocation2 + $0x30] sm:$0x1]  ;;  %v1279_v26 = vld [vmem:[#allocation2 + $0xb4] sm:$0xf] }
  0x7c   : > { %5964 = vmatpush3.bf16.msra.mxu0 %v6291_v44  ;;  %2364 = vmatprep.mubr.bf16.mxu0 %v7007_v58  ;;  %v1981_v60 = vsel %vm1942_vm9, %v1978_v57, %v1980_v53  ;;  %v1273_v55 = vsel %vm6546_vm8, %v1085_v37, %v1272_v22  ;;  %v1097_v3 = vshrl.u32 %v5630_v42, 16  ;;  %v1982_v0 = vrot.slane %v7009_v17, 1  ;;  %1657 = vst [vmem:[#allocation3 + $0x1e0] sm:$0xff] %v7009_v17  ;;  %v1199_v43 = vld [vmem:[#allocation2 + $0x2c] sm:$0x1] }
  0x7d   : > { %3407 = vmatpush1.bf16.msra.mxu1 %v6245_v32  ;;  %v1094_v61 = vsel %vm6535_vm7, %v1086_v54, %v1093_v56  ;;  %2365 = vmatmul.mubr.bf16.gmra.mrb[8].mxu0 %v6856_v11  ;;  %2043 = vst [vmem:[#allocation3 + $0x1c0] sm:$0xff] %v1981_v60  ;;  %1274 = vst [vmem:[#allocation2 + $0xa8] sm:$0xf] %v1273_v55  ;;  %v1100_v4 = vshll.u32 %v5630_v42, 16  ;;  %v1277_v57 = vsel %vm6458_vm3, %v1095_v8, %v1276_v28  ;;  %v1283_v55 = vld [vmem:[#allocation2 + $0xbc] sm:$0x1] }
  0x7e   : > { %4235 = vmatprep.subr.bf16.mxu1 %v6336_v1  ;;  %6001 = vmatprep.mubr.bf16.mxu1 %v1981_v60  ;;  %1275 = vst [vmem:[#allocation2 + $0xac] sm:$0xf] %v1094_v61  ;;  %v733_v6 = vmax.f32 %v701_v59, 0.0  ;;  %v7027_v2 = vrot.slane %v1097_v3, 7  ;;  %1278 = vst [vmem:[#allocation2 + $0xb0] sm:$0x1] %v1277_v57  ;;  %v725_v47 = vadd.f32 %v6828_v48, %v686_v46  ;;  %v5733_v9 = vunpack.c.h.bf16 %v6975_v15 }
  0x7f   : > { %v687_v12 = vmul.f32 %v6804_v38, %v5732_v52  ;;  %v1983_v13 = vsel %vm1942_vm9, %v1980_v53, %v1982_v0  ;;  %v1698_v20 = vor.u32 %v1696_v19, %v1694_v50  ;;  %v483_v32 = vsel %vm6458_vm3, 0, %v482_v62 }
  0x80   : > { %v7033_v10 = vld [vmem:[#allocation2 + $0x20] sm:$0xff]   ;;  %v5607_v31 = vpack.c.bf16 %v733_v6, %v733_v6  ;;  %2044 = vst [vmem:[#allocation3 + $0x1d8] sm:$0xff] %v1983_v13  ;;  %6002 = vmatmul.mubr.bf16.gmra.mrb[20].mxu1 %v1983_v13  ;;  %v1102_v63 = vor.u32 %v1100_v4, %v7027_v2  ;;  %v757_v27 = vmax.f32 %v725_v47, 0.0  ;;  %v688_v35 = vmul.f32 %v6804_v38, %v5733_v9 }
  0x81   : > { %484 = vst [vmem:[#allocation2 + $0x30] sm:$0x1] %v483_v32  ;;  %v5684_v15 = vunpack.c.l.bf16 %v5825_v7  ;;  %v1700_v36 = vshll.u32 %v7033_v10, 16  ;;  %1641 = vst [vmem:[#allocation3 + $0x60] sm:$0xff] %v7033_v10  ;;  %v1103_v19 = vrot.slane %v7027_v2, 4  ;;  %v726_v24 = vadd.f32 %v6828_v48, %v687_v12 }
  0x82   : > { %v901_v39 = vshrl.u32 %v5607_v31, 16  ;;  %v904_v40 = vshll.u32 %v5607_v31, 16  ;;  %v1280_v22 = vsel %vm6546_vm8, %v1102_v63, %v1279_v26  ;;  %v5631_v44 = vpack.c.bf16 %v757_v27, %v757_v27  ;;  %v1286_v63 = vld [vmem:[#allocation2 + $0xc0] sm:$0xf] }
  0x83   : > { %v7045_v33 = vrot.slane %v1700_v36, 1  ;;  %1281 = vst [vmem:[#allocation2 + $0xb4] sm:$0xf] %v1280_v22  ;;  %v727_v49 = vadd.f32 %v6828_v48, %v688_v35  ;;  %v5685_v46 = vunpack.c.h.bf16 %v5825_v7  ;;  %v663_v37 = vmul.f32 %v6804_v38, %v5684_v15  ;;  %v485_v22 = vld [vmem:[#allocation2 + $0x3c] sm:$0x1] }
  0x84   : > { %v903_v28 = vrot.slane %v901_v39, 7  ;;  %v1105_v42 = vshrl.u32 %v5631_v44, 16  ;;  %v1108_v8 = vshll.u32 %v5631_v44, 16  ;;  %v758_v59 = vmax.f32 %v726_v24, 0.0 }
  0x85   : > { %v7048_v50 = vld [vmem:[#allocation2 + $0xa8] sm:$0xff]   ;;  %v7052_v51 = vsel %vm1667_vm10, %v1698_v20, %v7045_v33  ;;  %v759_v3 = vmax.f32 %v727_v49, 0.0  ;;  %v664_v62 = vmul.f32 %v6804_v38, %v5685_v46  ;;  %v702_v2 = vadd.f32 %v6828_v48, %v663_v37 }
  0x86   : > { %v906_v52 = vor.u32 %v904_v40, %v903_v28  ;;  %v908_v53 = vrot.slane %v903_v28, 4  ;;  %1918 = vst [vmem:[#allocation3 + $0x50] sm:$0xff] %v7052_v51  ;;  %2372 = vmatprep.mubr.bf16.mxu0 %v7052_v51  ;;  %v1984_v54 = vrot.slane %v7048_v50, 1  ;;  %1658 = vst [vmem:[#allocation3 + $0x1f8] sm:$0xff] %v7048_v50  ;;  %v1107_v56 = vrot.slane %v1105_v42, 7 }
  0x87   : > { %2373 = vmatmul.mubr.bf16.gmra.mrb[12].mxu0 %v6977_v16  ;;  %v5632_v7 = vpack.c.bf16 %v758_v59, %v758_v59  ;;  %v5633_v5 = vpack.c.bf16 %v759_v3, %v759_v3  ;;  %v734_v26 = vmax.f32 %v702_v2, 0.0  ;;  %v1704_v27 = vshrl.u32 %v7033_v10, 16 }
  0x88   : > { %v907_v60 = vsel %vm6535_vm7, %v899_v30, %v906_v52  ;;  %v1200_v61 = vsel %vm6458_vm3, %v908_v53, %v1199_v43  ;;  %v1985_v4 = vsel %vm1942_vm9, %v1982_v0, %v1984_v54  ;;  %v1110_v57 = vor.u32 %v1108_v8, %v1107_v56  ;;  %v541_v43 = vld [vmem:[#allocation2 + $0x38] sm:$0x1] }
  0x89   : > { %1198 = vst [vmem:[#allocation2 + $0x28] sm:$0xf] %v907_v60  ;;  %1201 = vst [vmem:[#allocation2 + $0x2c] sm:$0x1] %v1200_v61  ;;  %v1112_v6 = vrot.slane %v1107_v56, 4  ;;  %6005 = vmatprep.mubr.bf16.mxu1 %v1985_v4  ;;  %v703_v30 = vadd.f32 %v6828_v48, %v664_v62  ;;  %v1114_v0 = vshrl.u32 %v5632_v7, 16  ;;  %v5608_v15 = vpack.c.bf16 %v734_v26, %v734_v26 }
  0x8a   : > { %2045 = vst [vmem:[#allocation3 + $0x1f0] sm:$0xff] %v1985_v4  ;;  %v7070_v47 = vld [vmem:[#allocation2 + $0xb0] sm:$0xff]   ;;  %v1111_v9 = vsel %vm6535_vm7, %v1103_v19, %v1110_v57  ;;  %v1117_v12 = vshll.u32 %v5632_v7, 16  ;;  %v1122_v13 = vshrl.u32 %v5633_v5, 16  ;;  %v1125_v20 = vshll.u32 %v5633_v5, 16  ;;  %v6293_v26 = vld [vmem:[#allocation3 + $0xd8] sm:$0xff] }
  0x8b   : > { %v1284_v38 = vsel %vm6458_vm3, %v1112_v6, %v1283_v55  ;;  %1282 = vst [vmem:[#allocation2 + $0xb8] sm:$0xf] %v1111_v9  ;;  %v735_v31 = vmax.f32 %v703_v30, 0.0  ;;  %v1986_v32 = vrot.slane %v7070_v47, 1  ;;  %1659 = vst [vmem:[#allocation3 + $0x210] sm:$0xff] %v7070_v47  ;;  %v1116_v48 = vrot.slane %v1114_v0, 7 }
  0x8c   : > { %1285 = vst [vmem:[#allocation2 + $0xbc] sm:$0x1] %v1284_v38  ;;  %v7079_v35 = vrot.slane %v1122_v13, 7  ;;  %v910_v49 = vshrl.u32 %v5608_v15, 16  ;;  %v913_v46 = vshll.u32 %v5608_v15, 16  ;;  %v1706_v52 = vor.u32 %v1704_v27, %v7045_v33  ;;  %v6292_v0 = vld [vmem:[#allocation3 + $0xc0] sm:$0xff] }
  0x8d   : > { %v5609_v36 = vpack.c.bf16 %v735_v31, %v735_v31  ;;  %v1987_v39 = vsel %vm1942_vm9, %v1984_v54, %v1986_v32  ;;  %v1119_v40 = vor.u32 %v1117_v12, %v1116_v48  ;;  %v1120_v19 = vrot.slane %v1116_v48, 4  ;;  %v1202_v56 = vld [vmem:[#allocation2 + $0x30] sm:$0xf]  ;;  %v2815_v57 = vld [vmem:[#allocation3 + $0x20] sm:$0xf0] }
  0x8e   : > { %2046 = vst [vmem:[#allocation3 + $0x208] sm:$0xff] %v1987_v39  ;;  %6006 = vmatmul.mubr.bf16.gmra.mrb[24].mxu1 %v1987_v39  ;;  %v1127_v24 = vor.u32 %v1125_v20, %v7079_v35  ;;  %v912_v59 = vrot.slane %v910_v49, 7  ;;  %v486_v33 = vsel %vm6458_vm3, 0, %v485_v22  ;;  %v542_v55 = vsel %vm6466_vm4, 0, %v541_v43  ;;  %v2814_v48 = vld [vmem:[#allocation3 + $0x18] sm:$0xf0] }
  0x8f   : > { %v1287_v28 = vsel %vm6546_vm8, %v1119_v40, %v1286_v63  ;;  %v918_v42 = vshrl.u32 %v5609_v36, 16  ;;  %v921_v54 = vshll.u32 %v5609_v36, 16  ;;  %487 = vst [vmem:[#allocation2 + $0x3c] sm:$0x1] %v486_v33  ;;  %543 = vst [vmem:[#allocation2 + $0x38] sm:$0x1] %v542_v55 }
  0x90   : > { %v7082_v44 = vld [vmem:[#allocation2 + $0x28] sm:$0xff]   ;;  %v1128_v37 = vsel %vm6535_vm7, %v1120_v19, %v1127_v24  ;;  %1288 = vst [vmem:[#allocation2 + $0xc0] sm:$0xf] %v1287_v28  ;;  %v915_v62 = vor.u32 %v913_v46, %v912_v59  ;;  %v916_v4 = vrot.slane %v912_v59, 4  ;;  %v3016_v9 = vrot.slane %v2815_v57, 4  ;;  %v6294_v39 = vld [vmem:[#allocation3 + $0xf0] sm:$0xff] }
  0x91   : > { %v1708_v53 = vshll.u32 %v7082_v44, 16  ;;  %1642 = vst [vmem:[#allocation3 + $0x78] sm:$0xff] %v7082_v44  ;;  %1289 = vst [vmem:[#allocation2 + $0xc4] sm:$0xf] %v1128_v37  ;;  %v920_v61 = vrot.slane %v918_v42, 7  ;;  %v3017_v38 = vrot.slane %v7007_v58, 4 }
  0x92   : > { %v1203_v2 = vsel %vm6546_vm8, %v915_v62, %v1202_v56  ;;  %v1732_v12 = vshll.u32 %v6292_v0, 16  ;;  %v1736_v20 = vshrl.u32 %v6292_v0, 16  ;;  %v1740_v31 = vshll.u32 %v6293_v26, 16  ;;  %v6295_v46 = vld [vmem:[#allocation3 + $0x108] sm:$0xff] }
  0x93   : > { %v7092_v8 = vld [vmem:[#allocation2 + $0xb8] sm:$0xff]   ;;  %v7094_v60 = vrot.slane %v1708_v53, 1  ;;  %v923_v7 = vor.u32 %v921_v54, %v920_v61  ;;  %1204 = vst [vmem:[#allocation2 + $0x30] sm:$0xf] %v1203_v2  ;;  %v925_v13 = vrot.slane %v920_v61, 4  ;;  %v1744_v27 = vshrl.u32 %v6293_v26, 16 }
  0x94   : > { %v1988_v3 = vrot.slane %v7092_v8, 1  ;;  %1660 = vst [vmem:[#allocation3 + $0x228] sm:$0xff] %v7092_v8  ;;  %v7117_v63 = vrot.slane %v1732_v12, 1  ;;  %v1712_v15 = vshrl.u32 %v7082_v44, 16  ;;  %v1742_v36 = vrot.slane %v1740_v31, 1 }
  0x95   : > { %v7104_v6 = vsel %vm1667_vm10, %v1706_v52, %v7094_v60  ;;  %v924_v30 = vsel %vm6535_vm7, %v916_v4, %v923_v7  ;;  %v1748_v40 = vshll.u32 %v6294_v39, 16  ;;  %v1752_v19 = vshrl.u32 %v6294_v39, 16  ;;  %v6296_v4 = vld [vmem:[#allocation3 + $0x120] sm:$0xff]  ;;  %v6298_v39 = vld [vmem:[#allocation3 + $0x150] sm:$0xff] }
  0x96   : > { %1919 = vst [vmem:[#allocation3 + $0x68] sm:$0xff] %v7104_v6  ;;  %2380 = vmatprep.mubr.bf16.mxu0 %v7104_v6  ;;  %v1989_v5 = vsel %vm1942_vm9, %v1986_v32, %v1988_v3  ;;  %1205 = vst [vmem:[#allocation2 + $0x34] sm:$0xf] %v924_v30  ;;  %v3018_v43 = vsel %vm1179_vm6, %v3016_v9, %v3017_v38  ;;  %v1206_v24 = vld [vmem:[#allocation2 + $0x38] sm:$0x1]  ;;  %v1738_v49 = vor.u32 %v1736_v20, %v7117_v63  ;;  %v6297_v30 = vld [vmem:[#allocation3 + $0x138] sm:$0xff] }
  0x97   : > { %2381 = vmatmul.mubr.bf16.gmra.mrb[16].mxu0 %v7033_v10  ;;  %2047 = vst [vmem:[#allocation3 + $0x220] sm:$0xff] %v1989_v5  ;;  %6009 = vmatprep.mubr.bf16.mxu1 %v1989_v5  ;;  %v1209_v28 = vld [vmem:[#allocation2 + $0x3c] sm:$0xf]  ;;  %v1756_v42 = vshll.u32 %v6295_v46, 16  ;;  %v1207_v52 = vsel %vm6458_vm3, %v925_v13, %v1206_v24  ;;  %v1746_v37 = vor.u32 %v1744_v27, %v1742_v36  ;;  %v1750_v54 = vrot.slane %v1748_v40, 1 }
  0x98   : > { %v7115_v32 = vld [vmem:[#allocation2 + $0xc0] sm:$0xff]   ;;  %v1210_v53 = vsel %vm6546_vm8, %v6542_v29, %v1209_v28  ;;  %1208 = vst [vmem:[#allocation2 + $0x38] sm:$0x1] %v1207_v52  ;;  %v7135_v59 = vsel %vm1667_vm10, %v1738_v49, %v1742_v36  ;;  %v1760_v33 = vshrl.u32 %v6295_v46, 16  ;;  %v3013_v55 = vrot.slane %v2814_v48, 4 }
  0x99   : > { %v1990_v22 = vrot.slane %v7115_v32, 1  ;;  %1661 = vst [vmem:[#allocation3 + $0x240] sm:$0xff] %v7115_v32  ;;  %1211 = vst [vmem:[#allocation2 + $0x3c] sm:$0xf] %v1210_v53  ;;  %v1758_v61 = vrot.slane %v1756_v42, 1  ;;  %v7139_v29 = vsel %vm1667_vm10, %v1746_v37, %v1750_v54  ;;  %v1754_v62 = vor.u32 %v1752_v19, %v1750_v54 }
  0x9a   : > { %1923 = vst [vmem:[#allocation3 + $0xc8] sm:$0xff] %v7135_v59  ;;  %v1764_v57 = vshll.u32 %v6296_v4, 16  ;;  %1924 = vst [vmem:[#allocation3 + $0xe0] sm:$0xff] %v7139_v29  ;;  %v1768_v2 = vshrl.u32 %v6296_v4, 16  ;;  %v1772_v9 = vshll.u32 %v6297_v30, 16  ;;  %v3024_v0 = vrot.slane %v7052_v51, 4 }
  0x9b   : > { %v1991_v56 = vsel %vm1942_vm9, %v1988_v3, %v1990_v22  ;;  %v3014_v3 = vrot.slane %v6856_v11, 4  ;;  %v1762_v5 = vor.u32 %v1760_v33, %v1758_v61  ;;  %v7147_v12 = vsel %vm1667_vm10, %v1754_v62, %v1758_v61 }
  0x9c   : > { %2048 = vst [vmem:[#allocation3 + $0x238] sm:$0xff] %v1991_v56  ;;  %6010 = vmatmul.mubr.bf16.gmra.mrb[28].mxu1 %v1991_v56  ;;  %v1766_v13 = vrot.slane %v1764_v57, 1  ;;  %v1714_v20 = vor.u32 %v1712_v15, %v7094_v60  ;;  %1925 = vst [vmem:[#allocation3 + $0xf8] sm:$0xff] %v7147_v12  ;;  %v1774_v31 = vrot.slane %v1772_v9, 1  ;;  %v6246_v60 = vld [vmem:[%s8181_s3 + $0x180] sm:$0xff]   ;;  %v1776_v15 = vshrl.u32 %v6297_v30, 16 }
  0x9d   : > { %v7141_v7 = vld [vmem:[#allocation2 + $0x30] sm:$0xff]   ;;  %3408 = vmatprep.mubr.bf16.mxu1 %v3018_v43  ;;  %v3015_v36 = vsel %vm1179_vm6, %v3013_v55, %v3014_v3  ;;  %v1780_v40 = vshll.u32 %v6298_v39, 16  ;;  %v3025_v28 = vsel %vm1179_vm6, %v3017_v38, %v3024_v0  ;;  %v3022_v58 = vrot.slane %v6977_v16, 4  ;;  %v6248_v38 = vld [vmem:[%s8181_s3 + $0x188] sm:$0xff]  }
  0x9e   : > { %v1716_v26 = vshll.u32 %v7141_v7, 16  ;;  %1643 = vst [vmem:[#allocation3 + $0x90] sm:$0xff] %v7141_v7  ;;  %v1720_v11 = vshrl.u32 %v7141_v7, 16  ;;  %v7155_v48 = vsel %vm1667_vm10, %v1762_v5, %v1766_v13  ;;  %v1770_v27 = vor.u32 %v1768_v2, %v1766_v13  ;;  %v6299_v55 = vld [vmem:[#allocation3 + $0x168] sm:$0xff]  ;;  %v6300_v9 = vld [vmem:[#allocation3 + $0x180] sm:$0xff] }
  0x9f   : > { %1926 = vst [vmem:[#allocation3 + $0x110] sm:$0xff] %v7155_v48  ;;  %v1778_v49 = vor.u32 %v1776_v15, %v1774_v31  ;;  %v1782_v46 = vrot.slane %v1780_v40, 1  ;;  %v1784_v54 = vshrl.u32 %v6298_v39, 16  ;;  %v3030_v61 = vrot.slane %v7104_v6, 4 }
  0xa0   : > { %v1718_v51 = vrot.slane %v1716_v26, 1  ;;  %v7162_v19 = vld [vmem:[#allocation2 + $0x38] sm:$0xff]   ;;  %v7165_v43 = vsel %vm1667_vm10, %v1770_v27, %v1774_v31  ;;  %v1788_v62 = vshll.u32 %v6299_v55, 16  ;;  %v1792_v5 = vshrl.u32 %v6299_v55, 16  ;;  %v6249_v26 = vld [vmem:[%s8181_s3 + $0x190] sm:$0xff]  }
  0xa1   : > { %1927 = vst [vmem:[#allocation3 + $0x128] sm:$0xff] %v7165_v43  ;;  %v1724_v52 = vshll.u32 %v7162_v19, 16  ;;  %1644 = vst [vmem:[#allocation3 + $0xa8] sm:$0xff] %v7162_v19  ;;  %v1728_v53 = vshrl.u32 %v7162_v19, 16  ;;  %v7185_v37 = vsel %vm1667_vm10, %v1778_v49, %v1782_v46  ;;  %v1786_v33 = vor.u32 %v1784_v54, %v1782_v46 }
  0xa2   : > { %v7168_v24 = vsel %vm1667_vm10, %v1714_v20, %v1718_v51  ;;  %v1722_v42 = vor.u32 %v1720_v11, %v1718_v51  ;;  %1928 = vst [vmem:[#allocation3 + $0x140] sm:$0xff] %v7185_v37  ;;  %v3023_v2 = vsel %vm1179_vm6, %v3014_v3, %v3022_v58  ;;  %v1790_v30 = vrot.slane %v1788_v62, 1 }
  0xa3   : > { %1920 = vst [vmem:[#allocation3 + $0x80] sm:$0xff] %v7168_v24  ;;  %2388 = vmatprep.mubr.bf16.mxu0 %v7168_v24  ;;  %v1726_v56 = vrot.slane %v1724_v52, 1  ;;  %v1796_v6 = vshll.u32 %v6300_v9, 16  ;;  %v3031_v20 = vsel %vm1179_vm6, %v3024_v0, %v3030_v61  ;;  %v3072_v11 = vrot.slane %v7155_v48, 4 }
  0xa4   : > { %3409 = vmatmul.mubr.bf16.vlgmr.msra.gmra.mrb[32].mxu1 %v3015_v36  ;;  %2389 = vmatmul.mubr.bf16.gmra.mrb[20].mxu0 %v7082_v44  ;;  %v3078_v3 = vrot.slane %v7165_v43, 4  ;;  %v7209_v31 = vsel %vm1667_vm10, %v1786_v33, %v1790_v30  ;;  %v1794_v27 = vor.u32 %v1792_v5, %v1790_v30  ;;  %v1800_v36 = vshrl.u32 %v6300_v9, 16  ;;  %v6251_v30 = vld [vmem:[%s8181_s3 + $0x1a0] sm:$0xff]  }
  0xa5   : > { %4236 = vmatpush1.bf16.msra.mxu1 %v6246_v60  ;;  %3416 = vmatprep.mubr.bf16.mxu1 %v3025_v28  ;;  %v7191_v4 = vsel %vm1667_vm10, %v1722_v42, %v1726_v56  ;;  %v1730_v57 = vor.u32 %v1728_v53, %v1726_v56  ;;  %1929 = vst [vmem:[#allocation3 + $0x158] sm:$0xff] %v7209_v31  ;;  %v1798_v0 = vrot.slane %v1796_v6, 1  ;;  %v6301_v60 = vld [vmem:[#allocation3 + $0x198] sm:$0xff]  ;;  %v3084_v39 = vrot.slane %v7185_v37, 4 }
  0xa6   : > { %4237 = vmatprep.subr.bf16.mxu1 %v6336_v1  ;;  %1921 = vst [vmem:[#allocation3 + $0x98] sm:$0xff] %v7191_v4  ;;  %2396 = vmatprep.mubr.bf16.mxu0 %v7191_v4  ;;  %v7216_v51 = vsel %vm1179_vm6, %v3072_v11, %v3078_v3  ;;  %v1804_v15 = vshll.u32 %v6301_v60, 16  ;;  %v3036_v40 = vrot.slane %v7168_v24, 4  ;;  %v6250_v28 = vld [vmem:[%s8181_s3 + $0x198] sm:$0xff]   ;;  %v1808_v42 = vshrl.u32 %v6301_v60, 16 }
  0xa7   : > { %v7198_v13 = vsel %vm1667_vm10, %v1730_v57, %v7117_v63  ;;  %v3028_v63 = vrot.slane %v7033_v10, 4  ;;  %v7226_v49 = vsel %vm1667_vm10, %v1794_v27, %v1798_v0  ;;  %v1802_v46 = vor.u32 %v1800_v36, %v1798_v0 }
  0xa8   : > { %1922 = vst [vmem:[#allocation3 + $0xb0] sm:$0xff] %v7198_v13  ;;  %1930 = vst [vmem:[#allocation3 + $0x170] sm:$0xff] %v7226_v49  ;;  %v1806_v52 = vrot.slane %v1804_v15, 1  ;;  %v7231_v53 = vsel %vm1179_vm6, %v3078_v3, %v3084_v39  ;;  %v1812_v24 = vshll.u32 %v6919_v21, 16  ;;  %v1816_v56 = vshrl.u32 %v6919_v21, 16  ;;  %v6252_v15 = vld [vmem:[%s8181_s3 + $0x1a8] sm:$0xff]  }
  0xa9   : > { %4238 = vmatpush1.bf16.msra.mxu1 %v6248_v38  ;;  %v3090_v38 = vrot.slane %v7209_v31, 4  ;;  %v3029_v54 = vsel %vm1179_vm6, %v3022_v58, %v3028_v63  ;;  %v1820_v33 = vshll.u32 %v6996_v45, 16  ;;  %v3096_v58 = vrot.slane %v7226_v49, 4 }
  0xaa   : > { %4239 = vmatprep.subr.bf16.mxu1 %v6336_v1  ;;  %v7241_v55 = vsel %vm1667_vm10, %v1802_v46, %v1806_v52  ;;  %v1810_v62 = vor.u32 %v1808_v42, %v1806_v52  ;;  %v1814_v57 = vrot.slane %v1812_v24, 1  ;;  %v1832_v36 = vshrl.u32 %v7009_v17, 16 }
  0xab   : > { %v7244_v5 = vsel %vm1179_vm6, %v3084_v39, %v3090_v38  ;;  %1931 = vst [vmem:[#allocation3 + $0x188] sm:$0xff] %v7241_v55  ;;  %v1822_v21 = vrot.slane %v1820_v33, 1  ;;  %v7263_v3 = vsel %vm1179_vm6, %v3090_v38, %v3096_v58  ;;  %v3042_v60 = vrot.slane %v7191_v4, 4  ;;  %v6253_v33 = vld [vmem:[%s8181_s3 + $0x1b0] sm:$0xff]  }
  0xac   : > { %3417 = vmatmul.mubr.bf16.gmra.mrb[36].mxu1 %v3023_v2  ;;  %2397 = vmatmul.mubr.bf16.gmra.mrb[24].mxu0 %v7141_v7  ;;  %v3037_v2 = vsel %vm1179_vm6, %v3030_v61, %v3036_v40  ;;  %v7254_v9 = vsel %vm1667_vm10, %v1810_v62, %v1814_v57  ;;  %v1818_v6 = vor.u32 %v1816_v56, %v1814_v57  ;;  %v1828_v61 = vshll.u32 %v7009_v17, 16  ;;  %v7291_v56 = vld [vmem:[#allocation3 + $0xc0] sm:$0xff] }
  0xad   : > { %3424 = vmatprep.mubr.bf16.mxu1 %v3031_v20  ;;  %2404 = vmatprep.mubr.bf16.mxu0 %v7198_v13  ;;  %v1824_v20 = vshrl.u32 %v6996_v45, 16  ;;  %1932 = vst [vmem:[#allocation3 + $0x1a0] sm:$0xff] %v7254_v9  ;;  %v1836_v39 = vshll.u32 %v7048_v50, 16  ;;  %v1840_v17 = vshrl.u32 %v7048_v50, 16  ;;  %v1844_v52 = vshll.u32 %v7070_v47, 16 }
  0xae   : > { %4240 = vmatpush1.bf16.msra.mxu1 %v6249_v26  ;;  %v3034_v26 = vrot.slane %v7082_v44, 4  ;;  %v7267_v27 = vsel %vm1667_vm10, %v1818_v6, %v1822_v21  ;;  %v1830_v45 = vrot.slane %v1828_v61, 1  ;;  %v1848_v38 = vshrl.u32 %v7070_v47, 16 }
  0xaf   : > { %4241 = vmatprep.subr.bf16.mxu1 %v6336_v1  ;;  %v1826_v0 = vor.u32 %v1824_v20, %v1822_v21  ;;  %1933 = vst [vmem:[#allocation3 + $0x1b8] sm:$0xff] %v7267_v27  ;;  %v1838_v42 = vrot.slane %v1836_v39, 1  ;;  %v3043_v50 = vsel %vm1179_vm6, %v3036_v40, %v3042_v60  ;;  %v1860_v21 = vshll.u32 %v7115_v32, 16  ;;  %v7316_v20 = vld [vmem:[%s8181_s3 + $0x140] sm:$0xff]  }
  0xb0   : > { %v1834_v46 = vor.u32 %v1832_v36, %v1830_v45  ;;  %v3035_v24 = vsel %vm1179_vm6, %v3028_v63, %v3034_v26  ;;  %v1846_v63 = vrot.slane %v1844_v52, 1  ;;  %v3040_v6 = vrot.slane %v7141_v7, 4  ;;  %v6302_v39 = vld [vmem:[#allocation3] sm:$0xff]  ;;  %v6304_v52 = vld [vmem:[#allocation3 + $0x30] sm:$0xff]  ;;  %6013 = vmatprep.subr.bf16.mxu0 %v7316_v20 }
  0xb1   : > { %v1842_v57 = vor.u32 %v1840_v17, %v1838_v42  ;;  %v3048_v61 = vrot.slane %v7198_v13, 4  ;;  %v6303_v17 = vld [vmem:[#allocation3 + $0x18] sm:$0xff]  ;;  %v3066_v25 = vrot.slane %v7147_v12, 4  ;;  %v1864_v23 = vshrl.u32 %v7115_v32, 16 }
  0xb2   : > { %4242 = vmatpush1.bf16.msra.mxu1 %v6250_v28  ;;  %v7279_v28 = vsel %vm1667_vm10, %v1826_v0, %v1830_v45  ;;  %v7300_v62 = vsel %vm1667_vm10, %v1834_v46, %v1838_v42  ;;  %v1850_v40 = vor.u32 %v1848_v38, %v1846_v63  ;;  %v6254_v0 = vld [vmem:[%s8181_s3 + $0x1b8] sm:$0xff]   ;;  %v1943_v46 = vrot.slane %v6302_v39, 1  ;;  %v580_v39 = vld [vmem:[#allocation2 + $0xd4] sm:$0x1] }
  0xb3   : > { %4243 = vmatprep.subr.bf16.mxu1 %v6336_v1  ;;  %1934 = vst [vmem:[#allocation3 + $0x1d0] sm:$0xff] %v7279_v28  ;;  %1935 = vst [vmem:[#allocation3 + $0x1e8] sm:$0xff] %v7300_v62  ;;  %v1944_v42 = vrot.slane %v6303_v17, 1  ;;  %v3046_v17 = vrot.slane %v7162_v19, 4 }
  0xb4   : > { %3425 = vmatmul.mubr.bf16.gmra.mrb[40].mxu1 %v3029_v54  ;;  %2405 = vmatmul.mubr.bf16.gmra.mrb[28].mxu0 %v7162_v19  ;;  %v1852_v54 = vshll.u32 %v7092_v8, 16 }
  0xb5   : > { %3432 = vmatprep.mubr.bf16.mxu1 %v3037_v2  ;;  %2412 = vmatprep.mubr.bf16.mxu0 %v7135_v59  ;;  %v7306_v2 = vsel %vm1667_vm10, %v1842_v57, %v1846_v63  ;;  %v7345_v57 = vsel %vm1942_vm9, %v1943_v46, %v1944_v42  ;;  %v3047_v18 = vsel %vm1179_vm6, %v3040_v6, %v3046_v17 }
  0xb6   : > { %4244 = vmatpush1.bf16.msra.mxu1 %v6251_v30  ;;  %v1854_v47 = vrot.slane %v1852_v54, 1  ;;  %v1856_v30 = vshrl.u32 %v7092_v8, 16  ;;  %1936 = vst [vmem:[#allocation3 + $0x200] sm:$0xff] %v7306_v2  ;;  %v521_v54 = vld [vmem:[#allocation2 + $0xcc] sm:$0x1] }
  0xb7   : > { %4245 = vmatprep.subr.bf16.mxu1 %v6336_v1  ;;  %v522_v46 = vsel %vm6458_vm3, 0, %v521_v54  ;;  %v3054_v54 = vrot.slane %v7135_v59, 4 }
  0xb8   : > { %v7324_v45 = vsel %vm1667_vm10, %v1850_v40, %v1854_v47  ;;  %v1858_v36 = vor.u32 %v1856_v30, %v1854_v47  ;;  %v5739_v47 = vld [vmem:[%s443_s14] sm:$0xff]   ;;  %v3049_v30 = vsel %vm1179_vm6, %v3042_v60, %v3048_v61  ;;  %523 = vst [vmem:[#allocation2 + $0xcc] sm:$0x1] %v522_v46 }
  0xb9   : > { %1937 = vst [vmem:[#allocation3 + $0x218] sm:$0xff] %v7324_v45  ;;  %v7350_v40 = vld [vmem:[#allocation3 + $0xd8] sm:$0xff]  ;;  %v3055_v59 = vsel %vm1179_vm6, %v3048_v61, %v3054_v54 }
  0xba   : > { %4246 = vmatpush1.bf16.msra.mxu1 %v6252_v15  ;;  %v7326_v15 = vrot.slane %v1860_v21, 1  ;;  %v1948_v21 = vrot.slane %v6977_v16, 1  ;;  %v5363_v60 = vld [vmem:[%s8182_s4] ss:$0 sm:$0xff] }
  0xbb   : > { %4247 = vmatprep.subr.bf16.mxu1 %v6336_v1 }
  0xbc   : > { %3433 = vmatmul.mubr.bf16.gmra.mrb[44].mxu1 %v3035_v24  ;;  %2413 = vmatmul.mubr.bf16.gmra.mrb[32].mxu0 %v7291_v56  ;;  %v1946_v24 = vrot.slane %v6304_v52, 1  ;;  %v7336_v38 = vsel %vm1667_vm10, %v1858_v36, %v7326_v15  ;;  %v1950_v36 = vrot.slane %v7033_v10, 1  ;;  %v5740_v10 = vunpack.c.l.bf16 %v5739_v47 }
  0xbd   : > { %3440 = vmatprep.mubr.bf16.mxu1 %v3043_v50  ;;  %2420 = vmatprep.mubr.bf16.mxu0 %v7139_v29  ;;  %v577_v50 = vld [vmem:[#allocation2 + $0xc8] sm:$0x1]  ;;  %1938 = vst [vmem:[#allocation3 + $0x230] sm:$0xff] %v7336_v38  ;;  %v581_v52 = vsel %vm6466_vm4, 0, %v580_v39  ;;  %v7395_v39 = vld [vmem:[#allocation3 + $0xf0] sm:$0xff] }
  0xbe   : > { %4248 = vmatpush1.bf16.msra.mxu1 %v6253_v33  ;;  %v3041_v33 = vsel %vm1179_vm6, %v3034_v26, %v3040_v6  ;;  %v7348_v63 = vsel %vm1942_vm9, %v1944_v42, %v1946_v24  ;;  %v6255_v26 = vld [vmem:[%s8181_s3 + $0x1c0] sm:$0xff]   ;;  %v578_v4 = vsel %vm6466_vm4, 0, %v577_v50  ;;  %v7375_v16 = vsel %vm1942_vm9, %v1948_v21, %v1950_v36  ;;  %v6256_v50 = vld [vmem:[%s8181_s3 + $0x1c8] sm:$0xff]   ;;  %582 = vst [vmem:[#allocation2 + $0xd4] sm:$0x1] %v581_v52 }
  0xbf   : > { %4249 = vmatprep.subr.bf16.mxu1 %v6336_v1  ;;  %2026 = vst [vmem:[#allocation3 + $0x28] sm:$0xff] %v7348_v63  ;;  %579 = vst [vmem:[#allocation2 + $0xc8] sm:$0x1] %v578_v4  ;;  %v5364_v42 = vld [vmem:[%s8183_s5] ss:$0 sm:$0xff]  ;;  %v1952_v4 = vrot.slane %v7082_v44, 1 }
  0xc0   : > { %2028 = vst [vmem:[#allocation3 + $0x58] sm:$0xff] %v7375_v16  ;;  %v3052_v44 = vrot.slane %v7291_v56, 4 }
  0xc2   : > { %4250 = vmatpush1.bf16.msra.mxu1 %v6254_v0  ;;  %v7372_v0 = vsel %vm1942_vm9, %v1946_v24, %v1948_v21  ;;  %v5741_v24 = vunpack.c.h.bf16 %v5739_v47  ;;  %v1129_v21 = vrot.slane %v7079_v35, 4  ;;  %v1954_v35 = vrot.slane %v7141_v7, 1 }
  0xc3   : > { %4251 = vmatprep.subr.bf16.mxu1 %v6336_v1 }
  0xc4   : > { %3441 = vmatmul.mubr.bf16.gmra.mrb[48].mxu1 %v3041_v33  ;;  %2421 = vmatmul.mubr.bf16.gmra.mrb[36].mxu0 %v7350_v40  ;;  %v1367_v33 = vmul.f32 %v5740_v10, %v5363_v60  ;;  %v7410_v13 = vsel %vm1942_vm9, %v1952_v4, %v1954_v35 }
  0xc5   : > { %3448 = vmatprep.mubr.bf16.mxu1 %v3049_v30  ;;  %2428 = vmatprep.mubr.bf16.mxu0 %v7147_v12  ;;  %v1368_v30 = vmul.f32 %v5741_v24, %v5363_v60  ;;  %2030 = vst [vmem:[#allocation3 + $0x88] sm:$0xff] %v7410_v13  ;;  %v6258_v24 = vld [vmem:[%s8181_s3 + $0x1d8] sm:$0xff]  }
  0xc6   : > { %4252 = vmatpush1.bf16.msra.mxu1 %v6255_v26  ;;  %v1376_v46 = vadd.f32 %v5364_v42, %v1367_v33  ;;  %v6257_v26 = vld [vmem:[%s8181_s3 + $0x1d0] sm:$0xff]   ;;  %v1290_v6 = vld [vmem:[#allocation2 + $0xc8] sm:$0x1] }
  0xc7   : > { %4253 = vmatprep.subr.bf16.mxu1 %v6336_v1  ;;  %v1377_v47 = vadd.f32 %v5364_v42, %v1368_v30  ;;  %v7407_v42 = vsel %vm1942_vm9, %v1950_v36, %v1952_v4  ;;  %v1291_v61 = vsel %vm6458_vm3, %v1129_v21, %v1290_v6  ;;  %v3060_v36 = vrot.slane %v7139_v29, 4  ;;  %v6259_v29 = vld [vmem:[%s8181_s3 + $0x1e0] sm:$0xff]  }
  0xc8   : > { %v1378_v60 = vmax.f32 %v1376_v46, 0.0  ;;  %2029 = vst [vmem:[#allocation3 + $0x70] sm:$0xff] %v7407_v42  ;;  %1292 = vst [vmem:[#allocation2 + $0xc8] sm:$0x1] %v1291_v61  ;;  %v3053_v21 = vsel %vm1179_vm6, %v3046_v17, %v3052_v44 }
  0xc9   : > { %v1379_v10 = vmax.f32 %v1377_v47, 0.0  ;;  %v7425_v47 = vld [vmem:[#allocation3 + $0x108] sm:$0xff] }
  0xca   : > { %4254 = vmatpush1.bf16.msra.mxu1 %v6256_v50  ;;  %v1384_v52 = vmul.f32 0.0, %v1378_v60  ;;  %v1413_v60 = vld [vmem:[#allocation2 + $0xcc] sm:$0xf] }
  0xcb   : > { %4255 = vmatprep.subr.bf16.mxu1 %v6336_v1  ;;  %v1385_v7 = vmul.f32 0.0, %v1379_v10 }
  0xcc   : > { %3449 = vmatmul.mubr.bf16.gmra.mrb[52].mxu1 %v3047_v18  ;;  %2429 = vmatmul.mubr.bf16.gmra.mrb[40].mxu0 %v7395_v39  ;;  %v5636_v50 = vpack.c.bf16 %v1384_v52, %v1384_v52  ;;  %v1417_v52 = vld [vmem:[#allocation2 + $0xd4] sm:$0x1] }
  0xcd   : > { %3456 = vmatprep.mubr.bf16.mxu1 %v3055_v59  ;;  %2436 = vmatprep.mubr.bf16.mxu0 %v7155_v48  ;;  %v5637_v33 = vpack.c.bf16 %v1385_v7, %v1385_v7  ;;  %v3061_v59 = vsel %vm1179_vm6, %v3054_v54, %v3060_v36 }
  0xce   : > { %4256 = vmatpush1.bf16.msra.mxu1 %v6257_v26  ;;  %v1393_v56 = vshrl.u32 %v5636_v50, 16  ;;  %v1396_v30 = vshll.u32 %v5636_v50, 16  ;;  %v1956_v26 = vrot.slane %v7162_v19, 1  ;;  %v3058_v19 = vrot.slane %v7350_v40, 4 }
  0xcf   : > { %4257 = vmatprep.subr.bf16.mxu1 %v6336_v1  ;;  %v1401_v46 = vshrl.u32 %v5637_v33, 16  ;;  %v1404_v18 = vshll.u32 %v5637_v33, 16  ;;  %v3067_v33 = vsel %vm1179_vm6, %v3060_v36, %v3066_v25  ;;  %v6271_v36 = vld [vmem:[%s8181_s3 + $0x1f8] sm:$0xff]  }
  0xd0   : > { %v1395_v4 = vrot.slane %v1393_v56, 7  ;;  %v7434_v17 = vsel %vm1942_vm9, %v1954_v35, %v1956_v26  ;;  %v7439_v54 = vsel %vm1942_vm9, %v1956_v26, %v1958_v41  ;;  %v6263_v41 = vld [vmem:[%s8181_s3 + $0x1e8] sm:$0xff]   ;;  %v3059_v12 = vsel %vm1179_vm6, %v3052_v44, %v3058_v19 }
  0xd1   : > { %v1403_v6 = vrot.slane %v1401_v46, 7  ;;  %2031 = vst [vmem:[#allocation3 + $0xa0] sm:$0xff] %v7434_v17  ;;  %2032 = vst [vmem:[#allocation3 + $0xb8] sm:$0xff] %v7439_v54  ;;  %v3064_v56 = vrot.slane %v7395_v39, 4 }
  0xd2   : > { %4258 = vmatpush1.bf16.msra.mxu1 %v6258_v24  ;;  %v1398_v10 = vor.u32 %v1396_v30, %v1395_v4  ;;  %v1399_v61 = vrot.slane %v1395_v4, 4 }
  0xd3   : > { %4259 = vmatprep.subr.bf16.mxu1 %v6336_v1  ;;  %v1406_v7 = vor.u32 %v1404_v18, %v1403_v6  ;;  %v1408_v35 = vrot.slane %v1403_v6, 4  ;;  %v2094_v6 = vld [vmem:[#allocation3 + $0x150] sm:$0xff] }
  0xd4   : > { %3457 = vmatmul.mubr.bf16.gmra.mrb[56].mxu1 %v3053_v21  ;;  %2437 = vmatmul.mubr.bf16.gmra.mrb[44].mxu0 %v7425_v47  ;;  %v1414_v24 = vsel %vm6546_vm8, %v1398_v10, %v1413_v60  ;;  %v1866_v21 = vor.u32 %v1864_v23, %v7326_v15  ;;  %v3070_v60 = vrot.slane %v7425_v47, 4  ;;  %v3114_v23 = vrot.slane %v7267_v27, 4 }
  0xd5   : > { %3464 = vmatprep.mubr.bf16.mxu1 %v3061_v59  ;;  %2444 = vmatprep.mubr.bf16.mxu0 %v7165_v43  ;;  %1415 = vst [vmem:[#allocation2 + $0xcc] sm:$0xf] %v1414_v24  ;;  %v1407_v40 = vsel %vm6535_vm7, %v1399_v61, %v1406_v7  ;;  %v1418_v50 = vsel %vm6458_vm3, %v1408_v35, %v1417_v52  ;;  %v2088_v43 = vld [vmem:[#allocation3 + $0x120] sm:$0xff]  ;;  %v2091_v59 = vld [vmem:[#allocation3 + $0x138] sm:$0xff]  ;;  %v2097_v61 = vld [vmem:[#allocation3 + $0x168] sm:$0xff] }
  0xd6   : > { %4260 = vmatpush1.bf16.msra.mxu1 %v6259_v29  ;;  %1416 = vst [vmem:[#allocation2 + $0xd0] sm:$0xf] %v1407_v40  ;;  %1419 = vst [vmem:[#allocation2 + $0xd4] sm:$0x1] %v1418_v50  ;;  %v3076_v10 = vrot.slane %v2088_v43, 4  ;;  %v2103_v35 = vld [vmem:[#allocation3 + $0x198] sm:$0xff] }
  0xd7   : > { %4261 = vmatprep.subr.bf16.mxu1 %v6336_v1  ;;  %v2106_v24 = vld [vmem:[#allocation3 + $0x1b0] sm:$0xff] }
  0xd8   : > { %v3077_v47 = vsel %vm1179_vm6, %v3070_v60, %v3076_v10 }
  0xda   : > { %4262 = vmatpush1.bf16.msra.mxu1 %v6263_v41 }
  0xdb   : > { %4263 = vmatprep.subr.bf16.mxu1 %v6336_v1 }
  0xdc   : > { %3465 = vmatmul.mubr.bf16.gmra.mrb[60].mxu1 %v3059_v12  ;;  %2445 = vmatmul.mubr.bf16.gmra.mrb[48].mxu0 %v2088_v43  ;;  %v7466_v44 = vld [vmem:[#allocation2 + $0xc8] sm:$0xff]  }
  0xdd   : > { %3472 = vmatprep.mubr.bf16.mxu1 %v3067_v33  ;;  %2452 = vmatprep.mubr.bf16.mxu0 %v7185_v37  ;;  %v7472_v30 = vld [vmem:[#allocation2 + $0xd0] sm:$0xff]   ;;  %v1868_v46 = vshll.u32 %v7466_v44, 16  ;;  %1662 = vst [vmem:[#allocation3 + $0x258] sm:$0xff] %v7466_v44  ;;  %v1872_v39 = vshrl.u32 %v7466_v44, 16  ;;  %v3065_v37 = vsel %vm1179_vm6, %v3058_v19, %v3064_v56  ;;  %v2100_v19 = vld [vmem:[#allocation3 + $0x180] sm:$0xff] }
  0xde   : > { %4264 = vmatpush1.bf16.msra.mxu1 %v6267_v34  ;;  %v1876_v18 = vshll.u32 %v7472_v30, 16  ;;  %1663 = vst [vmem:[#allocation3 + $0x270] sm:$0xff] %v7472_v30  ;;  %v3100_v40 = vrot.slane %v2100_v19, 4  ;;  %v3106_v34 = vrot.slane %v2103_v35, 4 }
  0xdf   : > { %4265 = vmatprep.subr.bf16.mxu1 %v6336_v1  ;;  %v3073_v1 = vsel %vm1179_vm6, %v3066_v25, %v3072_v11  ;;  %v1870_v29 = vrot.slane %v1868_v46, 1  ;;  %v3071_v11 = vsel %vm1179_vm6, %v3064_v56, %v3070_v60  ;;  %v3102_v25 = vrot.slane %v7241_v55, 4  ;;  %v2112_v46 = vld [vmem:[#allocation3 + $0x1e0] sm:$0xff]  ;;  %v2115_v60 = vld [vmem:[#allocation3 + $0x1f8] sm:$0xff] }
  0xe0   : > { %v7484_v15 = vrot.slane %v1876_v18, 1  ;;  %v3112_v18 = vrot.slane %v2106_v24, 4 }
  0xe1   : > { %v7487_v26 = vsel %vm1667_vm10, %v1866_v21, %v1870_v29  ;;  %v1874_v4 = vor.u32 %v1872_v39, %v1870_v29 }
  0xe2   : > { %4266 = vmatpush1.bf16.msra.mxu1 %v6271_v36  ;;  %1939 = vst [vmem:[#allocation3 + $0x248] sm:$0xff] %v7487_v26  ;;  %v3107_v36 = vsel %vm1179_vm6, %v3100_v40, %v3106_v34  ;;  %v3113_v29 = vsel %vm1179_vm6, %v3106_v34, %v3112_v18 }
  0xe3   : > { %v1879_v48 = vsel %vm1667_vm10, %v1874_v4, %v7484_v15 }
  0xe4   : > { %3473 = vmatmul.mubr.bf16.gmra.mrb[64].mxu1 %v3065_v37  ;;  %2453 = vmatmul.mubr.bf16.gmra.mrb[52].mxu0 %v2091_v59  ;;  %1940 = vst [vmem:[#allocation3 + $0x260] sm:$0xff] %v1879_v48 }
  0xe5   : > { %3480 = vmatprep.mubr.bf16.mxu1 %v3073_v1  ;;  %2460 = vmatprep.mubr.bf16.mxu0 %v7209_v31  ;;  %v3082_v31 = vrot.slane %v2091_v59, 4  ;;  %v3120_v59 = vrot.slane %v7279_v28, 4 }
  0xe7   : > { %v3083_v52 = vsel %vm1179_vm6, %v3076_v10, %v3082_v31  ;;  %v3121_v48 = vsel %vm1179_vm6, %v3114_v23, %v3120_v59 }
  0xec   : > { %3481 = vmatmul.mubr.bf16.gmra.mrb[68].mxu1 %v3071_v11  ;;  %2461 = vmatmul.mubr.bf16.gmra.mrb[56].mxu0 %v2094_v6 }
  0xed   : > { %3488 = vmatprep.mubr.bf16.mxu1 %v7216_v51  ;;  %2468 = vmatprep.mubr.bf16.mxu0 %v7226_v49  ;;  %v3088_v51 = vrot.slane %v2094_v6, 4  ;;  %v2109_v49 = vld [vmem:[#allocation3 + $0x1c8] sm:$0xff] }
  0xee   : > { %v3118_v6 = vrot.slane %v2109_v49, 4 }
  0xef   : > { %v3089_v7 = vsel %vm1179_vm6, %v3082_v31, %v3088_v51  ;;  %v1992_v31 = vrot.slane %v7466_v44, 1 }
  0xf0   : > { %v3119_v10 = vsel %vm1179_vm6, %v3112_v18, %v3118_v6 }
  0xf4   : > { %3489 = vmatmul.mubr.bf16.gmra.mrb[72].mxu1 %v3077_v47  ;;  %2469 = vmatmul.mubr.bf16.gmra.mrb[60].mxu0 %v2097_v61  ;;  %v7542_v47 = vld [vmem:[#allocation3 + $0x210] sm:$0xff] }
  0xf5   : > { %3496 = vmatprep.mubr.bf16.mxu1 %v7231_v53  ;;  %2476 = vmatprep.mubr.bf16.mxu0 %v7241_v55  ;;  %v3094_v53 = vrot.slane %v2097_v61, 4 }
  0xf7   : > { %v3095_v41 = vsel %vm1179_vm6, %v3088_v51, %v3094_v53  ;;  %v3101_v33 = vsel %vm1179_vm6, %v3094_v53, %v3100_v40  ;;  %v3124_v51 = vrot.slane %v2112_v46, 4 }
  0xfc   : > { %3497 = vmatmul.mubr.bf16.gmra.mrb[76].mxu1 %v3083_v52  ;;  %2477 = vmatmul.mubr.bf16.gmra.mrb[64].mxu0 %v2100_v19  ;;  %v8186_v52 = vrot.slane %v7472_v30, 1 }
  0xfd   : > { %3504 = vmatprep.mubr.bf16.mxu1 %v7244_v5  ;;  %2484 = vmatprep.mubr.bf16.mxu0 %v7254_v9  ;;  %v3103_v5 = vsel %vm1179_vm6, %v3096_v58, %v3102_v25 }
  0xfe   : > { %v1995_v19 = vsel %vm1942_vm9, %v1992_v31, %v8186_v52  ;;  %v7732_v52 = vld [vmem:[#allocation3 + $0x1a8] sm:$0xff] }
  0xff   : > { %2050 = vst [vmem:[#allocation3 + $0x268] sm:$0xff] %v1995_v19  ;;  %v6268_v19 = vld [vmem:[%s8181_s3 + $0x170] sm:$0xff]  }
 0x104   : > { %3505 = vmatmul.mubr.bf16.gmra.mrb[80].mxu1 %v3089_v7  ;;  %2485 = vmatmul.mubr.bf16.gmra.mrb[68].mxu0 %v2103_v35  ;;  %v3132_v7 = vrot.slane %v7306_v2, 4 }
 0x105   : > { %3512 = vmatprep.mubr.bf16.mxu1 %v7263_v3  ;;  %2492 = vmatprep.mubr.bf16.mxu0 %v7267_v27  ;;  %v3108_v3 = vrot.slane %v7254_v9, 4 }
 0x107   : > { %v3109_v58 = vsel %vm1179_vm6, %v3102_v25, %v3108_v3  ;;  %v3115_v39 = vsel %vm1179_vm6, %v3108_v3, %v3114_v23  ;;  %v3125_v25 = vsel %vm1179_vm6, %v3118_v6, %v3124_v51  ;;  %v3144_v23 = vrot.slane %v7336_v38, 4  ;;  %v2883_v6 = vld [vmem:[#allocation3 + $0x240] sm:$0xff] }
 0x10c   : > { %3513 = vmatmul.mubr.bf16.gmra.mrb[84].mxu1 %v3095_v41  ;;  %2493 = vmatmul.mubr.bf16.gmra.mrb[72].mxu0 %v2106_v24  ;;  %v7562_v24 = vsel %vm1942_vm9, %v1990_v22, %v1992_v31 }
 0x10d   : > { %3520 = vmatprep.mubr.bf16.mxu1 %v3103_v5  ;;  %2500 = vmatprep.mubr.bf16.mxu0 %v7279_v28  ;;  %v3126_v28 = vrot.slane %v7300_v62, 4  ;;  %v3130_v5 = vrot.slane %v2115_v60, 4 }
 0x10f   : > { %v3127_v61 = vsel %vm1179_vm6, %v3120_v59, %v3126_v28  ;;  %v3133_v41 = vsel %vm1179_vm6, %v3126_v28, %v3132_v7  ;;  %v3131_v32 = vsel %vm1179_vm6, %v3124_v51, %v3130_v5  ;;  %v6266_v28 = vld [vmem:[%s8181_s3 + $0x168] sm:$0xff]  }
 0x112   : > { %v7511_v50 = vpop.f32.mrb[0].mxu1 }
 0x113   : > { %v7515_v12 = vpop.f32.mrb[1].mxu1 }
 0x114   : > { %v7517_v55 = vpop.f32.mrb[2].mxu1  ;;  %3521 = vmatmul.mubr.bf16.gmra.mrb[88].mxu1 %v3101_v33  ;;  %2501 = vmatmul.mubr.bf16.gmra.mrb[76].mxu0 %v2109_v49 }
 0x115   : > { %v2642_v43 = vpop.f32.mrb[3].mxu1  ;;  %3528 = vmatprep.mubr.bf16.mxu1 %v3109_v58  ;;  %2508 = vmatprep.mubr.bf16.mxu0 %v7300_v62 }
 0x11a   : > { %v7523_v56 = vpop.f32.mrb[4].mxu1 }
 0x11b   : > { %v2655_v9 = vpop.f32.mrb[5].mxu1 }
 0x11c   : > { %v5988_v21 = vpop.f32.mrb[6].mxu1  ;;  %3529 = vmatmul.mubr.bf16.gmra.mrb[92].mxu1 %v3107_v36  ;;  %2509 = vmatmul.mubr.bf16.gmra.mrb[80].mxu0 %v2112_v46  ;;  %v6262_v9 = vld [vmem:[%s8181_s3 + $0x150] sm:$0xff]  }
 0x11d   : > { %v7527_v37 = vpop.f32.mrb[7].mxu1  ;;  %3536 = vmatprep.mubr.bf16.mxu1 %v3115_v39  ;;  %2516 = vmatprep.mubr.bf16.mxu0 %v7306_v2  ;;  %v3138_v2 = vrot.slane %v7324_v45, 4  ;;  %v2880_v21 = vld [vmem:[#allocation3 + $0x228] sm:$0xff] }
 0x11e   : > { %v3142_v18 = vrot.slane %v2880_v21, 4 }
 0x11f   : > { %v3139_v22 = vsel %vm1179_vm6, %v3132_v7, %v3138_v2  ;;  %v3020_v7 = vrot.slane %v7372_v0, 4 }
 0x123   : > { %v5991_v27 = vpop.f32.mrb[8].mxu1 }
 0x124   : > { %v7531_v1 = vpop.f32.mrb[9].mxu1  ;;  %3537 = vmatmul.mubr.bf16.gmra.mrb[96].mxu1 %v3113_v29  ;;  %2517 = vmatmul.mubr.bf16.gmra.mrb[84].mxu0 %v2115_v60  ;;  %v3150_v27 = vrot.slane %v7487_v26, 4  ;;  %v6265_v29 = vld [vmem:[%s8181_s3 + $0x160] sm:$0xff]   ;;  %v3148_v26 = vrot.slane %v2883_v6, 4 }
 0x125   : > { %v7534_v4 = vpop.f32.mrb[10].mxu1  ;;  %3544 = vmatprep.mubr.bf16.mxu1 %v3121_v48  ;;  %2524 = vmatprep.mubr.bf16.mxu0 %v7324_v45  ;;  %v3136_v45 = vrot.slane %v7542_v47, 4 }
 0x126   : > { %v7537_v11 = vpop.f32.mrb[11].mxu1  ;;  %v3151_v48 = vsel %vm1179_vm6, %v3144_v23, %v3150_v27 }
 0x127   : > { %v3137_v36 = vsel %vm1179_vm6, %v3130_v5, %v3136_v45  ;;  %v3143_v60 = vsel %vm1179_vm6, %v3136_v45, %v3142_v18  ;;  %v3026_v45 = vrot.slane %v7375_v16, 4 }
 0x129   : > { %v3027_v21 = vsel %vm1179_vm6, %v3020_v7, %v3026_v45 }
 0x12c   : > { %3545 = vmatmul.mubr.bf16.gmra.mrb[100].mxu1 %v3119_v10  ;;  %2525 = vmatmul.mubr.bf16.gmra.mrb[88].mxu0 %v7542_v47  ;;  %v2887_v10 = vld [vmem:[#allocation3 + $0x260] sm:$0xf]  ;;  %v2816_v47 = vld [vmem:[#allocation3 + $0x28] sm:$0xf0] }
 0x12d   : > { %3552 = vmatprep.mubr.bf16.mxu1 %v3127_v61  ;;  %2532 = vmatprep.mubr.bf16.mxu0 %v7336_v38  ;;  %v3156_v61 = vrot.slane %v2887_v10, 4  ;;  %v3019_v51 = vrot.slane %v2816_v47, 4  ;;  %v3974_v47 = vld [vmem:[#allocation3 + $0x68] sm:$0xff] }
 0x132   : > { %v7551_v62 = vpop.f32.mrb[0].mxu0 }
 0x133   : > { %v2352_v35 = vpop.f32.mrb[1].mxu0 }
 0x134   : > { %v7555_v44 = vpop.f32.mrb[2].mxu0  ;;  %3553 = vmatmul.mubr.bf16.gmra.mrb[104].mxu1 %v3125_v25  ;;  %2533 = vmatmul.mubr.bf16.gmra.mrb[92].mxu0 %v7092_v8  ;;  %v6261_v8 = vld [vmem:[%s8181_s3 + $0x148] sm:$0xff]   ;;  %v3149_v25 = vsel %vm1179_vm6, %v3142_v18, %v3148_v26 }
 0x135   : > { %v2355_v53 = vpop.f32.mrb[3].mxu0  ;;  %3560 = vmatprep.mubr.bf16.mxu1 %v3133_v41  ;;  %5965 = vmatprep.mubr.bf16.mxu0 %v7345_v57  ;;  %v6274_v18 = vld [vmem:[%s8181_s3 + $0x208] sm:$0xff]  }
 0x137   : > { %v7567_v40 = vpop.f32.mrb[12].mxu1 }
 0x138   : > { %v7569_v3 = vpop.f32.mrb[13].mxu1 }
 0x139   : > { %v7571_v43 = vpop.f32.mrb[14].mxu1 }
 0x13a   : > { %v2690_v33 = vpop.f32.mrb[15].mxu1 }
 0x13c   : > { %3561 = vmatmul.mubr.bf16.gmra.mrb[108].mxu1 %v3131_v32  ;;  %5966 = vmatmul.mubr.bf16.vlgmr.msra.gmra.mrb[96].mxu0 %v7348_v63  ;;  %v3145_v63 = vsel %vm1179_vm6, %v3138_v2, %v3144_v23  ;;  %v3157_v2 = vsel %vm1179_vm6, %v3150_v27, %v3156_v61  ;;  %v2886_v32 = vld [vmem:[#allocation3 + $0x258] sm:$0xf]  ;;  %v3032_v23 = vrot.slane %v7407_v42, 4  ;;  %v3044_v27 = vrot.slane %v7434_v17, 4  ;;  %v7660_v61 = vld [vmem:[#allocation3 + $0xd0] sm:$0xff] }
 0x13d   : > { %v2358_v49 = vpop.f32.mrb[4].mxu0  ;;  %3568 = vmatprep.mubr.bf16.mxu1 %v3139_v22  ;;  %6014 = vmatpush3.bf16.msra.mxu0 %v7316_v20  ;;  %v6264_v20 = vld [vmem:[%s8181_s3 + $0x158] sm:$0xff]  }
 0x13e   : > { %v2360_v58 = vpop.f32.mrb[5].mxu0  ;;  %5969 = vmatprep.mubr.bf16.mxu0 %v7372_v0  ;;  %6015 = vmatprep.subr.bf16.mxu0 %v6261_v8  ;;  %v6270_v22 = vld [vmem:[%s8181_s3 + $0x178] sm:$0xff]   ;;  %v3021_v49 = vsel %vm1179_vm6, %v3019_v51, %v3020_v7  ;;  %v3056_v51 = vrot.slane %v7660_v61, 4  ;;  %v6277_v7 = vld [vmem:[%s8181_s3 + $0x220] sm:$0xff]  }
 0x13f   : > { %v7578_v57 = vpop.f32.mrb[6].mxu0  ;;  %v3154_v58 = vrot.slane %v2886_v32, 4 }
 0x140   : > { %v2363_v34 = vpop.f32.mrb[7].mxu0 }
 0x141   : > { %6016 = vmatpush3.bf16.msra.mxu0 %v6261_v8  ;;  %v6273_v34 = vld [vmem:[%s8181_s3 + $0x200] sm:$0xff]  }
 0x142   : > { %6017 = vmatprep.subr.bf16.mxu0 %v6262_v9 }
 0x144   : > { %3569 = vmatmul.mubr.bf16.gmra.mrb[112].mxu1 %v3137_v36  ;;  %5970 = vmatmul.mubr.bf16.gmra.mrb[100].mxu0 %v7375_v16  ;;  %v3155_v36 = vsel %vm1179_vm6, %v3148_v26, %v3154_v58  ;;  %v3033_v16 = vsel %vm1179_vm6, %v3026_v45, %v3032_v23  ;;  %v7676_v58 = vld [vmem:[#allocation3 + $0x100] sm:$0xff] }
 0x145   : > { %v7590_v46 = vpop.f32.mrb[16].mxu1  ;;  %3576 = vmatprep.mubr.bf16.mxu1 %v3145_v63  ;;  %6018 = vmatpush3.bf16.msra.mxu0 %v6262_v9 }
 0x146   : > { %v2703_v39 = vpop.f32.mrb[17].mxu1  ;;  %5973 = vmatprep.mubr.bf16.mxu0 %v7407_v42  ;;  %6019 = vmatprep.subr.bf16.mxu0 %v6264_v20  ;;  %v3038_v42 = vrot.slane %v7410_v13, 4 }
 0x147   : > { %v6000_v38 = vpop.f32.mrb[18].mxu1 }
 0x148   : > { %v7596_v59 = vpop.f32.mrb[19].mxu1 }
 0x149   : > { %6020 = vmatpush3.bf16.msra.mxu0 %v6264_v20  ;;  %v3971_v20 = vld [vmem:[#allocation3 + $0x50] sm:$0xff] }
 0x14a   : > { %6021 = vmatprep.subr.bf16.mxu0 %v6265_v29 }
 0x14c   : > { %3577 = vmatmul.mubr.bf16.gmra.mrb[116].mxu1 %v3143_v60  ;;  %5974 = vmatmul.mubr.bf16.gmra.mrb[104].mxu0 %v7410_v13  ;;  %v3045_v13 = vsel %vm1179_vm6, %v3038_v42, %v3044_v27 }
 0x14d   : > { %3584 = vmatprep.mubr.bf16.mxu1 %v3151_v48  ;;  %6022 = vmatpush3.bf16.msra.mxu0 %v6265_v29  ;;  %v6275_v29 = vld [vmem:[%s8181_s3 + $0x210] sm:$0xff]  }
 0x14e   : > { %5977 = vmatprep.mubr.bf16.mxu0 %v7434_v17  ;;  %6023 = vmatprep.subr.bf16.mxu0 %v6266_v28  ;;  %v3970_v48 = vld [vmem:[#allocation3 + $0x48] sm:$0xff]  ;;  %v6276_v17 = vld [vmem:[%s8181_s3 + $0x218] sm:$0xff]  }
 0x150   : > { %v7610_v31 = vpop.f32.mrb[8].mxu0 }
 0x151   : > { %v2368_v35 = vpop.f32.mrb[9].mxu0  ;;  %6024 = vmatpush3.bf16.msra.mxu0 %v6266_v28  ;;  %v3039_v28 = vsel %vm1179_vm6, %v3032_v23, %v3038_v42  ;;  %v3068_v23 = vrot.slane %v7676_v58, 4 }
 0x152   : > { %v2369_v53 = vpop.f32.mrb[10].mxu0  ;;  %6025 = vmatprep.subr.bf16.mxu0 %v6268_v19 }
 0x153   : > { %v6003_v41 = vpop.f32.mrb[20].mxu1  ;;  %v2371_v5 = vpop.f32.mrb[11].mxu0  ;;  %v3973_v53 = vld [vmem:[#allocation3 + $0x60] sm:$0xff] }
 0x154   : > { %v7618_v33 = vpop.f32.mrb[21].mxu1  ;;  %3585 = vmatmul.mubr.bf16.gmra.mrb[120].mxu1 %v3149_v25  ;;  %5978 = vmatmul.mubr.bf16.gmra.mrb[108].mxu0 %v7439_v54 }
 0x155   : > { %v7624_v0 = vpop.f32.mrb[22].mxu1  ;;  %3592 = vmatprep.mubr.bf16.mxu1 %v3157_v2  ;;  %6026 = vmatpush3.bf16.msra.mxu0 %v6268_v19  ;;  %v3050_v19 = vrot.slane %v7439_v54, 4  ;;  %v3977_v2 = vld [vmem:[#allocation3 + $0x80] sm:$0xff]  ;;  %v7671_v54 = vld [vmem:[#allocation3 + $0xe8] sm:$0xff] }
 0x156   : > { %v7626_v8 = vpop.f32.mrb[23].mxu1  ;;  %6029 = vmatprep.mubr.bf16.mxu0 %v3021_v49  ;;  %6027 = vmatprep.subr.bf16.mxu0 %v6270_v22  ;;  %v6278_v49 = vld [vmem:[%s8181_s3 + $0x228] sm:$0xff]   ;;  %v3062_v45 = vrot.slane %v7671_v54, 4 }
 0x157   : > { %v3051_v41 = vsel %vm1179_vm6, %v3044_v27, %v3050_v19  ;;  %v3057_v32 = vsel %vm1179_vm6, %v3050_v19, %v3056_v51  ;;  %v7689_v27 = vld [vmem:[#allocation3 + $0x118] sm:$0xff] }
 0x158   : > { %v3069_v42 = vsel %vm1179_vm6, %v3062_v45, %v3068_v23 }
 0x159   : > { %6028 = vmatpush3.bf16.msra.mxu0 %v6270_v22 }
 0x15a   : > { %v7634_v9 = vpop.f32.mrb[12].mxu0  ;;  %6077 = vmatprep.subr.bf16.mxu0 %v6273_v34 }
 0x15b   : > { %v2376_v63 = vpop.f32.mrb[13].mxu0 }
 0x15c   : > { %v7638_v39 = vpop.f32.mrb[14].mxu0  ;;  %3593 = vmatmul.mubr.bf16.gmra.mrb[124].mxu1 %v3155_v36  ;;  %6030 = vmatmul.mubr.bf16.vlgmr.msra.gmra.mrb[112].mxu0 %v3027_v21  ;;  %v6279_v36 = vld [vmem:[%s8181_s3 + $0x230] sm:$0xff]  }
 0x15d   : > { %v2379_v38 = vpop.f32.mrb[15].mxu0  ;;  %4267 = vmatprep.mubr.bf16.mxu1 %v3971_v20  ;;  %6033 = vmatprep.mubr.bf16.mxu0 %v3033_v16  ;;  %v3976_v20 = vld [vmem:[#allocation3 + $0x78] sm:$0xff]  ;;  %v3063_v16 = vsel %vm1179_vm6, %v3056_v51, %v3062_v45 }
 0x15e   : > { %6078 = vmatpush3.bf16.msra.mxu0 %v6273_v34 }
 0x15f   : > { %6079 = vmatprep.subr.bf16.mxu0 %v6274_v18 }
 0x161   : > { %v7649_v60 = vpop.f32.mrb[24].mxu1 }
 0x162   : > { %v7651_v6 = vpop.f32.mrb[25].mxu1  ;;  %6080 = vmatpush3.bf16.msra.mxu0 %v6274_v18  ;;  %v3980_v18 = vld [vmem:[#allocation3 + $0x98] sm:$0xff] }
 0x163   : > { %v7654_v10 = vpop.f32.mrb[26].mxu1  ;;  %6081 = vmatprep.subr.bf16.mxu0 %v6275_v29 }
 0x164   : > { %v2738_v26 = vpop.f32.mrb[27].mxu1  ;;  %4268 = vmatmul.mubr.bf16.vlgmr.msra.gmra.mrb[128].mxu1 %v3970_v48  ;;  %6034 = vmatmul.mubr.bf16.gmra.mrb[116].mxu0 %v3039_v28  ;;  %v7694_v48 = vld [vmem:[#allocation3 + $0x130] sm:$0xff]  ;;  %v3074_v28 = vrot.slane %v7689_v27, 4 }
 0x165   : > { %4275 = vmatprep.mubr.bf16.mxu1 %v3974_v47  ;;  %6037 = vmatprep.mubr.bf16.mxu0 %v3045_v13  ;;  %v3080_v13 = vrot.slane %v7694_v48, 4 }
 0x166   : > { %6082 = vmatpush3.bf16.msra.mxu0 %v6275_v29  ;;  %v6280_v29 = vld [vmem:[%s8181_s3 + $0x238] sm:$0xff]  }
 0x167   : > { %6083 = vmatprep.subr.bf16.mxu0 %v6276_v17 }
 0x16a   : > { %v2382_v35 = vpop.f32.mrb[16].mxu0  ;;  %6084 = vmatpush3.bf16.msra.mxu0 %v6276_v17 }
 0x16b   : > { %v2384_v25 = vpop.f32.mrb[17].mxu0  ;;  %6085 = vmatprep.subr.bf16.mxu0 %v6277_v7  ;;  %v3075_v35 = vsel %vm1179_vm6, %v3068_v23, %v3074_v28 }
 0x16c   : > { %v7668_v5 = vpop.f32.mrb[18].mxu0  ;;  %4276 = vmatmul.mubr.bf16.gmra.mrb[132].mxu1 %v3973_v53  ;;  %6038 = vmatmul.mubr.bf16.gmra.mrb[120].mxu0 %v3051_v41  ;;  %v3983_v41 = vld [vmem:[#allocation3 + $0xb0] sm:$0xff] }
 0x16d   : > { %v2387_v22 = vpop.f32.mrb[19].mxu0  ;;  %4283 = vmatprep.mubr.bf16.mxu1 %v3977_v2  ;;  %6041 = vmatprep.mubr.bf16.mxu0 %v3057_v32  ;;  %v3081_v32 = vsel %vm1179_vm6, %v3074_v28, %v3080_v13 }
 0x16e   : > { %6086 = vmatpush3.bf16.msra.mxu0 %v6277_v7  ;;  %v3979_v7 = vld [vmem:[#allocation3 + $0x90] sm:$0xff]  ;;  %v7706_v22 = vld [vmem:[#allocation3 + $0x148] sm:$0xff] }
 0x16f   : > { %v7679_v34 = vpop.f32.mrb[28].mxu1  ;;  %6087 = vmatprep.subr.bf16.mxu0 %v6278_v49  ;;  %v3086_v45 = vrot.slane %v7706_v22, 4 }
 0x170   : > { %v2751_v63 = vpop.f32.mrb[29].mxu1 }
 0x171   : > { %v6012_v21 = vpop.f32.mrb[30].mxu1 }
 0x172   : > { %v7686_v38 = vpop.f32.mrb[31].mxu1  ;;  %6088 = vmatpush3.bf16.msra.mxu0 %v6278_v49  ;;  %v7708_v49 = vld [vmem:[#allocation3 + $0x160] sm:$0xff] }
 0x173   : > { %6089 = vmatprep.subr.bf16.mxu0 %v6279_v36  ;;  %v3092_v23 = vrot.slane %v7708_v49, 4 }
 0x174   : > { %4284 = vmatmul.mubr.bf16.gmra.mrb[136].mxu1 %v3976_v20  ;;  %6042 = vmatmul.mubr.bf16.gmra.mrb[124].mxu0 %v3063_v16 }
 0x175   : > { %4291 = vmatprep.mubr.bf16.mxu1 %v3980_v18  ;;  %6045 = vmatprep.mubr.bf16.mxu0 %v3069_v42  ;;  %v3982_v18 = vld [vmem:[#allocation3 + $0xa8] sm:$0xff]  ;;  %v3087_v42 = vsel %vm1179_vm6, %v3080_v13, %v3086_v45 }
 0x176   : > { %6090 = vmatpush3.bf16.msra.mxu0 %v6279_v36 }
 0x177   : > { %v7697_v47 = vpop.f32.mrb[32].mxu1  ;;  %6091 = vmatprep.subr.bf16.mxu0 %v6280_v29  ;;  %v7700_v26 = vpop.f32.mrb[20].mxu0 }
 0x178   : > { %8195 = vst [vmem:[#allocation5_spill] sm:$0xff] %v7697_v47  ;;  %v3412_v17 = vpop.f32.mrb[33].mxu1  ;;  %v2392_v19 = vpop.f32.mrb[21].mxu0 }
 0x179   : > { %v7702_v51 = vpop.f32.mrb[34].mxu1  ;;  %v2393_v53 = vpop.f32.mrb[22].mxu0  ;;  %v3986_v17 = vld [vmem:[#allocation3 + $0xc8] sm:$0xff] }
 0x17a   : > { %8196 = vst [vmem:[#allocation6_spill] sm:$0xff] %v7702_v51  ;;  %v3415_v25 = vpop.f32.mrb[35].mxu1  ;;  %6092 = vmatpush3.bf16.msra.mxu0 %v6280_v29  ;;  %v2395_v2 = vpop.f32.mrb[23].mxu0  ;;  %v7722_v53 = vld [vmem:[#allocation3 + $0x190] sm:$0xff] }
 0x17b   : > { %v3104_v13 = vrot.slane %v7722_v53, 4 }
 0x17c   : > { %4292 = vmatmul.mubr.bf16.gmra.mrb[140].mxu1 %v3979_v7  ;;  %6046 = vmatmul.mubr.bf16.gmra.mrb[128].mxu0 %v3075_v35  ;;  %v3093_v7 = vsel %vm1179_vm6, %v3086_v45, %v3092_v23  ;;  %v7720_v35 = vld [vmem:[#allocation3 + $0x178] sm:$0xff] }
 0x17d   : > { %4299 = vmatprep.mubr.bf16.mxu1 %v3983_v41  ;;  %6049 = vmatprep.mubr.bf16.mxu0 %v3081_v32  ;;  %v3098_v25 = vrot.slane %v7720_v35, 4 }
 0x17f   : > { %v3418_v36 = vpop.f32.mrb[36].mxu1  ;;  %v7712_v63 = vpop.f32.mrb[24].mxu0  ;;  %v3099_v45 = vsel %vm1179_vm6, %v3092_v23, %v3098_v25  ;;  %v3110_v23 = vrot.slane %v7732_v52, 4 }
 0x180   : > { %v3420_v21 = vpop.f32.mrb[37].mxu1  ;;  %v2400_v20 = vpop.f32.mrb[25].mxu0 }
 0x181   : > { %v7714_v16 = vpop.f32.mrb[38].mxu1  ;;  %v7717_v29 = vpop.f32.mrb[26].mxu0  ;;  %v3985_v20 = vld [vmem:[#allocation3 + $0xc0] sm:$0xff] }
 0x182   : > { %8197 = vst [vmem:[#allocation7_spill] sm:$0xff] %v7714_v16  ;;  %8198 = vst [vmem:[#allocation8_spill] sm:$0xff] %v7717_v29  ;;  %v3423_v28 = vpop.f32.mrb[39].mxu1  ;;  %v2403_v19 = vpop.f32.mrb[27].mxu0 }
 0x183   : > { %v3989_v19 = vld [vmem:[#allocation3 + $0xe0] sm:$0xff] }
 0x184   : > { %4300 = vmatmul.mubr.bf16.gmra.mrb[144].mxu1 %v3982_v18  ;;  %6050 = vmatmul.mubr.bf16.gmra.mrb[132].mxu0 %v3087_v42  ;;  %v524_v42 = vld [vmem:[#allocation2 + $0xd8] sm:$0x1] }
 0x185   : > { %4307 = vmatprep.mubr.bf16.mxu1 %v3986_v17  ;;  %6053 = vmatprep.mubr.bf16.mxu0 %v3093_v7  ;;  %v3105_v7 = vsel %vm1179_vm6, %v3098_v25, %v3104_v13 }
 0x187   : > { %v7725_v41 = vpop.f32.mrb[40].mxu1  ;;  %v2406_v2 = vpop.f32.mrb[28].mxu0 }
 0x188   : > { %8199 = vst [vmem:[#allocation9_spill] sm:$0xff] %v7725_v41  ;;  %v3428_v32 = vpop.f32.mrb[41].mxu1  ;;  %v2408_v36 = vpop.f32.mrb[29].mxu0  ;;  %v525_v41 = vsel %vm6458_vm3, 0, %v524_v42  ;;  %v7736_v2 = vld [vmem:[#allocation3 + $0x1c0] sm:$0xff] }
 0x189   : > { %v3429_v21 = vpop.f32.mrb[42].mxu1  ;;  %v7729_v28 = vpop.f32.mrb[30].mxu0  ;;  %526 = vst [vmem:[#allocation2 + $0xd8] sm:$0x1] %v525_v41  ;;  %v3116_v36 = vrot.slane %v7736_v2, 4  ;;  %v3111_v41 = vsel %vm1179_vm6, %v3104_v13, %v3110_v23  ;;  %v1880_v13 = vshrl.u32 %v7472_v30, 16 }
 0x18a   : > { %8200 = vst [vmem:[#allocation10_spill] sm:$0xff] %v7729_v28  ;;  %v3431_v18 = vpop.f32.mrb[43].mxu1  ;;  %v2411_v17 = vpop.f32.mrb[31].mxu0 }
 0x18b   : > { %v3992_v17 = vld [vmem:[#allocation3 + $0xf8] sm:$0xff]  ;;  %v3117_v51 = vsel %vm1179_vm6, %v3110_v23, %v3116_v36  ;;  %v8204_v23 = vrot.slane %v7472_v30, 1  ;;  %v3995_v30 = vld [vmem:[#allocation3 + $0x110] sm:$0xff] }
 0x18c   : > { %4308 = vmatmul.mubr.bf16.gmra.mrb[148].mxu1 %v3985_v20  ;;  %6054 = vmatmul.mubr.bf16.gmra.mrb[136].mxu0 %v3099_v45  ;;  %v3988_v20 = vld [vmem:[#allocation3 + $0xd8] sm:$0xff] }
 0x18d   : > { %4315 = vmatprep.mubr.bf16.mxu1 %v3989_v19  ;;  %6057 = vmatprep.mubr.bf16.mxu0 %v3105_v7 }
 0x18f   : > { %v7739_v32 = vpop.f32.mrb[44].mxu1  ;;  %v2414_v21 = vpop.f32.mrb[32].mxu0 }
 0x190   : > { %8201 = vst [vmem:[#allocation11_spill] sm:$0xff] %v7739_v32  ;;  %v3436_v25 = vpop.f32.mrb[45].mxu1  ;;  %v7743_v18 = vadd.f32 %v7515_v12, %v2414_v21  ;;  %v2416_v14 = vpop.f32.mrb[33].mxu0  ;;  %v7749_v32 = vld [vmem:[#allocation3 + $0x1d8] sm:$0xff]  ;;  %v6281_v16 = vld [vmem:[#allocation2 + $0xd8] ss:$0 sps:$4 sm:$0xff]  }
 0x191   : > { %v7745_v42 = vpop.f32.mrb[46].mxu1  ;;  %v2417_v45 = vpop.f32.mrb[34].mxu0  ;;  %v7751_v25 = vld [vmem:[#allocation3 + $0x1f0] sm:$0xff]  ;;  %v1996_v12 = vrot.slane %v6281_v16, 1  ;;  %v3122_v21 = vrot.slane %v7749_v32, 4  ;;  %v1884_v14 = vshll.u32 %v6281_v16, 16 }
 0x192   : > { %8202 = vst [vmem:[#allocation12_spill] sm:$0xff] %v7743_v18  ;;  %8203 = vst [vmem:[#allocation13_spill] sm:$0xff] %v7745_v42  ;;  %v3439_v19 = vpop.f32.mrb[47].mxu1  ;;  %v2419_v7 = vpop.f32.mrb[35].mxu0  ;;  %v3991_v16 = vld [vmem:[#allocation3 + $0xf0] sm:$0xff] }
 0x193   : > { %v3128_v19 = vrot.slane %v7751_v25, 4  ;;  %v7759_v7 = vsel %vm1942_vm9, %v8204_v23, %v1996_v12  ;;  %v3123_v29 = vsel %vm1179_vm6, %v3116_v36, %v3122_v21 }
 0x194   : > { %4316 = vmatmul.mubr.bf16.gmra.mrb[152].mxu1 %v3988_v20  ;;  %6058 = vmatmul.mubr.bf16.gmra.mrb[140].mxu0 %v3111_v41  ;;  %v1882_v41 = vor.u32 %v1880_v13, %v7484_v15 }
 0x195   : > { %4323 = vmatprep.mubr.bf16.mxu1 %v3992_v17  ;;  %6061 = vmatprep.mubr.bf16.mxu0 %v3117_v51  ;;  %v1886_v17 = vrot.slane %v1884_v14, 1  ;;  %v3129_v13 = vsel %vm1179_vm6, %v3122_v21, %v3128_v19 }
 0x197   : > { %v3442_v45 = vpop.f32.mrb[48].mxu1  ;;  %v2422_v20 = vpop.f32.mrb[36].mxu0  ;;  %v7769_v12 = vsel %vm1667_vm10, %v1882_v41, %v1886_v17  ;;  %v3994_v17 = vld [vmem:[#allocation3 + $0x108] sm:$0xff] }
 0x198   : > { %v3444_v18 = vpop.f32.mrb[49].mxu1  ;;  %v7763_v51 = vadd.f32 %v7511_v50, %v2422_v20  ;;  %v2424_v42 = vpop.f32.mrb[37].mxu0  ;;  %v7775_v50 = vld [vmem:[#allocation3 + $0x208] sm:$0xff] }
 0x199   : > { %v7765_v47 = vpop.f32.mrb[50].mxu1  ;;  %v2425_v45 = vpop.f32.mrb[38].mxu0  ;;  %v7777_v42 = vld [vmem:[#allocation3 + $0x220] sm:$0xff] }
 0x19a   : > { %8205 = vst [vmem:[#allocation14_spill] sm:$0xff] %v7763_v51  ;;  %v3447_v28 = vpop.f32.mrb[51].mxu1  ;;  %v7772_v18 = vadd.f32 %v7517_v55, %v2425_v45  ;;  %v2427_v15 = vpop.f32.mrb[39].mxu0  ;;  %v3140_v14 = vrot.slane %v7777_v42, 4  ;;  %v2888_v51 = vld [vmem:[#allocation3 + $0x268] sm:$0xf] }
 0x19b   : > { %v3134_v28 = vrot.slane %v7775_v50, 4  ;;  %v3998_v15 = vld [vmem:[#allocation3 + $0x128] sm:$0xff] }
 0x19c   : > { %8206 = vst [vmem:[#allocation15_spill] sm:$0xff] %v7772_v18  ;;  %4324 = vmatmul.mubr.bf16.gmra.mrb[156].mxu1 %v3991_v16  ;;  %6062 = vmatmul.mubr.bf16.gmra.mrb[144].mxu0 %v3123_v29  ;;  %v7788_v18 = vld [vmem:[#allocation3 + $0x238] sm:$0xff] }
 0x19d   : > { %4331 = vmatprep.mubr.bf16.mxu1 %v3995_v30  ;;  %6065 = vmatprep.mubr.bf16.mxu0 %v3129_v13  ;;  %v3135_v45 = vsel %vm1179_vm6, %v3128_v19, %v3134_v28  ;;  %v3141_v13 = vsel %vm1179_vm6, %v3134_v28, %v3140_v14  ;;  %v3152_v19 = vrot.slane %v7562_v24, 4  ;;  %v3997_v28 = vld [vmem:[#allocation3 + $0x120] sm:$0xff] }
 0x19f   : > { %v7780_v36 = vpop.f32.mrb[52].mxu1  ;;  %v2430_v23 = vpop.f32.mrb[40].mxu0 }
 0x1a0   : > { %v3452_v55 = vpop.f32.mrb[53].mxu1  ;;  %v2432_v20 = vpop.f32.mrb[41].mxu0  ;;  %v3146_v23 = vrot.slane %v7788_v18, 4 }
 0x1a1   : > { %v3453_v41 = vpop.f32.mrb[54].mxu1  ;;  %v2433_v21 = vpop.f32.mrb[42].mxu0 }
 0x1a2   : > { %v3455_v16 = vpop.f32.mrb[55].mxu1  ;;  %v7785_v29 = vadd.f32 %v7527_v37, %v2433_v21  ;;  %v2435_v30 = vpop.f32.mrb[43].mxu0 }
 0x1a3   : > { %v4001_v30 = vld [vmem:[#allocation3 + $0x140] sm:$0xff] }
 0x1a4   : > { %8207 = vst [vmem:[#allocation16_spill] sm:$0xff] %v7785_v29  ;;  %4332 = vmatmul.mubr.bf16.gmra.mrb[160].mxu1 %v3994_v17  ;;  %6066 = vmatmul.mubr.bf16.gmra.mrb[148].mxu0 %v3135_v45  ;;  %v3147_v17 = vsel %vm1179_vm6, %v3140_v14, %v3146_v23  ;;  %v3153_v29 = vsel %vm1179_vm6, %v3146_v23, %v3152_v19 }
 0x1a5   : > { %4339 = vmatprep.mubr.bf16.mxu1 %v3998_v15  ;;  %6069 = vmatprep.mubr.bf16.mxu0 %v3141_v13 }
 0x1a7   : > { %v7791_v55 = vpop.f32.mrb[56].mxu1  ;;  %v2438_v20 = vpop.f32.mrb[44].mxu0 }
 0x1a8   : > { %8208 = vst [vmem:[#allocation17_spill] sm:$0xff] %v7791_v55  ;;  %v3460_v41 = vpop.f32.mrb[57].mxu1  ;;  %v7795_v37 = vadd.f32 %v7523_v56, %v2438_v20  ;;  %v2440_v21 = vpop.f32.mrb[45].mxu0  ;;  %v4004_v55 = vld [vmem:[#allocation3 + $0x158] sm:$0xff] }
 0x1a9   : > { %v7797_v16 = vpop.f32.mrb[58].mxu1  ;;  %v2441_v45 = vpop.f32.mrb[46].mxu0  ;;  %v3158_v41 = vrot.slane %v2888_v51, 4  ;;  %v6305_v51 = vld [vmem:[#allocation3 + $0x58] sm:$0xff] }
 0x1aa   : > { %8209 = vst [vmem:[#allocation18_spill] sm:$0xff] %v7795_v37  ;;  %8210 = vst [vmem:[#allocation19_spill] sm:$0xff] %v7797_v16  ;;  %v3463_v15 = vpop.f32.mrb[59].mxu1  ;;  %v2443_v13 = vpop.f32.mrb[47].mxu0  ;;  %v4000_v45 = vld [vmem:[#allocation3 + $0x138] sm:$0xff] }
 0x1ab   : > { %v3159_v13 = vsel %vm1179_vm6, %v3152_v19, %v3158_v41  ;;  %v4007_v41 = vld [vmem:[#allocation3 + $0x170] sm:$0xff] }
 0x1ac   : > { %4340 = vmatmul.mubr.bf16.gmra.mrb[164].mxu1 %v3997_v28  ;;  %6070 = vmatmul.mubr.bf16.gmra.mrb[152].mxu0 %v3147_v17 }
 0x1ad   : > { %4347 = vmatprep.mubr.bf16.mxu1 %v4001_v30  ;;  %6073 = vmatprep.mubr.bf16.mxu0 %v3153_v29 }
 0x1af   : > { %v3466_v56 = vpop.f32.mrb[60].mxu1  ;;  %v2446_v20 = vpop.f32.mrb[48].mxu0 }
 0x1b0   : > { %v3468_v21 = vpop.f32.mrb[61].mxu1  ;;  %v7802_v37 = vadd.f32 %v7531_v1, %v2446_v20  ;;  %v2448_v16 = vpop.f32.mrb[49].mxu0  ;;  %v4003_v20 = vld [vmem:[#allocation3 + $0x150] sm:$0xff] }
 0x1b1   : > { %v7804_v14 = vpop.f32.mrb[62].mxu1  ;;  %v2449_v15 = vpop.f32.mrb[50].mxu0 }
 0x1b2   : > { %v3471_v23 = vpop.f32.mrb[63].mxu1  ;;  %v7808_v28 = vadd.f32 %v7537_v11, %v2449_v15  ;;  %v2451_v29 = vpop.f32.mrb[51].mxu0 }
 0x1b4   : > { %4348 = vmatmul.mubr.bf16.gmra.mrb[168].mxu1 %v4000_v45  ;;  %6074 = vmatmul.mubr.bf16.gmra.mrb[156].mxu0 %v3159_v13  ;;  %v6306_v45 = vld [vmem:[#allocation3 + $0x70] sm:$0xff] }
 0x1b5   : > { %4355 = vmatprep.mubr.bf16.mxu1 %v4004_v55  ;;  %6093 = vmatprep.mubr.bf16.mxu0 %v6305_v51  ;;  %v6307_v55 = vld [vmem:[#allocation3 + $0x88] sm:$0xff] }
 0x1b7   : > { %v7810_v1 = vpop.f32.mrb[64].mxu1  ;;  %v2454_v16 = vpop.f32.mrb[52].mxu0 }
 0x1b8   : > { %v3476_v17 = vpop.f32.mrb[65].mxu1  ;;  %v2456_v30 = vpop.f32.mrb[53].mxu0 }
 0x1b9   : > { %v3477_v56 = vpop.f32.mrb[66].mxu1  ;;  %v2457_v21 = vpop.f32.mrb[54].mxu0  ;;  %v4006_v30 = vld [vmem:[#allocation3 + $0x168] sm:$0xff] }
 0x1ba   : > { %v3479_v19 = vpop.f32.mrb[67].mxu1  ;;  %v7813_v23 = vadd.f32 %v7534_v4, %v2457_v21  ;;  %v2459_v11 = vpop.f32.mrb[55].mxu0  ;;  %v4010_v21 = vld [vmem:[#allocation3 + $0x188] sm:$0xff] }
 0x1bb   : > { %v6308_v19 = vld [vmem:[#allocation3 + $0xa0] sm:$0xff] }
 0x1bc   : > { %4356 = vmatmul.mubr.bf16.gmra.mrb[172].mxu1 %v4003_v20  ;;  %6094 = vmatmul.mubr.bf16.vlgmr.msra.gmra.mrb[160].mxu0 %v6306_v45 }
 0x1bd   : > { %4363 = vmatprep.mubr.bf16.mxu1 %v4007_v41  ;;  %6097 = vmatprep.mubr.bf16.mxu0 %v6307_v55  ;;  %v6309_v41 = vld [vmem:[#allocation3 + $0xb8] sm:$0xff] }
 0x1bf   : > { %v7815_v15 = vpop.f32.mrb[68].mxu1  ;;  %v2462_v13 = vpop.f32.mrb[56].mxu0 }
 0x1c0   : > { %v3484_v29 = vpop.f32.mrb[69].mxu1  ;;  %v7818_v51 = vadd.f32 %v7569_v3, %v2462_v13  ;;  %v2464_v16 = vpop.f32.mrb[57].mxu0 }
 0x1c1   : > { %v7820_v17 = vpop.f32.mrb[70].mxu1  ;;  %v2465_v4 = vpop.f32.mrb[58].mxu0  ;;  %v4009_v16 = vld [vmem:[#allocation3 + $0x180] sm:$0xff] }
 0x1c2   : > { %8211 = vst [vmem:[#allocation20_spill] sm:$0xff] %v7818_v51  ;;  %v3487_v56 = vpop.f32.mrb[71].mxu1  ;;  %v2467_v20 = vpop.f32.mrb[59].mxu0  ;;  %v4013_v51 = vld [vmem:[#allocation3 + $0x1a0] sm:$0xff] }
 0x1c4   : > { %4364 = vmatmul.mubr.bf16.gmra.mrb[176].mxu1 %v4006_v30  ;;  %6098 = vmatmul.mubr.bf16.gmra.mrb[164].mxu0 %v6308_v19 }
 0x1c5   : > { %4371 = vmatprep.mubr.bf16.mxu1 %v4010_v21  ;;  %6101 = vmatprep.mubr.bf16.mxu0 %v6309_v41 }
 0x1c7   : > { %v3490_v11 = vpop.f32.mrb[72].mxu1  ;;  %v2470_v45 = vpop.f32.mrb[60].mxu0 }
 0x1c8   : > { %v3492_v55 = vpop.f32.mrb[73].mxu1  ;;  %v7823_v3 = vadd.f32 %v7567_v40, %v2470_v45  ;;  %v2472_v13 = vpop.f32.mrb[61].mxu0  ;;  %v4012_v45 = vld [vmem:[#allocation3 + $0x198] sm:$0xff] }
 0x1c9   : > { %v7825_v29 = vpop.f32.mrb[74].mxu1  ;;  %v2473_v4 = vpop.f32.mrb[62].mxu0 }
 0x1ca   : > { %v3495_v56 = vpop.f32.mrb[75].mxu1  ;;  %v7828_v30 = vadd.f32 %v7571_v43, %v2473_v4  ;;  %v2475_v20 = vpop.f32.mrb[63].mxu0 }
 0x1cb   : > { %v4016_v56 = vld [vmem:[#allocation3 + $0x1b8] sm:$0xff] }
 0x1cc   : > { %4372 = vmatmul.mubr.bf16.gmra.mrb[180].mxu1 %v4009_v16  ;;  %6102 = vmatmul.mubr.bf16.gmra.mrb[168].mxu0 %v7660_v61 }
 0x1cd   : > { %4379 = vmatprep.mubr.bf16.mxu1 %v4013_v51  ;;  %6105 = vmatprep.mubr.bf16.mxu0 %v7671_v54 }
 0x1cf   : > { %v7832_v21 = vpop.f32.mrb[76].mxu1  ;;  %v2478_v40 = vpop.f32.mrb[64].mxu0 }
 0x1d0   : > { %v3500_v19 = vpop.f32.mrb[77].mxu1  ;;  %v2480_v41 = vpop.f32.mrb[65].mxu0 }
 0x1d1   : > { %v3501_v11 = vpop.f32.mrb[78].mxu1  ;;  %v2481_v55 = vpop.f32.mrb[66].mxu0  ;;  %v4015_v19 = vld [vmem:[#allocation3 + $0x1b0] sm:$0xff] }
 0x1d2   : > { %v3503_v13 = vpop.f32.mrb[79].mxu1  ;;  %v7835_v43 = vadd.f32 %v7596_v59, %v2481_v55  ;;  %v2483_v4 = vpop.f32.mrb[67].mxu0  ;;  %v4019_v11 = vld [vmem:[#allocation3 + $0x1d0] sm:$0xff] }
 0x1d3   : > { %v4018_v4 = vld [vmem:[#allocation3 + $0x1c8] sm:$0xff] }
 0x1d4   : > { %4380 = vmatmul.mubr.bf16.gmra.mrb[184].mxu1 %v4012_v45  ;;  %6106 = vmatmul.mubr.bf16.gmra.mrb[172].mxu0 %v7676_v58 }
 0x1d5   : > { %4387 = vmatprep.mubr.bf16.mxu1 %v4016_v56  ;;  %6109 = vmatprep.mubr.bf16.mxu0 %v7689_v27 }
 0x1d7   : > { %v7839_v61 = vpop.f32.mrb[80].mxu1  ;;  %v2486_v54 = vpop.f32.mrb[68].mxu0 }
 0x1d8   : > { %v3508_v51 = vpop.f32.mrb[81].mxu1  ;;  %v7842_v16 = vadd.f32 %v7590_v46, %v2486_v54  ;;  %v2488_v20 = vpop.f32.mrb[69].mxu0 }
 0x1d9   : > { %v7844_v40 = vpop.f32.mrb[82].mxu1  ;;  %v2489_v59 = vpop.f32.mrb[70].mxu0  ;;  %v4022_v20 = vld [vmem:[#allocation3 + $0x1e8] sm:$0xff] }
 0x1da   : > { %v3511_v41 = vpop.f32.mrb[83].mxu1  ;;  %v2491_v45 = vpop.f32.mrb[71].mxu0 }
 0x1db   : > { %v4021_v45 = vld [vmem:[#allocation3 + $0x1e0] sm:$0xff] }
 0x1dc   : > { %4388 = vmatmul.mubr.bf16.gmra.mrb[188].mxu1 %v4015_v19  ;;  %6110 = vmatmul.mubr.bf16.gmra.mrb[176].mxu0 %v7694_v48 }
 0x1dd   : > { %4395 = vmatprep.mubr.bf16.mxu1 %v4019_v11  ;;  %6113 = vmatprep.mubr.bf16.mxu0 %v7706_v22 }
 0x1df   : > { %v3514_v58 = vpop.f32.mrb[84].mxu1  ;;  %v2494_v27 = vpop.f32.mrb[72].mxu0 }
 0x1e0   : > { %v3516_v55 = vpop.f32.mrb[85].mxu1  ;;  %v7849_v46 = vadd.f32 %v7618_v33, %v2494_v27  ;;  %v2496_v13 = vpop.f32.mrb[73].mxu0 }
 0x1e1   : > { %v7851_v56 = vpop.f32.mrb[86].mxu1  ;;  %v2497_v54 = vpop.f32.mrb[74].mxu0  ;;  %v4025_v55 = vld [vmem:[#allocation3 + $0x200] sm:$0xff] }
 0x1e2   : > { %v3519_v51 = vpop.f32.mrb[87].mxu1  ;;  %v7854_v19 = vadd.f32 %v7626_v8, %v2497_v54  ;;  %v2499_v48 = vpop.f32.mrb[75].mxu0 }
 0x1e3   : > { %v4024_v48 = vld [vmem:[#allocation3 + $0x1f8] sm:$0xff] }
 0x1e4   : > { %4396 = vmatmul.mubr.bf16.gmra.mrb[192].mxu1 %v4018_v4  ;;  %6114 = vmatmul.mubr.bf16.gmra.mrb[180].mxu0 %v7708_v49 }
 0x1e5   : > { %4403 = vmatprep.mubr.bf16.mxu1 %v4022_v20  ;;  %6117 = vmatprep.mubr.bf16.mxu0 %v7720_v35 }
 0x1e7   : > { %v7858_v22 = vpop.f32.mrb[88].mxu1  ;;  %v2502_v33 = vpop.f32.mrb[76].mxu0 }
 0x1e8   : > { %v3524_v59 = vpop.f32.mrb[89].mxu1  ;;  %v2504_v41 = vpop.f32.mrb[77].mxu0 }
 0x1e9   : > { %v3525_v11 = vpop.f32.mrb[90].mxu1  ;;  %v2505_v58 = vpop.f32.mrb[78].mxu0  ;;  %v4028_v59 = vld [vmem:[#allocation3 + $0x218] sm:$0xff] }
 0x1ea   : > { %v3527_v27 = vpop.f32.mrb[91].mxu1  ;;  %v7861_v8 = vadd.f32 %v7624_v0, %v2505_v58  ;;  %v2507_v13 = vpop.f32.mrb[79].mxu0 }
 0x1eb   : > { %v4027_v27 = vld [vmem:[#allocation3 + $0x210] sm:$0xff] }
 0x1ec   : > { %4404 = vmatmul.mubr.bf16.gmra.mrb[196].mxu1 %v4021_v45  ;;  %6118 = vmatmul.mubr.bf16.gmra.mrb[184].mxu0 %v7722_v53 }
 0x1ed   : > { %4411 = vmatprep.mubr.bf16.mxu1 %v4025_v55  ;;  %6121 = vmatprep.mubr.bf16.mxu0 %v7732_v52 }
 0x1ef   : > { %v7865_v49 = vpop.f32.mrb[92].mxu1  ;;  %v2510_v35 = vpop.f32.mrb[80].mxu0 }
 0x1f0   : > { %v3532_v4 = vpop.f32.mrb[93].mxu1  ;;  %v7868_v54 = vadd.f32 %v7651_v6, %v2510_v35  ;;  %v2512_v51 = vpop.f32.mrb[81].mxu0  ;;  %v4031_v35 = vld [vmem:[#allocation3 + $0x230] sm:$0xff] }
 0x1f1   : > { %v7870_v20 = vpop.f32.mrb[94].mxu1  ;;  %v2513_v0 = vpop.f32.mrb[82].mxu0 }
 0x1f2   : > { %v3535_v33 = vpop.f32.mrb[95].mxu1  ;;  %v2515_v41 = vpop.f32.mrb[83].mxu0 }
 0x1f3   : > { %v4030_v33 = vld [vmem:[#allocation3 + $0x228] sm:$0xff] }
 0x1f4   : > { %4412 = vmatmul.mubr.bf16.gmra.mrb[200].mxu1 %v4024_v48  ;;  %6122 = vmatmul.mubr.bf16.gmra.mrb[188].mxu0 %v7736_v2 }
 0x1f5   : > { %4419 = vmatprep.mubr.bf16.mxu1 %v4028_v59  ;;  %6125 = vmatprep.mubr.bf16.mxu0 %v7749_v32 }
 0x1f7   : > { %v3538_v52 = vpop.f32.mrb[96].mxu1  ;;  %v2518_v53 = vpop.f32.mrb[84].mxu0 }
 0x1f8   : > { %v3540_v11 = vpop.f32.mrb[97].mxu1  ;;  %v7875_v6 = vadd.f32 %v7649_v60, %v2518_v53  ;;  %v2520_v45 = vpop.f32.mrb[85].mxu0  ;;  %v4034_v52 = vld [vmem:[#allocation3 + $0x248] sm:$0xff] }
 0x1f9   : > { %v7877_v58 = vpop.f32.mrb[98].mxu1  ;;  %v2521_v55 = vpop.f32.mrb[86].mxu0 }
 0x1fa   : > { %v3543_v13 = vpop.f32.mrb[99].mxu1  ;;  %v7880_v4 = vadd.f32 %v7654_v10, %v2521_v55  ;;  %v2523_v2 = vpop.f32.mrb[87].mxu0 }
 0x1fb   : > { %v4033_v13 = vld [vmem:[#allocation3 + $0x240] sm:$0xff] }
 0x1fc   : > { %4420 = vmatmul.mubr.bf16.gmra.mrb[204].mxu1 %v4027_v27  ;;  %6126 = vmatmul.mubr.bf16.gmra.mrb[192].mxu0 %v7751_v25 }
 0x1fd   : > { %4427 = vmatprep.mubr.bf16.mxu1 %v4031_v35  ;;  %6129 = vmatprep.mubr.bf16.mxu0 %v7775_v50 }
 0x1ff   : > { %v7884_v32 = vpop.f32.mrb[100].mxu1  ;;  %v2526_v60 = vpop.f32.mrb[88].mxu0 }
 0x200   : > { %v3548_v51 = vpop.f32.mrb[101].mxu1  ;;  %v2528_v48 = vpop.f32.mrb[89].mxu0 }
 0x201   : > { %v3549_v0 = vpop.f32.mrb[102].mxu1  ;;  %v2529_v59 = vpop.f32.mrb[90].mxu0 }
 0x202   : > { %v3551_v41 = vpop.f32.mrb[103].mxu1  ;;  %v7887_v10 = vadd.f32 %v7686_v38, %v2529_v59  ;;  %v2531_v53 = vpop.f32.mrb[91].mxu0 }
 0x204   : > { %8212 = vst [vmem:[#allocation21_spill] sm:$0xff] %v7887_v10  ;;  %4428 = vmatmul.mubr.bf16.gmra.mrb[208].mxu1 %v4030_v33  ;;  %6130 = vmatmul.mubr.bf16.gmra.mrb[196].mxu0 %v7777_v42  ;;  %v6310_v42 = vld [vmem:[#allocation3 + $0x260] sm:$0xff]  ;;  %v4036_v33 = vld [vmem:[#allocation3 + $0x258] sm:$0xff] }
 0x205   : > { %4435 = vmatprep.mubr.bf16.mxu1 %v4034_v52  ;;  %6133 = vmatprep.mubr.bf16.mxu0 %v7788_v18  ;;  %v6311_v18 = vld [vmem:[#allocation3 + $0x268] sm:$0xff] }
 0x207   : > { %v7891_v25 = vpop.f32.mrb[104].mxu1  ;;  %v2534_v50 = vpop.f32.mrb[92].mxu0 }
 0x208   : > { %v3556_v11 = vpop.f32.mrb[105].mxu1  ;;  %v7894_v45 = vadd.f32 %v7679_v34, %v2534_v50  ;;  %v2536_v27 = vpop.f32.mrb[93].mxu0 }
 0x209   : > { %v7896_v55 = vpop.f32.mrb[106].mxu1  ;;  %v2537_v38 = vpop.f32.mrb[94].mxu0 }
 0x20a   : > { %8213 = vst [vmem:[#allocation22_spill] sm:$0xff] %v7894_v45  ;;  %v3559_v35 = vpop.f32.mrb[107].mxu1  ;;  %v2539_v2 = vpop.f32.mrb[95].mxu0 }
 0x20b   : > { %v4039_v2 = vld [vmem:[#allocation3 + $0x270] sm:$0xff] }
 0x20c   : > { %4436 = vmatmul.mubr.bf16.gmra.mrb[212].mxu1 %v4033_v13  ;;  %6134 = vmatmul.mubr.bf16.gmra.mrb[200].mxu0 %v7562_v24 }
 0x20d   : > { %4443 = vmatprep.mubr.bf16.mxu1 %v6310_v42  ;;  %6137 = vmatprep.mubr.bf16.mxu0 %v6311_v18 }
 0x20f   : > { %v3562_v60 = vpop.f32.mrb[108].mxu1  ;;  %v5967_v51 = vpop.f32.mrb[96].mxu0 }
 0x210   : > { %v3564_v48 = vpop.f32.mrb[109].mxu1  ;;  %v2575_v0 = vpop.f32.mrb[97].mxu0 }
 0x211   : > { %v7899_v34 = vpop.f32.mrb[110].mxu1  ;;  %v2576_v59 = vadd.f32 %v2575_v0, %v7551_v62  ;;  %v5968_v41 = vpop.f32.mrb[98].mxu0 }
 0x212   : > { %v3567_v52 = vpop.f32.mrb[111].mxu1  ;;  %v2587_v53 = vadd.f32 %v5968_v41, %v7578_v57  ;;  %v2578_v50 = vpop.f32.mrb[99].mxu0 }
 0x213   : > { %v2579_v24 = vadd.f32 %v2578_v50, %v7555_v44 }
 0x214   : > { %4444 = vmatmul.mubr.bf16.gmra.mrb[216].mxu1 %v4036_v33  ;;  %6138 = vmatmul.mubr.bf16.gmra.mrb[204].mxu0 %v7759_v7 }
 0x215   : > { %4451 = vmatprep.mubr.bf16.mxu1 %v7769_v12 }
 0x217   : > { %v7906_v11 = vpop.f32.mrb[112].mxu1  ;;  %v5971_v27 = vpop.f32.mrb[100].mxu0 }
 0x218   : > { %v3572_v13 = vpop.f32.mrb[113].mxu1  ;;  %v2600_v38 = vadd.f32 %v5971_v27, %v7634_v9  ;;  %v2591_v35 = vpop.f32.mrb[101].mxu0 }
 0x219   : > { %v3573_v62 = vpop.f32.mrb[114].mxu1  ;;  %v2592_v42 = vadd.f32 %v2591_v35, %v7610_v31  ;;  %v5972_v57 = vpop.f32.mrb[102].mxu0 }
 0x21a   : > { %v3575_v18 = vpop.f32.mrb[115].mxu1  ;;  %v2603_v44 = vadd.f32 %v5972_v57, %v7638_v39  ;;  %v2594_v60 = vpop.f32.mrb[103].mxu0 }
 0x21b   : > { %v8215_v18 = vld [vmem:[#allocation10_spill] sm:$0xff] }
 0x21c   : > { %4452 = vmatmul.mubr.bf16.gmra.mrb[220].mxu1 %v4039_v2 }
 0x21f   : > { %v7911_v7 = vpop.f32.mrb[116].mxu1  ;;  %v5975_v12 = vpop.f32.mrb[104].mxu0 }
 0x220   : > { %v3580_v51 = vpop.f32.mrb[117].mxu1  ;;  %v2616_v48 = vadd.f32 %v5975_v12, %v7700_v26  ;;  %v2607_v0 = vpop.f32.mrb[105].mxu0  ;;  %v8216_v12 = vld [vmem:[#allocation8_spill] sm:$0xff] }
 0x221   : > { %v7914_v33 = vpop.f32.mrb[118].mxu1  ;;  %v5976_v9 = vpop.f32.mrb[106].mxu0 }
 0x222   : > { %v3583_v41 = vpop.f32.mrb[119].mxu1  ;;  %v2610_v52 = vpop.f32.mrb[107].mxu0 }
 0x223   : > { %v2611_v31 = vadd.f32 %v2610_v52, %v7668_v5 }
 0x227   : > { %v3586_v50 = vpop.f32.mrb[120].mxu1  ;;  %v5979_v27 = vpop.f32.mrb[108].mxu0 }
 0x228   : > { %v3588_v13 = vpop.f32.mrb[121].mxu1  ;;  %v2623_v39 = vpop.f32.mrb[109].mxu0  ;;  %v8218_v50 = vld [vmem:[#allocation5_spill] sm:$0xff] }
 0x229   : > { %v7917_v35 = vpop.f32.mrb[122].mxu1  ;;  %v2624_v62 = vadd.f32 %v2623_v39, %v7712_v63  ;;  %v5980_v2 = vpop.f32.mrb[110].mxu0 }
 0x22a   : > { %8214 = vst [vmem:[#allocation23_spill] sm:$0xff] %v7917_v35  ;;  %v3591_v57 = vpop.f32.mrb[123].mxu1  ;;  %v2635_v26 = vadd.f32 %v5980_v2, %v8215_v18  ;;  %v2626_v60 = vpop.f32.mrb[111].mxu0  ;;  %v8219_v35 = vld [vmem:[#allocation7_spill] sm:$0xff] }
 0x22b   : > { %v2627_v51 = vadd.f32 %v2626_v60, %v8216_v12  ;;  %v8220_v57 = vld [vmem:[#allocation6_spill] sm:$0xff] }
 0x22f   : > { %v7922_v0 = vpop.f32.mrb[124].mxu1  ;;  %v6031_v9 = vpop.f32.mrb[112].mxu0 }
 0x230   : > { %8217 = vst [vmem:[#allocation10_spill] sm:$0xff] %v7922_v0  ;;  %v3596_v41 = vpop.f32.mrb[125].mxu1  ;;  %v3635_v5 = vpop.f32.mrb[113].mxu0 }
 0x231   : > { %v3597_v52 = vpop.f32.mrb[126].mxu1  ;;  %v3636_v27 = vadd.f32 %v3635_v5, %v8218_v50  ;;  %v6032_v13 = vpop.f32.mrb[114].mxu0 }
 0x232   : > { %v3599_v10 = vpop.f32.mrb[127].mxu1  ;;  %v3647_v45 = vadd.f32 %v6032_v13, %v8219_v35  ;;  %v3638_v63 = vpop.f32.mrb[115].mxu0  ;;  %v8223_v52 = vld [vmem:[#allocation11_spill] sm:$0xff] }
 0x233   : > { %v7926_v39 = vadd.f32 %v3636_v27, %v2576_v59  ;;  %v3639_v2 = vadd.f32 %v3638_v63, %v8220_v57  ;;  %v8224_v10 = vld [vmem:[#allocation9_spill] sm:$0xff] }
 0x234   : > { %v7929_v18 = vadd.f32 %v3647_v45, %v2587_v53  ;;  %v8225_v63 = vld [vmem:[#allocation13_spill] sm:$0xff] }
 0x235   : > { %v7931_v60 = vadd.f32 %v3639_v2, %v2579_v24 }
 0x236   : > { %8221 = vst [vmem:[#allocation8_spill] sm:$0xff] %v7929_v18 }
 0x237   : > { %8222 = vst [vmem:[#allocation5_spill] sm:$0xff] %v7931_v60  ;;  %v7933_v12 = vpop.f32.mrb[128].mxu1  ;;  %v6035_v9 = vpop.f32.mrb[116].mxu0 }
 0x238   : > { %v4271_v41 = vpop.f32.mrb[129].mxu1  ;;  %v3660_v0 = vadd.f32 %v6035_v9, %v8223_v52  ;;  %v3651_v5 = vpop.f32.mrb[117].mxu0 }
 0x239   : > { %v7936_v50 = vpop.f32.mrb[130].mxu1  ;;  %v3652_v35 = vadd.f32 %v3651_v5, %v8224_v10  ;;  %v6036_v13 = vpop.f32.mrb[118].mxu0 }
 0x23a   : > { %v4274_v59 = vpop.f32.mrb[131].mxu1  ;;  %v7939_v27 = vadd.f32 %v3660_v0, %v2600_v38  ;;  %v3663_v45 = vadd.f32 %v6036_v13, %v8225_v63  ;;  %v3654_v53 = vpop.f32.mrb[119].mxu0 }
 0x23b   : > { %v7942_v24 = vadd.f32 %v3652_v35, %v2592_v42 }
 0x23c   : > { %v7944_v57 = vadd.f32 %v3663_v45, %v2603_v44  ;;  %v8226_v45 = vld [vmem:[#allocation17_spill] sm:$0xff] }
 0x23f   : > { %v4277_v2 = vpop.f32.mrb[132].mxu1  ;;  %v6039_v41 = vpop.f32.mrb[120].mxu0 }
 0x240   : > { %v4279_v60 = vpop.f32.mrb[133].mxu1  ;;  %v3676_v9 = vadd.f32 %v6039_v41, %v7780_v36  ;;  %v3667_v52 = vpop.f32.mrb[121].mxu0 }
 0x241   : > { %v7947_v18 = vpop.f32.mrb[134].mxu1  ;;  %v6040_v5 = vpop.f32.mrb[122].mxu0 }
 0x242   : > { %v4282_v10 = vpop.f32.mrb[135].mxu1  ;;  %v7949_v59 = vadd.f32 %v3676_v9, %v2616_v48  ;;  %v3670_v38 = vpop.f32.mrb[123].mxu0  ;;  %v8227_v9 = vld [vmem:[#allocation19_spill] sm:$0xff] }
 0x243   : > { %v3671_v0 = vadd.f32 %v3670_v38, %v7765_v47 }
 0x245   : > { %v7952_v13 = vadd.f32 %v3671_v0, %v2611_v31 }
 0x247   : > { %v7954_v42 = vpop.f32.mrb[136].mxu1  ;;  %v6043_v44 = vpop.f32.mrb[124].mxu0 }
 0x248   : > { %v4287_v35 = vpop.f32.mrb[137].mxu1  ;;  %v3683_v63 = vpop.f32.mrb[125].mxu0 }
 0x249   : > { %v4288_v60 = vpop.f32.mrb[138].mxu1  ;;  %v3684_v36 = vadd.f32 %v3683_v63, %v8226_v45  ;;  %v6044_v53 = vpop.f32.mrb[126].mxu0  ;;  %v8228_v45 = vld [vmem:[#allocation14_spill] sm:$0xff] }
 0x24a   : > { %v4290_v2 = vpop.f32.mrb[139].mxu1  ;;  %v3695_v41 = vadd.f32 %v6044_v53, %v7804_v14  ;;  %v3686_v52 = vpop.f32.mrb[127].mxu0  ;;  %v8229_v53 = vld [vmem:[#allocation12_spill] sm:$0xff] }
 0x24b   : > { %v7958_v48 = vadd.f32 %v3684_v36, %v2624_v62  ;;  %v3687_v5 = vadd.f32 %v3686_v52, %v8227_v9 }
 0x24c   : > { %v7961_v47 = vadd.f32 %v3695_v41, %v2635_v26  ;;  %v8230_v41 = vld [vmem:[#allocation15_spill] sm:$0xff] }
 0x24d   : > { %v7963_v31 = vadd.f32 %v3687_v5, %v2627_v51 }
 0x24f   : > { %v7965_v10 = vpop.f32.mrb[140].mxu1  ;;  %v6047_v38 = vpop.f32.mrb[128].mxu0 }
 0x250   : > { %v4295_v0 = vpop.f32.mrb[141].mxu1  ;;  %v3708_v44 = vadd.f32 %v6047_v38, %v7815_v15  ;;  %v3699_v35 = vpop.f32.mrb[129].mxu0 }
 0x251   : > { %v7968_v63 = vpop.f32.mrb[142].mxu1  ;;  %v3700_v14 = vadd.f32 %v3699_v35, %v7810_v1  ;;  %v6048_v60 = vpop.f32.mrb[130].mxu0 }
 0x252   : > { %v4298_v62 = vpop.f32.mrb[143].mxu1  ;;  %v7972_v36 = vadd.f32 %v3708_v44, %v8228_v45  ;;  %v3711_v26 = vadd.f32 %v6048_v60, %v7820_v17  ;;  %v3702_v51 = vpop.f32.mrb[131].mxu0  ;;  %v8232_v60 = vld [vmem:[#allocation16_spill] sm:$0xff] }
 0x253   : > { %v7976_v2 = vadd.f32 %v3700_v14, %v8229_v53  ;;  %v8231_v62 = vld [vmem:[#allocation18_spill] sm:$0xff] }
 0x254   : > { %v7979_v52 = vadd.f32 %v3711_v26, %v8230_v41 }
 0x257   : > { %v4301_v15 = vpop.f32.mrb[144].mxu1  ;;  %v6051_v9 = vpop.f32.mrb[132].mxu0 }
 0x258   : > { %v4303_v5 = vpop.f32.mrb[145].mxu1  ;;  %v3724_v38 = vadd.f32 %v6051_v9, %v7832_v21  ;;  %v3715_v1 = vpop.f32.mrb[133].mxu0 }
 0x259   : > { %v7982_v0 = vpop.f32.mrb[146].mxu1  ;;  %v6052_v35 = vpop.f32.mrb[134].mxu0 }
 0x25a   : > { %v4306_v44 = vpop.f32.mrb[147].mxu1  ;;  %v7985_v45 = vadd.f32 %v3724_v38, %v8231_v62  ;;  %v3718_v17 = vpop.f32.mrb[135].mxu0 }
 0x25b   : > { %v3719_v14 = vadd.f32 %v3718_v17, %v7825_v29 }
 0x25d   : > { %v7989_v51 = vadd.f32 %v3719_v14, %v8232_v60 }
 0x25f   : > { %v7991_v26 = vpop.f32.mrb[148].mxu1  ;;  %v6055_v53 = vpop.f32.mrb[136].mxu0 }
 0x260   : > { %v4311_v41 = vpop.f32.mrb[149].mxu1  ;;  %v3731_v15 = vpop.f32.mrb[137].mxu0 }
 0x261   : > { %v4312_v21 = vpop.f32.mrb[150].mxu1  ;;  %v3732_v9 = vadd.f32 %v3731_v15, %v7839_v61  ;;  %v6056_v5 = vpop.f32.mrb[138].mxu0 }
 0x262   : > { %v4314_v1 = vpop.f32.mrb[151].mxu1  ;;  %v3743_v35 = vadd.f32 %v6056_v5, %v7851_v56  ;;  %v3734_v38 = vpop.f32.mrb[139].mxu0 }
 0x263   : > { %v7996_v44 = vadd.f32 %v3732_v9, %v7802_v37  ;;  %v3735_v29 = vadd.f32 %v3734_v38, %v7844_v40  ;;  %v8233_v9 = vld [vmem:[#allocation20_spill] sm:$0xff] }
 0x264   : > { %v8000_v62 = vadd.f32 %v3743_v35, %v7813_v23 }
 0x265   : > { %v8003_v17 = vadd.f32 %v3735_v29, %v7808_v28 }
 0x267   : > { %v8005_v14 = vpop.f32.mrb[152].mxu1  ;;  %v6059_v60 = vpop.f32.mrb[140].mxu0 }
 0x268   : > { %v4319_v61 = vpop.f32.mrb[153].mxu1  ;;  %v3756_v53 = vadd.f32 %v6059_v60, %v7865_v49  ;;  %v3747_v41 = vpop.f32.mrb[141].mxu0 }
 0x269   : > { %v8008_v56 = vpop.f32.mrb[154].mxu1  ;;  %v3748_v37 = vadd.f32 %v3747_v41, %v7858_v22  ;;  %v6060_v15 = vpop.f32.mrb[142].mxu0 }
 0x26a   : > { %v4322_v21 = vpop.f32.mrb[155].mxu1  ;;  %v8012_v40 = vadd.f32 %v3756_v53, %v7823_v3  ;;  %v3759_v23 = vadd.f32 %v6060_v15, %v7870_v20  ;;  %v3750_v28 = vpop.f32.mrb[143].mxu0 }
 0x26b   : > { %v8016_v5 = vadd.f32 %v3748_v37, %v8233_v9 }
 0x26c   : > { %v8019_v1 = vadd.f32 %v3759_v23, %v7828_v30 }
 0x26f   : > { %v4325_v49 = vpop.f32.mrb[156].mxu1  ;;  %v6063_v35 = vpop.f32.mrb[144].mxu0 }
 0x270   : > { %v4327_v38 = vpop.f32.mrb[157].mxu1  ;;  %v3772_v29 = vadd.f32 %v6063_v35, %v7884_v32  ;;  %v3763_v22 = vpop.f32.mrb[145].mxu0 }
 0x271   : > { %v8022_v60 = vpop.f32.mrb[158].mxu1  ;;  %v6064_v61 = vpop.f32.mrb[146].mxu0 }
 0x272   : > { %v4330_v3 = vpop.f32.mrb[159].mxu1  ;;  %v8025_v53 = vadd.f32 %v3772_v29, %v7842_v16  ;;  %v3766_v20 = vpop.f32.mrb[147].mxu0 }
 0x273   : > { %v3767_v41 = vadd.f32 %v3766_v20, %v7877_v58 }
 0x275   : > { %v8029_v37 = vadd.f32 %v3767_v41, %v7835_v43 }
 0x277   : > { %v8031_v30 = vpop.f32.mrb[160].mxu1  ;;  %v6067_v15 = vpop.f32.mrb[148].mxu0 }
 0x278   : > { %v4335_v21 = vpop.f32.mrb[161].mxu1  ;;  %v3779_v23 = vpop.f32.mrb[149].mxu0 }
 0x279   : > { %v4336_v32 = vpop.f32.mrb[162].mxu1  ;;  %v3780_v28 = vadd.f32 %v3779_v23, %v7891_v25  ;;  %v6068_v9 = vpop.f32.mrb[150].mxu0 }
 0x27a   : > { %v4338_v49 = vpop.f32.mrb[163].mxu1  ;;  %v3791_v35 = vadd.f32 %v6068_v9, %v7899_v34  ;;  %v3782_v16 = vpop.f32.mrb[151].mxu0  ;;  %v8234_v9 = vld [vmem:[#allocation10_spill] sm:$0xff] }
 0x27b   : > { %v8036_v38 = vadd.f32 %v3780_v28, %v7849_v46  ;;  %v3783_v58 = vadd.f32 %v3782_v16, %v7896_v55 }
 0x27c   : > { %v8040_v43 = vadd.f32 %v3791_v35, %v7861_v8 }
 0x27d   : > { %v8043_v29 = vadd.f32 %v3783_v58, %v7854_v19  ;;  %v8235_v58 = vld [vmem:[#allocation22_spill] sm:$0xff] }
 0x27f   : > { %v8045_v22 = vpop.f32.mrb[164].mxu1  ;;  %v6071_v61 = vpop.f32.mrb[152].mxu0 }
 0x280   : > { %v4343_v25 = vpop.f32.mrb[165].mxu1  ;;  %v3804_v3 = vadd.f32 %v6071_v61, %v7911_v7  ;;  %v3795_v20 = vpop.f32.mrb[153].mxu0 }
 0x281   : > { %v8048_v34 = vpop.f32.mrb[166].mxu1  ;;  %v3796_v46 = vadd.f32 %v3795_v20, %v7906_v11  ;;  %v6072_v41 = vpop.f32.mrb[154].mxu0  ;;  %v8236_v25 = vld [vmem:[#allocation23_spill] sm:$0xff] }
 0x282   : > { %v4346_v15 = vpop.f32.mrb[167].mxu1  ;;  %v8052_v55 = vadd.f32 %v3804_v3, %v7875_v6  ;;  %v3807_v8 = vadd.f32 %v6072_v41, %v7914_v33  ;;  %v3798_v19 = vpop.f32.mrb[155].mxu0  ;;  %v8237_v3 = vld [vmem:[#allocation21_spill] sm:$0xff] }
 0x283   : > { %v8056_v21 = vadd.f32 %v3796_v46, %v7868_v54 }
 0x284   : > { %v8059_v23 = vadd.f32 %v3807_v8, %v7880_v4 }
 0x287   : > { %v4349_v7 = vpop.f32.mrb[168].mxu1  ;;  %v6075_v32 = vpop.f32.mrb[156].mxu0 }
 0x288   : > { %v4351_v28 = vpop.f32.mrb[169].mxu1  ;;  %v3820_v49 = vadd.f32 %v6075_v32, %v8234_v9  ;;  %v3811_v11 = vpop.f32.mrb[157].mxu0 }
 0x289   : > { %v8062_v35 = vpop.f32.mrb[170].mxu1  ;;  %v6076_v16 = vpop.f32.mrb[158].mxu0 }
 0x28a   : > { %v4354_v6 = vpop.f32.mrb[171].mxu1  ;;  %v8065_v61 = vadd.f32 %v3820_v49, %v8235_v58  ;;  %v3814_v33 = vpop.f32.mrb[159].mxu0  ;;  %v8238_v16 = vld [vmem:[#allocation8_spill] sm:$0xff]  ;;  %v8239_v58 = vld [vmem:[#allocation5_spill] sm:$0xff] }
 0x28b   : > { %v3815_v54 = vadd.f32 %v3814_v33, %v8236_v25 }
 0x28d   : > { %v8069_v4 = vadd.f32 %v3815_v54, %v8237_v3 }
 0x28f   : > { %v8071_v20 = vpop.f32.mrb[172].mxu1  ;;  %v6095_v46 = vpop.f32.mrb[160].mxu0 }
 0x290   : > { %v4359_v41 = vpop.f32.mrb[173].mxu1  ;;  %v4494_v15 = vpop.f32.mrb[161].mxu0 }
 0x291   : > { %v4360_v8 = vpop.f32.mrb[174].mxu1  ;;  %v4495_v19 = vadd.f32 %v4494_v15, %v7933_v12  ;;  %v6096_v7 = vpop.f32.mrb[162].mxu0 }
 0x292   : > { %v4362_v32 = vpop.f32.mrb[175].mxu1  ;;  %v4506_v28 = vadd.f32 %v6096_v7, %v7947_v18  ;;  %v4497_v9 = vpop.f32.mrb[163].mxu0 }
 0x293   : > { %v4733_v49 = vadd.f32 %v4495_v19, %v7926_v39  ;;  %v4498_v11 = vadd.f32 %v4497_v9, %v7936_v50 }
 0x294   : > { %v4736_v6 = vadd.f32 %v4506_v28, %v8238_v16 }
 0x295   : > { %v4734_v33 = vadd.f32 %v4498_v11, %v8239_v58  ;;  %v5058_v25 = vmul.f32 %v4733_v49, %v4733_v49 }
 0x296   : > { %v5060_v8 = vmul.f32 %v4736_v6, %v4736_v6 }
 0x297   : > { %v8085_v12 = vpop.f32.mrb[176].mxu1  ;;  %v5745_v54 = vpack.c.bf16 %v4734_v33, %v4733_v49  ;;  %v5021_v18 = vadd.f32 %v4734_v33, %v4733_v49  ;;  %v5059_v3 = vmul.f32 %v4734_v33, %v4734_v33  ;;  %v6099_v46 = vpop.f32.mrb[164].mxu0 }
 0x298   : > { %v4367_v39 = vpop.f32.mrb[177].mxu1  ;;  %v4519_v50 = vadd.f32 %v6099_v46, %v7965_v10  ;;  %v4510_v41 = vpop.f32.mrb[165].mxu0 }
 0x299   : > { %v8088_v15 = vpop.f32.mrb[178].mxu1  ;;  %5746 = vst [vmem:[%s8083_s12] sm:$0xff] %v5745_v54   ;;  %v5090_v19 = vadd.f32 %v5059_v3, %v5058_v25  ;;  %v4511_v7 = vadd.f32 %v4510_v41, %v7954_v42  ;;  %v5022_v32 = vadd.f32 %v5021_v18, %v4736_v6  ;;  %v6100_v28 = vpop.f32.mrb[166].mxu0 }
 0x29a   : > { %v4370_v9 = vpop.f32.mrb[179].mxu1  ;;  %v4739_v11 = vadd.f32 %v4519_v50, %v7939_v27  ;;  %v4522_v49 = vadd.f32 %v6100_v28, %v7968_v63  ;;  %v4513_v16 = vpop.f32.mrb[167].mxu0 }
 0x29b   : > { %v4737_v10 = vadd.f32 %v4511_v7, %v7942_v24  ;;  %v5091_v58 = vadd.f32 %v5090_v19, %v5060_v8 }
 0x29c   : > { %v4740_v33 = vadd.f32 %v4522_v49, %v7944_v57  ;;  %v5062_v39 = vmul.f32 %v4739_v11, %v4739_v11 }
 0x29d   : > { %v5750_v46 = vpack.c.bf16 %v4737_v10, %v4736_v6  ;;  %v5023_v54 = vadd.f32 %v5022_v32, %v4737_v10  ;;  %v5061_v25 = vmul.f32 %v4737_v10, %v4737_v10 }
 0x29e   : > { %v5755_v3 = vpack.c.bf16 %v4740_v33, %v4739_v11  ;;  %v5063_v8 = vmul.f32 %v4740_v33, %v4740_v33 }
 0x29f   : > { %v4373_v42 = vpop.f32.mrb[180].mxu1  ;;  %5838 = vst [vmem:[%s8083_s12 + $0x8] sm:$0xff] %v5750_v46   ;;  %v5092_v18 = vadd.f32 %v5091_v58, %v5061_v25  ;;  %v5024_v41 = vadd.f32 %v5023_v54, %v4739_v11  ;;  %v6103_v9 = vpop.f32.mrb[168].mxu0 }
 0x2a0   : > { %v4375_v27 = vpop.f32.mrb[181].mxu1  ;;  %5839 = vst [vmem:[%s8083_s12 + $0x10] sm:$0xff] %v5755_v3   ;;  %v4535_v63 = vadd.f32 %v6103_v9, %v7991_v26  ;;  %v4526_v50 = vpop.f32.mrb[169].mxu0 }
 0x2a1   : > { %v8099_v28 = vpop.f32.mrb[182].mxu1  ;;  %v5025_v24 = vadd.f32 %v5024_v41, %v4740_v33  ;;  %v5093_v57 = vadd.f32 %v5092_v18, %v5062_v39  ;;  %v6104_v6 = vpop.f32.mrb[170].mxu0 }
 0x2a2   : > { %v4378_v19 = vpop.f32.mrb[183].mxu1  ;;  %v4743_v7 = vadd.f32 %v4535_v63, %v7949_v59  ;;  %v4529_v32 = vpop.f32.mrb[171].mxu0 }
 0x2a3   : > { %v5094_v49 = vadd.f32 %v5093_v57, %v5063_v8  ;;  %v4530_v11 = vadd.f32 %v4529_v32, %v7982_v0 }
 0x2a4   : > { %v5065_v42 = vmul.f32 %v4743_v7, %v4743_v7 }
 0x2a5   : > { %v4742_v16 = vadd.f32 %v4530_v11, %v7952_v13 }
 0x2a7   : > { %v8104_v10 = vpop.f32.mrb[184].mxu1  ;;  %v5760_v26 = vpack.c.bf16 %v4743_v7, %v4742_v16  ;;  %v5026_v58 = vadd.f32 %v5025_v24, %v4742_v16  ;;  %v5064_v46 = vmul.f32 %v4742_v16, %v4742_v16  ;;  %v6107_v54 = vpop.f32.mrb[172].mxu0 }
 0x2a8   : > { %v4383_v25 = vpop.f32.mrb[185].mxu1  ;;  %v4542_v33 = vpop.f32.mrb[173].mxu0 }
 0x2a9   : > { %v4384_v3 = vpop.f32.mrb[186].mxu1  ;;  %5840 = vst [vmem:[%s8083_s12 + $0x18] sm:$0xff] %v5760_v26   ;;  %v5095_v39 = vadd.f32 %v5094_v49, %v5064_v46  ;;  %v4543_v59 = vadd.f32 %v4542_v33, %v8005_v14  ;;  %v5027_v18 = vadd.f32 %v5026_v58, %v4743_v7  ;;  %v6108_v41 = vpop.f32.mrb[174].mxu0 }
 0x2aa   : > { %v4386_v9 = vpop.f32.mrb[187].mxu1  ;;  %v4554_v0 = vadd.f32 %v6108_v41, %v8022_v60  ;;  %v4545_v13 = vpop.f32.mrb[175].mxu0 }
 0x2ab   : > { %v4745_v27 = vadd.f32 %v4543_v59, %v7958_v48  ;;  %v5096_v63 = vadd.f32 %v5095_v39, %v5065_v42  ;;  %v4546_v50 = vadd.f32 %v4545_v13, %v8008_v56 }
 0x2ac   : > { %v4748_v24 = vadd.f32 %v4554_v0, %v7961_v47 }
 0x2ad   : > { %v5028_v8 = vadd.f32 %v5027_v18, %v4745_v27  ;;  %v5066_v57 = vmul.f32 %v4745_v27, %v4745_v27  ;;  %v4746_v6 = vadd.f32 %v4546_v50, %v7963_v31 }
 0x2ae   : > { %v5068_v56 = vmul.f32 %v4748_v24, %v4748_v24 }
 0x2af   : > { %v8113_v19 = vpop.f32.mrb[188].mxu1  ;;  %v5097_v14 = vadd.f32 %v5096_v63, %v5066_v57  ;;  %v5765_v7 = vpack.c.bf16 %v4746_v6, %v4745_v27  ;;  %v5029_v32 = vadd.f32 %v5028_v8, %v4746_v6  ;;  %v5067_v49 = vmul.f32 %v4746_v6, %v4746_v6  ;;  %v6111_v60 = vpop.f32.mrb[176].mxu0 }
 0x2b0   : > { %v4391_v11 = vpop.f32.mrb[189].mxu1  ;;  %v4567_v48 = vadd.f32 %v6111_v60, %v8045_v22  ;;  %v4558_v16 = vpop.f32.mrb[177].mxu0 }
 0x2b1   : > { %v8116_v26 = vpop.f32.mrb[190].mxu1  ;;  %5841 = vst [vmem:[%s8083_s12 + $0x20] sm:$0xff] %v5765_v7   ;;  %v5098_v47 = vadd.f32 %v5097_v14, %v5067_v49  ;;  %v4559_v58 = vadd.f32 %v4558_v16, %v8031_v30  ;;  %v5030_v31 = vadd.f32 %v5029_v32, %v4748_v24  ;;  %v6112_v46 = vpop.f32.mrb[178].mxu0 }
 0x2b2   : > { %v4394_v54 = vpop.f32.mrb[191].mxu1  ;;  %v4751_v25 = vadd.f32 %v4567_v48, %v7972_v36  ;;  %v4570_v33 = vadd.f32 %v6112_v46, %v8048_v34  ;;  %v4561_v3 = vpop.f32.mrb[179].mxu0 }
 0x2b3   : > { %v4749_v22 = vadd.f32 %v4559_v58, %v7976_v2  ;;  %v5099_v42 = vadd.f32 %v5098_v47, %v5068_v56 }
 0x2b4   : > { %v4752_v39 = vadd.f32 %v4570_v33, %v7979_v52  ;;  %v5070_v0 = vmul.f32 %v4751_v25, %v4751_v25 }
 0x2b5   : > { %v5770_v59 = vpack.c.bf16 %v4749_v22, %v4748_v24  ;;  %v5031_v18 = vadd.f32 %v5030_v31, %v4749_v22  ;;  %v5069_v41 = vmul.f32 %v4749_v22, %v4749_v22 }
 0x2b6   : > { %v5775_v9 = vpack.c.bf16 %v4752_v39, %v4751_v25  ;;  %v5071_v57 = vmul.f32 %v4752_v39, %v4752_v39 }
 0x2b7   : > { %v4397_v30 = vpop.f32.mrb[192].mxu1  ;;  %5842 = vst [vmem:[%s8083_s12 + $0x28] sm:$0xff] %v5770_v59   ;;  %v5100_v13 = vadd.f32 %v5099_v42, %v5069_v41  ;;  %v5032_v27 = vadd.f32 %v5031_v18, %v4751_v25  ;;  %v6115_v63 = vpop.f32.mrb[180].mxu0 }
 0x2b8   : > { %v4399_v36 = vpop.f32.mrb[193].mxu1  ;;  %5843 = vst [vmem:[%s8083_s12 + $0x30] sm:$0xff] %v5775_v9   ;;  %v4583_v34 = vadd.f32 %v6115_v63, %v8071_v20  ;;  %v4574_v50 = vpop.f32.mrb[181].mxu0 }
 0x2b9   : > { %v8127_v8 = vpop.f32.mrb[194].mxu1  ;;  %v5033_v2 = vadd.f32 %v5032_v27, %v4752_v39  ;;  %v5101_v52 = vadd.f32 %v5100_v13, %v5070_v0  ;;  %v6116_v24 = vpop.f32.mrb[182].mxu0 }
 0x2ba   : > { %v4402_v6 = vpop.f32.mrb[195].mxu1  ;;  %v4755_v14 = vadd.f32 %v4583_v34, %v7985_v45  ;;  %v4577_v7 = vpop.f32.mrb[183].mxu0 }
 0x2bb   : > { %v5102_v32 = vadd.f32 %v5101_v52, %v5071_v57  ;;  %v4578_v49 = vadd.f32 %v4577_v7, %v8062_v35 }
 0x2bc   : > { %v5073_v46 = vmul.f32 %v4755_v14, %v4755_v14 }
 0x2bd   : > { %v4754_v60 = vadd.f32 %v4578_v49, %v7989_v51 }
 0x2bf   : > { %v4405_v11 = vpop.f32.mrb[196].mxu1  ;;  %v5780_v48 = vpack.c.bf16 %v4755_v14, %v4754_v60  ;;  %v5034_v20 = vadd.f32 %v5033_v2, %v4754_v60  ;;  %v5072_v16 = vmul.f32 %v4754_v60, %v4754_v60  ;;  %v6119_v56 = vpop.f32.mrb[184].mxu0 }
 0x2c0   : > { %v4407_v47 = vpop.f32.mrb[197].mxu1  ;;  %v4590_v58 = vpop.f32.mrb[185].mxu0 }
 0x2c1   : > { %v4408_v31 = vpop.f32.mrb[198].mxu1  ;;  %5844 = vst [vmem:[%s8083_s12 + $0x38] sm:$0xff] %v5780_v48   ;;  %v5103_v54 = vadd.f32 %v5102_v32, %v5072_v16  ;;  %v4591_v25 = vadd.f32 %v4590_v58, %v8085_v12  ;;  %v5035_v45 = vadd.f32 %v5034_v20, %v4755_v14  ;;  %v6120_v33 = vpop.f32.mrb[186].mxu0 }
 0x2c2   : > { %v4410_v3 = vpop.f32.mrb[199].mxu1  ;;  %v4602_v35 = vadd.f32 %v6120_v33, %v8099_v28  ;;  %v4593_v22 = vpop.f32.mrb[187].mxu0 }
 0x2c3   : > { %v4757_v51 = vadd.f32 %v4591_v25, %v7996_v44  ;;  %v5104_v42 = vadd.f32 %v5103_v54, %v5073_v46  ;;  %v4594_v39 = vadd.f32 %v4593_v22, %v8088_v15 }
 0x2c4   : > { %v4760_v59 = vadd.f32 %v4602_v35, %v8000_v62 }
 0x2c5   : > { %v5036_v18 = vadd.f32 %v5035_v45, %v4757_v51  ;;  %v5074_v41 = vmul.f32 %v4757_v51, %v4757_v51  ;;  %v4758_v9 = vadd.f32 %v4594_v39, %v8003_v17 }
 0x2c6   : > { %v5076_v50 = vmul.f32 %v4760_v59, %v4760_v59 }
 0x2c7   : > { %v4413_v30 = vpop.f32.mrb[200].mxu1  ;;  %v5105_v12 = vadd.f32 %v5104_v42, %v5074_v41  ;;  %v5785_v0 = vpack.c.bf16 %v4758_v9, %v4757_v51  ;;  %v5037_v13 = vadd.f32 %v5036_v18, %v4758_v9  ;;  %v5075_v27 = vmul.f32 %v4758_v9, %v4758_v9  ;;  %v6123_v63 = vpop.f32.mrb[188].mxu0 }
 0x2c8   : > { %v4415_v28 = vpop.f32.mrb[201].mxu1  ;;  %v4615_v36 = vadd.f32 %v6123_v63, %v8113_v19  ;;  %v4606_v44 = vpop.f32.mrb[189].mxu0 }
 0x2c9   : > { %v4416_v34 = vpop.f32.mrb[202].mxu1  ;;  %5845 = vst [vmem:[%s8083_s12 + $0x40] sm:$0xff] %v5785_v0   ;;  %v5106_v15 = vadd.f32 %v5105_v12, %v5075_v27  ;;  %v4607_v62 = vadd.f32 %v4606_v44, %v8104_v10  ;;  %v5038_v2 = vadd.f32 %v5037_v13, %v4760_v59  ;;  %v6124_v57 = vpop.f32.mrb[190].mxu0 }
 0x2ca   : > { %v4418_v17 = vpop.f32.mrb[203].mxu1  ;;  %v4763_v52 = vadd.f32 %v4615_v36, %v8012_v40  ;;  %v4618_v24 = vadd.f32 %v6124_v57, %v8116_v26  ;;  %v4609_v6 = vpop.f32.mrb[191].mxu0 }
 0x2cb   : > { %v4761_v14 = vadd.f32 %v4607_v62, %v8016_v5  ;;  %v5107_v19 = vadd.f32 %v5106_v15, %v5076_v50 }
 0x2cc   : > { %v4764_v7 = vadd.f32 %v4618_v24, %v8019_v1  ;;  %v5078_v20 = vmul.f32 %v4763_v52, %v4763_v52 }
 0x2cd   : > { %v5790_v32 = vpack.c.bf16 %v4761_v14, %v4760_v59  ;;  %v5039_v49 = vadd.f32 %v5038_v2, %v4761_v14  ;;  %v5077_v60 = vmul.f32 %v4761_v14, %v4761_v14 }
 0x2ce   : > { %v5795_v48 = vpack.c.bf16 %v4764_v7, %v4763_v52  ;;  %v5079_v5 = vmul.f32 %v4764_v7, %v4764_v7 }
 0x2cf   : > { %v4421_v10 = vpop.f32.mrb[204].mxu1  ;;  %5846 = vst [vmem:[%s8083_s12 + $0x48] sm:$0xff] %v5790_v32   ;;  %v5108_v16 = vadd.f32 %v5107_v19, %v5077_v60  ;;  %v5040_v56 = vadd.f32 %v5039_v49, %v4763_v52  ;;  %v6127_v47 = vpop.f32.mrb[192].mxu0 }
 0x2d0   : > { %v4423_v40 = vpop.f32.mrb[205].mxu1  ;;  %5847 = vst [vmem:[%s8083_s12 + $0x50] sm:$0xff] %v5795_v48   ;;  %v4631_v26 = vadd.f32 %v6127_v47, %v4405_v11  ;;  %v4622_v58 = vpop.f32.mrb[193].mxu0 }
 0x2d1   : > { %v4424_v31 = vpop.f32.mrb[206].mxu1  ;;  %v5041_v46 = vadd.f32 %v5040_v56, %v4764_v7  ;;  %v5109_v54 = vadd.f32 %v5108_v16, %v5078_v20  ;;  %v6128_v25 = vpop.f32.mrb[194].mxu0 }
 0x2d2   : > { %v4426_v1 = vpop.f32.mrb[207].mxu1  ;;  %v4767_v45 = vadd.f32 %v4631_v26, %v8025_v53  ;;  %v4625_v33 = vpop.f32.mrb[195].mxu0 }
 0x2d3   : > { %v5110_v3 = vadd.f32 %v5109_v54, %v5079_v5  ;;  %v4626_v35 = vadd.f32 %v4625_v33, %v8127_v8 }
 0x2d4   : > { %v5081_v12 = vmul.f32 %v4767_v45, %v4767_v45 }
 0x2d5   : > { %v4766_v22 = vadd.f32 %v4626_v35, %v8029_v37 }
 0x2d7   : > { %v4429_v51 = vpop.f32.mrb[208].mxu1  ;;  %v5800_v42 = vpack.c.bf16 %v4767_v45, %v4766_v22  ;;  %v5042_v39 = vadd.f32 %v5041_v46, %v4766_v22  ;;  %v5080_v11 = vmul.f32 %v4766_v22, %v4766_v22  ;;  %v6131_v59 = vpop.f32.mrb[196].mxu0 }
 0x2d8   : > { %v4431_v18 = vpop.f32.mrb[209].mxu1  ;;  %v4638_v41 = vpop.f32.mrb[197].mxu0 }
 0x2d9   : > { %v4432_v9 = vpop.f32.mrb[210].mxu1  ;;  %5848 = vst [vmem:[%s8083_s12 + $0x58] sm:$0xff] %v5800_v42   ;;  %v5111_v0 = vadd.f32 %v5110_v3, %v5080_v11  ;;  %v4639_v13 = vadd.f32 %v4638_v41, %v4413_v30  ;;  %v5043_v27 = vadd.f32 %v5042_v39, %v4767_v45  ;;  %v6132_v53 = vpop.f32.mrb[198].mxu0 }
 0x2da   : > { %v4434_v63 = vpop.f32.mrb[211].mxu1  ;;  %v4650_v28 = vadd.f32 %v6132_v53, %v4424_v31  ;;  %v4641_v36 = vpop.f32.mrb[199].mxu0 }
 0x2db   : > { %v4769_v8 = vadd.f32 %v4639_v13, %v8036_v38  ;;  %v5112_v37 = vadd.f32 %v5111_v0, %v5081_v12  ;;  %v4642_v44 = vadd.f32 %v4641_v36, %v4416_v34 }
 0x2dc   : > { %v4772_v50 = vadd.f32 %v4650_v28, %v8040_v43 }
 0x2dd   : > { %v5044_v15 = vadd.f32 %v5043_v27, %v4769_v8  ;;  %v5082_v62 = vmul.f32 %v4769_v8, %v4769_v8  ;;  %v4770_v2 = vadd.f32 %v4642_v44, %v8043_v29 }
 0x2de   : > { %v5084_v38 = vmul.f32 %v4772_v50, %v4772_v50 }
 0x2df   : > { %v4437_v57 = vpop.f32.mrb[212].mxu1  ;;  %v5113_v17 = vadd.f32 %v5112_v37, %v5082_v62  ;;  %v5805_v52 = vpack.c.bf16 %v4770_v2, %v4769_v8  ;;  %v5045_v30 = vadd.f32 %v5044_v15, %v4770_v2  ;;  %v5083_v24 = vmul.f32 %v4770_v2, %v4770_v2  ;;  %v6135_v6 = vpop.f32.mrb[200].mxu0 }
 0x2e0   : > { %v4439_v14 = vpop.f32.mrb[213].mxu1  ;;  %v4654_v19 = vpop.f32.mrb[201].mxu0  ;;  %v4663_v7 = vadd.f32 %v6135_v6, %v4437_v57 }
 0x2e1   : > { %v4440_v32 = vpop.f32.mrb[214].mxu1  ;;  %5849 = vst [vmem:[%s8083_s12 + $0x60] sm:$0xff] %v5805_v52   ;;  %v5114_v34 = vadd.f32 %v5113_v17, %v5083_v24  ;;  %v4655_v49 = vadd.f32 %v4654_v19, %v4429_v51  ;;  %v5046_v43 = vadd.f32 %v5045_v30, %v4772_v50  ;;  %v6136_v60 = vpop.f32.mrb[202].mxu0 }
 0x2e2   : > { %v4442_v48 = vpop.f32.mrb[215].mxu1  ;;  %v4775_v29 = vadd.f32 %v4663_v7, %v8052_v55  ;;  %v4666_v10 = vadd.f32 %v6136_v60, %v4440_v32  ;;  %v4657_v20 = vpop.f32.mrb[203].mxu0 }
 0x2e3   : > { %v4773_v16 = vadd.f32 %v4655_v49, %v8056_v21  ;;  %v5115_v56 = vadd.f32 %v5114_v34, %v5084_v38 }
 0x2e4   : > { %v4776_v47 = vadd.f32 %v4666_v10, %v8059_v23  ;;  %v5086_v25 = vmul.f32 %v4775_v29, %v4775_v29 }
 0x2e5   : > { %v5810_v40 = vpack.c.bf16 %v4773_v16, %v4772_v50  ;;  %v5047_v26 = vadd.f32 %v5046_v43, %v4773_v16  ;;  %v5085_v58 = vmul.f32 %v4773_v16, %v4773_v16 }
 0x2e6   : > { %v5815_v31 = vpack.c.bf16 %v4776_v47, %v4775_v29  ;;  %v5087_v21 = vmul.f32 %v4776_v47, %v4776_v47 }
 0x2e7   : > { %v4445_v46 = vpop.f32.mrb[216].mxu1  ;;  %5850 = vst [vmem:[%s8083_s12 + $0x68] sm:$0xff] %v5810_v40   ;;  %v5116_v5 = vadd.f32 %v5115_v56, %v5085_v58  ;;  %v5048_v54 = vadd.f32 %v5047_v26, %v4775_v29  ;;  %v6139_v1 = vpop.f32.mrb[204].mxu0 }
 0x2e8   : > { %v4447_v45 = vpop.f32.mrb[217].mxu1  ;;  %5851 = vst [vmem:[%s8083_s12 + $0x70] sm:$0xff] %v5815_v31   ;;  %v4670_v55 = vpop.f32.mrb[205].mxu0 }
 0x2e9   : > { %v4448_v33 = vpop.f32.mrb[218].mxu1  ;;  %v5117_v3 = vadd.f32 %v5116_v5, %v5086_v25  ;;  %v5049_v35 = vadd.f32 %v5048_v54, %v4776_v47  ;;  %v6140_v22 = vpop.f32.mrb[206].mxu0 }
 0x2ea   : > { %v4450_v51 = vpop.f32.mrb[219].mxu1  ;;  %v4673_v23 = vpop.f32.mrb[207].mxu0 }
 0x2eb   : > { %v5118_v42 = vadd.f32 %v5117_v3, %v5087_v21  ;;  %v4674_v39 = vadd.f32 %v4673_v23, %v4448_v33 }
 0x2ed   : > { %v4778_v11 = vadd.f32 %v4674_v39, %v8069_v4 }
 0x2ef   : > { %v4453_v59 = vpop.f32.mrb[220].mxu1  ;;  %v5050_v18 = vadd.f32 %v5049_v35, %v4778_v11  ;;  %v5088_v41 = vmul.f32 %v4778_v11, %v4778_v11 }
 0x2f0   : > { %v4679_v9 = vadd.f32 %v6139_v1, %v4453_v59  ;;  %v4455_v12 = vpop.f32.mrb[221].mxu1 }
 0x2f1   : > { %v4456_v0 = vpop.f32.mrb[222].mxu1  ;;  %v5119_v13 = vadd.f32 %v5118_v42, %v5088_v41 }
 0x2f2   : > { %v4779_v27 = vadd.f32 %v4679_v9, %v8065_v61  ;;  %v4458_v53 = vpop.f32.mrb[223].mxu1 }
 0x2f4   : > { %v5820_v63 = vpack.c.bf16 %v4779_v27, %v4778_v11  ;;  %v5051_v28 = vadd.f32 %v5050_v18, %v4779_v27  ;;  %v5089_v36 = vmul.f32 %v4779_v27, %v4779_v27 }
 0x2f6   : > { %5852 = vst [vmem:[%s8083_s12 + $0x78] sm:$0xff] %v5820_v63   ;;  %v5052_v8 = vrot.slane %v5051_v28, 4  ;;  %v5120_v37 = vadd.f32 %v5119_v13, %v5089_v36 }
 0x2f8   : > { %v5053_v44 = vadd.f32 %v5052_v8, %v5051_v28  ;;  %v5121_v50 = vrot.slane %v5120_v37, 4 }
 0x2fa   : > { %v5054_v4 = vrot.slane %v5053_v44, 2  ;;  %v5122_v15 = vadd.f32 %v5121_v50, %v5120_v37 }
 0x2fc   : > { %v5055_v62 = vadd.f32 %v5054_v4, %v5053_v44  ;;  %v5123_v2 = vrot.slane %v5122_v15, 2 }
 0x2fe   : > { %v5056_v57 = vrot.slane %v5055_v62, 1  ;;  %v5124_v17 = vadd.f32 %v5123_v2, %v5122_v15 }
 0x300   : > { %v5125_v52 = vrot.slane %v5124_v17, 1  ;;  %v5057_v30 = vadd.f32 %v5056_v57, %v5055_v62 }
 0x302   : > { %v5126_v61 = vadd.f32 %v5125_v52, %v5124_v17 }
 0x304   : > { %v5128_v24 = vsel %vm467_vm0, %v5057_v30, %v5126_v61 }
 0x305   : > { %v5130_v6 = vsel %vm5129_vm11, %v5128_v24, 0.0 }
 0x306   : > { %5131 = vst [vmem:[%s465_s16] sm:$0xff] %v5130_v6 }
 0x307 PF: > { %s18_s26 = sadd.s32 1, %s6334_s26   ;;  %s8240_s24 = smov %s6330_s25 }
 0x308   : > { %p15_p5 = scmp.ge.s32.totalorder %s18_s26, 4   ;;  %s8241_s25 = smov %s8243_s27 }
 0x30a   :  { %17 = sbr.rel (!%p15_p5) target bundleno = 2 (0x2), region = 96 }

</bundles_post_ra>
